<compile_context>
chip_gen: v6e
topology: v6e:2x2x1
jax: 0.10.0
libtpu: 0.0.40
codegen_flags: <defaults>
</compile_context>

<pallas_src>
import jax
import jax.numpy as jnp
import numpy as np
from jax.experimental import pallas as pl
from jax.experimental.pallas import tpu as pltpu


def _attn_gru_decoder_kernel(embflat_ref, h0_ref, enc_ref,
                             w_ih_ref, b_ih_ref, w_hh_ref, b_hh_ref,
                             w_att_t_ref, b_att_ref,
                             w_ctx_a_ref, w_ctx_h_ref, b_ctx_ref,
                             w_pred_ref, b_pred_ref,
                             preds_ref,
                             gx_sc, enc_att_sc, enc_ctx_sc, sbias_sc, hs_sc):
    Bp, H = h0_ref.shape
    L = enc_ref.shape[1]
    T = hs_sc.shape[0] // Bp

    # ---------------- prologue: all t-invariant matmuls ----------------
    # (1) GRU input-gate pre-activations for every step: one (T*Bp, E)@(E, Gp).
    gx_sc[...] = (jnp.dot(embflat_ref[...], w_ih_ref[...],
                          preferred_element_type=jnp.float32) + b_ih_ref[...])

    enc = enc_ref[...]                                   # (Bp, L, H)
    enc2d = enc.reshape(Bp * L, H)

    # (2) fold decoder_att_linear through the encoder.
    enc_att_sc[...] = jnp.dot(enc2d, w_att_t_ref[...],
                              preferred_element_type=jnp.float32
                              ).reshape(Bp, L, H)
    sbias_sc[...] = jnp.sum(enc * b_att_ref[...][None, :, :], axis=-1)  # (Bp,L)

    # (3) fold the ctx half of decoder_attn_weighted_ctx through the encoder.
    enc_ctx_sc[...] = jnp.dot(enc2d, w_ctx_a_ref[...],
                              preferred_element_type=jnp.float32
                              ).reshape(Bp, L, H)

    def _sigmoid(x):                     # single EUP push per gate
        return 0.5 * (jnp.tanh(0.5 * x) + 1.0)

    # ---------------- serial recurrence over T decode steps ----------------
    # T is small and static -> fully unrolled.  (For large production T switch
    # to lax.fori_loop with the same hs_sc carry pattern.)
    h = h0_ref[...]                                      # (Bp, H)
    for t in range(T):
        gx = gx_sc[t * Bp:(t + 1) * Bp, :]               # one sublane tile

        # --- nn.GRUCell, gate order r, z, n (b_hn stays inside r*(...)) ---
        gh = (jnp.dot(h, w_hh_ref[...], preferred_element_type=jnp.float32)
              + b_hh_ref[...])
        r = _sigmoid(gx[:, 0:H] + gh[:, 0:H])
        z = _sigmoid(gx[:, H:2 * H] + gh[:, H:2 * H])
        n = jnp.tanh(gx[:, 2 * H:3 * H] + r * gh[:, 2 * H:3 * H])
        h_gru = (1.0 - z) * n + z * h

        # hidden half of decoder_attn_weighted_ctx (only other per-step matmul)
        h_ctx_half = jnp.dot(h_gru, w_ctx_h_ref[...],
                             preferred_element_type=jnp.float32)

        # --- attention with pre-folded weights: VPU mul + XLU reduce only ---
        scores = (jnp.sum(h_gru[:, None, :] * enc_att_sc[...], axis=-1)
                  + sbias_sc[...])                       # (Bp, L)
        scores = scores - jnp.max(scores, axis=-1, keepdims=True)
        p = jnp.exp(scores)
        p = p * pl.reciprocal(jnp.sum(p, axis=-1, keepdims=True), approx=True)
        ctx_a = jnp.sum(p[:, :, None] * enc_ctx_sc[...], axis=1)  # == ctx @ W_ctx_a

        h = jnp.tanh(ctx_a + h_ctx_half + b_ctx_ref[...])
        hs_sc[t * Bp:(t + 1) * Bp, :] = h                # unmasked 8-row store

    # ---------------- epilogue: one dense prediction matmul + slab store ----
    preds_ref[...] = (jnp.dot(hs_sc[...], w_pred_ref[...],
                              preferred_element_type=jnp.float32)
                      + b_pred_ref[...])


def attn_gru_decoder_forward(emb_inputs, h0, enc, params):
    """emb_inputs: (T, B, E) embedded decoder inputs; h0: (B, H); enc: (B, L, H).
    Returns preds: (B, T, V) matching PyTorch `preds` in forward()."""
    T, B, E = emb_inputs.shape
    H = h0.shape[-1]
    L = enc.shape[1]
    V = params['w_pred'].shape[-1]

    Bp = 8 * pl.cdiv(B, 8)                   # sublane-pad batch (2 -> 8)
    Gp = 128 * pl.cdiv(3 * H, 128)           # lane-pad gate dim (96 -> 128)
    Vp = 128 * pl.cdiv(V, 128)               # lane-pad vocab dim (64 -> 128)

    def pad_last(x, n):
        p = n - x.shape[-1]
        return x if p == 0 else jnp.pad(x, [(0, 0)] * (x.ndim - 1) + [(0, p)])

    # Wrapper-side (one-time) plumbing: zero-pad to lane/sublane-dense shapes.
    h0_p = jnp.pad(h0, ((0, Bp - B), (0, 0)))
    enc_p = jnp.pad(enc, ((0, Bp - B), (0, 0), (0, 0)))
    emb_flat = jnp.pad(emb_inputs,
                       ((0, 0), (0, Bp - B), (0, 0))).reshape(T * Bp, E)

    w_ih = pad_last(params['w_ih'], Gp)
    b_ih = pad_last(params['b_ih'], Gp)
    w_hh = pad_last(params['w_hh'], Gp)
    b_hh = pad_last(params['b_hh'], Gp)
    w_att_t = params['w_att'].T              # encoder-side fold of W_att
    w_pred = pad_last(params['w_pred'], Vp)
    b_pred = pad_last(params['b_pred'], Vp)

    inputs = (emb_flat, h0_p, enc_p,
              w_ih, b_ih, w_hh, b_hh,
              w_att_t, params['b_att'],
              params['w_ctx_a'], params['w_ctx_h'], params['b_ctx'],
              w_pred, b_pred)

    preds_padded = pl.pallas_call(
        _attn_gru_decoder_kernel,
        out_shape=jax.ShapeDtypeStruct((T * Bp, Vp), jnp.float32),
        # Single invocation (no grid): every operand fully resident in VMEM.
        in_specs=[pl.BlockSpec(memory_space=pltpu.MemorySpace.VMEM)
                  for _ in inputs],
        out_specs=pl.BlockSpec(memory_space=pltpu.MemorySpace.VMEM),
        scratch_shapes=[
            pltpu.VMEM((T * Bp, Gp), jnp.float32),   # gx_all
            pltpu.VMEM((Bp, L, H), jnp.float32),     # enc @ W_att^T
            pltpu.VMEM((Bp, L, H), jnp.float32),     # enc @ W_ctx_a
            pltpu.VMEM((Bp, L), jnp.float32),        # enc . b_att
            pltpu.VMEM((T * Bp, H), jnp.float32),    # per-step hidden states
        ],
    )(*inputs)

    preds = preds_padded.reshape(T, Bp, Vp)[:, :B, :V]   # strip padding
    return jnp.transpose(preds, (1, 0, 2))               # (B, T, V)


def reference_forward(emb_inputs, h0, enc, params):
    """Pure-JAX reference mirroring the PyTorch training forward (unfused,
    unpadded, exact softmax/sigmoid)."""
    T = emb_inputs.shape[0]
    H = h0.shape[-1]
    h = h0
    preds = []
    for t in range(T):
        x = emb_inputs[t]
        gx = x @ params['w_ih'] + params['b_ih']
        gh = h @ params['w_hh'] + params['b_hh']
        r = jax.nn.sigmoid(gx[:, :H] + gh[:, :H])
        z = jax.nn.sigmoid(gx[:, H:2 * H] + gh[:, H:2 * H])
        n = jnp.tanh(gx[:, 2 * H:] + r * gh[:, 2 * H:])
        h_gru = (1.0 - z) * n + z * h
        a = h_gru @ params['w_att'] + params['b_att']
        scores = jnp.einsum('bh,blh->bl', a, enc)
        p = jax.nn.softmax(scores, axis=-1)
        ctx = jnp.einsum('bl,blh->bh', p, enc)
        h = jnp.tanh(ctx @ params['w_ctx_a'] + h_gru @ params['w_ctx_h']
                     + params['b_ctx'])
        preds.append(h @ params['w_pred'] + params['b_pred'])
    return jnp.stack(preds, axis=1)


if __name__ == "__main__":
    B, T, L = 2, 8, 8            # batch, target words, encoder length
    E, H, V = 16, 32, 64         # input(embed) size, hidden size, vocab size
    START_TOKEN_IDX = 1

    key = jax.random.PRNGKey(0)
    ks = jax.random.split(key, 12)

    def glorot(k, shape):
        lim = np.sqrt(6.0 / (shape[0] + shape[-1]))
        return jax.random.uniform(k, shape, jnp.float32, -lim, lim)

    params = {
        'w_ih': glorot(ks[0], (E, 3 * H)), 'b_ih': jnp.zeros((1, 3 * H), jnp.float32),
        'w_hh': glorot(ks[1], (H, 3 * H)), 'b_hh': jnp.zeros((1, 3 * H), jnp.float32),
        'w_att': glorot(ks[2], (H, H)),    'b_att': 0.01 * jnp.ones((1, H), jnp.float32),
        'w_ctx_a': glorot(ks[3], (H, H)),                       # acts on ctx half of cat
        'w_ctx_h': glorot(ks[4], (H, H)),                       # acts on hidden half
        'b_ctx': 0.01 * jnp.ones((1, H), jnp.float32),
        'w_pred': glorot(ks[5], (H, V)),   'b_pred': jnp.zeros((1, V), jnp.float32),
    }
    embedding = 0.1 * jax.random.normal(ks[6], (V, E), jnp.float32)  # GLoVE table

    # Module inputs (original_sequence only contributes shapes in training path).
    target_sequence = jax.random.randint(ks[7], (B, T, 1), 0, V)
    hidden_state = 0.1 * jax.random.normal(ks[8], (B, H), jnp.float32)
    encoder_attention = 0.1 * jax.random.normal(ks[9], (B, L, H), jnp.float32)

    # teacher_forcing_ratio = 1.0 (deterministic): step 0 = START token,
    # step t = target_sequence[:, t-1]. Embedding gather done in JAX glue.
    idx = jnp.concatenate(
        [jnp.full((1, B), START_TOKEN_IDX, jnp.int32),
         target_sequence[:, :-1, 0].T.astype(jnp.int32)], axis=0)   # (T, B)
    emb_inputs = embedding[idx]                                     # (T, B, E)

    preds = attn_gru_decoder_forward(emb_inputs, hidden_state,
                                     encoder_attention, params)
    preds = jax.block_until_ready(preds)

    ref = reference_forward(emb_inputs, hidden_state, encoder_attention, params)
    assert preds.shape == (B, T, V)
    assert bool(jnp.all(jnp.isfinite(preds)))
    # Tolerance covers the approximate-reciprocal softmax and the reassociated
    # (mathematically identical) encoder-side weight folds; all math is f32.
    assert bool(jnp.allclose(preds, ref, atol=1e-2, rtol=1e-2)), \
        float(jnp.max(jnp.abs(preds - ref)))
    print("KERNEL_OK")
</pallas_src>

<mosaic_0001>
module attributes {stable_mosaic.version = 11 : i64} {
  func.func @_attn_gru_decoder_kernel(%arg0: memref<64x16xf32, #tpu.memory_space<vmem>>, %arg1: memref<8x32xf32, #tpu.memory_space<vmem>>, %arg2: memref<8x8x32xf32, #tpu.memory_space<vmem>>, %arg3: memref<16x128xf32, #tpu.memory_space<vmem>>, %arg4: memref<1x128xf32, #tpu.memory_space<vmem>>, %arg5: memref<32x128xf32, #tpu.memory_space<vmem>>, %arg6: memref<1x128xf32, #tpu.memory_space<vmem>>, %arg7: memref<32x32xf32, #tpu.memory_space<vmem>>, %arg8: memref<1x32xf32, #tpu.memory_space<vmem>>, %arg9: memref<32x32xf32, #tpu.memory_space<vmem>>, %arg10: memref<32x32xf32, #tpu.memory_space<vmem>>, %arg11: memref<1x32xf32, #tpu.memory_space<vmem>>, %arg12: memref<32x128xf32, #tpu.memory_space<vmem>>, %arg13: memref<1x128xf32, #tpu.memory_space<vmem>>, %arg14: memref<64x128xf32, #tpu.memory_space<vmem>>, %arg15: memref<64x128xf32, #tpu.memory_space<vmem>>, %arg16: memref<8x8x32xf32, #tpu.memory_space<vmem>>, %arg17: memref<8x8x32xf32, #tpu.memory_space<vmem>>, %arg18: memref<8x8xf32, #tpu.memory_space<vmem>>, %arg19: memref<64x32xf32, #tpu.memory_space<vmem>>) attributes {dimension_semantics = [], scalar_prefetch = 0 : i64, scratch_operands = 5 : i64, tpu.core_type = #tpu.core_type<tc>} {
    %c0 = arith.constant 0 : index
    %c0_0 = arith.constant 0 : index
    %0 = vector.load %arg0[%c0, %c0_0] : memref<64x16xf32, #tpu.memory_space<vmem>>, vector<64x16xf32>
    %c0_1 = arith.constant 0 : index
    %c0_2 = arith.constant 0 : index
    %1 = vector.load %arg3[%c0_1, %c0_2] : memref<16x128xf32, #tpu.memory_space<vmem>>, vector<16x128xf32>
    %cst = arith.constant dense<0.000000e+00> : vector<64x128xf32>
    %2 = tpu.matmul %0, %1, %cst {dimension_numbers = #tpu.dot_dimension_numbers<[1], [0], [0], [1], [0, 0, 1, 1], [], []>} : vector<64x16xf32>, vector<16x128xf32>, vector<64x128xf32> -> vector<64x128xf32>
    %c0_3 = arith.constant 0 : index
    %c0_4 = arith.constant 0 : index
    %3 = vector.load %arg4[%c0_3, %c0_4] : memref<1x128xf32, #tpu.memory_space<vmem>>, vector<1x128xf32>
    %4 = vector.broadcast %3 : vector<1x128xf32> to vector<64x128xf32>
    %5 = arith.addf %2, %4 : vector<64x128xf32>
    %c0_5 = arith.constant 0 : index
    %c0_6 = arith.constant 0 : index
    %6 = vector.load %arg15[%c0_5, %c0_6] : memref<64x128xf32, #tpu.memory_space<vmem>>, vector<64x128xf32>
    tpu.vector_store %arg15[%c0_5, %c0_6], %5 {strides = array<i32>} : memref<64x128xf32, #tpu.memory_space<vmem>>, vector<64x128xf32>,
    %c0_7 = arith.constant 0 : index
    %c0_8 = arith.constant 0 : index
    %c0_9 = arith.constant 0 : index
    %7 = vector.load %arg2[%c0_7, %c0_8, %c0_9] : memref<8x8x32xf32, #tpu.memory_space<vmem>>, vector<8x8x32xf32>
    %8 = vector.shape_cast %7 : vector<8x8x32xf32> to vector<64x32xf32>
    %c0_10 = arith.constant 0 : index
    %c0_11 = arith.constant 0 : index
    %9 = vector.load %arg7[%c0_10, %c0_11] : memref<32x32xf32, #tpu.memory_space<vmem>>, vector<32x32xf32>
    %cst_12 = arith.constant dense<0.000000e+00> : vector<64x32xf32>
    %10 = tpu.matmul %8, %9, %cst_12 {dimension_numbers = #tpu.dot_dimension_numbers<[1], [0], [0], [1], [0, 0, 1, 1], [], []>} : vector<64x32xf32>, vector<32x32xf32>, vector<64x32xf32> -> vector<64x32xf32>
    %11 = vector.shape_cast %10 : vector<64x32xf32> to vector<8x8x32xf32>
    %c0_13 = arith.constant 0 : index
    %c0_14 = arith.constant 0 : index
    %c0_15 = arith.constant 0 : index
    %12 = vector.load %arg16[%c0_13, %c0_14, %c0_15] : memref<8x8x32xf32, #tpu.memory_space<vmem>>, vector<8x8x32xf32>
    tpu.vector_store %arg16[%c0_13, %c0_14, %c0_15], %11 {strides = array<i32>} : memref<8x8x32xf32, #tpu.memory_space<vmem>>, vector<8x8x32xf32>,
    %c0_16 = arith.constant 0 : index
    %c0_17 = arith.constant 0 : index
    %13 = vector.load %arg8[%c0_16, %c0_17] : memref<1x32xf32, #tpu.memory_space<vmem>>, vector<1x32xf32>
    %14 = vector.shape_cast %13 : vector<1x32xf32> to vector<1x1x32xf32>
    %15 = vector.broadcast %14 : vector<1x1x32xf32> to vector<8x8x32xf32>
    %16 = arith.mulf %7, %15 : vector<8x8x32xf32>
    %cst_18 = arith.constant dense<0.000000e+00> : vector<8x8xf32>
    %17 = vector.multi_reduction <add>, %16, %cst_18 [2] : vector<8x8x32xf32> to vector<8x8xf32>
    %c0_19 = arith.constant 0 : index
    %c0_20 = arith.constant 0 : index
    %18 = vector.load %arg18[%c0_19, %c0_20] : memref<8x8xf32, #tpu.memory_space<vmem>>, vector<8x8xf32>
    tpu.vector_store %arg18[%c0_19, %c0_20], %17 {strides = array<i32>} : memref<8x8xf32, #tpu.memory_space<vmem>>, vector<8x8xf32>,
    %c0_21 = arith.constant 0 : index
    %c0_22 = arith.constant 0 : index
    %19 = vector.load %arg9[%c0_21, %c0_22] : memref<32x32xf32, #tpu.memory_space<vmem>>, vector<32x32xf32>
    %cst_23 = arith.constant dense<0.000000e+00> : vector<64x32xf32>
    %20 = tpu.matmul %8, %19, %cst_23 {dimension_numbers = #tpu.dot_dimension_numbers<[1], [0], [0], [1], [0, 0, 1, 1], [], []>} : vector<64x32xf32>, vector<32x32xf32>, vector<64x32xf32> -> vector<64x32xf32>
    %21 = vector.shape_cast %20 : vector<64x32xf32> to vector<8x8x32xf32>
    %c0_24 = arith.constant 0 : index
    %c0_25 = arith.constant 0 : index
    %c0_26 = arith.constant 0 : index
    %22 = vector.load %arg17[%c0_24, %c0_25, %c0_26] : memref<8x8x32xf32, #tpu.memory_space<vmem>>, vector<8x8x32xf32>
    tpu.vector_store %arg17[%c0_24, %c0_25, %c0_26], %21 {strides = array<i32>} : memref<8x8x32xf32, #tpu.memory_space<vmem>>, vector<8x8x32xf32>,
    %c0_27 = arith.constant 0 : index
    %c0_28 = arith.constant 0 : index
    %23 = vector.load %arg1[%c0_27, %c0_28] : memref<8x32xf32, #tpu.memory_space<vmem>>, vector<8x32xf32>
    %c0_29 = arith.constant 0 : index
    %c0_30 = arith.constant 0 : index
    %24 = vector.load %arg15[%c0_29, %c0_30] : memref<64x128xf32, #tpu.memory_space<vmem>>, vector<8x128xf32>
    %c0_31 = arith.constant 0 : index
    %c0_32 = arith.constant 0 : index
    %25 = vector.load %arg5[%c0_31, %c0_32] : memref<32x128xf32, #tpu.memory_space<vmem>>, vector<32x128xf32>
    %cst_33 = arith.constant dense<0.000000e+00> : vector<8x128xf32>
    %26 = tpu.matmul %23, %25, %cst_33 {dimension_numbers = #tpu.dot_dimension_numbers<[1], [0], [0], [1], [0, 0, 1, 1], [], []>} : vector<8x32xf32>, vector<32x128xf32>, vector<8x128xf32> -> vector<8x128xf32>
    %c0_34 = arith.constant 0 : index
    %c0_35 = arith.constant 0 : index
    %27 = vector.load %arg6[%c0_34, %c0_35] : memref<1x128xf32, #tpu.memory_space<vmem>>, vector<1x128xf32>
    %28 = vector.broadcast %27 : vector<1x128xf32> to vector<8x128xf32>
    %29 = arith.addf %26, %28 : vector<8x128xf32>
    %30 = vector.extract_strided_slice %24 {offsets = [0, 0], sizes = [8, 32], strides = [1, 1]} : vector<8x128xf32> to vector<8x32xf32>
    %31 = vector.extract_strided_slice %29 {offsets = [0, 0], sizes = [8, 32], strides = [1, 1]} : vector<8x128xf32> to vector<8x32xf32>
    %32 = arith.addf %30, %31 : vector<8x32xf32>
    %cst_36 = arith.constant 5.000000e-01 : f32
    %33 = vector.broadcast %cst_36 : f32 to vector<8x32xf32>
    %34 = arith.mulf %33, %32 : vector<8x32xf32>
    %35 = math.tanh %34 : vector<8x32xf32>
    %cst_37 = arith.constant 1.000000e+00 : f32
    %36 = vector.broadcast %cst_37 : f32 to vector<8x32xf32>
    %37 = arith.addf %35, %36 : vector<8x32xf32>
    %cst_38 = arith.constant 5.000000e-01 : f32
    %38 = vector.broadcast %cst_38 : f32 to vector<8x32xf32>
    %39 = arith.mulf %38, %37 : vector<8x32xf32>
    %40 = vector.extract_strided_slice %24 {offsets = [0, 32], sizes = [8, 32], strides = [1, 1]} : vector<8x128xf32> to vector<8x32xf32>
    %41 = vector.extract_strided_slice %29 {offsets = [0, 32], sizes = [8, 32], strides = [1, 1]} : vector<8x128xf32> to vector<8x32xf32>
    %42 = arith.addf %40, %41 : vector<8x32xf32>
    %cst_39 = arith.constant 5.000000e-01 : f32
    %43 = vector.broadcast %cst_39 : f32 to vector<8x32xf32>
    %44 = arith.mulf %43, %42 : vector<8x32xf32>
    %45 = math.tanh %44 : vector<8x32xf32>
    %cst_40 = arith.constant 1.000000e+00 : f32
    %46 = vector.broadcast %cst_40 : f32 to vector<8x32xf32>
    %47 = arith.addf %45, %46 : vector<8x32xf32>
    %cst_41 = arith.constant 5.000000e-01 : f32
    %48 = vector.broadcast %cst_41 : f32 to vector<8x32xf32>
    %49 = arith.mulf %48, %47 : vector<8x32xf32>
    %50 = vector.extract_strided_slice %24 {offsets = [0, 64], sizes = [8, 32], strides = [1, 1]} : vector<8x128xf32> to vector<8x32xf32>
    %51 = vector.extract_strided_slice %29 {offsets = [0, 64], sizes = [8, 32], strides = [1, 1]} : vector<8x128xf32> to vector<8x32xf32>
    %52 = arith.mulf %39, %51 : vector<8x32xf32>
    %53 = arith.addf %50, %52 : vector<8x32xf32>
    %54 = math.tanh %53 : vector<8x32xf32>
    %cst_42 = arith.constant 1.000000e+00 : f32
    %55 = vector.broadcast %cst_42 : f32 to vector<8x32xf32>
    %56 = arith.subf %55, %49 : vector<8x32xf32>
    %57 = arith.mulf %56, %54 : vector<8x32xf32>
    %58 = arith.mulf %49, %23 : vector<8x32xf32>
    %59 = arith.addf %57, %58 : vector<8x32xf32>
    %c0_43 = arith.constant 0 : index
    %c0_44 = arith.constant 0 : index
    %60 = vector.load %arg10[%c0_43, %c0_44] : memref<32x32xf32, #tpu.memory_space<vmem>>, vector<32x32xf32>
    %cst_45 = arith.constant dense<0.000000e+00> : vector<8x32xf32>
    %61 = tpu.matmul %59, %60, %cst_45 {dimension_numbers = #tpu.dot_dimension_numbers<[1], [0], [0], [1], [0, 0, 1, 1], [], []>} : vector<8x32xf32>, vector<32x32xf32>, vector<8x32xf32> -> vector<8x32xf32>
    %62 = vector.shape_cast %59 : vector<8x32xf32> to vector<8x1x32xf32>
    %c0_46 = arith.constant 0 : index
    %c0_47 = arith.constant 0 : index
    %c0_48 = arith.constant 0 : index
    %63 = vector.load %arg16[%c0_46, %c0_47, %c0_48] : memref<8x8x32xf32, #tpu.memory_space<vmem>>, vector<8x8x32xf32>
    %64 = vector.broadcast %62 : vector<8x1x32xf32> to vector<8x8x32xf32>
    %65 = arith.mulf %64, %63 : vector<8x8x32xf32>
    %cst_49 = arith.constant dense<0.000000e+00> : vector<8x8xf32>
    %66 = vector.multi_reduction <add>, %65, %cst_49 [2] : vector<8x8x32xf32> to vector<8x8xf32>
    %c0_50 = arith.constant 0 : index
    %c0_51 = arith.constant 0 : index
    %67 = vector.load %arg18[%c0_50, %c0_51] : memref<8x8xf32, #tpu.memory_space<vmem>>, vector<8x8xf32>
    %68 = arith.addf %66, %67 : vector<8x8xf32>
    %cst_52 = arith.constant dense<0xFF800000> : vector<8xf32>
    %69 = vector.multi_reduction <maximumf>, %68, %cst_52 [1] : vector<8x8xf32> to vector<8xf32>
    %70 = vector.shape_cast %69 : vector<8xf32> to vector<8x1xf32>
    %71 = vector.broadcast %70 : vector<8x1xf32> to vector<8x8xf32>
    %72 = arith.subf %68, %71 : vector<8x8xf32>
    %73 = math.exp %72 : vector<8x8xf32>
    %cst_53 = arith.constant dense<0.000000e+00> : vector<8xf32>
    %74 = vector.multi_reduction <add>, %73, %cst_53 [1] : vector<8x8xf32> to vector<8xf32>
    %75 = vector.shape_cast %74 : vector<8xf32> to vector<8x1xf32>
    %76 = tpu.reciprocal %75 {approx = true} : vector<8x1xf32> -> vector<8x1xf32>
    %77 = vector.broadcast %76 : vector<8x1xf32> to vector<8x8xf32>
    %78 = arith.mulf %73, %77 : vector<8x8xf32>
    %79 = vector.shape_cast %78 : vector<8x8xf32> to vector<8x8x1xf32>
    %c0_54 = arith.constant 0 : index
    %c0_55 = arith.constant 0 : index
    %c0_56 = arith.constant 0 : index
    %80 = vector.load %arg17[%c0_54, %c0_55, %c0_56] : memref<8x8x32xf32, #tpu.memory_space<vmem>>, vector<8x8x32xf32>
    %81 = vector.broadcast %79 : vector<8x8x1xf32> to vector<8x8x32xf32>
    %82 = arith.mulf %81, %80 : vector<8x8x32xf32>
    %cst_57 = arith.constant dense<0.000000e+00> : vector<8x32xf32>
    %83 = vector.multi_reduction <add>, %82, %cst_57 [1] : vector<8x8x32xf32> to vector<8x32xf32>
    %84 = arith.addf %83, %61 : vector<8x32xf32>
    %c0_58 = arith.constant 0 : index
    %c0_59 = arith.constant 0 : index
    %85 = vector.load %arg11[%c0_58, %c0_59] : memref<1x32xf32, #tpu.memory_space<vmem>>, vector<1x32xf32>
    %86 = vector.broadcast %85 : vector<1x32xf32> to vector<8x32xf32>
    %87 = arith.addf %84, %86 : vector<8x32xf32>
    %88 = math.tanh %87 : vector<8x32xf32>
    %c0_60 = arith.constant 0 : index
    %c0_61 = arith.constant 0 : index
    %89 = vector.load %arg19[%c0_60, %c0_61] : memref<64x32xf32, #tpu.memory_space<vmem>>, vector<8x32xf32>
    tpu.vector_store %arg19[%c0_60, %c0_61], %88 {strides = array<i32>} : memref<64x32xf32, #tpu.memory_space<vmem>>, vector<8x32xf32>,
    %c8 = arith.constant 8 : index
    %c0_62 = arith.constant 0 : index
    %90 = vector.load %arg15[%c8, %c0_62] : memref<64x128xf32, #tpu.memory_space<vmem>>, vector<8x128xf32>
    %c0_63 = arith.constant 0 : index
    %c0_64 = arith.constant 0 : index
    %91 = vector.load %arg5[%c0_63, %c0_64] : memref<32x128xf32, #tpu.memory_space<vmem>>, vector<32x128xf32>
    %cst_65 = arith.constant dense<0.000000e+00> : vector<8x128xf32>
    %92 = tpu.matmul %88, %91, %cst_65 {dimension_numbers = #tpu.dot_dimension_numbers<[1], [0], [0], [1], [0, 0, 1, 1], [], []>} : vector<8x32xf32>, vector<32x128xf32>, vector<8x128xf32> -> vector<8x128xf32>
    %c0_66 = arith.constant 0 : index
    %c0_67 = arith.constant 0 : index
    %93 = vector.load %arg6[%c0_66, %c0_67] : memref<1x128xf32, #tpu.memory_space<vmem>>, vector<1x128xf32>
    %94 = vector.broadcast %93 : vector<1x128xf32> to vector<8x128xf32>
    %95 = arith.addf %92, %94 : vector<8x128xf32>
    %96 = vector.extract_strided_slice %90 {offsets = [0, 0], sizes = [8, 32], strides = [1, 1]} : vector<8x128xf32> to vector<8x32xf32>
    %97 = vector.extract_strided_slice %95 {offsets = [0, 0], sizes = [8, 32], strides = [1, 1]} : vector<8x128xf32> to vector<8x32xf32>
    %98 = arith.addf %96, %97 : vector<8x32xf32>
    %cst_68 = arith.constant 5.000000e-01 : f32
    %99 = vector.broadcast %cst_68 : f32 to vector<8x32xf32>
    %100 = arith.mulf %99, %98 : vector<8x32xf32>
    %101 = math.tanh %100 : vector<8x32xf32>
    %cst_69 = arith.constant 1.000000e+00 : f32
    %102 = vector.broadcast %cst_69 : f32 to vector<8x32xf32>
    %103 = arith.addf %101, %102 : vector<8x32xf32>
    %cst_70 = arith.constant 5.000000e-01 : f32
    %104 = vector.broadcast %cst_70 : f32 to vector<8x32xf32>
    %105 = arith.mulf %104, %103 : vector<8x32xf32>
    %106 = vector.extract_strided_slice %90 {offsets = [0, 32], sizes = [8, 32], strides = [1, 1]} : vector<8x128xf32> to vector<8x32xf32>
    %107 = vector.extract_strided_slice %95 {offsets = [0, 32], sizes = [8, 32], strides = [1, 1]} : vector<8x128xf32> to vector<8x32xf32>
    %108 = arith.addf %106, %107 : vector<8x32xf32>
    %cst_71 = arith.constant 5.000000e-01 : f32
    %109 = vector.broadcast %cst_71 : f32 to vector<8x32xf32>
    %110 = arith.mulf %109, %108 : vector<8x32xf32>
    %111 = math.tanh %110 : vector<8x32xf32>
    %cst_72 = arith.constant 1.000000e+00 : f32
    %112 = vector.broadcast %cst_72 : f32 to vector<8x32xf32>
    %113 = arith.addf %111, %112 : vector<8x32xf32>
    %cst_73 = arith.constant 5.000000e-01 : f32
    %114 = vector.broadcast %cst_73 : f32 to vector<8x32xf32>
    %115 = arith.mulf %114, %113 : vector<8x32xf32>
    %116 = vector.extract_strided_slice %90 {offsets = [0, 64], sizes = [8, 32], strides = [1, 1]} : vector<8x128xf32> to vector<8x32xf32>
    %117 = vector.extract_strided_slice %95 {offsets = [0, 64], sizes = [8, 32], strides = [1, 1]} : vector<8x128xf32> to vector<8x32xf32>
    %118 = arith.mulf %105, %117 : vector<8x32xf32>
    %119 = arith.addf %116, %118 : vector<8x32xf32>
    %120 = math.tanh %119 : vector<8x32xf32>
    %cst_74 = arith.constant 1.000000e+00 : f32
    %121 = vector.broadcast %cst_74 : f32 to vector<8x32xf32>
    %122 = arith.subf %121, %115 : vector<8x32xf32>
    %123 = arith.mulf %122, %120 : vector<8x32xf32>
    %124 = arith.mulf %115, %88 : vector<8x32xf32>
    %125 = arith.addf %123, %124 : vector<8x32xf32>
    %c0_75 = arith.constant 0 : index
    %c0_76 = arith.constant 0 : index
    %126 = vector.load %arg10[%c0_75, %c0_76] : memref<32x32xf32, #tpu.memory_space<vmem>>, vector<32x32xf32>
    %cst_77 = arith.constant dense<0.000000e+00> : vector<8x32xf32>
    %127 = tpu.matmul %125, %126, %cst_77 {dimension_numbers = #tpu.dot_dimension_numbers<[1], [0], [0], [1], [0, 0, 1, 1], [], []>} : vector<8x32xf32>, vector<32x32xf32>, vector<8x32xf32> -> vector<8x32xf32>
    %128 = vector.shape_cast %125 : vector<8x32xf32> to vector<8x1x32xf32>
    %c0_78 = arith.constant 0 : index
    %c0_79 = arith.constant 0 : index
    %c0_80 = arith.constant 0 : index
    %129 = vector.load %arg16[%c0_78, %c0_79, %c0_80] : memref<8x8x32xf32, #tpu.memory_space<vmem>>, vector<8x8x32xf32>
    %130 = vector.broadcast %128 : vector<8x1x32xf32> to vector<8x8x32xf32>
    %131 = arith.mulf %130, %129 : vector<8x8x32xf32>
    %cst_81 = arith.constant dense<0.000000e+00> : vector<8x8xf32>
    %132 = vector.multi_reduction <add>, %131, %cst_81 [2] : vector<8x8x32xf32> to vector<8x8xf32>
    %c0_82 = arith.constant 0 : index
    %c0_83 = arith.constant 0 : index
    %133 = vector.load %arg18[%c0_82, %c0_83] : memref<8x8xf32, #tpu.memory_space<vmem>>, vector<8x8xf32>
    %134 = arith.addf %132, %133 : vector<8x8xf32>
    %cst_84 = arith.constant dense<0xFF800000> : vector<8xf32>
    %135 = vector.multi_reduction <maximumf>, %134, %cst_84 [1] : vector<8x8xf32> to vector<8xf32>
    %136 = vector.shape_cast %135 : vector<8xf32> to vector<8x1xf32>
    %137 = vector.broadcast %136 : vector<8x1xf32> to vector<8x8xf32>
    %138 = arith.subf %134, %137 : vector<8x8xf32>
    %139 = math.exp %138 : vector<8x8xf32>
    %cst_85 = arith.constant dense<0.000000e+00> : vector<8xf32>
    %140 = vector.multi_reduction <add>, %139, %cst_85 [1] : vector<8x8xf32> to vector<8xf32>
    %141 = vector.shape_cast %140 : vector<8xf32> to vector<8x1xf32>
    %142 = tpu.reciprocal %141 {approx = true} : vector<8x1xf32> -> vector<8x1xf32>
    %143 = vector.broadcast %142 : vector<8x1xf32> to vector<8x8xf32>
    %144 = arith.mulf %139, %143 : vector<8x8xf32>
    %145 = vector.shape_cast %144 : vector<8x8xf32> to vector<8x8x1xf32>
    %c0_86 = arith.constant 0 : index
    %c0_87 = arith.constant 0 : index
    %c0_88 = arith.constant 0 : index
    %146 = vector.load %arg17[%c0_86, %c0_87, %c0_88] : memref<8x8x32xf32, #tpu.memory_space<vmem>>, vector<8x8x32xf32>
    %147 = vector.broadcast %145 : vector<8x8x1xf32> to vector<8x8x32xf32>
    %148 = arith.mulf %147, %146 : vector<8x8x32xf32>
    %cst_89 = arith.constant dense<0.000000e+00> : vector<8x32xf32>
    %149 = vector.multi_reduction <add>, %148, %cst_89 [1] : vector<8x8x32xf32> to vector<8x32xf32>
    %150 = arith.addf %149, %127 : vector<8x32xf32>
    %c0_90 = arith.constant 0 : index
    %c0_91 = arith.constant 0 : index
    %151 = vector.load %arg11[%c0_90, %c0_91] : memref<1x32xf32, #tpu.memory_space<vmem>>, vector<1x32xf32>
    %152 = vector.broadcast %151 : vector<1x32xf32> to vector<8x32xf32>
    %153 = arith.addf %150, %152 : vector<8x32xf32>
    %154 = math.tanh %153 : vector<8x32xf32>
    %c8_92 = arith.constant 8 : index
    %c0_93 = arith.constant 0 : index
    %155 = vector.load %arg19[%c8_92, %c0_93] : memref<64x32xf32, #tpu.memory_space<vmem>>, vector<8x32xf32>
    tpu.vector_store %arg19[%c8_92, %c0_93], %154 {strides = array<i32>} : memref<64x32xf32, #tpu.memory_space<vmem>>, vector<8x32xf32>,
    %c16 = arith.constant 16 : index
    %c0_94 = arith.constant 0 : index
    %156 = vector.load %arg15[%c16, %c0_94] : memref<64x128xf32, #tpu.memory_space<vmem>>, vector<8x128xf32>
    %c0_95 = arith.constant 0 : index
    %c0_96 = arith.constant 0 : index
    %157 = vector.load %arg5[%c0_95, %c0_96] : memref<32x128xf32, #tpu.memory_space<vmem>>, vector<32x128xf32>
    %cst_97 = arith.constant dense<0.000000e+00> : vector<8x128xf32>
    %158 = tpu.matmul %154, %157, %cst_97 {dimension_numbers = #tpu.dot_dimension_numbers<[1], [0], [0], [1], [0, 0, 1, 1], [], []>} : vector<8x32xf32>, vector<32x128xf32>, vector<8x128xf32> -> vector<8x128xf32>
    %c0_98 = arith.constant 0 : index
    %c0_99 = arith.constant 0 : index
    %159 = vector.load %arg6[%c0_98, %c0_99] : memref<1x128xf32, #tpu.memory_space<vmem>>, vector<1x128xf32>
    %160 = vector.broadcast %159 : vector<1x128xf32> to vector<8x128xf32>
    %161 = arith.addf %158, %160 : vector<8x128xf32>
    %162 = vector.extract_strided_slice %156 {offsets = [0, 0], sizes = [8, 32], strides = [1, 1]} : vector<8x128xf32> to vector<8x32xf32>
    %163 = vector.extract_strided_slice %161 {offsets = [0, 0], sizes = [8, 32], strides = [1, 1]} : vector<8x128xf32> to vector<8x32xf32>
    %164 = arith.addf %162, %163 : vector<8x32xf32>
    %cst_100 = arith.constant 5.000000e-01 : f32
    %165 = vector.broadcast %cst_100 : f32 to vector<8x32xf32>
    %166 = arith.mulf %165, %164 : vector<8x32xf32>
    %167 = math.tanh %166 : vector<8x32xf32>
    %cst_101 = arith.constant 1.000000e+00 : f32
    %168 = vector.broadcast %cst_101 : f32 to vector<8x32xf32>
    %169 = arith.addf %167, %168 : vector<8x32xf32>
    %cst_102 = arith.constant 5.000000e-01 : f32
    %170 = vector.broadcast %cst_102 : f32 to vector<8x32xf32>
    %171 = arith.mulf %170, %169 : vector<8x32xf32>
    %172 = vector.extract_strided_slice %156 {offsets = [0, 32], sizes = [8, 32], strides = [1, 1]} : vector<8x128xf32> to vector<8x32xf32>
    %173 = vector.extract_strided_slice %161 {offsets = [0, 32], sizes = [8, 32], strides = [1, 1]} : vector<8x128xf32> to vector<8x32xf32>
    %174 = arith.addf %172, %173 : vector<8x32xf32>
    %cst_103 = arith.constant 5.000000e-01 : f32
    %175 = vector.broadcast %cst_103 : f32 to vector<8x32xf32>
    %176 = arith.mulf %175, %174 : vector<8x32xf32>
    %177 = math.tanh %176 : vector<8x32xf32>
    %cst_104 = arith.constant 1.000000e+00 : f32
    %178 = vector.broadcast %cst_104 : f32 to vector<8x32xf32>
    %179 = arith.addf %177, %178 : vector<8x32xf32>
    %cst_105 = arith.constant 5.000000e-01 : f32
    %180 = vector.broadcast %cst_105 : f32 to vector<8x32xf32>
    %181 = arith.mulf %180, %179 : vector<8x32xf32>
    %182 = vector.extract_strided_slice %156 {offsets = [0, 64], sizes = [8, 32], strides = [1, 1]} : vector<8x128xf32> to vector<8x32xf32>
    %183 = vector.extract_strided_slice %161 {offsets = [0, 64], sizes = [8, 32], strides = [1, 1]} : vector<8x128xf32> to vector<8x32xf32>
    %184 = arith.mulf %171, %183 : vector<8x32xf32>
    %185 = arith.addf %182, %184 : vector<8x32xf32>
    %186 = math.tanh %185 : vector<8x32xf32>
    %cst_106 = arith.constant 1.000000e+00 : f32
    %187 = vector.broadcast %cst_106 : f32 to vector<8x32xf32>
    %188 = arith.subf %187, %181 : vector<8x32xf32>
    %189 = arith.mulf %188, %186 : vector<8x32xf32>
    %190 = arith.mulf %181, %154 : vector<8x32xf32>
    %191 = arith.addf %189, %190 : vector<8x32xf32>
    %c0_107 = arith.constant 0 : index
    %c0_108 = arith.constant 0 : index
    %192 = vector.load %arg10[%c0_107, %c0_108] : memref<32x32xf32, #tpu.memory_space<vmem>>, vector<32x32xf32>
    %cst_109 = arith.constant dense<0.000000e+00> : vector<8x32xf32>
    %193 = tpu.matmul %191, %192, %cst_109 {dimension_numbers = #tpu.dot_dimension_numbers<[1], [0], [0], [1], [0, 0, 1, 1], [], []>} : vector<8x32xf32>, vector<32x32xf32>, vector<8x32xf32> -> vector<8x32xf32>
    %194 = vector.shape_cast %191 : vector<8x32xf32> to vector<8x1x32xf32>
    %c0_110 = arith.constant 0 : index
    %c0_111 = arith.constant 0 : index
    %c0_112 = arith.constant 0 : index
    %195 = vector.load %arg16[%c0_110, %c0_111, %c0_112] : memref<8x8x32xf32, #tpu.memory_space<vmem>>, vector<8x8x32xf32>
    %196 = vector.broadcast %194 : vector<8x1x32xf32> to vector<8x8x32xf32>
    %197 = arith.mulf %196, %195 : vector<8x8x32xf32>
    %cst_113 = arith.constant dense<0.000000e+00> : vector<8x8xf32>
    %198 = vector.multi_reduction <add>, %197, %cst_113 [2] : vector<8x8x32xf32> to vector<8x8xf32>
    %c0_114 = arith.constant 0 : index
    %c0_115 = arith.constant 0 : index
    %199 = vector.load %arg18[%c0_114, %c0_115] : memref<8x8xf32, #tpu.memory_space<vmem>>, vector<8x8xf32>
    %200 = arith.addf %198, %199 : vector<8x8xf32>
    %cst_116 = arith.constant dense<0xFF800000> : vector<8xf32>
    %201 = vector.multi_reduction <maximumf>, %200, %cst_116 [1] : vector<8x8xf32> to vector<8xf32>
    %202 = vector.shape_cast %201 : vector<8xf32> to vector<8x1xf32>
    %203 = vector.broadcast %202 : vector<8x1xf32> to vector<8x8xf32>
    %204 = arith.subf %200, %203 : vector<8x8xf32>
    %205 = math.exp %204 : vector<8x8xf32>
    %cst_117 = arith.constant dense<0.000000e+00> : vector<8xf32>
    %206 = vector.multi_reduction <add>, %205, %cst_117 [1] : vector<8x8xf32> to vector<8xf32>
    %207 = vector.shape_cast %206 : vector<8xf32> to vector<8x1xf32>
    %208 = tpu.reciprocal %207 {approx = true} : vector<8x1xf32> -> vector<8x1xf32>
    %209 = vector.broadcast %208 : vector<8x1xf32> to vector<8x8xf32>
    %210 = arith.mulf %205, %209 : vector<8x8xf32>
    %211 = vector.shape_cast %210 : vector<8x8xf32> to vector<8x8x1xf32>
    %c0_118 = arith.constant 0 : index
    %c0_119 = arith.constant 0 : index
    %c0_120 = arith.constant 0 : index
    %212 = vector.load %arg17[%c0_118, %c0_119, %c0_120] : memref<8x8x32xf32, #tpu.memory_space<vmem>>, vector<8x8x32xf32>
    %213 = vector.broadcast %211 : vector<8x8x1xf32> to vector<8x8x32xf32>
    %214 = arith.mulf %213, %212 : vector<8x8x32xf32>
    %cst_121 = arith.constant dense<0.000000e+00> : vector<8x32xf32>
    %215 = vector.multi_reduction <add>, %214, %cst_121 [1] : vector<8x8x32xf32> to vector<8x32xf32>
    %216 = arith.addf %215, %193 : vector<8x32xf32>
    %c0_122 = arith.constant 0 : index
    %c0_123 = arith.constant 0 : index
    %217 = vector.load %arg11[%c0_122, %c0_123] : memref<1x32xf32, #tpu.memory_space<vmem>>, vector<1x32xf32>
    %218 = vector.broadcast %217 : vector<1x32xf32> to vector<8x32xf32>
    %219 = arith.addf %216, %218 : vector<8x32xf32>
    %220 = math.tanh %219 : vector<8x32xf32>
    %c16_124 = arith.constant 16 : index
    %c0_125 = arith.constant 0 : index
    %221 = vector.load %arg19[%c16_124, %c0_125] : memref<64x32xf32, #tpu.memory_space<vmem>>, vector<8x32xf32>
    tpu.vector_store %arg19[%c16_124, %c0_125], %220 {strides = array<i32>} : memref<64x32xf32, #tpu.memory_space<vmem>>, vector<8x32xf32>,
    %c24 = arith.constant 24 : index
    %c0_126 = arith.constant 0 : index
    %222 = vector.load %arg15[%c24, %c0_126] : memref<64x128xf32, #tpu.memory_space<vmem>>, vector<8x128xf32>
    %c0_127 = arith.constant 0 : index
    %c0_128 = arith.constant 0 : index
    %223 = vector.load %arg5[%c0_127, %c0_128] : memref<32x128xf32, #tpu.memory_space<vmem>>, vector<32x128xf32>
    %cst_129 = arith.constant dense<0.000000e+00> : vector<8x128xf32>
    %224 = tpu.matmul %220, %223, %cst_129 {dimension_numbers = #tpu.dot_dimension_numbers<[1], [0], [0], [1], [0, 0, 1, 1], [], []>} : vector<8x32xf32>, vector<32x128xf32>, vector<8x128xf32> -> vector<8x128xf32>
    %c0_130 = arith.constant 0 : index
    %c0_131 = arith.constant 0 : index
    %225 = vector.load %arg6[%c0_130, %c0_131] : memref<1x128xf32, #tpu.memory_space<vmem>>, vector<1x128xf32>
    %226 = vector.broadcast %225 : vector<1x128xf32> to vector<8x128xf32>
    %227 = arith.addf %224, %226 : vector<8x128xf32>
    %228 = vector.extract_strided_slice %222 {offsets = [0, 0], sizes = [8, 32], strides = [1, 1]} : vector<8x128xf32> to vector<8x32xf32>
    %229 = vector.extract_strided_slice %227 {offsets = [0, 0], sizes = [8, 32], strides = [1, 1]} : vector<8x128xf32> to vector<8x32xf32>
    %230 = arith.addf %228, %229 : vector<8x32xf32>
    %cst_132 = arith.constant 5.000000e-01 : f32
    %231 = vector.broadcast %cst_132 : f32 to vector<8x32xf32>
    %232 = arith.mulf %231, %230 : vector<8x32xf32>
    %233 = math.tanh %232 : vector<8x32xf32>
    %cst_133 = arith.constant 1.000000e+00 : f32
    %234 = vector.broadcast %cst_133 : f32 to vector<8x32xf32>
    %235 = arith.addf %233, %234 : vector<8x32xf32>
    %cst_134 = arith.constant 5.000000e-01 : f32
    %236 = vector.broadcast %cst_134 : f32 to vector<8x32xf32>
    %237 = arith.mulf %236, %235 : vector<8x32xf32>
    %238 = vector.extract_strided_slice %222 {offsets = [0, 32], sizes = [8, 32], strides = [1, 1]} : vector<8x128xf32> to vector<8x32xf32>
    %239 = vector.extract_strided_slice %227 {offsets = [0, 32], sizes = [8, 32], strides = [1, 1]} : vector<8x128xf32> to vector<8x32xf32>
    %240 = arith.addf %238, %239 : vector<8x32xf32>
    %cst_135 = arith.constant 5.000000e-01 : f32
    %241 = vector.broadcast %cst_135 : f32 to vector<8x32xf32>
    %242 = arith.mulf %241, %240 : vector<8x32xf32>
    %243 = math.tanh %242 : vector<8x32xf32>
    %cst_136 = arith.constant 1.000000e+00 : f32
    %244 = vector.broadcast %cst_136 : f32 to vector<8x32xf32>
    %245 = arith.addf %243, %244 : vector<8x32xf32>
    %cst_137 = arith.constant 5.000000e-01 : f32
    %246 = vector.broadcast %cst_137 : f32 to vector<8x32xf32>
    %247 = arith.mulf %246, %245 : vector<8x32xf32>
    %248 = vector.extract_strided_slice %222 {offsets = [0, 64], sizes = [8, 32], strides = [1, 1]} : vector<8x128xf32> to vector<8x32xf32>
    %249 = vector.extract_strided_slice %227 {offsets = [0, 64], sizes = [8, 32], strides = [1, 1]} : vector<8x128xf32> to vector<8x32xf32>
    %250 = arith.mulf %237, %249 : vector<8x32xf32>
    %251 = arith.addf %248, %250 : vector<8x32xf32>
    %252 = math.tanh %251 : vector<8x32xf32>
    %cst_138 = arith.constant 1.000000e+00 : f32
    %253 = vector.broadcast %cst_138 : f32 to vector<8x32xf32>
    %254 = arith.subf %253, %247 : vector<8x32xf32>
    %255 = arith.mulf %254, %252 : vector<8x32xf32>
    %256 = arith.mulf %247, %220 : vector<8x32xf32>
    %257 = arith.addf %255, %256 : vector<8x32xf32>
    %c0_139 = arith.constant 0 : index
    %c0_140 = arith.constant 0 : index
    %258 = vector.load %arg10[%c0_139, %c0_140] : memref<32x32xf32, #tpu.memory_space<vmem>>, vector<32x32xf32>
    %cst_141 = arith.constant dense<0.000000e+00> : vector<8x32xf32>
    %259 = tpu.matmul %257, %258, %cst_141 {dimension_numbers = #tpu.dot_dimension_numbers<[1], [0], [0], [1], [0, 0, 1, 1], [], []>} : vector<8x32xf32>, vector<32x32xf32>, vector<8x32xf32> -> vector<8x32xf32>
    %260 = vector.shape_cast %257 : vector<8x32xf32> to vector<8x1x32xf32>
    %c0_142 = arith.constant 0 : index
    %c0_143 = arith.constant 0 : index
    %c0_144 = arith.constant 0 : index
    %261 = vector.load %arg16[%c0_142, %c0_143, %c0_144] : memref<8x8x32xf32, #tpu.memory_space<vmem>>, vector<8x8x32xf32>
    %262 = vector.broadcast %260 : vector<8x1x32xf32> to vector<8x8x32xf32>
    %263 = arith.mulf %262, %261 : vector<8x8x32xf32>
    %cst_145 = arith.constant dense<0.000000e+00> : vector<8x8xf32>
    %264 = vector.multi_reduction <add>, %263, %cst_145 [2] : vector<8x8x32xf32> to vector<8x8xf32>
    %c0_146 = arith.constant 0 : index
    %c0_147 = arith.constant 0 : index
    %265 = vector.load %arg18[%c0_146, %c0_147] : memref<8x8xf32, #tpu.memory_space<vmem>>, vector<8x8xf32>
    %266 = arith.addf %264, %265 : vector<8x8xf32>
    %cst_148 = arith.constant dense<0xFF800000> : vector<8xf32>
    %267 = vector.multi_reduction <maximumf>, %266, %cst_148 [1] : vector<8x8xf32> to vector<8xf32>
    %268 = vector.shape_cast %267 : vector<8xf32> to vector<8x1xf32>
    %269 = vector.broadcast %268 : vector<8x1xf32> to vector<8x8xf32>
    %270 = arith.subf %266, %269 : vector<8x8xf32>
    %271 = math.exp %270 : vector<8x8xf32>
    %cst_149 = arith.constant dense<0.000000e+00> : vector<8xf32>
    %272 = vector.multi_reduction <add>, %271, %cst_149 [1] : vector<8x8xf32> to vector<8xf32>
    %273 = vector.shape_cast %272 : vector<8xf32> to vector<8x1xf32>
    %274 = tpu.reciprocal %273 {approx = true} : vector<8x1xf32> -> vector<8x1xf32>
    %275 = vector.broadcast %274 : vector<8x1xf32> to vector<8x8xf32>
    %276 = arith.mulf %271, %275 : vector<8x8xf32>
    %277 = vector.shape_cast %276 : vector<8x8xf32> to vector<8x8x1xf32>
    %c0_150 = arith.constant 0 : index
    %c0_151 = arith.constant 0 : index
    %c0_152 = arith.constant 0 : index
    %278 = vector.load %arg17[%c0_150, %c0_151, %c0_152] : memref<8x8x32xf32, #tpu.memory_space<vmem>>, vector<8x8x32xf32>
    %279 = vector.broadcast %277 : vector<8x8x1xf32> to vector<8x8x32xf32>
    %280 = arith.mulf %279, %278 : vector<8x8x32xf32>
    %cst_153 = arith.constant dense<0.000000e+00> : vector<8x32xf32>
    %281 = vector.multi_reduction <add>, %280, %cst_153 [1] : vector<8x8x32xf32> to vector<8x32xf32>
    %282 = arith.addf %281, %259 : vector<8x32xf32>
    %c0_154 = arith.constant 0 : index
    %c0_155 = arith.constant 0 : index
    %283 = vector.load %arg11[%c0_154, %c0_155] : memref<1x32xf32, #tpu.memory_space<vmem>>, vector<1x32xf32>
    %284 = vector.broadcast %283 : vector<1x32xf32> to vector<8x32xf32>
    %285 = arith.addf %282, %284 : vector<8x32xf32>
    %286 = math.tanh %285 : vector<8x32xf32>
    %c24_156 = arith.constant 24 : index
    %c0_157 = arith.constant 0 : index
    %287 = vector.load %arg19[%c24_156, %c0_157] : memref<64x32xf32, #tpu.memory_space<vmem>>, vector<8x32xf32>
    tpu.vector_store %arg19[%c24_156, %c0_157], %286 {strides = array<i32>} : memref<64x32xf32, #tpu.memory_space<vmem>>, vector<8x32xf32>,
    %c32 = arith.constant 32 : index
    %c0_158 = arith.constant 0 : index
    %288 = vector.load %arg15[%c32, %c0_158] : memref<64x128xf32, #tpu.memory_space<vmem>>, vector<8x128xf32>
    %c0_159 = arith.constant 0 : index
    %c0_160 = arith.constant 0 : index
    %289 = vector.load %arg5[%c0_159, %c0_160] : memref<32x128xf32, #tpu.memory_space<vmem>>, vector<32x128xf32>
    %cst_161 = arith.constant dense<0.000000e+00> : vector<8x128xf32>
    %290 = tpu.matmul %286, %289, %cst_161 {dimension_numbers = #tpu.dot_dimension_numbers<[1], [0], [0], [1], [0, 0, 1, 1], [], []>} : vector<8x32xf32>, vector<32x128xf32>, vector<8x128xf32> -> vector<8x128xf32>
    %c0_162 = arith.constant 0 : index
    %c0_163 = arith.constant 0 : index
    %291 = vector.load %arg6[%c0_162, %c0_163] : memref<1x128xf32, #tpu.memory_space<vmem>>, vector<1x128xf32>
    %292 = vector.broadcast %291 : vector<1x128xf32> to vector<8x128xf32>
    %293 = arith.addf %290, %292 : vector<8x128xf32>
    %294 = vector.extract_strided_slice %288 {offsets = [0, 0], sizes = [8, 32], strides = [1, 1]} : vector<8x128xf32> to vector<8x32xf32>
    %295 = vector.extract_strided_slice %293 {offsets = [0, 0], sizes = [8, 32], strides = [1, 1]} : vector<8x128xf32> to vector<8x32xf32>
    %296 = arith.addf %294, %295 : vector<8x32xf32>
    %cst_164 = arith.constant 5.000000e-01 : f32
    %297 = vector.broadcast %cst_164 : f32 to vector<8x32xf32>
    %298 = arith.mulf %297, %296 : vector<8x32xf32>
    %299 = math.tanh %298 : vector<8x32xf32>
    %cst_165 = arith.constant 1.000000e+00 : f32
    %300 = vector.broadcast %cst_165 : f32 to vector<8x32xf32>
    %301 = arith.addf %299, %300 : vector<8x32xf32>
    %cst_166 = arith.constant 5.000000e-01 : f32
    %302 = vector.broadcast %cst_166 : f32 to vector<8x32xf32>
    %303 = arith.mulf %302, %301 : vector<8x32xf32>
    %304 = vector.extract_strided_slice %288 {offsets = [0, 32], sizes = [8, 32], strides = [1, 1]} : vector<8x128xf32> to vector<8x32xf32>
    %305 = vector.extract_strided_slice %293 {offsets = [0, 32], sizes = [8, 32], strides = [1, 1]} : vector<8x128xf32> to vector<8x32xf32>
    %306 = arith.addf %304, %305 : vector<8x32xf32>
    %cst_167 = arith.constant 5.000000e-01 : f32
    %307 = vector.broadcast %cst_167 : f32 to vector<8x32xf32>
    %308 = arith.mulf %307, %306 : vector<8x32xf32>
    %309 = math.tanh %308 : vector<8x32xf32>
    %cst_168 = arith.constant 1.000000e+00 : f32
    %310 = vector.broadcast %cst_168 : f32 to vector<8x32xf32>
    %311 = arith.addf %309, %310 : vector<8x32xf32>
    %cst_169 = arith.constant 5.000000e-01 : f32
    %312 = vector.broadcast %cst_169 : f32 to vector<8x32xf32>
    %313 = arith.mulf %312, %311 : vector<8x32xf32>
    %314 = vector.extract_strided_slice %288 {offsets = [0, 64], sizes = [8, 32], strides = [1, 1]} : vector<8x128xf32> to vector<8x32xf32>
    %315 = vector.extract_strided_slice %293 {offsets = [0, 64], sizes = [8, 32], strides = [1, 1]} : vector<8x128xf32> to vector<8x32xf32>
    %316 = arith.mulf %303, %315 : vector<8x32xf32>
    %317 = arith.addf %314, %316 : vector<8x32xf32>
    %318 = math.tanh %317 : vector<8x32xf32>
    %cst_170 = arith.constant 1.000000e+00 : f32
    %319 = vector.broadcast %cst_170 : f32 to vector<8x32xf32>
    %320 = arith.subf %319, %313 : vector<8x32xf32>
    %321 = arith.mulf %320, %318 : vector<8x32xf32>
    %322 = arith.mulf %313, %286 : vector<8x32xf32>
    %323 = arith.addf %321, %322 : vector<8x32xf32>
    %c0_171 = arith.constant 0 : index
    %c0_172 = arith.constant 0 : index
    %324 = vector.load %arg10[%c0_171, %c0_172] : memref<32x32xf32, #tpu.memory_space<vmem>>, vector<32x32xf32>
    %cst_173 = arith.constant dense<0.000000e+00> : vector<8x32xf32>
    %325 = tpu.matmul %323, %324, %cst_173 {dimension_numbers = #tpu.dot_dimension_numbers<[1], [0], [0], [1], [0, 0, 1, 1], [], []>} : vector<8x32xf32>, vector<32x32xf32>, vector<8x32xf32> -> vector<8x32xf32>
    %326 = vector.shape_cast %323 : vector<8x32xf32> to vector<8x1x32xf32>
    %c0_174 = arith.constant 0 : index
    %c0_175 = arith.constant 0 : index
    %c0_176 = arith.constant 0 : index
    %327 = vector.load %arg16[%c0_174, %c0_175, %c0_176] : memref<8x8x32xf32, #tpu.memory_space<vmem>>, vector<8x8x32xf32>
    %328 = vector.broadcast %326 : vector<8x1x32xf32> to vector<8x8x32xf32>
    %329 = arith.mulf %328, %327 : vector<8x8x32xf32>
    %cst_177 = arith.constant dense<0.000000e+00> : vector<8x8xf32>
    %330 = vector.multi_reduction <add>, %329, %cst_177 [2] : vector<8x8x32xf32> to vector<8x8xf32>
    %c0_178 = arith.constant 0 : index
    %c0_179 = arith.constant 0 : index
    %331 = vector.load %arg18[%c0_178, %c0_179] : memref<8x8xf32, #tpu.memory_space<vmem>>, vector<8x8xf32>
    %332 = arith.addf %330, %331 : vector<8x8xf32>
    %cst_180 = arith.constant dense<0xFF800000> : vector<8xf32>
    %333 = vector.multi_reduction <maximumf>, %332, %cst_180 [1] : vector<8x8xf32> to vector<8xf32>
    %334 = vector.shape_cast %333 : vector<8xf32> to vector<8x1xf32>
    %335 = vector.broadcast %334 : vector<8x1xf32> to vector<8x8xf32>
    %336 = arith.subf %332, %335 : vector<8x8xf32>
    %337 = math.exp %336 : vector<8x8xf32>
    %cst_181 = arith.constant dense<0.000000e+00> : vector<8xf32>
    %338 = vector.multi_reduction <add>, %337, %cst_181 [1] : vector<8x8xf32> to vector<8xf32>
    %339 = vector.shape_cast %338 : vector<8xf32> to vector<8x1xf32>
    %340 = tpu.reciprocal %339 {approx = true} : vector<8x1xf32> -> vector<8x1xf32>
    %341 = vector.broadcast %340 : vector<8x1xf32> to vector<8x8xf32>
    %342 = arith.mulf %337, %341 : vector<8x8xf32>
    %343 = vector.shape_cast %342 : vector<8x8xf32> to vector<8x8x1xf32>
    %c0_182 = arith.constant 0 : index
    %c0_183 = arith.constant 0 : index
    %c0_184 = arith.constant 0 : index
    %344 = vector.load %arg17[%c0_182, %c0_183, %c0_184] : memref<8x8x32xf32, #tpu.memory_space<vmem>>, vector<8x8x32xf32>
    %345 = vector.broadcast %343 : vector<8x8x1xf32> to vector<8x8x32xf32>
    %346 = arith.mulf %345, %344 : vector<8x8x32xf32>
    %cst_185 = arith.constant dense<0.000000e+00> : vector<8x32xf32>
    %347 = vector.multi_reduction <add>, %346, %cst_185 [1] : vector<8x8x32xf32> to vector<8x32xf32>
    %348 = arith.addf %347, %325 : vector<8x32xf32>
    %c0_186 = arith.constant 0 : index
    %c0_187 = arith.constant 0 : index
    %349 = vector.load %arg11[%c0_186, %c0_187] : memref<1x32xf32, #tpu.memory_space<vmem>>, vector<1x32xf32>
    %350 = vector.broadcast %349 : vector<1x32xf32> to vector<8x32xf32>
    %351 = arith.addf %348, %350 : vector<8x32xf32>
    %352 = math.tanh %351 : vector<8x32xf32>
    %c32_188 = arith.constant 32 : index
    %c0_189 = arith.constant 0 : index
    %353 = vector.load %arg19[%c32_188, %c0_189] : memref<64x32xf32, #tpu.memory_space<vmem>>, vector<8x32xf32>
    tpu.vector_store %arg19[%c32_188, %c0_189], %352 {strides = array<i32>} : memref<64x32xf32, #tpu.memory_space<vmem>>, vector<8x32xf32>,
    %c40 = arith.constant 40 : index
    %c0_190 = arith.constant 0 : index
    %354 = vector.load %arg15[%c40, %c0_190] : memref<64x128xf32, #tpu.memory_space<vmem>>, vector<8x128xf32>
    %c0_191 = arith.constant 0 : index
    %c0_192 = arith.constant 0 : index
    %355 = vector.load %arg5[%c0_191, %c0_192] : memref<32x128xf32, #tpu.memory_space<vmem>>, vector<32x128xf32>
    %cst_193 = arith.constant dense<0.000000e+00> : vector<8x128xf32>
    %356 = tpu.matmul %352, %355, %cst_193 {dimension_numbers = #tpu.dot_dimension_numbers<[1], [0], [0], [1], [0, 0, 1, 1], [], []>} : vector<8x32xf32>, vector<32x128xf32>, vector<8x128xf32> -> vector<8x128xf32>
    %c0_194 = arith.constant 0 : index
    %c0_195 = arith.constant 0 : index
    %357 = vector.load %arg6[%c0_194, %c0_195] : memref<1x128xf32, #tpu.memory_space<vmem>>, vector<1x128xf32>
    %358 = vector.broadcast %357 : vector<1x128xf32> to vector<8x128xf32>
    %359 = arith.addf %356, %358 : vector<8x128xf32>
    %360 = vector.extract_strided_slice %354 {offsets = [0, 0], sizes = [8, 32], strides = [1, 1]} : vector<8x128xf32> to vector<8x32xf32>
    %361 = vector.extract_strided_slice %359 {offsets = [0, 0], sizes = [8, 32], strides = [1, 1]} : vector<8x128xf32> to vector<8x32xf32>
    %362 = arith.addf %360, %361 : vector<8x32xf32>
    %cst_196 = arith.constant 5.000000e-01 : f32
    %363 = vector.broadcast %cst_196 : f32 to vector<8x32xf32>
    %364 = arith.mulf %363, %362 : vector<8x32xf32>
    %365 = math.tanh %364 : vector<8x32xf32>
    %cst_197 = arith.constant 1.000000e+00 : f32
    %366 = vector.broadcast %cst_197 : f32 to vector<8x32xf32>
    %367 = arith.addf %365, %366 : vector<8x32xf32>
    %cst_198 = arith.constant 5.000000e-01 : f32
    %368 = vector.broadcast %cst_198 : f32 to vector<8x32xf32>
    %369 = arith.mulf %368, %367 : vector<8x32xf32>
    %370 = vector.extract_strided_slice %354 {offsets = [0, 32], sizes = [8, 32], strides = [1, 1]} : vector<8x128xf32> to vector<8x32xf32>
    %371 = vector.extract_strided_slice %359 {offsets = [0, 32], sizes = [8, 32], strides = [1, 1]} : vector<8x128xf32> to vector<8x32xf32>
    %372 = arith.addf %370, %371 : vector<8x32xf32>
    %cst_199 = arith.constant 5.000000e-01 : f32
    %373 = vector.broadcast %cst_199 : f32 to vector<8x32xf32>
    %374 = arith.mulf %373, %372 : vector<8x32xf32>
    %375 = math.tanh %374 : vector<8x32xf32>
    %cst_200 = arith.constant 1.000000e+00 : f32
    %376 = vector.broadcast %cst_200 : f32 to vector<8x32xf32>
    %377 = arith.addf %375, %376 : vector<8x32xf32>
    %cst_201 = arith.constant 5.000000e-01 : f32
    %378 = vector.broadcast %cst_201 : f32 to vector<8x32xf32>
    %379 = arith.mulf %378, %377 : vector<8x32xf32>
    %380 = vector.extract_strided_slice %354 {offsets = [0, 64], sizes = [8, 32], strides = [1, 1]} : vector<8x128xf32> to vector<8x32xf32>
    %381 = vector.extract_strided_slice %359 {offsets = [0, 64], sizes = [8, 32], strides = [1, 1]} : vector<8x128xf32> to vector<8x32xf32>
    %382 = arith.mulf %369, %381 : vector<8x32xf32>
    %383 = arith.addf %380, %382 : vector<8x32xf32>
    %384 = math.tanh %383 : vector<8x32xf32>
    %cst_202 = arith.constant 1.000000e+00 : f32
    %385 = vector.broadcast %cst_202 : f32 to vector<8x32xf32>
    %386 = arith.subf %385, %379 : vector<8x32xf32>
    %387 = arith.mulf %386, %384 : vector<8x32xf32>
    %388 = arith.mulf %379, %352 : vector<8x32xf32>
    %389 = arith.addf %387, %388 : vector<8x32xf32>
    %c0_203 = arith.constant 0 : index
    %c0_204 = arith.constant 0 : index
    %390 = vector.load %arg10[%c0_203, %c0_204] : memref<32x32xf32, #tpu.memory_space<vmem>>, vector<32x32xf32>
    %cst_205 = arith.constant dense<0.000000e+00> : vector<8x32xf32>
    %391 = tpu.matmul %389, %390, %cst_205 {dimension_numbers = #tpu.dot_dimension_numbers<[1], [0], [0], [1], [0, 0, 1, 1], [], []>} : vector<8x32xf32>, vector<32x32xf32>, vector<8x32xf32> -> vector<8x32xf32>
    %392 = vector.shape_cast %389 : vector<8x32xf32> to vector<8x1x32xf32>
    %c0_206 = arith.constant 0 : index
    %c0_207 = arith.constant 0 : index
    %c0_208 = arith.constant 0 : index
    %393 = vector.load %arg16[%c0_206, %c0_207, %c0_208] : memref<8x8x32xf32, #tpu.memory_space<vmem>>, vector<8x8x32xf32>
    %394 = vector.broadcast %392 : vector<8x1x32xf32> to vector<8x8x32xf32>
    %395 = arith.mulf %394, %393 : vector<8x8x32xf32>
    %cst_209 = arith.constant dense<0.000000e+00> : vector<8x8xf32>
    %396 = vector.multi_reduction <add>, %395, %cst_209 [2] : vector<8x8x32xf32> to vector<8x8xf32>
    %c0_210 = arith.constant 0 : index
    %c0_211 = arith.constant 0 : index
    %397 = vector.load %arg18[%c0_210, %c0_211] : memref<8x8xf32, #tpu.memory_space<vmem>>, vector<8x8xf32>
    %398 = arith.addf %396, %397 : vector<8x8xf32>
    %cst_212 = arith.constant dense<0xFF800000> : vector<8xf32>
    %399 = vector.multi_reduction <maximumf>, %398, %cst_212 [1] : vector<8x8xf32> to vector<8xf32>
    %400 = vector.shape_cast %399 : vector<8xf32> to vector<8x1xf32>
    %401 = vector.broadcast %400 : vector<8x1xf32> to vector<8x8xf32>
    %402 = arith.subf %398, %401 : vector<8x8xf32>
    %403 = math.exp %402 : vector<8x8xf32>
    %cst_213 = arith.constant dense<0.000000e+00> : vector<8xf32>
    %404 = vector.multi_reduction <add>, %403, %cst_213 [1] : vector<8x8xf32> to vector<8xf32>
    %405 = vector.shape_cast %404 : vector<8xf32> to vector<8x1xf32>
    %406 = tpu.reciprocal %405 {approx = true} : vector<8x1xf32> -> vector<8x1xf32>
    %407 = vector.broadcast %406 : vector<8x1xf32> to vector<8x8xf32>
    %408 = arith.mulf %403, %407 : vector<8x8xf32>
    %409 = vector.shape_cast %408 : vector<8x8xf32> to vector<8x8x1xf32>
    %c0_214 = arith.constant 0 : index
    %c0_215 = arith.constant 0 : index
    %c0_216 = arith.constant 0 : index
    %410 = vector.load %arg17[%c0_214, %c0_215, %c0_216] : memref<8x8x32xf32, #tpu.memory_space<vmem>>, vector<8x8x32xf32>
    %411 = vector.broadcast %409 : vector<8x8x1xf32> to vector<8x8x32xf32>
    %412 = arith.mulf %411, %410 : vector<8x8x32xf32>
    %cst_217 = arith.constant dense<0.000000e+00> : vector<8x32xf32>
    %413 = vector.multi_reduction <add>, %412, %cst_217 [1] : vector<8x8x32xf32> to vector<8x32xf32>
    %414 = arith.addf %413, %391 : vector<8x32xf32>
    %c0_218 = arith.constant 0 : index
    %c0_219 = arith.constant 0 : index
    %415 = vector.load %arg11[%c0_218, %c0_219] : memref<1x32xf32, #tpu.memory_space<vmem>>, vector<1x32xf32>
    %416 = vector.broadcast %415 : vector<1x32xf32> to vector<8x32xf32>
    %417 = arith.addf %414, %416 : vector<8x32xf32>
    %418 = math.tanh %417 : vector<8x32xf32>
    %c40_220 = arith.constant 40 : index
    %c0_221 = arith.constant 0 : index
    %419 = vector.load %arg19[%c40_220, %c0_221] : memref<64x32xf32, #tpu.memory_space<vmem>>, vector<8x32xf32>
    tpu.vector_store %arg19[%c40_220, %c0_221], %418 {strides = array<i32>} : memref<64x32xf32, #tpu.memory_space<vmem>>, vector<8x32xf32>,
    %c48 = arith.constant 48 : index
    %c0_222 = arith.constant 0 : index
    %420 = vector.load %arg15[%c48, %c0_222] : memref<64x128xf32, #tpu.memory_space<vmem>>, vector<8x128xf32>
    %c0_223 = arith.constant 0 : index
    %c0_224 = arith.constant 0 : index
    %421 = vector.load %arg5[%c0_223, %c0_224] : memref<32x128xf32, #tpu.memory_space<vmem>>, vector<32x128xf32>
    %cst_225 = arith.constant dense<0.000000e+00> : vector<8x128xf32>
    %422 = tpu.matmul %418, %421, %cst_225 {dimension_numbers = #tpu.dot_dimension_numbers<[1], [0], [0], [1], [0, 0, 1, 1], [], []>} : vector<8x32xf32>, vector<32x128xf32>, vector<8x128xf32> -> vector<8x128xf32>
    %c0_226 = arith.constant 0 : index
    %c0_227 = arith.constant 0 : index
    %423 = vector.load %arg6[%c0_226, %c0_227] : memref<1x128xf32, #tpu.memory_space<vmem>>, vector<1x128xf32>
    %424 = vector.broadcast %423 : vector<1x128xf32> to vector<8x128xf32>
    %425 = arith.addf %422, %424 : vector<8x128xf32>
    %426 = vector.extract_strided_slice %420 {offsets = [0, 0], sizes = [8, 32], strides = [1, 1]} : vector<8x128xf32> to vector<8x32xf32>
    %427 = vector.extract_strided_slice %425 {offsets = [0, 0], sizes = [8, 32], strides = [1, 1]} : vector<8x128xf32> to vector<8x32xf32>
    %428 = arith.addf %426, %427 : vector<8x32xf32>
    %cst_228 = arith.constant 5.000000e-01 : f32
    %429 = vector.broadcast %cst_228 : f32 to vector<8x32xf32>
    %430 = arith.mulf %429, %428 : vector<8x32xf32>
    %431 = math.tanh %430 : vector<8x32xf32>
    %cst_229 = arith.constant 1.000000e+00 : f32
    %432 = vector.broadcast %cst_229 : f32 to vector<8x32xf32>
    %433 = arith.addf %431, %432 : vector<8x32xf32>
    %cst_230 = arith.constant 5.000000e-01 : f32
    %434 = vector.broadcast %cst_230 : f32 to vector<8x32xf32>
    %435 = arith.mulf %434, %433 : vector<8x32xf32>
    %436 = vector.extract_strided_slice %420 {offsets = [0, 32], sizes = [8, 32], strides = [1, 1]} : vector<8x128xf32> to vector<8x32xf32>
    %437 = vector.extract_strided_slice %425 {offsets = [0, 32], sizes = [8, 32], strides = [1, 1]} : vector<8x128xf32> to vector<8x32xf32>
    %438 = arith.addf %436, %437 : vector<8x32xf32>
    %cst_231 = arith.constant 5.000000e-01 : f32
    %439 = vector.broadcast %cst_231 : f32 to vector<8x32xf32>
    %440 = arith.mulf %439, %438 : vector<8x32xf32>
    %441 = math.tanh %440 : vector<8x32xf32>
    %cst_232 = arith.constant 1.000000e+00 : f32
    %442 = vector.broadcast %cst_232 : f32 to vector<8x32xf32>
    %443 = arith.addf %441, %442 : vector<8x32xf32>
    %cst_233 = arith.constant 5.000000e-01 : f32
    %444 = vector.broadcast %cst_233 : f32 to vector<8x32xf32>
    %445 = arith.mulf %444, %443 : vector<8x32xf32>
    %446 = vector.extract_strided_slice %420 {offsets = [0, 64], sizes = [8, 32], strides = [1, 1]} : vector<8x128xf32> to vector<8x32xf32>
    %447 = vector.extract_strided_slice %425 {offsets = [0, 64], sizes = [8, 32], strides = [1, 1]} : vector<8x128xf32> to vector<8x32xf32>
    %448 = arith.mulf %435, %447 : vector<8x32xf32>
    %449 = arith.addf %446, %448 : vector<8x32xf32>
    %450 = math.tanh %449 : vector<8x32xf32>
    %cst_234 = arith.constant 1.000000e+00 : f32
    %451 = vector.broadcast %cst_234 : f32 to vector<8x32xf32>
    %452 = arith.subf %451, %445 : vector<8x32xf32>
    %453 = arith.mulf %452, %450 : vector<8x32xf32>
    %454 = arith.mulf %445, %418 : vector<8x32xf32>
    %455 = arith.addf %453, %454 : vector<8x32xf32>
    %c0_235 = arith.constant 0 : index
    %c0_236 = arith.constant 0 : index
    %456 = vector.load %arg10[%c0_235, %c0_236] : memref<32x32xf32, #tpu.memory_space<vmem>>, vector<32x32xf32>
    %cst_237 = arith.constant dense<0.000000e+00> : vector<8x32xf32>
    %457 = tpu.matmul %455, %456, %cst_237 {dimension_numbers = #tpu.dot_dimension_numbers<[1], [0], [0], [1], [0, 0, 1, 1], [], []>} : vector<8x32xf32>, vector<32x32xf32>, vector<8x32xf32> -> vector<8x32xf32>
    %458 = vector.shape_cast %455 : vector<8x32xf32> to vector<8x1x32xf32>
    %c0_238 = arith.constant 0 : index
    %c0_239 = arith.constant 0 : index
    %c0_240 = arith.constant 0 : index
    %459 = vector.load %arg16[%c0_238, %c0_239, %c0_240] : memref<8x8x32xf32, #tpu.memory_space<vmem>>, vector<8x8x32xf32>
    %460 = vector.broadcast %458 : vector<8x1x32xf32> to vector<8x8x32xf32>
    %461 = arith.mulf %460, %459 : vector<8x8x32xf32>
    %cst_241 = arith.constant dense<0.000000e+00> : vector<8x8xf32>
    %462 = vector.multi_reduction <add>, %461, %cst_241 [2] : vector<8x8x32xf32> to vector<8x8xf32>
    %c0_242 = arith.constant 0 : index
    %c0_243 = arith.constant 0 : index
    %463 = vector.load %arg18[%c0_242, %c0_243] : memref<8x8xf32, #tpu.memory_space<vmem>>, vector<8x8xf32>
    %464 = arith.addf %462, %463 : vector<8x8xf32>
    %cst_244 = arith.constant dense<0xFF800000> : vector<8xf32>
    %465 = vector.multi_reduction <maximumf>, %464, %cst_244 [1] : vector<8x8xf32> to vector<8xf32>
    %466 = vector.shape_cast %465 : vector<8xf32> to vector<8x1xf32>
    %467 = vector.broadcast %466 : vector<8x1xf32> to vector<8x8xf32>
    %468 = arith.subf %464, %467 : vector<8x8xf32>
    %469 = math.exp %468 : vector<8x8xf32>
    %cst_245 = arith.constant dense<0.000000e+00> : vector<8xf32>
    %470 = vector.multi_reduction <add>, %469, %cst_245 [1] : vector<8x8xf32> to vector<8xf32>
    %471 = vector.shape_cast %470 : vector<8xf32> to vector<8x1xf32>
    %472 = tpu.reciprocal %471 {approx = true} : vector<8x1xf32> -> vector<8x1xf32>
    %473 = vector.broadcast %472 : vector<8x1xf32> to vector<8x8xf32>
    %474 = arith.mulf %469, %473 : vector<8x8xf32>
    %475 = vector.shape_cast %474 : vector<8x8xf32> to vector<8x8x1xf32>
    %c0_246 = arith.constant 0 : index
    %c0_247 = arith.constant 0 : index
    %c0_248 = arith.constant 0 : index
    %476 = vector.load %arg17[%c0_246, %c0_247, %c0_248] : memref<8x8x32xf32, #tpu.memory_space<vmem>>, vector<8x8x32xf32>
    %477 = vector.broadcast %475 : vector<8x8x1xf32> to vector<8x8x32xf32>
    %478 = arith.mulf %477, %476 : vector<8x8x32xf32>
    %cst_249 = arith.constant dense<0.000000e+00> : vector<8x32xf32>
    %479 = vector.multi_reduction <add>, %478, %cst_249 [1] : vector<8x8x32xf32> to vector<8x32xf32>
    %480 = arith.addf %479, %457 : vector<8x32xf32>
    %c0_250 = arith.constant 0 : index
    %c0_251 = arith.constant 0 : index
    %481 = vector.load %arg11[%c0_250, %c0_251] : memref<1x32xf32, #tpu.memory_space<vmem>>, vector<1x32xf32>
    %482 = vector.broadcast %481 : vector<1x32xf32> to vector<8x32xf32>
    %483 = arith.addf %480, %482 : vector<8x32xf32>
    %484 = math.tanh %483 : vector<8x32xf32>
    %c48_252 = arith.constant 48 : index
    %c0_253 = arith.constant 0 : index
    %485 = vector.load %arg19[%c48_252, %c0_253] : memref<64x32xf32, #tpu.memory_space<vmem>>, vector<8x32xf32>
    tpu.vector_store %arg19[%c48_252, %c0_253], %484 {strides = array<i32>} : memref<64x32xf32, #tpu.memory_space<vmem>>, vector<8x32xf32>,
    %c56 = arith.constant 56 : index
    %c0_254 = arith.constant 0 : index
    %486 = vector.load %arg15[%c56, %c0_254] : memref<64x128xf32, #tpu.memory_space<vmem>>, vector<8x128xf32>
    %c0_255 = arith.constant 0 : index
    %c0_256 = arith.constant 0 : index
    %487 = vector.load %arg5[%c0_255, %c0_256] : memref<32x128xf32, #tpu.memory_space<vmem>>, vector<32x128xf32>
    %cst_257 = arith.constant dense<0.000000e+00> : vector<8x128xf32>
    %488 = tpu.matmul %484, %487, %cst_257 {dimension_numbers = #tpu.dot_dimension_numbers<[1], [0], [0], [1], [0, 0, 1, 1], [], []>} : vector<8x32xf32>, vector<32x128xf32>, vector<8x128xf32> -> vector<8x128xf32>
    %c0_258 = arith.constant 0 : index
    %c0_259 = arith.constant 0 : index
    %489 = vector.load %arg6[%c0_258, %c0_259] : memref<1x128xf32, #tpu.memory_space<vmem>>, vector<1x128xf32>
    %490 = vector.broadcast %489 : vector<1x128xf32> to vector<8x128xf32>
    %491 = arith.addf %488, %490 : vector<8x128xf32>
    %492 = vector.extract_strided_slice %486 {offsets = [0, 0], sizes = [8, 32], strides = [1, 1]} : vector<8x128xf32> to vector<8x32xf32>
    %493 = vector.extract_strided_slice %491 {offsets = [0, 0], sizes = [8, 32], strides = [1, 1]} : vector<8x128xf32> to vector<8x32xf32>
    %494 = arith.addf %492, %493 : vector<8x32xf32>
    %cst_260 = arith.constant 5.000000e-01 : f32
    %495 = vector.broadcast %cst_260 : f32 to vector<8x32xf32>
    %496 = arith.mulf %495, %494 : vector<8x32xf32>
    %497 = math.tanh %496 : vector<8x32xf32>
    %cst_261 = arith.constant 1.000000e+00 : f32
    %498 = vector.broadcast %cst_261 : f32 to vector<8x32xf32>
    %499 = arith.addf %497, %498 : vector<8x32xf32>
    %cst_262 = arith.constant 5.000000e-01 : f32
    %500 = vector.broadcast %cst_262 : f32 to vector<8x32xf32>
    %501 = arith.mulf %500, %499 : vector<8x32xf32>
    %502 = vector.extract_strided_slice %486 {offsets = [0, 32], sizes = [8, 32], strides = [1, 1]} : vector<8x128xf32> to vector<8x32xf32>
    %503 = vector.extract_strided_slice %491 {offsets = [0, 32], sizes = [8, 32], strides = [1, 1]} : vector<8x128xf32> to vector<8x32xf32>
    %504 = arith.addf %502, %503 : vector<8x32xf32>
    %cst_263 = arith.constant 5.000000e-01 : f32
    %505 = vector.broadcast %cst_263 : f32 to vector<8x32xf32>
    %506 = arith.mulf %505, %504 : vector<8x32xf32>
    %507 = math.tanh %506 : vector<8x32xf32>
    %cst_264 = arith.constant 1.000000e+00 : f32
    %508 = vector.broadcast %cst_264 : f32 to vector<8x32xf32>
    %509 = arith.addf %507, %508 : vector<8x32xf32>
    %cst_265 = arith.constant 5.000000e-01 : f32
    %510 = vector.broadcast %cst_265 : f32 to vector<8x32xf32>
    %511 = arith.mulf %510, %509 : vector<8x32xf32>
    %512 = vector.extract_strided_slice %486 {offsets = [0, 64], sizes = [8, 32], strides = [1, 1]} : vector<8x128xf32> to vector<8x32xf32>
    %513 = vector.extract_strided_slice %491 {offsets = [0, 64], sizes = [8, 32], strides = [1, 1]} : vector<8x128xf32> to vector<8x32xf32>
    %514 = arith.mulf %501, %513 : vector<8x32xf32>
    %515 = arith.addf %512, %514 : vector<8x32xf32>
    %516 = math.tanh %515 : vector<8x32xf32>
    %cst_266 = arith.constant 1.000000e+00 : f32
    %517 = vector.broadcast %cst_266 : f32 to vector<8x32xf32>
    %518 = arith.subf %517, %511 : vector<8x32xf32>
    %519 = arith.mulf %518, %516 : vector<8x32xf32>
    %520 = arith.mulf %511, %484 : vector<8x32xf32>
    %521 = arith.addf %519, %520 : vector<8x32xf32>
    %c0_267 = arith.constant 0 : index
    %c0_268 = arith.constant 0 : index
    %522 = vector.load %arg10[%c0_267, %c0_268] : memref<32x32xf32, #tpu.memory_space<vmem>>, vector<32x32xf32>
    %cst_269 = arith.constant dense<0.000000e+00> : vector<8x32xf32>
    %523 = tpu.matmul %521, %522, %cst_269 {dimension_numbers = #tpu.dot_dimension_numbers<[1], [0], [0], [1], [0, 0, 1, 1], [], []>} : vector<8x32xf32>, vector<32x32xf32>, vector<8x32xf32> -> vector<8x32xf32>
    %524 = vector.shape_cast %521 : vector<8x32xf32> to vector<8x1x32xf32>
    %c0_270 = arith.constant 0 : index
    %c0_271 = arith.constant 0 : index
    %c0_272 = arith.constant 0 : index
    %525 = vector.load %arg16[%c0_270, %c0_271, %c0_272] : memref<8x8x32xf32, #tpu.memory_space<vmem>>, vector<8x8x32xf32>
    %526 = vector.broadcast %524 : vector<8x1x32xf32> to vector<8x8x32xf32>
    %527 = arith.mulf %526, %525 : vector<8x8x32xf32>
    %cst_273 = arith.constant dense<0.000000e+00> : vector<8x8xf32>
    %528 = vector.multi_reduction <add>, %527, %cst_273 [2] : vector<8x8x32xf32> to vector<8x8xf32>
    %c0_274 = arith.constant 0 : index
    %c0_275 = arith.constant 0 : index
    %529 = vector.load %arg18[%c0_274, %c0_275] : memref<8x8xf32, #tpu.memory_space<vmem>>, vector<8x8xf32>
    %530 = arith.addf %528, %529 : vector<8x8xf32>
    %cst_276 = arith.constant dense<0xFF800000> : vector<8xf32>
    %531 = vector.multi_reduction <maximumf>, %530, %cst_276 [1] : vector<8x8xf32> to vector<8xf32>
    %532 = vector.shape_cast %531 : vector<8xf32> to vector<8x1xf32>
    %533 = vector.broadcast %532 : vector<8x1xf32> to vector<8x8xf32>
    %534 = arith.subf %530, %533 : vector<8x8xf32>
    %535 = math.exp %534 : vector<8x8xf32>
    %cst_277 = arith.constant dense<0.000000e+00> : vector<8xf32>
    %536 = vector.multi_reduction <add>, %535, %cst_277 [1] : vector<8x8xf32> to vector<8xf32>
    %537 = vector.shape_cast %536 : vector<8xf32> to vector<8x1xf32>
    %538 = tpu.reciprocal %537 {approx = true} : vector<8x1xf32> -> vector<8x1xf32>
    %539 = vector.broadcast %538 : vector<8x1xf32> to vector<8x8xf32>
    %540 = arith.mulf %535, %539 : vector<8x8xf32>
    %541 = vector.shape_cast %540 : vector<8x8xf32> to vector<8x8x1xf32>
    %c0_278 = arith.constant 0 : index
    %c0_279 = arith.constant 0 : index
    %c0_280 = arith.constant 0 : index
    %542 = vector.load %arg17[%c0_278, %c0_279, %c0_280] : memref<8x8x32xf32, #tpu.memory_space<vmem>>, vector<8x8x32xf32>
    %543 = vector.broadcast %541 : vector<8x8x1xf32> to vector<8x8x32xf32>
    %544 = arith.mulf %543, %542 : vector<8x8x32xf32>
    %cst_281 = arith.constant dense<0.000000e+00> : vector<8x32xf32>
    %545 = vector.multi_reduction <add>, %544, %cst_281 [1] : vector<8x8x32xf32> to vector<8x32xf32>
    %546 = arith.addf %545, %523 : vector<8x32xf32>
    %c0_282 = arith.constant 0 : index
    %c0_283 = arith.constant 0 : index
    %547 = vector.load %arg11[%c0_282, %c0_283] : memref<1x32xf32, #tpu.memory_space<vmem>>, vector<1x32xf32>
    %548 = vector.broadcast %547 : vector<1x32xf32> to vector<8x32xf32>
    %549 = arith.addf %546, %548 : vector<8x32xf32>
    %550 = math.tanh %549 : vector<8x32xf32>
    %c56_284 = arith.constant 56 : index
    %c0_285 = arith.constant 0 : index
    %551 = vector.load %arg19[%c56_284, %c0_285] : memref<64x32xf32, #tpu.memory_space<vmem>>, vector<8x32xf32>
    tpu.vector_store %arg19[%c56_284, %c0_285], %550 {strides = array<i32>} : memref<64x32xf32, #tpu.memory_space<vmem>>, vector<8x32xf32>,
    %c0_286 = arith.constant 0 : index
    %c0_287 = arith.constant 0 : index
    %552 = vector.load %arg19[%c0_286, %c0_287] : memref<64x32xf32, #tpu.memory_space<vmem>>, vector<64x32xf32>
    %c0_288 = arith.constant 0 : index
    %c0_289 = arith.constant 0 : index
    %553 = vector.load %arg12[%c0_288, %c0_289] : memref<32x128xf32, #tpu.memory_space<vmem>>, vector<32x128xf32>
    %cst_290 = arith.constant dense<0.000000e+00> : vector<64x128xf32>
    %554 = tpu.matmul %552, %553, %cst_290 {dimension_numbers = #tpu.dot_dimension_numbers<[1], [0], [0], [1], [0, 0, 1, 1], [], []>} : vector<64x32xf32>, vector<32x128xf32>, vector<64x128xf32> -> vector<64x128xf32>
    %c0_291 = arith.constant 0 : index
    %c0_292 = arith.constant 0 : index
    %555 = vector.load %arg13[%c0_291, %c0_292] : memref<1x128xf32, #tpu.memory_space<vmem>>, vector<1x128xf32>
    %556 = vector.broadcast %555 : vector<1x128xf32> to vector<64x128xf32>
    %557 = arith.addf %554, %556 : vector<64x128xf32>
    %c0_293 = arith.constant 0 : index
    %c0_294 = arith.constant 0 : index
    %558 = vector.load %arg14[%c0_293, %c0_294] : memref<64x128xf32, #tpu.memory_space<vmem>>, vector<64x128xf32>
    tpu.vector_store %arg14[%c0_293, %c0_294], %557 {strides = array<i32>} : memref<64x128xf32, #tpu.memory_space<vmem>>, vector<64x128xf32>,
    return
  }
}

</mosaic_0001>

<bundles_post_ra>
// kernel: tpu_custom_call.1
= control target key start
LH: loop header
LB: loop body
LE: loop exit
PB: predicated region body
PF: predicated region fallthrough
CT: control target
= control target key end

     0   :  { %19 = vsyncpa [#allocation8], 0  ;;  %s11372_s0 = inlined_call_operand.vmem [shape: f32[64,16], index: 0, kind: input, shape index: {}]   ;;  %s11373_s1 = inlined_call_operand.hbm [shape: f32[8,32], index: 1, kind: input, shape index: {}]   ;;  %s11374_s2 = inlined_call_operand.vmem [shape: f32[8,8,32], index: 2, kind: input, shape index: {}]   ;;  %s11375_s3 = inlined_call_operand.hbm [shape: f32[16,128], index: 3, kind: input, shape index: {}]   ;;  %s11376_s4 = inlined_call_operand.hbm [shape: f32[1,128], index: 4, kind: input, shape index: {}]   ;;  %s11377_s5 = inlined_call_operand.hbm [shape: f32[32,128], index: 5, kind: input, shape index: {}]   ;;  %s11378_s6 = inlined_call_operand.hbm [shape: f32[1,128], index: 6, kind: input, shape index: {}]   ;;  %s11379_s7 = inlined_call_operand.hbm [shape: f32[32,32], index: 7, kind: input, shape index: {}]   ;;  %s11380_s8 = inlined_call_operand.hbm [shape: f32[1,32], index: 8, kind: input, shape index: {}]   ;;  %s11381_s9 = inlined_call_operand.vmem [shape: f32[32,32], index: 9, kind: input, shape index: {}]   ;;  %s11382_s10 = inlined_call_operand.hbm [shape: f32[32,32], index: 10, kind: input, shape index: {}]   ;;  %s11383_s11 = inlined_call_operand.vmem [shape: f32[1,32], index: 11, kind: input, shape index: {}]   ;;  %s11384_s12 = inlined_call_operand.hbm [shape: f32[32,128], index: 12, kind: input, shape index: {}]   ;;  %s11385_s13 = inlined_call_operand.vmem [shape: f32[1,128], index: 13, kind: input, shape index: {}]   ;;  %s11386_s14 = inlined_call_operand.hbm [shape: f32[64,128], index: 14, kind: output, shape index: {}]  }
   0x1   :  { %20 = vsyncpa [#allocation11], 0 }
   0x2   :  { %21 = vsyncpa [#allocation14], 0 }
   0x3   :  { %22 = vsyncpa [#allocation17], 0 }
   0x4   :  { %23 = vsyncpa [#allocation20], 0 }
   0x5   :  { %24 = vsyncpa [#allocation9], 0  ;;  %s9091_s29 = smov [#allocation10]  }
   0x6   :  { %s44_s30 = sshll.u32 %s9091_s29, 4  ;;  %s45_s30 = int_to_ptr.vmem [resolvable:$true] %s44_s30 }
   0x7   :  { %s8887_s15 = scalar_lea.vmem %s45_s30, 256  ;;  %p8892_p1 = scmp.lt.s32.totalorder %s45_s30, %s45_s30 }
   0x8   :  { %p8888_p0 = scmp.ne.s32.totalorder %s45_s30, %s8887_s15  ;;  %p8893_p2 = scmp.lt.s32.totalorder %s8887_s15, %s8887_s15 }
   0xa   :  { %p8894_p3 = por %p8893_p2, %p8892_p1 }
   0xc   :  { %p8895_p4 = pnand %p8894_p3, %p8888_p0 }
   0xe   :  { %8898 = shalt.err (!%p8895_p4)
}
   0xf   :  { %s9092_s16 = smov 128   ;;  %s9093_s17 = smov 8  }
  0x10   :  { %50 = dma.hbm_to_vmem [thread:$0]  %s11375_s3, 256, %s45_s30, [#allocation11], %s9092_s16, %s9092_s16, %s9093_s17  }
  0x11   :  { %s9094_s20 = smov [#allocation13]   ;;  %s9095_s22 = smov [#allocation16]  }
  0x12   :  { %s66_s21 = sshll.u32 %s9094_s20, 4  ;;  %s88_s23 = sshll.u32 %s9095_s22, 4  ;;  %s67_s21 = int_to_ptr.vmem [resolvable:$true] %s66_s21  ;;  %s89_s23 = int_to_ptr.vmem [resolvable:$true] %s88_s23 }
  0x13   :  { %s8907_s24 = scalar_lea.vmem %s67_s21, 512  ;;  %p8912_p6 = scmp.lt.s32.totalorder %s67_s21, %s67_s21 }
  0x14   :  { %p8908_p5 = scmp.ne.s32.totalorder %s67_s21, %s8907_s24  ;;  %p8913_p7 = scmp.lt.s32.totalorder %s8907_s24, %s8907_s24 }
  0x16   :  { %p8914_p8 = por %p8913_p7, %p8912_p6 }
  0x18   :  { %p8915_p9 = pnand %p8914_p8, %p8908_p5 }
  0x1a   :  { %8918 = shalt.err (!%p8915_p9)
}
  0x1b   :  { %72 = dma.hbm_to_vmem [thread:$0]  %s11377_s5, 512, %s67_s21, [#allocation14], %s9092_s16, %s9092_s16, %s9093_s17  }
  0x1c   :  { %s8927_s3 = scalar_lea.vmem %s89_s23, 512  ;;  %p8932_p11 = scmp.lt.s32.totalorder %s89_s23, %s89_s23 }
  0x1d   :  { %p8928_p10 = scmp.ne.s32.totalorder %s89_s23, %s8927_s3  ;;  %p8933_p12 = scmp.lt.s32.totalorder %s8927_s3, %s8927_s3 }
  0x1f   :  { %p8934_p13 = por %p8933_p12, %p8932_p11 }
  0x21   :  { %p8935_p0 = pnand %p8934_p13, %p8928_p10 }
  0x23   :  { %8938 = shalt.err (!%p8935_p0)
}
  0x24   :  { %94 = dma.hbm_to_vmem [thread:$0]  %s11379_s7, 512, %s89_s23, [#allocation17], %s9092_s16, %s9092_s16, %s9093_s17  }
  0x25   :  { %s9096_s29 = smov [#allocation19]   ;;  %s9097_s15 = smov [#allocation7]  }
  0x26   :  { %s112_s30 = sshll.u32 %s9096_s29, 4  ;;  %s33_s5 = sshll.u32 %s9097_s15, 4  ;;  %s113_s30 = int_to_ptr.vmem [resolvable:$true] %s112_s30  ;;  %s34_s5 = int_to_ptr.vmem [resolvable:$true] %s33_s5 }
  0x27   :  { %s8947_s18 = scalar_lea.vmem %s113_s30, 512  ;;  %p8952_p2 = scmp.lt.s32.totalorder %s113_s30, %s113_s30 }
  0x28   :  { %p8948_p1 = scmp.ne.s32.totalorder %s113_s30, %s8947_s18  ;;  %p8953_p3 = scmp.lt.s32.totalorder %s8947_s18, %s8947_s18 }
  0x2a   :  { %p8954_p4 = por %p8953_p3, %p8952_p2 }
  0x2c   :  { %p8955_p5 = pnand %p8954_p4, %p8948_p1 }
  0x2e   :  { %8958 = shalt.err (!%p8955_p5)
}
  0x2f   :  { %118 = dma.hbm_to_vmem [thread:$0]  %s11382_s10, 512, %s113_s30, [#allocation20], %s9092_s16, %s9092_s16, %s9093_s17  }
  0x30   :  { %s8967_s7 = scalar_lea.vmem %s34_s5, 128  ;;  %p8972_p7 = scmp.lt.s32.totalorder %s34_s5, %s34_s5 }
  0x31   :  { %p8968_p6 = scmp.ne.s32.totalorder %s34_s5, %s8967_s7  ;;  %p8973_p8 = scmp.lt.s32.totalorder %s8967_s7, %s8967_s7 }
  0x33   :  { %p8974_p9 = por %p8973_p8, %p8972_p7 }
  0x35   :  { %p8975_p10 = pnand %p8974_p9, %p8968_p6 }
  0x37   :  { %8978 = shalt.err (!%p8975_p10)
}
  0x38   :  { %36 = dma.hbm_to_vmem [thread:$0]  %s11373_s1, 128, %s34_s5, [#allocation8]  }
  0x39   :  { %s9098_s23 = smov [#allocation12]   ;;  %s9099_s25 = smov [#allocation15]  }
  0x3a   :  { %s57_s24 = sshll.u32 %s9098_s23, 4  ;;  %s79_s26 = sshll.u32 %s9099_s25, 4  ;;  %s58_s24 = int_to_ptr.vmem [resolvable:$true] %s57_s24  ;;  %s80_s26 = int_to_ptr.vmem [resolvable:$true] %s79_s26 }
  0x3b   :  { %s8987_s3 = scalar_lea.vmem %s58_s24, 16  ;;  %s8991_s10 = scalar_lea.vmem %s58_s24, 32 }
  0x3c   :  { %p8988_p11 = scmp.ne.s32.totalorder %s58_s24, %s8987_s3  ;;  %p8992_p12 = scmp.lt.s32.totalorder %s58_s24, %s58_s24 }
  0x3d   :  { %p8993_p13 = scmp.lt.s32.totalorder %s8991_s10, %s8987_s3 }
  0x3f   :  { %p8994_p0 = por %p8993_p13, %p8992_p12 }
  0x41   :  { %p8995_p1 = pnand %p8994_p0, %p8988_p11 }
  0x43   :  { %8998 = shalt.err (!%p8995_p1)
}
  0x44   :  { %60 = dma.hbm_to_vmem [thread:$0]  %s11376_s4, 16, %s58_s24, [#allocation11]  }
  0x45   :  { %s9007_s29 = scalar_lea.vmem %s80_s26, 16  ;;  %s9011_s1 = scalar_lea.vmem %s80_s26, 32 }
  0x46   :  { %p9008_p2 = scmp.ne.s32.totalorder %s80_s26, %s9007_s29  ;;  %p9012_p3 = scmp.lt.s32.totalorder %s80_s26, %s80_s26 }
  0x47   :  { %p9013_p4 = scmp.lt.s32.totalorder %s9011_s1, %s9007_s29 }
  0x49   :  { %p9014_p5 = por %p9013_p4, %p9012_p3 }
  0x4b   :  { %p9015_p6 = pnand %p9014_p5, %p9008_p2 }
  0x4d   :  { %9018 = shalt.err (!%p9015_p6)
}
  0x4e   :  { %82 = dma.hbm_to_vmem [thread:$0]  %s11378_s6, 16, %s80_s26, [#allocation14]  }
  0x4f   :  { %s9100_s5 = smov [#allocation18]   ;;  %s9101_s19 = smov [#allocation21]  }
  0x50   :  { %s101_s18 = sshll.u32 %s9100_s5, 4  ;;  %s126_s20 = sshll.u32 %s9101_s19, 4  ;;  %s102_s18 = int_to_ptr.vmem [resolvable:$true] %s101_s18  ;;  %s127_s20 = int_to_ptr.vmem [resolvable:$true] %s126_s20 }
  0x51   :  { %s9027_s7 = scalar_lea.vmem %s102_s18, 16  ;;  %s9031_s4 = scalar_lea.vmem %s102_s18, 32 }
  0x52   :  { %p9028_p7 = scmp.ne.s32.totalorder %s102_s18, %s9027_s7  ;;  %p9032_p8 = scmp.lt.s32.totalorder %s102_s18, %s102_s18 }
  0x53   :  { %p9033_p9 = scmp.lt.s32.totalorder %s9031_s4, %s9027_s7 }
  0x55   :  { %p9034_p10 = por %p9033_p9, %p9032_p8 }
  0x57   :  { %p9035_p11 = pnand %p9034_p10, %p9028_p7 }
  0x59   :  { %9038 = shalt.err (!%p9035_p11)
}
  0x5a   :  { %104 = dma.hbm_to_vmem [thread:$0]  %s11380_s8, 16, %s102_s18, [#allocation17]  }
  0x5b   :  { %s9047_s23 = scalar_lea.vmem %s127_s20, 512  ;;  %p9052_p13 = scmp.lt.s32.totalorder %s127_s20, %s127_s20 }
  0x5c   :  { %p9048_p12 = scmp.ne.s32.totalorder %s127_s20, %s9047_s23  ;;  %p9053_p0 = scmp.lt.s32.totalorder %s9047_s23, %s9047_s23 }
  0x5e   :  { %p9054_p1 = por %p9053_p0, %p9052_p13 }
  0x60   :  { %p9055_p2 = pnand %p9054_p1, %p9048_p12 }
  0x62   :  { %9058 = shalt.err (!%p9055_p2)
}
  0x63   :  { %132 = dma.hbm_to_vmem [thread:$0]  %s11384_s12, 512, %s127_s20, [#allocation20], %s9092_s16, %s9092_s16, %s9093_s17  }
  0x64   :  { %9079 = dma.done.wait [#allocation8], 128  }
  0x65   :  { %9080 = vsyncadd [#allocation8], 4294967168 }
  0x66   :  { %9081 = dma.done.wait [#allocation11], 272  }
  0x67   :  { %9082 = vsyncadd [#allocation11], 4294967024 }
  0x68   :  { %9083 = dma.done.wait [#allocation14], 528  }
  0x69   :  { %9084 = vsyncadd [#allocation14], 4294966768 }
  0x6a   :  { %9085 = dma.done.wait [#allocation17], 528  }
  0x6b   :  { %9086 = vsyncadd [#allocation17], 4294966768 }
  0x6c   :  { %9087 = dma.done.wait [#allocation20], 1024  }
  0x6d   :  { %9088 = vsyncadd [#allocation20], 4294966272  ;;  %vm179_vm0 = vcmask 130048   ;;  %v171_v0 = vld [vmem:[#allocation10 + $0x8] sm:$0xff]  ;;  %v170_v1 = vld [vmem:[#allocation10] sm:$0xff]  ;;  %vm329_vm1 = vcmask 261120  }
  0x6e   :  { %v166_v2 = vld [vmem:[%s11372_s0 + $0x20] sm:$0xff]  ;;  %8546 = vmatprep.subr.mxu1 %v171_v0  ;;  %v167_v3 = vld [vmem:[%s11372_s0 + $0x28] sm:$0xff]  ;;  %8294 = vmatprep.subr.mxu0 %v171_v0  ;;  %v168_v5 = vld [vmem:[%s11372_s0 + $0x30] sm:$0xff]  ;;  %s9102_s21 = smov 32   ;;  %v11387_v17 = vmov 0.0   ;;  %vm9104_vm2 = vmmov 0  }
  0x6f   :  { %8304 = vmatprep.mubr.msk.f32.mxu1 %vm179_vm0, %v166_v2  ;;  %8548 = vmatpush3.msra.mxu1 %v171_v0  ;;  %v328_v4 = vld [vmem:[#allocation16 + $0x18] sm:$0xff]  ;;  %v327_v6 = vld [vmem:[#allocation16 + $0x10] sm:$0xff]  ;;  %v326_v8 = vld [vmem:[#allocation16 + $0x8] sm:$0xff]  ;;  %s9106_s27 = smov 96   ;;  %vm548_vm3 = vcmask 1041409   ;;  %vm550_vm4 = vcmask 1042434  }
  0x70   :  { %8547 = vmatprep.subr.mxu1 %v170_v1  ;;  %8295 = vmatpush3.msra.mxu0 %v171_v0  ;;  %v169_v7 = vld [vmem:[%s11372_s0 + $0x38] sm:$0xff]  ;;  %v9245_v9 = vld [vmem:[%s11374_s2] sm:$0xff]  ;;  %v163_v12 = vld [vmem:[%s11372_s0 + $0x8] sm:$0xff]  ;;  %vm552_vm5 = vcmask 1043459   ;;  %vm554_vm6 = vcmask 1044484   ;;  %vm556_vm7 = vcmask 1045509  }
  0x71   :  { %8549 = vmatpush3.msra.mxu1 %v170_v1  ;;  %8296 = vmatprep.subr.mxu0 %v170_v1  ;;  %v162_v10 = vld [vmem:[%s11372_s0] sm:$0xff]  ;;  %v9260_v13 = vld [vmem:[%s11374_s2 + $0x8] sm:$0xff]  ;;  %v9265_v15 = vld [vmem:[%s11374_s2 + $0x10] sm:$0xff]  ;;  %vm558_vm8 = vcmask 1046534   ;;  %vm560_vm9 = vcmask 1047559   ;;  %vm563_vm10 = vcmask 64512  }
  0x72   :  { %8305 = vmatmul.mubr.msk.f32.vlgmr.msra.gmra.mxu1 %vm179_vm0, %v167_v3  ;;  %8310 = vmatprep.subr.mxu1 %v328_v4  ;;  %v325_v11 = vld [vmem:[#allocation16] sm:$0xff]  ;;  %v687_v14 = vld [vmem:[#allocation13 + $0x18] sm:$0xff]  ;;  %v686_v18 = vld [vmem:[#allocation13 + $0x10] sm:$0xff] }
  0x73   :  { %8311 = vmatpush3.msra.mxu1 %v328_v4  ;;  %8307 = vmatprep.mubr.msk.f32.mxu1 %vm179_vm0, %v168_v5  ;;  %v682_v16 = vld [vmem:[#allocation7] sm:$0xff]  ;;  %v9277_v19 = vld [vmem:[%s11374_s2 + $0x18] sm:$0xff]  ;;  %v9283_v20 = vld [vmem:[%s11374_s2 + $0x20] sm:$0xff] }
  0x74   :  { %8312 = vmatprep.subr.mxu1 %v327_v6  ;;  %8297 = vmatpush3.msra.mxu0 %v170_v1  ;;  %v685_v21 = vld [vmem:[#allocation13 + $0x8] sm:$0xff]  ;;  %v684_v22 = vld [vmem:[#allocation13] sm:$0xff]  ;;  %v9309_v25 = vld [vmem:[%s11374_s2 + $0x38] sm:$0xff] }
  0x75   :  { %8313 = vmatpush3.msra.mxu1 %v327_v6  ;;  %8298 = vmatprep.mubr.msk.f32.mxu0 %vm179_vm0, %v162_v10  ;;  %v9293_v23 = vld [vmem:[%s11374_s2 + $0x28] sm:$0xff]  ;;  %v9298_v24 = vld [vmem:[%s11374_s2 + $0x30] sm:$0xff]  ;;  %v8127_v40 = vld [vmem:[#allocation15] ss:$0 sm:$0xff]  ;;  %s9105_s2 = smov 64  }
  0x76   :  { %8308 = vmatmul.mubr.msk.f32.gmra.mxu1 %vm179_vm0, %v169_v7  ;;  %8314 = vmatprep.subr.mxu1 %v326_v8  ;;  %v8118_v46 = vld [vmem:[#allocation18] ss:$0 sm:$0xff]  ;;  %v8101_v51 = vld [vmem:[#allocation12] ss:$0 sm:$0xff] }
  0x77   :  { %8315 = vmatpush3.msra.mxu1 %v326_v8  ;;  %8318 = vmatprep.mubr.msk.f32.mxu1 %vm329_vm1, %v9245_v9  ;;  %v475_v47 = vmul.f32 %v8118_v46, %v9260_v13  ;;  %v474_v0 = vmul.f32 %v8118_v46, %v9245_v9  ;;  %v476_v2 = vmul.f32 %v8118_v46, %v9265_v15 }
  0x78   :  { %8316 = vmatprep.subr.mxu1 %v325_v11  ;;  %8299 = vmatmul.mubr.msk.f32.vlgmr.msra.gmra.mxu0 %vm179_vm0, %v163_v12  ;;  %v477_v4 = vmul.f32 %v8118_v46, %v9277_v19  ;;  %v479_v6 = vmul.f32 %v8118_v46, %v9293_v23  ;;  %v481_v8 = vmul.f32 %v8118_v46, %v9309_v25 }
  0x79   :  { %8317 = vmatpush3.msra.mxu1 %v325_v11  ;;  %790 = vrot.lane.b32.xlu1 %v682_v16, %s9102_s21  ;;  %v485_v48 = vsel %vm329_vm1, %v475_v47, 0.0  ;;  %v482_v1 = vsel %vm329_vm1, %v474_v0, 0.0  ;;  %v488_v3 = vsel %vm329_vm1, %v476_v2, 0.0 }
  0x7a   :  { %8319 = vmatmul.mubr.msk.f32.vlgmr.msra.gmra.mxu1 %vm329_vm1, %v9260_v13  ;;  %8350 = vmatprep.subr.mxu1 %v11387_v17  ;;  %v491_v5 = vsel %vm329_vm1, %v477_v4, 0.0  ;;  %v497_v7 = vsel %vm329_vm1, %v479_v6, 0.0  ;;  %v503_v10 = vsel %vm329_vm1, %v481_v8, 0.0 }
  0x7b   :  { %8351 = vmatpush3.msra.mxu1 %v687_v14  ;;  %8321 = vmatprep.mubr.msk.f32.mxu1 %vm329_vm1, %v9265_v15 }
  0x7c   :  { %8352 = vmatprep.subr.mxu1 %v11387_v17 }
  0x7d   :  { %8353 = vmatpush3.msra.mxu1 %v686_v18 }
  0x7e   :  { %8322 = vmatmul.mubr.msk.f32.gmra.mxu1 %vm329_vm1, %v9277_v19  ;;  %8354 = vmatprep.subr.mxu1 %v11387_v17 }
  0x7f   :  { %8324 = vmatprep.mubr.msk.f32.mxu1 %vm329_vm1, %v9283_v20  ;;  %8355 = vmatpush3.msra.mxu1 %v685_v21  ;;  %v480_v21 = vmul.f32 %v8118_v46, %v9298_v24 }
  0x80   :  { %8356 = vmatprep.subr.mxu1 %v11387_v17 }
  0x81   :  { %8357 = vmatpush3.msra.mxu1 %v684_v22  ;;  %v500_v22 = vsel %vm329_vm1, %v480_v21, 0.0 }
  0x82   :  { %8325 = vmatmul.mubr.msk.f32.gmra.mxu1 %vm329_vm1, %v9293_v23  ;;  %8361 = vmatprep.subr.mxu1 %v11387_v17 }
  0x83   :  { %8327 = vmatprep.mubr.msk.f32.mxu1 %vm329_vm1, %v9298_v24 }
  0x86   :  { %8328 = vmatmul.mubr.msk.f32.gmra.mxu1 %vm329_vm1, %v9309_v25 }
  0x87   :  { %8358 = vmatprep.mubr.msk.f32.mxu1 %vm9104_vm2, %v11387_v17 }
  0x8a   :  { %8359 = vmatmul.mubr.msk.f32.vlgmr.msra.gmra.mxu1 %vm329_vm1, %v682_v16  ;;  %v478_v16 = vmul.f32 %v8118_v46, %v9283_v20 }
  0x8b   :  { %8369 = vmatprep.mubr.msk.f32.mxu1 %vm9104_vm2, %v11387_v17 }
  0x8c   :  { %v494_v18 = vsel %vm329_vm1, %v478_v16, 0.0 }
 0x132   :  { %v9318_v26 = vpop.f32.mrf.mxu1 }
 0x133   :  { %11389 = vst [vmem:[#allocation29_spill] sm:$0xff] %v9318_v26 }
 0x134   :  { %v9320_v27 = vpop.f32.mrf.mxu1 }
 0x135   :  { %11390 = vst [vmem:[#allocation30_spill] sm:$0xff] %v9320_v27 }
 0x136   :  { %v9322_v28 = vpop.f32.mrf.mxu1 }
 0x137   :  { %11391 = vst [vmem:[#allocation31_spill] sm:$0xff] %v9322_v28 }
 0x138   :  { %v9324_v29 = vpop.f32.mrf.mxu1  ;;  %v9341_v49 = vpop.f32.mrf.mxu0 }
 0x139   :  { %11392 = vst [vmem:[#allocation32_spill] sm:$0xff] %v9324_v29 }
 0x13a   :  { %v8320_v30 = vpop.f32.mrf.mxu1  ;;  %v270_v50 = vpop.f32.mrf.mxu0 }
 0x13b   :  { %460 = vst.msk [vmem:[#allocation3 + $0x8] sm:$0xff] %vm329_vm1, %v8320_v30  ;;  %v271_v52 = vadd.f32 %v8101_v51, %v270_v50  ;;  %v9107_v50 = vmov 1966171168  }
 0x13c   :  { %v420_v31 = vpop.f32.mrf.mxu1  ;;  %v876_v51 = vunpack.c.l.s4 %v9107_v50 }
 0x13d   :  { %459 = vst.msk [vmem:[#allocation3] sm:$0xff] %vm329_vm1, %v420_v31  ;;  %v791_v31 = vpop.permute.xlu1 %790 }
 0x13e   :  { %v8323_v32 = vpop.f32.mrf.mxu1 }
 0x13f   :  { %462 = vst.msk [vmem:[#allocation3 + $0x18] sm:$0xff] %vm329_vm1, %v8323_v32 }
 0x140   :  { %v430_v33 = vpop.f32.mrf.mxu1 }
 0x141   :  { %461 = vst.msk [vmem:[#allocation3 + $0x10] sm:$0xff] %vm329_vm1, %v430_v33 }
 0x142   :  { %v8326_v34 = vpop.f32.mrf.mxu1  ;;  %v924_v35 = vld [vmem:[#allocation3 + $0x8] sm:$0xff] }
 0x143   :  { %464 = vst.msk [vmem:[#allocation3 + $0x28] sm:$0xff] %vm329_vm1, %v8326_v34  ;;  %981 = vrot.lane.b32.xlu1 %v924_v35, %s9102_s21 }
 0x144   :  { %v440_v36 = vpop.f32.mrf.mxu1  ;;  %v923_v60 = vld [vmem:[#allocation3] sm:$0xff] }
 0x145   :  { %463 = vst.msk [vmem:[#allocation3 + $0x20] sm:$0xff] %vm329_vm1, %v440_v36 }
 0x146   :  { %v8329_v37 = vpop.f32.mrf.mxu1  ;;  %v926_v38 = vld [vmem:[#allocation3 + $0x18] sm:$0xff] }
 0x147   :  { %466 = vst.msk [vmem:[#allocation3 + $0x38] sm:$0xff] %vm329_vm1, %v8329_v37  ;;  %985 = vrot.lane.b32.xlu1 %v926_v38, %s9102_s21 }
 0x148   :  { %v450_v39 = vpop.f32.mrf.mxu1  ;;  %v925_v61 = vld [vmem:[#allocation3 + $0x10] sm:$0xff] }
 0x149   :  { %465 = vst.msk [vmem:[#allocation3 + $0x30] sm:$0xff] %vm329_vm1, %v450_v39  ;;  %v514_v39 = vlaneseq }
 0x14a   :  { %v764_v41 = vpop.f32.mrf.mxu1  ;;  %v928_v42 = vld [vmem:[#allocation3 + $0x28] sm:$0xff] }
 0x14b   :  { %v765_v43 = vadd.f32 %v8127_v40, %v764_v41  ;;  %989 = vrot.lane.b32.xlu1 %v928_v42, %s9102_s21  ;;  %v515_v41 = vand.u32 127, %v514_v39 }
 0x14c   :  { %v8360_v44 = vpop.f32.mrf.mxu1  ;;  %v927_v62 = vld [vmem:[#allocation3 + $0x20] sm:$0xff] }
 0x14d   :  { %774 = vrot.lane.b32.xlu0 %v765_v43, %s9105_s2  ;;  %v768_v53 = vadd.f32 %v765_v43, %v271_v52  ;;  %v9382_v43 = vshrl.u32 %v514_v39, 7 }
 0x14e   :  { %v930_v45 = vld [vmem:[#allocation3 + $0x38] sm:$0xff] }
 0x14f   :  { %993 = vrot.lane.b32.xlu1 %v930_v45, %s9102_s21  ;;  %v769_v54 = vmul.f32 0.5, %v768_v53  ;;  %v9385_v44 = vsub.s32 %v515_v41, %v9382_v43  ;;  %v9415_v21 = vsub.s32 0, %v9382_v43 }
 0x150   :  { %v929_v63 = vld [vmem:[#allocation3 + $0x30] sm:$0xff] }
 0x151   :  { %8571 = vtanh.f32 %v769_v54 }
 0x15e   :  { %v8572_v55 = vpop.eup %8571 }
 0x15f   :  { %v771_v56 = vadd.f32 1.0, %v8572_v55 }
 0x161   :  { %v9343_v57 = vmul.f32 0.5, %v771_v56 }
 0x163   :  { %v784_v53 = vsub.f32 1.0, %v9343_v57 }
 0x173   :  { %486 = vadd.xlane.f32.xlu1 %v485_v48 }
 0x1b5   :  { %v9370_v33 = vpop.permute.xlu1 %981 }
 0x1b9   :  { %v9374_v35 = vpop.permute.xlu1 %985 }
 0x1bd   :  { %v9378_v37 = vpop.permute.xlu1 %989 }
 0x1bf   :  { %v775_v58 = vpop.permute.xlu0 %774 }
 0x1c0   :  { %v777_v59 = vmul.f32 %v775_v58, %v9343_v57  ;;  %v877_v58 = vunpack.c.0.s8 %v876_v51 }
 0x1c1   :  { %v9380_v40 = vpop.permute.xlu1 %993 }
 0x1c2   :  { %779 = vrot.lane.b32.xlu0 %v777_v59, %s9105_s2  ;;  %v9396_v0 = vsub.s32 %v877_v58, %v9382_v43 }
 0x1c6   :  { %979 = vrot.lane.b32.xlu0 %v923_v60, %s9102_s21 }
 0x1ca   :  { %983 = vrot.lane.b32.xlu0 %v925_v61, %s9102_s21  ;;  %v793_v61 = vmul.f32 %v791_v31, %v9343_v57 }
 0x1ce   :  { %987 = vrot.lane.b32.xlu0 %v927_v62, %s9102_s21 }
 0x1d2   :  { %991 = vrot.lane.b32.xlu0 %v929_v63, %s9102_s21 }
 0x1f1   :  { %483 = vadd.xlane.f32.xlu0 %v482_v1 }
 0x1f5   :  { %489 = vadd.xlane.f32.xlu0 %v488_v3 }
 0x1f9   :  { %492 = vadd.xlane.f32.xlu0 %v491_v5 }
 0x1fc   :  { %v487_v45 = vpop.xlane.xlu1 %486 }
 0x1fd   :  { %498 = vadd.xlane.f32.xlu0 %v497_v7  ;;  %v523_v47 = vrot.slane %v487_v45, %v9385_v44 }
 0x201   :  { %504 = vadd.xlane.f32.xlu0 %v503_v10 }
 0x234   :  { %v780_v11 = vpop.permute.xlu0 %779 }
 0x235   :  { %v782_v12 = vadd.f32 %v780_v11, %v271_v52 }
 0x237   :  { %8573 = vtanh.f32 %v782_v12 }
 0x238   :  { %v9366_v30 = vpop.permute.xlu0 %979 }
 0x23c   :  { %v9368_v32 = vpop.permute.xlu0 %983 }
 0x240   :  { %v9372_v34 = vpop.permute.xlu0 %987 }
 0x244   :  { %v8574_v14 = vpop.eup %8573  ;;  %v9376_v36 = vpop.permute.xlu0 %991 }
 0x245   :  { %786 = vrot.lane.b32.xlu1 %v8574_v14, %s9106_s27 }
 0x269   :  { %495 = vadd.xlane.f32.xlu1 %v494_v18 }
 0x26d   :  { %501 = vadd.xlane.f32.xlu1 %v500_v22 }
 0x27a   :  { %v484_v38 = vpop.xlane.xlu0 %483 }
 0x27b   :  { %v519_v48 = vrot.slane %v484_v38, %v9385_v44  ;;  %v9420_v38 = vsub.s32 1, %v9382_v43 }
 0x27d   :  { %v549_v56 = vsel %vm548_vm3, %v523_v47, %v519_v48 }
 0x27e   :  { %v490_v42 = vpop.xlane.xlu0 %489 }
 0x27f   :  { %v527_v54 = vrot.slane %v490_v42, %v9385_v44 }
 0x281   :  { %v551_v62 = vsel %vm550_vm4, %v527_v54, %v549_v56 }
 0x282   :  { %v493_v46 = vpop.xlane.xlu0 %492 }
 0x283   :  { %v531_v60 = vrot.slane %v493_v46, %v9385_v44 }
 0x285   :  { %v553_v4 = vsel %vm552_vm5, %v531_v60, %v551_v62 }
 0x286   :  { %v499_v55 = vpop.xlane.xlu0 %498 }
 0x287   :  { %v539_v5 = vrot.slane %v499_v55, %v9385_v44 }
 0x28a   :  { %v505_v3 = vpop.xlane.xlu0 %504 }
 0x28b   :  { %v547_v7 = vrot.slane %v505_v3, %v9385_v44 }
 0x2b7   :  { %v787_v52 = vpop.permute.xlu1 %786 }
 0x2b8   :  { %v789_v59 = vmul.f32 %v787_v52, %v784_v53 }
 0x2ba   :  { %v9398_v1 = vadd.f32 %v793_v61, %v789_v59 }
 0x2bc   :  { %v881_v8 = vrot.slane %v9398_v1, %v9396_v0  ;;  %v874_v14 = vcombine.high %v9398_v1, %v9398_v1 }
 0x2be   :  { %v889_v18 = vcombine.high %v881_v8, %v881_v8  ;;  %v897_v22 = vrot.slane %v881_v8, %v9396_v0  ;;  %v888_v31 = vrot.slane %v874_v14, %v9396_v0 }
 0x2c0   :  { %v911_v39 = vrot.slane %v889_v18, %v9396_v0  ;;  %v934_v42 = vrot.slane %v897_v22, %v9415_v21  ;;  %v904_v45 = vrot.slane %v888_v31, %v9396_v0  ;;  %v919_v50 = vcombine.high %v897_v22, %v897_v22 }
 0x2c1   :  { %v890_v53 = vcombine.high %v888_v31, %v888_v31 }
 0x2c2   :  { %v938_v48 = vrot.slane %v911_v39, %v9415_v21  ;;  %v1003_v51 = vmul.f32 %v9366_v30, %v934_v42  ;;  %v950_v52 = vrot.slane %v904_v45, %v9415_v21  ;;  %v942_v55 = vrot.slane %v919_v50, %v9415_v21 }
 0x2c3   :  { %v920_v56 = vcombine.high %v904_v45, %v904_v45  ;;  %v921_v58 = vcombine.high %v911_v39, %v911_v39  ;;  %v918_v59 = vrot.slane %v890_v53, %v9396_v0  ;;  %v9108_v53 = vmov 0  }
 0x2c4   :  { %v1004_v54 = vmul.f32 %v9370_v33, %v938_v48  ;;  %v1007_v60 = vmul.f32 %v9372_v34, %v950_v52  ;;  %v1005_v61 = vmul.f32 %v9368_v32, %v942_v55  ;;  %v9452_v33 = vsub.s32 4, %v9382_v43  ;;  %8570 = vset.pattern.permute.xlu1 %v9108_v53  ;;  %8569 = vset.pattern.permute.xlu0 %v9108_v53 }
 0x2c5   :  { %v958_v30 = vrot.slane %v920_v56, %v9415_v21  ;;  %v946_v62 = vrot.slane %v921_v58, %v9415_v21  ;;  %v954_v3 = vrot.slane %v918_v59, %v9415_v21  ;;  %v922_v34 = vcombine.high %v918_v59, %v918_v59 }
 0x2c6   :  { %v9502_v56 = vsub.s32 7, %v9382_v43  ;;  %v9510_v59 = vsub.s32 6, %v9382_v43 }
 0x2f2   :  { %v496_v63 = vpop.xlane.xlu1 %495 }
 0x2f3   :  { %v535_v2 = vrot.slane %v496_v63, %v9385_v44  ;;  %v1009_v63 = vmul.f32 %v9376_v36, %v958_v30  ;;  %v9469_v36 = vsub.s32 2, %v9382_v43 }
 0x2f5   :  { %v555_v6 = vsel %vm554_vm6, %v535_v2, %v553_v4  ;;  %v1006_v2 = vmul.f32 %v9374_v35, %v946_v62  ;;  %v1008_v4 = vmul.f32 %v9378_v37, %v954_v3 }
 0x2f6   :  { %v502_v57 = vpop.xlane.xlu1 %501  ;;  %v557_v11 = vsel %vm556_vm7, %v539_v5, %v555_v6  ;;  %v962_v5 = vrot.slane %v922_v34, %v9415_v21 }
 0x2f7   :  { %v543_v10 = vrot.slane %v502_v57, %v9385_v44  ;;  %v9477_v57 = vsub.s32 3, %v9382_v43 }
 0x2f8   :  { %v1010_v35 = vmul.f32 %v9380_v40, %v962_v5  ;;  %v9485_v40 = vsub.s32 5, %v9382_v43 }
 0x2f9   :  { %v559_v12 = vsel %vm558_vm8, %v543_v10, %v557_v11 }
 0x2fa   :  { %v561_v16 = vsel %vm560_vm9, %v547_v7, %v559_v12 }
 0x2fb   :  { %564 = vst.msk [vmem:[#allocation5] sm:$0xff] %vm563_vm10, %v561_v16 }
 0x302   :  { %v9423_v41 = vld [vmem:[#allocation5] sm:$0xff] }
 0x303   :  { %v9429_v46 = vrot.slane %v9423_v41, %v9420_v38  ;;  %v9433_v47 = vrot.slane %v9423_v41, %v9415_v21  ;;  %v9461_v32 = vrot.slane %v9423_v41, %v9452_v33  ;;  %v9474_v6 = vrot.slane %v9423_v41, %v9469_v36 }
 0x304   :  { %v9482_v37 = vrot.slane %v9423_v41, %v9477_v57  ;;  %v9490_v7 = vrot.slane %v9423_v41, %v9485_v40  ;;  %v9506_v58 = vrot.slane %v9423_v41, %v9502_v56 }
 0x305   :  { %1081 = vbcast.lane.b32.xlu0 %v9429_v46, 256  ;;  %1074 = vbcast.lane.b32.xlu1 %v9433_v47, 256 }
 0x309   :  { %1021 = vrot.lane.b32.xlu0 %v1004_v54, %s9106_s27  ;;  %1019 = vrot.lane.b32.xlu1 %v1003_v51, %s9106_s27 }
 0x30d   :  { %1027 = vrot.lane.b32.xlu0 %v1007_v60, %s9106_s27  ;;  %1023 = vrot.lane.b32.xlu1 %v1005_v61, %s9106_s27  ;;  %v9514_v60 = vrot.slane %v9423_v41, %v9510_v59 }
 0x311   :  { %1031 = vrot.lane.b32.xlu0 %v1009_v63, %s9106_s27  ;;  %1025 = vrot.lane.b32.xlu1 %v1006_v2, %s9106_s27 }
 0x315   :  { %1102 = vbcast.lane.b32.xlu0 %v9461_v32, 256  ;;  %1029 = vrot.lane.b32.xlu1 %v1008_v4, %s9106_s27 }
 0x319   :  { %1033 = vrot.lane.b32.xlu1 %v1010_v35, %s9106_s27 }
 0x31d   :  { %1088 = vbcast.lane.b32.xlu1 %v9474_v6, 256 }
 0x321   :  { %1095 = vbcast.lane.b32.xlu1 %v9482_v37, 256 }
 0x325   :  { %1109 = vbcast.lane.b32.xlu1 %v9490_v7, 256 }
 0x377   :  { %v1082_v8 = vpop.permute.xlu0 %1081  ;;  %v1075_v10 = vpop.permute.xlu1 %1074 }
 0x37b   :  { %v1022_v11 = vpop.permute.xlu0 %1021  ;;  %v1020_v12 = vpop.permute.xlu1 %1019 }
 0x37c   :  { %v1046_v14 = vsel %vm329_vm1, %v1022_v11, 0.0  ;;  %v1043_v16 = vsel %vm329_vm1, %v1020_v12, 0.0 }
 0x37d   :  { %1047 = vadd.xlane.f32.xlu1 %v1046_v14  ;;  %1044 = vadd.xlane.f32.xlu0 %v1043_v16 }
 0x37f   :  { %v1028_v18 = vpop.permute.xlu0 %1027  ;;  %v1024_v22 = vpop.permute.xlu1 %1023 }
 0x380   :  { %v1055_v31 = vsel %vm329_vm1, %v1028_v18, 0.0  ;;  %v1049_v39 = vsel %vm329_vm1, %v1024_v22, 0.0  ;;  %v796_v22 = vld [vmem:[#allocation19 + $0x8] sm:$0xff] }
 0x381   :  { %1056 = vadd.xlane.f32.xlu1 %v1055_v31  ;;  %1050 = vadd.xlane.f32.xlu0 %v1049_v39  ;;  %v795_v31 = vld [vmem:[#allocation19] sm:$0xff] }
 0x383   :  { %v1032_v42 = vpop.permute.xlu0 %1031  ;;  %v1026_v45 = vpop.permute.xlu1 %1025 }
 0x384   :  { %v1061_v48 = vsel %vm329_vm1, %v1032_v42, 0.0  ;;  %v1052_v50 = vsel %vm329_vm1, %v1026_v45, 0.0 }
 0x385   :  { %1062 = vadd.xlane.f32.xlu1 %v1061_v48  ;;  %1053 = vadd.xlane.f32.xlu0 %v1052_v50 }
 0x387   :  { %v1030_v51 = vpop.permute.xlu1 %1029  ;;  %v1103_v62 = vpop.permute.xlu0 %1102 }
 0x388   :  { %v1058_v52 = vsel %vm329_vm1, %v1030_v51, 0.0 }
 0x389   :  { %1059 = vadd.xlane.f32.xlu0 %v1058_v52 }
 0x38b   :  { %v1034_v54 = vpop.permute.xlu1 %1033 }
 0x38c   :  { %v1064_v55 = vsel %vm329_vm1, %v1034_v54, 0.0 }
 0x38d   :  { %1065 = vadd.xlane.f32.xlu0 %v1064_v55 }
 0x38f   :  { %v1089_v61 = vpop.permute.xlu1 %1088 }
 0x393   :  { %v1096_v30 = vpop.permute.xlu1 %1095 }
 0x396   :  { %1123 = vbcast.lane.b32.xlu1 %v9506_v58, 256 }
 0x397   :  { %v1110_v63 = vpop.permute.xlu1 %1109 }
 0x3a3   :  { %1116 = vbcast.lane.b32.xlu0 %v9514_v60, 256 }
 0x406   :  { %v1045_v2 = vpop.xlane.xlu0 %1044  ;;  %v1048_v3 = vpop.xlane.xlu1 %1047 }
 0x407   :  { %v9517_v34 = vadd.f32 %v1075_v10, %v1045_v2  ;;  %v9519_v4 = vadd.f32 %v1082_v8, %v1048_v3  ;;  %v798_v8 = vld [vmem:[#allocation19 + $0x18] sm:$0xff]  ;;  %v797_v10 = vld [vmem:[#allocation19 + $0x10] sm:$0xff] }
 0x408   :  { %8362 = vmatpush3.msra.mxu1 %v798_v8 }
 0x409   :  { %1150 = vperm.xlu0 %8569, %v9517_v34   ;;  %1153 = vperm.xlu1 %8570, %v9519_v4  }
 0x40a   :  { %v1051_v43 = vpop.xlane.xlu0 %1050  ;;  %v1057_v5 = vpop.xlane.xlu1 %1056  ;;  %8363 = vmatprep.subr.mxu1 %v11387_v17 }
 0x40b   :  { %v9523_v41 = vadd.f32 %v1089_v61, %v1051_v43  ;;  %v9526_v11 = vadd.f32 %v1103_v62, %v1057_v5  ;;  %8364 = vmatpush3.msra.mxu1 %v797_v10 }
 0x40c   :  { %8365 = vmatprep.subr.mxu1 %v11387_v17 }
 0x40d   :  { %1156 = vperm.xlu1 %8570, %v9523_v41   ;;  %8366 = vmatpush3.msra.mxu1 %v796_v22 }
 0x40e   :  { %v1054_v35 = vpop.xlane.xlu0 %1053  ;;  %v1063_v14 = vpop.xlane.xlu1 %1062  ;;  %8367 = vmatprep.subr.mxu1 %v11387_v17 }
 0x40f   :  { %v9528_v12 = vadd.f32 %v1096_v30, %v1054_v35  ;;  %8368 = vmatpush3.msra.mxu1 %v795_v31 }
 0x410   :  { %8383 = vmatprep.subr.mxu1 %v11387_v17 }
 0x411   :  { %1159 = vperm.xlu0 %8569, %v9528_v12   ;;  %1162 = vperm.xlu1 %8570, %v9526_v11  }
 0x412   :  { %v1060_v16 = vpop.xlane.xlu0 %1059  ;;  %v1124_v39 = vpop.permute.xlu1 %1123 }
 0x413   :  { %v9532_v18 = vadd.f32 %v1110_v63, %v1060_v16 }
 0x415   :  { %1165 = vperm.xlu0 %8569, %v9532_v18  }
 0x416   :  { %v1066_v42 = vpop.xlane.xlu0 %1065 }
 0x417   :  { %v9537_v45 = vadd.f32 %v1124_v39, %v1066_v42 }
 0x419   :  { %1171 = vperm.xlu0 %8569, %v9537_v45  }
 0x41a   :  { %v1117_v48 = vpop.permute.xlu0 %1116 }
 0x41b   :  { %v9542_v50 = vadd.f32 %v1117_v48, %v1063_v14 }
 0x41d   :  { %1168 = vperm.xlu1 %8570, %v9542_v50   ;;  %800 = vrot.lane.b32.xlu0 %v9398_v1, %s9106_s27 }
 0x484   :  { %v1154_v51 = vpop.permute.xlu1 %1153  ;;  %v1151_v52 = vpop.permute.xlu0 %1150 }
 0x485   :  { %v1176_v55 = vrot.slane %v1151_v52, %v9385_v44  ;;  %v1180_v61 = vrot.slane %v1154_v51, %v9385_v44 }
 0x487   :  { %v1205_v3 = vsel %vm548_vm3, %v1180_v61, %v1176_v55 }
 0x488   :  { %v1157_v53 = vpop.permute.xlu1 %1156 }
 0x489   :  { %v1184_v62 = vrot.slane %v1157_v53, %v9385_v44 }
 0x48b   :  { %v1206_v5 = vsel %vm550_vm4, %v1184_v62, %v1205_v3 }
 0x48c   :  { %v1160_v54 = vpop.permute.xlu0 %1159  ;;  %v1163_v2 = vpop.permute.xlu1 %1162 }
 0x48d   :  { %v1188_v63 = vrot.slane %v1160_v54, %v9385_v44  ;;  %v1192_v1 = vrot.slane %v1163_v2, %v9385_v44 }
 0x48f   :  { %v1207_v35 = vsel %vm552_vm5, %v1188_v63, %v1206_v5 }
 0x490   :  { %v1166_v30 = vpop.permute.xlu0 %1165  ;;  %v1208_v42 = vsel %vm554_vm6, %v1192_v1, %v1207_v35 }
 0x491   :  { %v1196_v14 = vrot.slane %v1166_v30, %v9385_v44 }
 0x493   :  { %v1209_v52 = vsel %vm556_vm7, %v1196_v14, %v1208_v42 }
 0x494   :  { %v1172_v43 = vpop.permute.xlu0 %1171 }
 0x495   :  { %v1204_v51 = vrot.slane %v1172_v43, %v9385_v44 }
 0x498   :  { %v801_v16 = vpop.permute.xlu0 %800  ;;  %v1169_v39 = vpop.permute.xlu1 %1168 }
 0x499   :  { %v1200_v48 = vrot.slane %v1169_v39, %v9385_v44  ;;  %8370 = vmatmul.mubr.msk.f32.vlgmr.msra.gmra.mxu1 %vm329_vm1, %v801_v16 }
 0x49a   :  { %8384 = vmatpush3.msra.mxu1 %v798_v8  ;;  %8391 = vmatprep.mubr.msk.f32.mxu1 %vm9104_vm2, %v11387_v17 }
 0x49b   :  { %v1210_v53 = vsel %vm558_vm8, %v1200_v48, %v1209_v52  ;;  %8385 = vmatprep.subr.mxu1 %v11387_v17 }
 0x49c   :  { %v1211_v54 = vsel %vm560_vm9, %v1204_v51, %v1210_v53  ;;  %8386 = vmatpush3.msra.mxu1 %v797_v10 }
 0x49d   :  { %v1213_v55 = vsel %vm563_vm10, %v1211_v54, -inf  ;;  %8387 = vmatprep.subr.mxu1 %v11387_v17 }
 0x49e   :  { %1214 = vmax.xlane.f32.xlu1 %v1213_v55  ;;  %8388 = vmatpush3.msra.mxu1 %v796_v22 }
 0x49f   :  { %8389 = vmatprep.subr.mxu1 %v11387_v17 }
 0x4a0   :  { %8390 = vmatpush3.msra.mxu1 %v795_v31 }
 0x4a1   :  { %8405 = vmatprep.subr.mxu1 %v11387_v17 }
 0x527   :  { %v1215_v8 = vpop.xlane.xlu1 %1214 }
 0x528   :  { %v1220_v61 = vrot.slane %v1215_v8, %v9415_v21  ;;  %v1224_v30 = vrot.slane %v1215_v8, %v9420_v38  ;;  %v1228_v62 = vrot.slane %v1215_v8, %v9469_v36  ;;  %v1232_v3 = vrot.slane %v1215_v8, %v9477_v57 }
 0x529   :  { %v1236_v43 = vrot.slane %v1215_v8, %v9452_v33  ;;  %v1240_v35 = vrot.slane %v1215_v8, %v9485_v40 }
 0x52a   :  { %v1257_v10 = vsub.f32 %v9517_v34, %v1220_v61  ;;  %v1258_v63 = vsub.f32 %v9519_v4, %v1224_v30  ;;  %v1259_v22 = vsub.f32 %v9523_v41, %v1228_v62  ;;  %v1260_v5 = vsub.f32 %v9528_v12, %v1232_v3  ;;  %v568_v61 = vld [vmem:[%s11381_s9 + $0x18] sm:$0xff]  ;;  %v567_v30 = vld [vmem:[%s11381_s9 + $0x10] sm:$0xff] }
 0x52b   :  { %v1261_v14 = vsub.f32 %v9526_v11, %v1236_v43  ;;  %v1244_v4 = vrot.slane %v1215_v8, %v9510_v59  ;;  %v1262_v16 = vsub.f32 %v9532_v18, %v1240_v35  ;;  %v1248_v12 = vrot.slane %v1215_v8, %v9502_v56  ;;  %v164_v62 = vld [vmem:[%s11372_s0 + $0x10] sm:$0xff]  ;;  %8330 = vmatprep.subr.mxu0 %v568_v61 }
 0x52c   :  { %v1265_v2 = vmul.f32 1.442695, %v1257_v10  ;;  %v1267_v31 = vmul.f32 1.442695, %v1258_v63  ;;  %v1269_v1 = vmul.f32 1.442695, %v1259_v22  ;;  %8301 = vmatprep.mubr.msk.f32.mxu0 %vm179_vm0, %v164_v62  ;;  %8331 = vmatpush3.msra.mxu0 %v568_v61 }
 0x52d   :  { %v1271_v34 = vmul.f32 1.442695, %v1260_v5  ;;  %v1273_v41 = vmul.f32 1.442695, %v1261_v14  ;;  %v1263_v42 = vsub.f32 %v9542_v50, %v1244_v4  ;;  %v1275_v48 = vmul.f32 1.442695, %v1262_v16  ;;  %8332 = vmatprep.subr.mxu0 %v567_v30 }
 0x52e   :  { %8575 = vpow2.f32 %v1265_v2  ;;  %v1264_v11 = vsub.f32 %v9537_v45, %v1248_v12  ;;  %v165_v63 = vld [vmem:[%s11372_s0 + $0x18] sm:$0xff]  ;;  %v566_v2 = vld [vmem:[%s11381_s9 + $0x8] sm:$0xff]  ;;  %8333 = vmatpush3.msra.mxu0 %v567_v30  ;;  %v565_v22 = vld [vmem:[%s11381_s9] sm:$0xff] }
 0x52f   :  { %8577 = vpow2.f32 %v1267_v31  ;;  %v1277_v18 = vmul.f32 1.442695, %v1263_v42  ;;  %8302 = vmatmul.mubr.msk.f32.gmra.mxu0 %vm179_vm0, %v165_v63  ;;  %8334 = vmatprep.subr.mxu0 %v566_v2 }
 0x530   :  { %8579 = vpow2.f32 %v1269_v1  ;;  %v1279_v53 = vmul.f32 1.442695, %v1264_v11  ;;  %8338 = vmatprep.mubr.msk.f32.mxu0 %vm329_vm1, %v9245_v9  ;;  %8335 = vmatpush3.msra.mxu0 %v566_v2 }
 0x531   :  { %8581 = vpow2.f32 %v1271_v34  ;;  %8336 = vmatprep.subr.mxu0 %v565_v22 }
 0x532   :  { %8583 = vpow2.f32 %v1273_v41  ;;  %8337 = vmatpush3.msra.mxu0 %v565_v22 }
 0x533   :  { %8585 = vpow2.f32 %v1275_v48  ;;  %8339 = vmatmul.mubr.msk.f32.vlgmr.msra.gmra.mxu0 %vm329_vm1, %v9260_v13  ;;  %8372 = vmatprep.subr.mxu0 %v11387_v17 }
 0x534   :  { %8587 = vpow2.f32 %v1277_v18  ;;  %8341 = vmatprep.mubr.msk.f32.mxu0 %vm329_vm1, %v9265_v15 }
 0x535   :  { %8589 = vpow2.f32 %v1279_v53 }
 0x537   :  { %8342 = vmatmul.mubr.msk.f32.gmra.mxu0 %vm329_vm1, %v9277_v19 }
 0x538   :  { %8344 = vmatprep.mubr.msk.f32.mxu0 %vm329_vm1, %v9283_v20 }
 0x53b   :  { %v9583_v39 = vpop.eup %8575  ;;  %8345 = vmatmul.mubr.msk.f32.gmra.mxu0 %vm329_vm1, %v9293_v23 }
 0x53c   :  { %1290 = vperm.xlu0 %8569, %v9583_v39   ;;  %v9588_v51 = vpop.eup %8577  ;;  %8347 = vmatprep.mubr.msk.f32.mxu0 %vm329_vm1, %v9298_v24 }
 0x53d   :  { %v9592_v52 = vpop.eup %8579 }
 0x53e   :  { %v9595_v54 = vpop.eup %8581 }
 0x53f   :  { %v9598_v50 = vpop.eup %8583  ;;  %8348 = vmatmul.mubr.msk.f32.gmra.mxu0 %vm329_vm1, %v9309_v25 }
 0x540   :  { %1293 = vperm.xlu0 %8569, %v9588_v51   ;;  %v9601_v55 = vpop.eup %8585  ;;  %8380 = vmatprep.mubr.msk.f32.mxu0 %vm9104_vm2, %v11387_v17 }
 0x541   :  { %v9604_v45 = vpop.eup %8587 }
 0x542   :  { %v9607_v8 = vpop.eup %8589 }
 0x544   :  { %1296 = vperm.xlu0 %8569, %v9592_v52  }
 0x548   :  { %1299 = vperm.xlu0 %8569, %v9595_v54  }
 0x54c   :  { %1302 = vperm.xlu0 %8569, %v9598_v50  }
 0x550   :  { %1305 = vperm.xlu0 %8569, %v9601_v55  }
 0x554   :  { %1308 = vperm.xlu0 %8569, %v9604_v45  }
 0x558   :  { %1311 = vperm.xlu0 %8569, %v9607_v8  }
 0x559   :  { %v9619_v10 = vpop.f32.mrf.mxu1 }
 0x55a   :  { %v1524_v26 = vrot.slane %v9619_v10, 6 }
 0x55b   :  { %v8371_v3 = vpop.f32.mrf.mxu1 }
 0x5b7   :  { %v1291_v9 = vpop.permute.xlu0 %1290 }
 0x5b8   :  { %v1316_v23 = vrot.slane %v1291_v9, %v9385_v44 }
 0x5bb   :  { %v1294_v13 = vpop.permute.xlu0 %1293 }
 0x5bc   :  { %v1320_v20 = vrot.slane %v1294_v13, %v9385_v44 }
 0x5be   :  { %v1345_v35 = vsel %vm548_vm3, %v1320_v20, %v1316_v23 }
 0x5bf   :  { %v1297_v15 = vpop.permute.xlu0 %1296 }
 0x5c0   :  { %v1324_v5 = vrot.slane %v1297_v15, %v9385_v44 }
 0x5c2   :  { %v1346_v34 = vsel %vm550_vm4, %v1324_v5, %v1345_v35 }
 0x5c3   :  { %v1300_v31 = vpop.permute.xlu0 %1299 }
 0x5c4   :  { %v1328_v24 = vrot.slane %v1300_v31, %v9385_v44 }
 0x5c6   :  { %v1347_v16 = vsel %vm552_vm5, %v1328_v24, %v1346_v34 }
 0x5c7   :  { %v1303_v19 = vpop.permute.xlu0 %1302 }
 0x5c8   :  { %v1332_v1 = vrot.slane %v1303_v19, %v9385_v44 }
 0x5ca   :  { %v1348_v41 = vsel %vm554_vm6, %v1332_v1, %v1347_v16 }
 0x5cb   :  { %v1306_v43 = vpop.permute.xlu0 %1305 }
 0x5cc   :  { %v1336_v14 = vrot.slane %v1306_v43, %v9385_v44 }
 0x5ce   :  { %v1349_v48 = vsel %vm556_vm7, %v1336_v14, %v1348_v41  ;;  %v9695_v41 = vld [vmem:[#allocation13 + $0x18] sm:$0xff] }
 0x5cf   :  { %v1309_v25 = vpop.permute.xlu0 %1308  ;;  %8373 = vmatpush3.msra.mxu0 %v9695_v41 }
 0x5d0   :  { %v1340_v4 = vrot.slane %v1309_v25, %v9385_v44  ;;  %8374 = vmatprep.subr.mxu0 %v11387_v17 }
 0x5d2   :  { %v1350_v11 = vsel %vm558_vm8, %v1340_v4, %v1349_v48 }
 0x5d3   :  { %v1312_v12 = vpop.permute.xlu0 %1311 }
 0x5d4   :  { %v1344_v42 = vrot.slane %v1312_v12, %v9385_v44  ;;  %v9697_v12 = vld [vmem:[#allocation13 + $0x10] sm:$0xff] }
 0x5d5   :  { %8375 = vmatpush3.msra.mxu0 %v9697_v12 }
 0x5d6   :  { %v1351_v18 = vsel %vm560_vm9, %v1344_v42, %v1350_v11  ;;  %8376 = vmatprep.subr.mxu0 %v11387_v17 }
 0x5d7   :  { %v1353_v53 = vsel %vm563_vm10, %v1351_v18, 0.0 }
 0x5d8   :  { %1354 = vadd.xlane.f32.xlu1 %v1353_v53 }
 0x5ef   :  { %v9667_v61 = vpop.f32.mrf.mxu0 }
 0x5f1   :  { %v9669_v30 = vpop.f32.mrf.mxu0 }
 0x5f3   :  { %v8340_v62 = vpop.f32.mrf.mxu0 }
 0x5f4   :  { %675 = vst.msk [vmem:[#allocation4 + $0x8] sm:$0xff] %vm329_vm1, %v8340_v62 }
 0x5f5   :  { %v635_v63 = vpop.f32.mrf.mxu0 }
 0x5f6   :  { %674 = vst.msk [vmem:[#allocation4] sm:$0xff] %vm329_vm1, %v635_v63 }
 0x5f7   :  { %v8343_v2 = vpop.f32.mrf.mxu0 }
 0x5f8   :  { %677 = vst.msk [vmem:[#allocation4 + $0x18] sm:$0xff] %vm329_vm1, %v8343_v2 }
 0x5f9   :  { %v645_v3 = vpop.f32.mrf.mxu0 }
 0x5fa   :  { %676 = vst.msk [vmem:[#allocation4 + $0x10] sm:$0xff] %vm329_vm1, %v645_v3 }
 0x5fb   :  { %v8346_v22 = vpop.f32.mrf.mxu0 }
 0x5fc   :  { %679 = vst.msk [vmem:[#allocation4 + $0x28] sm:$0xff] %vm329_vm1, %v8346_v22 }
 0x5fd   :  { %v655_v9 = vpop.f32.mrf.mxu0  ;;  %v9719_v62 = vld [vmem:[#allocation4] sm:$0xff] }
 0x5fe   :  { %678 = vst.msk [vmem:[#allocation4 + $0x20] sm:$0xff] %vm329_vm1, %v655_v9 }
 0x5ff   :  { %v8349_v13 = vpop.f32.mrf.mxu0 }
 0x600   :  { %681 = vst.msk [vmem:[#allocation4 + $0x38] sm:$0xff] %vm329_vm1, %v8349_v13 }
 0x601   :  { %v665_v15 = vpop.f32.mrf.mxu0 }
 0x602   :  { %680 = vst.msk [vmem:[#allocation4 + $0x30] sm:$0xff] %vm329_vm1, %v665_v15 }
 0x609   :  { %v9717_v53 = vld [vmem:[#allocation4 + $0x30] sm:$0xff] }
 0x661   :  { %v1355_v31 = vpop.xlane.xlu1 %1354 }
 0x662   :  { %8591 = vrcp.f32 %v1355_v31 }
 0x66f   :  { %v8592_v19 = vpop.eup %8591 }
 0x670   :  { %v1369_v43 = vrot.slane %v8592_v19, %v9469_v36  ;;  %v1365_v20 = vrot.slane %v8592_v19, %v9420_v38  ;;  %v1385_v24 = vrot.slane %v8592_v19, %v9510_v59  ;;  %v1361_v1 = vrot.slane %v8592_v19, %v9415_v21 }
 0x671   :  { %v1373_v14 = vrot.slane %v8592_v19, %v9477_v57  ;;  %v1381_v4 = vrot.slane %v8592_v19, %v9485_v40 }
 0x672   :  { %v1400_v5 = vmul.f32 %v9592_v52, %v1369_v43  ;;  %v1399_v23 = vmul.f32 %v9588_v51, %v1365_v20  ;;  %v1404_v25 = vmul.f32 %v9604_v45, %v1385_v24  ;;  %v1398_v35 = vmul.f32 %v9583_v39, %v1361_v1  ;;  %v9725_v20 = vld [vmem:[#allocation4 + $0x18] sm:$0xff] }
 0x673   :  { %v1401_v34 = vmul.f32 %v9595_v54, %v1373_v14  ;;  %v1377_v52 = vrot.slane %v8592_v19, %v9452_v33  ;;  %v1403_v16 = vmul.f32 %v9601_v55, %v1381_v4  ;;  %v1389_v45 = vrot.slane %v8592_v19, %v9502_v56  ;;  %v9701_v54 = vld [vmem:[#allocation13 + $0x8] sm:$0xff] }
 0x674   :  { %1426 = vperm.xlu1 %8570, %v1400_v5   ;;  %1421 = vperm.xlu0 %8569, %v1399_v23   ;;  %v9711_v55 = vld [vmem:[#allocation4 + $0x10] sm:$0xff] }
 0x675   :  { %v1402_v51 = vmul.f32 %v9598_v50, %v1377_v52  ;;  %v1405_v39 = vmul.f32 %v9607_v8, %v1389_v45  ;;  %v9705_v50 = vld [vmem:[#allocation13] sm:$0xff]  ;;  %8377 = vmatpush3.msra.mxu0 %v9701_v54 }
 0x676   :  { %8378 = vmatprep.subr.mxu0 %v11387_v17  ;;  %v9713_v8 = vld [vmem:[#allocation4 + $0x8] sm:$0xff] }
 0x677   :  { %8379 = vmatpush3.msra.mxu0 %v9705_v50 }
 0x678   :  { %1446 = vperm.xlu1 %8570, %v1404_v25   ;;  %1416 = vperm.xlu0 %8569, %v1398_v35  }
 0x679   :  { %8394 = vmatprep.subr.mxu0 %v11387_v17 }
 0x67c   :  { %1431 = vperm.xlu0 %8569, %v1401_v34  }
 0x680   :  { %1436 = vperm.xlu0 %8569, %v1402_v51  }
 0x684   :  { %1441 = vperm.xlu0 %8569, %v1403_v16   ;;  %v9730_v16 = vld [vmem:[#allocation4 + $0x20] sm:$0xff] }
 0x688   :  { %1451 = vperm.xlu0 %8569, %v1405_v39  }
 0x6ef   :  { %v1427_v42 = vpop.permute.xlu1 %1426  ;;  %v1422_v48 = vpop.permute.xlu0 %1421 }
 0x6f0   :  { %v1456_v11 = vmul.f32 %v1427_v42, %v9711_v55  ;;  %v1455_v18 = vmul.f32 %v1422_v48, %v9713_v8 }
 0x6f2   :  { %v1476_v63 = vsel %vm329_vm1, %v1456_v11, 0.0  ;;  %v1469_v2 = vsel %vm329_vm1, %v1455_v18, 0.0 }
 0x6f3   :  { %v1477_v3 = vrot.slane %v1476_v63, 4  ;;  %v1470_v22 = vrot.slane %v1469_v2, 4  ;;  %v1447_v9 = vpop.permute.xlu1 %1446  ;;  %v1417_v13 = vpop.permute.xlu0 %1416 }
 0x6f4   :  { %v1460_v15 = vmul.f32 %v1447_v9, %v9717_v53  ;;  %v1454_v31 = vmul.f32 %v1417_v13, %v9719_v62 }
 0x6f5   :  { %v1478_v19 = vadd.f32 %v1477_v3, %v1476_v63  ;;  %v1471_v43 = vadd.f32 %v1470_v22, %v1469_v2 }
 0x6f6   :  { %v1504_v5 = vsel %vm329_vm1, %v1460_v15, 0.0  ;;  %v1462_v23 = vsel %vm329_vm1, %v1454_v31, 0.0 }
 0x6f7   :  { %v1479_v24 = vrot.slane %v1478_v19, 2  ;;  %v1472_v1 = vrot.slane %v1471_v43, 2  ;;  %v1505_v25 = vrot.slane %v1504_v5, 4  ;;  %v1463_v35 = vrot.slane %v1462_v23, 4  ;;  %v1432_v14 = vpop.permute.xlu0 %1431 }
 0x6f8   :  { %v1457_v34 = vmul.f32 %v1432_v14, %v9725_v20 }
 0x6f9   :  { %v1473_v52 = vadd.f32 %v1472_v1, %v1471_v43  ;;  %v1506_v51 = vadd.f32 %v1505_v25, %v1504_v5  ;;  %v1464_v4 = vadd.f32 %v1463_v35, %v1462_v23  ;;  %v1480_v45 = vadd.f32 %v1479_v24, %v1478_v19  ;;  %v9735_v5 = vld [vmem:[#allocation4 + $0x28] sm:$0xff] }
 0x6fa   :  { %v1483_v39 = vsel %vm329_vm1, %v1457_v34, 0.0  ;;  %v1519_v25 = vrot.slane %v9619_v10, 1 }
 0x6fb   :  { %v1474_v42 = vrot.slane %v1473_v52, 1  ;;  %v1507_v48 = vrot.slane %v1506_v51, 2  ;;  %v1465_v11 = vrot.slane %v1464_v4, 2  ;;  %v1437_v18 = vpop.permute.xlu0 %1436  ;;  %v1484_v63 = vrot.slane %v1483_v39, 4 }
 0x6fc   :  { %v1458_v2 = vmul.f32 %v1437_v18, %v9730_v16  ;;  %v1481_v22 = vrot.slane %v1480_v45, 1 }
 0x6fd   :  { %v1466_v3 = vadd.f32 %v1465_v11, %v1464_v4  ;;  %v1485_v9 = vadd.f32 %v1484_v63, %v1483_v39  ;;  %v1475_v15 = vadd.f32 %v1474_v42, %v1473_v52  ;;  %v1508_v31 = vadd.f32 %v1507_v48, %v1506_v51  ;;  %v9741_v48 = vld [vmem:[#allocation4 + $0x38] sm:$0xff]  ;;  %v9746_v63 = vld [vmem:[%s11383_s11] ss:$0 sm:$0xff] }
 0x6fe   :  { %v1490_v13 = vsel %vm329_vm1, %v1458_v2, 0.0  ;;  %v1482_v14 = vadd.f32 %v1481_v22, %v1480_v45  ;;  %v1520_v11 = vrot.slane %v9619_v10, 2 }
 0x6ff   :  { %v1467_v43 = vrot.slane %v1466_v3, 1  ;;  %v1442_v19 = vpop.permute.xlu0 %1441  ;;  %v1486_v23 = vrot.slane %v1485_v9, 2  ;;  %v1491_v24 = vrot.slane %v1490_v13, 4  ;;  %v1535_v52 = vadd.f32 %v1519_v25, %v1475_v15 }
 0x700   :  { %v1459_v1 = vmul.f32 %v1442_v19, %v9735_v5  ;;  %v1509_v51 = vrot.slane %v1508_v31, 1  ;;  %v1536_v15 = vadd.f32 %v1520_v11, %v1482_v14 }
 0x701   :  { %v1468_v35 = vadd.f32 %v1467_v43, %v1466_v3  ;;  %v1487_v34 = vadd.f32 %v1486_v23, %v1485_v9  ;;  %v1492_v4 = vadd.f32 %v1491_v24, %v1490_v13  ;;  %v1521_v9 = vrot.slane %v9619_v10, 3 }
 0x702   :  { %v1497_v39 = vsel %vm329_vm1, %v1459_v1, 0.0  ;;  %v1550_v24 = vadd.f32 %v9746_v63, %v1535_v52  ;;  %v1510_v17 = vadd.f32 %v1509_v51, %v1508_v31  ;;  %v1523_v51 = vrot.slane %v9619_v10, 5 }
 0x703   :  { %v1498_v42 = vrot.slane %v1497_v39, 4  ;;  %v1452_v18 = vpop.permute.xlu0 %1451  ;;  %v1534_v2 = vadd.f32 %v1468_v35, %v9619_v10  ;;  %v1488_v45 = vrot.slane %v1487_v34, 1  ;;  %v1493_v3 = vrot.slane %v1492_v4, 2 }
 0x704   :  { %v1461_v22 = vmul.f32 %v1452_v18, %v9741_v48  ;;  %8593 = vtanh.f32 %v1550_v24 }
 0x705   :  { %v1499_v13 = vadd.f32 %v1498_v42, %v1497_v39  ;;  %v1489_v43 = vadd.f32 %v1488_v45, %v1487_v34  ;;  %v1494_v19 = vadd.f32 %v1493_v3, %v1492_v4  ;;  %v1549_v28 = vadd.f32 %v9746_v63, %v1534_v2 }
 0x706   :  { %v1511_v23 = vsel %vm329_vm1, %v1461_v22, 0.0  ;;  %v1551_v39 = vadd.f32 %v9746_v63, %v1536_v15  ;;  %v1522_v34 = vrot.slane %v9619_v10, 4  ;;  %v1540_v42 = vadd.f32 %v1524_v26, %v1510_v17 }
 0x707   :  { %v1500_v1 = vrot.slane %v1499_v13, 2  ;;  %v1512_v25 = vrot.slane %v1511_v23, 4  ;;  %v1537_v35 = vadd.f32 %v1521_v9, %v1489_v43  ;;  %v1495_v29 = vrot.slane %v1494_v19, 1 }
 0x708   :  { %8595 = vtanh.f32 %v1549_v28  ;;  %v1525_v15 = vrot.slane %v9619_v10, 7 }
 0x709   :  { %v1501_v18 = vadd.f32 %v1500_v1, %v1499_v13  ;;  %v1513_v27 = vadd.f32 %v1512_v25, %v1511_v23  ;;  %v1552_v14 = vadd.f32 %v9746_v63, %v1537_v35  ;;  %v1496_v4 = vadd.f32 %v1495_v29, %v1494_v19 }
 0x70a   :  { %v1555_v13 = vadd.f32 %v9746_v63, %v1540_v42 }
 0x70b   :  { %v1502_v11 = vrot.slane %v1501_v18, 1  ;;  %v1514_v52 = vrot.slane %v1513_v27, 2  ;;  %v1538_v31 = vadd.f32 %v1522_v34, %v1496_v4  ;;  %8597 = vtanh.f32 %v1552_v14 }
 0x70c   :  { %8599 = vtanh.f32 %v1551_v39 }
 0x70d   :  { %v1503_v2 = vadd.f32 %v1502_v11, %v1501_v18  ;;  %v1515_v45 = vadd.f32 %v1514_v52, %v1513_v27  ;;  %v1553_v3 = vadd.f32 %v9746_v63, %v1538_v31 }
 0x70f   :  { %v1539_v22 = vadd.f32 %v1523_v51, %v1503_v2  ;;  %v1516_v9 = vrot.slane %v1515_v45, 1  ;;  %8601 = vtanh.f32 %v1553_v3 }
 0x711   :  { %v1554_v29 = vadd.f32 %v9746_v63, %v1539_v22  ;;  %v1517_v17 = vadd.f32 %v1516_v9, %v1515_v45  ;;  %v8594_v27 = vpop.eup %8593  ;;  %v11393_v22 = vmov 0.0   ;;  %v9783_v9 = vld [vmem:[#allocation15] ss:$0 sm:$0xff] }
 0x712   :  { %v1573_v24 = vrot.slane %v8594_v27, 7 }
 0x713   :  { %8603 = vtanh.f32 %v1554_v29  ;;  %v1541_v26 = vadd.f32 %v1525_v15, %v1517_v17  ;;  %v9787_v15 = vld [vmem:[#allocation12] ss:$0 sm:$0xff] }
 0x714   :  { %8605 = vtanh.f32 %v1555_v13 }
 0x715   :  { %v1556_v28 = vadd.f32 %v9746_v63, %v1541_v26  ;;  %v8596_v43 = vpop.eup %8595 }
 0x716   :  { %v1574_v35 = vsel %vm548_vm3, %v1573_v24, %v8596_v43  ;;  %v9805_v24 = vld [vmem:[#allocation3 + $0x38] sm:$0xff] }
 0x717   :  { %8607 = vtanh.f32 %v1556_v28 }
 0x718   :  { %v8598_v19 = vpop.eup %8597 }
 0x719   :  { %v8600_v23 = vpop.eup %8599  ;;  %v1577_v25 = vrot.slane %v8598_v19, 5  ;;  %v9793_v19 = vld [vmem:[#allocation3 + $0x8] sm:$0xff] }
 0x71a   :  { %v1575_v18 = vrot.slane %v8600_v23, 6  ;;  %v9797_v23 = vld [vmem:[#allocation3 + $0x18] sm:$0xff] }
 0x71c   :  { %v8602_v1 = vpop.eup %8601  ;;  %v1576_v10 = vsel %vm550_vm4, %v1575_v18, %v1574_v35  ;;  %v9811_v18 = vld [vmem:[#allocation3] sm:$0xff] }
 0x71d   :  { %v1579_v39 = vrot.slane %v8602_v1, 4  ;;  %v1578_v11 = vsel %vm552_vm5, %v1577_v25, %v1576_v10 }
 0x71f   :  { %v1580_v52 = vsel %vm554_vm6, %v1579_v39, %v1578_v11  ;;  %v9815_v39 = vld [vmem:[#allocation3 + $0x10] sm:$0xff] }
 0x720   :  { %v8604_v14 = vpop.eup %8603 }
 0x721   :  { %v8606_v34 = vpop.eup %8605  ;;  %v1581_v4 = vrot.slane %v8604_v14, 3  ;;  %v9819_v14 = vld [vmem:[#allocation3 + $0x20] sm:$0xff] }
 0x722   :  { %v1583_v51 = vrot.slane %v8606_v34, 2 }
 0x723   :  { %v1582_v42 = vsel %vm556_vm7, %v1581_v4, %v1580_v52 }
 0x724   :  { %v8608_v31 = vpop.eup %8607  ;;  %v1584_v45 = vsel %vm558_vm8, %v1583_v51, %v1582_v42 }
 0x725   :  { %v1585_v2 = vrot.slane %v8608_v31, 1 }
 0x727   :  { %v1586_v3 = vsel %vm560_vm9, %v1585_v2, %v1584_v45 }
 0x728   :  { %1588 = vst.msk [vmem:[#allocation6] sm:$0xff] %vm329_vm1, %v1586_v3  ;;  %8381 = vmatmul.mubr.msk.f32.vlgmr.msra.gmra.mxu0 %vm329_vm1, %v1586_v3 }
 0x729   :  { %8395 = vmatpush3.msra.mxu0 %v9695_v41  ;;  %8402 = vmatprep.mubr.msk.f32.mxu0 %vm9104_vm2, %v11393_v22 }
 0x72a   :  { %8396 = vmatprep.subr.mxu0 %v11393_v22 }
 0x72b   :  { %8397 = vmatpush3.msra.mxu0 %v9697_v12  ;;  %v276_v12 = vadd.f32 %v9787_v15, %v9341_v49  ;;  %v9801_v49 = vld [vmem:[#allocation3 + $0x28] sm:$0xff] }
 0x72c   :  { %8398 = vmatprep.subr.mxu0 %v11393_v22 }
 0x72d   :  { %8399 = vmatpush3.msra.mxu0 %v9701_v54 }
 0x72e   :  { %8400 = vmatprep.subr.mxu0 %v11393_v22 }
 0x72f   :  { %8401 = vmatpush3.msra.mxu0 %v9705_v50 }
 0x730   :  { %8416 = vmatprep.subr.mxu0 %v11393_v22 }
 0x7e8   :  { %v1669_v41 = vpop.f32.mrf.mxu0 }
 0x7e9   :  { %v1670_v13 = vadd.f32 %v9783_v9, %v1669_v41 }
 0x7ea   :  { %v8382_v29 = vpop.f32.mrf.mxu0 }
 0x7eb   :  { %1679 = vrot.lane.b32.xlu1 %v1670_v13, %s9105_s2  ;;  %v1673_v54 = vadd.f32 %v1670_v13, %v276_v12 }
 0x7ed   :  { %v1674_v17 = vmul.f32 0.5, %v1673_v54 }
 0x7ef   :  { %8609 = vtanh.f32 %v1674_v17 }
 0x7fc   :  { %v8610_v26 = vpop.eup %8609 }
 0x7fd   :  { %v1676_v50 = vadd.f32 1.0, %v8610_v26 }
 0x7ff   :  { %v1677_v28 = vmul.f32 0.5, %v1676_v50 }
 0x801   :  { %v1689_v34 = vsub.f32 1.0, %v1677_v28 }
 0x85d   :  { %v1680_v27 = vpop.permute.xlu1 %1679 }
 0x85e   :  { %v1682_v43 = vmul.f32 %v1680_v27, %v1677_v28 }
 0x860   :  { %1684 = vrot.lane.b32.xlu0 %v1682_v43, %s9105_s2 }
 0x864   :  { %1695 = vrot.lane.b32.xlu0 %v1586_v3, %s9102_s21 }
 0x868   :  { %1886 = vrot.lane.b32.xlu0 %v9793_v19, %s9102_s21 }
 0x86c   :  { %1890 = vrot.lane.b32.xlu0 %v9797_v23, %s9102_s21 }
 0x870   :  { %1894 = vrot.lane.b32.xlu0 %v9801_v49, %s9102_s21 }
 0x874   :  { %1898 = vrot.lane.b32.xlu0 %v9805_v24, %s9102_s21 }
 0x878   :  { %1979 = vbcast.lane.b32.xlu0 %v9433_v47, 256  ;;  %v9823_v47 = vld [vmem:[#allocation3 + $0x30] sm:$0xff] }
 0x8d2   :  { %v1685_v1 = vpop.permute.xlu0 %1684 }
 0x8d3   :  { %v1687_v25 = vadd.f32 %v1685_v1, %v276_v12 }
 0x8d5   :  { %8611 = vtanh.f32 %v1687_v25 }
 0x8d6   :  { %v1696_v10 = vpop.permute.xlu0 %1695 }
 0x8d7   :  { %v1698_v11 = vmul.f32 %v1696_v10, %v1677_v28 }
 0x8da   :  { %v1887_v45 = vpop.permute.xlu0 %1886 }
 0x8de   :  { %v1891_v1 = vpop.permute.xlu0 %1890 }
 0x8e2   :  { %v8612_v35 = vpop.eup %8611 }
 0x8e3   :  { %1691 = vrot.lane.b32.xlu1 %v8612_v35, %s9106_s27 }
 0x8e7   :  { %1884 = vrot.lane.b32.xlu1 %v9811_v18, %s9102_s21 }
 0x8eb   :  { %1888 = vrot.lane.b32.xlu1 %v9815_v39, %s9102_s21 }
 0x8ef   :  { %1892 = vrot.lane.b32.xlu1 %v9819_v14, %s9102_s21 }
 0x8f3   :  { %1896 = vrot.lane.b32.xlu1 %v9823_v47, %s9102_s21 }
 0x8f7   :  { %1986 = vbcast.lane.b32.xlu1 %v9429_v46, 256 }
 0x955   :  { %v1692_v4 = vpop.permute.xlu1 %1691 }
 0x956   :  { %v1694_v52 = vmul.f32 %v1692_v4, %v1689_v34 }
 0x958   :  { %v9828_v42 = vadd.f32 %v1698_v11, %v1694_v52 }
 0x959   :  { %v1885_v31 = vpop.permute.xlu1 %1884 }
 0x95a   :  { %v1779_v51 = vcombine.high %v9828_v42, %v9828_v42  ;;  %v1786_v2 = vrot.slane %v9828_v42, %v9396_v0 }
 0x95c   :  { %v1794_v3 = vcombine.high %v1786_v2, %v1786_v2  ;;  %v1802_v41 = vrot.slane %v1786_v2, %v9396_v0  ;;  %v1793_v46 = vrot.slane %v1779_v51, %v9396_v0 }
 0x95d   :  { %v1889_v13 = vpop.permute.xlu1 %1888 }
 0x95e   :  { %v1839_v29 = vrot.slane %v1802_v41, %v9415_v21  ;;  %v1824_v12 = vcombine.high %v1802_v41, %v1802_v41  ;;  %v1795_v54 = vcombine.high %v1793_v46, %v1793_v46  ;;  %v1816_v17 = vrot.slane %v1794_v3, %v9396_v0  ;;  %v1895_v3 = vpop.permute.xlu0 %1894 }
 0x95f   :  { %v1809_v28 = vrot.slane %v1793_v46, %v9396_v0 }
 0x960   :  { %v1908_v26 = vmul.f32 %v1885_v31, %v1839_v29  ;;  %v1847_v50 = vrot.slane %v1824_v12, %v9415_v21  ;;  %v1826_v27 = vcombine.high %v1816_v17, %v1816_v17  ;;  %v1843_v43 = vrot.slane %v1816_v17, %v9415_v21 }
 0x961   :  { %v1893_v25 = vpop.permute.xlu1 %1892  ;;  %v1823_v34 = vrot.slane %v1795_v54, %v9396_v0  ;;  %v1855_v11 = vrot.slane %v1809_v28, %v9415_v21  ;;  %v1825_v52 = vcombine.high %v1809_v28, %v1809_v28 }
 0x962   :  { %1924 = vrot.lane.b32.xlu1 %v1908_v26, %s9106_s27  ;;  %v1909_v35 = vmul.f32 %v1887_v45, %v1843_v43  ;;  %v1851_v10 = vrot.slane %v1826_v27, %v9415_v21  ;;  %v1910_v4 = vmul.f32 %v1889_v13, %v1847_v50  ;;  %v1899_v54 = vpop.permute.xlu0 %1898 }
 0x963   :  { %v1859_v51 = vrot.slane %v1823_v34, %v9415_v21  ;;  %v1827_v2 = vcombine.high %v1823_v34, %v1823_v34  ;;  %v1912_v41 = vmul.f32 %v1893_v25, %v1855_v11  ;;  %v1863_v45 = vrot.slane %v1825_v52, %v9415_v21 }
 0x964   :  { %1926 = vrot.lane.b32.xlu0 %v1909_v35, %s9106_s27  ;;  %v1911_v31 = vmul.f32 %v1891_v1, %v1851_v10 }
 0x965   :  { %v1897_v46 = vpop.permute.xlu1 %1896  ;;  %v1913_v13 = vmul.f32 %v1895_v3, %v1859_v51  ;;  %v1867_v29 = vrot.slane %v1827_v2, %v9415_v21 }
 0x966   :  { %1928 = vrot.lane.b32.xlu1 %v1910_v4, %s9106_s27  ;;  %v1914_v12 = vmul.f32 %v1897_v46, %v1863_v45  ;;  %v1980_v50 = vpop.permute.xlu0 %1979 }
 0x967   :  { %v1915_v17 = vmul.f32 %v1899_v54, %v1867_v29 }
 0x968   :  { %1930 = vrot.lane.b32.xlu0 %v1911_v31, %s9106_s27 }
 0x969   :  { %v1987_v26 = vpop.permute.xlu1 %1986 }
 0x96a   :  { %1932 = vrot.lane.b32.xlu1 %v1912_v41, %s9106_s27 }
 0x96c   :  { %1934 = vrot.lane.b32.xlu0 %v1913_v13, %s9106_s27 }
 0x96e   :  { %1936 = vrot.lane.b32.xlu1 %v1914_v12, %s9106_s27 }
 0x970   :  { %1938 = vrot.lane.b32.xlu0 %v1915_v17, %s9106_s27 }
 0x972   :  { %1993 = vbcast.lane.b32.xlu1 %v9474_v6, 256 }
 0x974   :  { %2000 = vbcast.lane.b32.xlu0 %v9482_v37, 256 }
 0x976   :  { %2007 = vbcast.lane.b32.xlu1 %v9461_v32, 256 }
 0x978   :  { %2014 = vbcast.lane.b32.xlu0 %v9490_v7, 256 }
 0x9d4   :  { %v1925_v28 = vpop.permute.xlu1 %1924 }
 0x9d5   :  { %v1948_v27 = vsel %vm329_vm1, %v1925_v28, 0.0 }
 0x9d6   :  { %1949 = vadd.xlane.f32.xlu1 %v1948_v27  ;;  %v1927_v43 = vpop.permute.xlu0 %1926 }
 0x9d7   :  { %v1951_v25 = vsel %vm329_vm1, %v1927_v43, 0.0 }
 0x9d8   :  { %v1929_v1 = vpop.permute.xlu1 %1928  ;;  %1952 = vadd.xlane.f32.xlu0 %v1951_v25 }
 0x9d9   :  { %v1954_v6 = vsel %vm329_vm1, %v1929_v1, 0.0 }
 0x9da   :  { %v1931_v35 = vpop.permute.xlu0 %1930 }
 0x9db   :  { %v1957_v37 = vsel %vm329_vm1, %v1931_v35, 0.0 }
 0x9dc   :  { %v1933_v10 = vpop.permute.xlu1 %1932  ;;  %1955 = vadd.xlane.f32.xlu0 %v1954_v6  ;;  %1958 = vadd.xlane.f32.xlu1 %v1957_v37 }
 0x9dd   :  { %v1960_v7 = vsel %vm329_vm1, %v1933_v10, 0.0 }
 0x9de   :  { %v1935_v32 = vpop.permute.xlu0 %1934 }
 0x9df   :  { %v1963_v34 = vsel %vm329_vm1, %v1935_v32, 0.0 }
 0x9e0   :  { %v1937_v4 = vpop.permute.xlu1 %1936  ;;  %1961 = vadd.xlane.f32.xlu0 %v1960_v7  ;;  %1964 = vadd.xlane.f32.xlu1 %v1963_v34 }
 0x9e1   :  { %v1966_v52 = vsel %vm329_vm1, %v1937_v4, 0.0 }
 0x9e2   :  { %v1939_v11 = vpop.permute.xlu0 %1938 }
 0x9e3   :  { %v1969_v31 = vsel %vm329_vm1, %v1939_v11, 0.0 }
 0x9e4   :  { %1967 = vadd.xlane.f32.xlu0 %v1966_v52  ;;  %1970 = vadd.xlane.f32.xlu1 %v1969_v31  ;;  %v1994_v51 = vpop.permute.xlu1 %1993 }
 0x9e6   :  { %v2001_v2 = vpop.permute.xlu0 %2000 }
 0x9e8   :  { %v2008_v3 = vpop.permute.xlu1 %2007 }
 0x9ea   :  { %v2015_v41 = vpop.permute.xlu0 %2014 }
 0x9f5   :  { %2021 = vbcast.lane.b32.xlu1 %v9514_v60, 256 }
 0x9fa   :  { %2028 = vbcast.lane.b32.xlu0 %v9506_v58, 256 }
 0xa5f   :  { %v1950_v46 = vpop.xlane.xlu1 %1949 }
 0xa60   :  { %v2038_v45 = vadd.f32 %v1980_v50, %v1950_v46 }
 0xa61   :  { %v1953_v13 = vpop.xlane.xlu0 %1952 }
 0xa62   :  { %2055 = vperm.xlu1 %8570, %v2038_v45   ;;  %v2039_v29 = vadd.f32 %v1987_v26, %v1953_v13 }
 0xa64   :  { %2058 = vperm.xlu0 %8569, %v2039_v29  }
 0xa65   :  { %v1959_v12 = vpop.xlane.xlu1 %1958  ;;  %v1956_v54 = vpop.xlane.xlu0 %1955 }
 0xa66   :  { %v2041_v17 = vadd.f32 %v2001_v2, %v1959_v12  ;;  %v2040_v28 = vadd.f32 %v1994_v51, %v1956_v54 }
 0xa68   :  { %2064 = vperm.xlu0 %8569, %v2041_v17   ;;  %2061 = vperm.xlu1 %8570, %v2040_v28  }
 0xa69   :  { %v1965_v27 = vpop.xlane.xlu1 %1964  ;;  %v1962_v60 = vpop.xlane.xlu0 %1961 }
 0xa6a   :  { %v2043_v43 = vadd.f32 %v2015_v41, %v1965_v27  ;;  %v2042_v58 = vadd.f32 %v2008_v3, %v1962_v60 }
 0xa6c   :  { %2070 = vperm.xlu0 %8569, %v2043_v43   ;;  %2067 = vperm.xlu1 %8570, %v2042_v58  }
 0xa6d   :  { %v1971_v1 = vpop.xlane.xlu1 %1970  ;;  %v1968_v25 = vpop.xlane.xlu0 %1967 }
 0xa71   :  { %v2022_v35 = vpop.permute.xlu1 %2021  ;;  %v2029_v50 = vpop.permute.xlu0 %2028 }
 0xa72   :  { %v2044_v10 = vadd.f32 %v2022_v35, %v1968_v25  ;;  %v9869_v6 = vadd.f32 %v2029_v50, %v1971_v1 }
 0xa74   :  { %2073 = vperm.xlu1 %8570, %v2044_v10   ;;  %2076 = vperm.xlu0 %8569, %v9869_v6  }
 0xa78   :  { %1705 = vrot.lane.b32.xlu0 %v9828_v42, %s9106_s27 }
 0xadd   :  { %v2056_v26 = vpop.permute.xlu1 %2055 }
 0xade   :  { %v2081_v11 = vrot.slane %v2056_v26, %v9385_v44 }
 0xadf   :  { %v2059_v37 = vpop.permute.xlu0 %2058 }
 0xae0   :  { %v2085_v34 = vrot.slane %v2059_v37, %v9385_v44 }
 0xae2   :  { %v2110_v31 = vsel %vm548_vm3, %v2085_v34, %v2081_v11 }
 0xae3   :  { %v2062_v32 = vpop.permute.xlu1 %2061  ;;  %v2065_v7 = vpop.permute.xlu0 %2064 }
 0xae4   :  { %v2089_v4 = vrot.slane %v2062_v32, %v9385_v44  ;;  %v2093_v51 = vrot.slane %v2065_v7, %v9385_v44 }
 0xae6   :  { %v2111_v2 = vsel %vm550_vm4, %v2089_v4, %v2110_v31 }
 0xae7   :  { %v2068_v52 = vpop.permute.xlu1 %2067  ;;  %v2071_v42 = vpop.permute.xlu0 %2070  ;;  %v2112_v41 = vsel %vm552_vm5, %v2093_v51, %v2111_v2 }
 0xae8   :  { %v2097_v3 = vrot.slane %v2068_v52, %v9385_v44  ;;  %v2101_v46 = vrot.slane %v2071_v42, %v9385_v44 }
 0xaea   :  { %v2113_v13 = vsel %vm554_vm6, %v2097_v3, %v2112_v41 }
 0xaeb   :  { %v2114_v1 = vsel %vm556_vm7, %v2101_v46, %v2113_v13 }
 0xaef   :  { %v2074_v12 = vpop.permute.xlu1 %2073  ;;  %v2077_v54 = vpop.permute.xlu0 %2076 }
 0xaf0   :  { %v2105_v27 = vrot.slane %v2074_v12, %v9385_v44  ;;  %v2109_v60 = vrot.slane %v2077_v54, %v9385_v44 }
 0xaf2   :  { %v2115_v25 = vsel %vm558_vm8, %v2105_v27, %v2114_v1 }
 0xaf3   :  { %v1706_v35 = vpop.permute.xlu0 %1705  ;;  %v2116_v50 = vsel %vm560_vm9, %v2109_v60, %v2115_v25 }
 0xaf4   :  { %8392 = vmatmul.mubr.msk.f32.vlgmr.msra.gmra.mxu1 %vm329_vm1, %v1706_v35  ;;  %v2118_v26 = vsel %vm563_vm10, %v2116_v50, -inf }
 0xaf5   :  { %2119 = vmax.xlane.f32.xlu1 %v2118_v26  ;;  %8413 = vmatprep.mubr.msk.f32.mxu1 %vm9104_vm2, %v11393_v22 }
 0xb7e   :  { %v2120_v37 = vpop.xlane.xlu1 %2119 }
 0xb7f   :  { %v2125_v32 = vrot.slane %v2120_v37, %v9415_v21  ;;  %v2129_v7 = vrot.slane %v2120_v37, %v9420_v38  ;;  %v2133_v34 = vrot.slane %v2120_v37, %v9469_v36  ;;  %v2137_v31 = vrot.slane %v2120_v37, %v9477_v57 }
 0xb80   :  { %v2141_v3 = vrot.slane %v2120_v37, %v9452_v33  ;;  %v2145_v46 = vrot.slane %v2120_v37, %v9485_v40  ;;  %v2149_v54 = vrot.slane %v2120_v37, %v9510_v59 }
 0xb81   :  { %v2162_v4 = vsub.f32 %v2038_v45, %v2125_v32  ;;  %v2163_v11 = vsub.f32 %v2039_v29, %v2129_v7  ;;  %v2164_v51 = vsub.f32 %v2040_v28, %v2133_v34  ;;  %v2165_v42 = vsub.f32 %v2041_v17, %v2137_v31 }
 0xb82   :  { %v2166_v13 = vsub.f32 %v2042_v58, %v2141_v3  ;;  %v2167_v45 = vsub.f32 %v2043_v43, %v2145_v46  ;;  %v2153_v28 = vrot.slane %v2120_v37, %v9502_v56  ;;  %v2168_v60 = vsub.f32 %v2044_v10, %v2149_v54 }
 0xb83   :  { %v2170_v52 = vmul.f32 1.442695, %v2162_v4  ;;  %v2172_v2 = vmul.f32 1.442695, %v2163_v11  ;;  %v2174_v41 = vmul.f32 1.442695, %v2164_v51 }
 0xb84   :  { %v2176_v12 = vmul.f32 1.442695, %v2165_v42  ;;  %v2178_v29 = vmul.f32 1.442695, %v2166_v13  ;;  %v2180_v17 = vmul.f32 1.442695, %v2167_v45  ;;  %v2169_v58 = vsub.f32 %v9869_v6, %v2153_v28 }
 0xb85   :  { %8613 = vpow2.f32 %v2170_v52  ;;  %v2182_v25 = vmul.f32 1.442695, %v2168_v60 }
 0xb86   :  { %8615 = vpow2.f32 %v2172_v2  ;;  %v2184_v43 = vmul.f32 1.442695, %v2169_v58 }
 0xb87   :  { %8617 = vpow2.f32 %v2174_v41 }
 0xb88   :  { %8619 = vpow2.f32 %v2176_v12 }
 0xb89   :  { %8621 = vpow2.f32 %v2178_v29 }
 0xb8a   :  { %8623 = vpow2.f32 %v2180_v17 }
 0xb8b   :  { %8625 = vpow2.f32 %v2182_v25 }
 0xb8c   :  { %8627 = vpow2.f32 %v2184_v43 }
 0xb92   :  { %v9900_v27 = vpop.eup %8613 }
 0xb93   :  { %2195 = vperm.xlu0 %8569, %v9900_v27   ;;  %v8616_v1 = vpop.eup %8615 }
 0xb94   :  { %v8618_v35 = vpop.eup %8617 }
 0xb95   :  { %v8620_v50 = vpop.eup %8619 }
 0xb96   :  { %v8622_v26 = vpop.eup %8621 }
 0xb97   :  { %2198 = vperm.xlu0 %8569, %v8616_v1   ;;  %v8624_v32 = vpop.eup %8623 }
 0xb98   :  { %v8626_v10 = vpop.eup %8625 }
 0xb99   :  { %v8628_v37 = vpop.eup %8627 }
 0xb9b   :  { %2201 = vperm.xlu0 %8569, %v8618_v35  }
 0xb9f   :  { %2204 = vperm.xlu0 %8569, %v8620_v50  }
 0xba3   :  { %2207 = vperm.xlu0 %8569, %v8622_v26  }
 0xba7   :  { %2210 = vperm.xlu0 %8569, %v8624_v32  }
 0xbab   :  { %2213 = vperm.xlu0 %8569, %v8626_v10  }
 0xbaf   :  { %2216 = vperm.xlu0 %8569, %v8628_v37  }
 0xbb4   :  { %v9905_v7 = vpop.f32.mrf.mxu1 }
 0xbb6   :  { %v8393_v6 = vpop.f32.mrf.mxu1 }
 0xc0e   :  { %v2196_v34 = vpop.permute.xlu0 %2195 }
 0xc0f   :  { %v2221_v42 = vrot.slane %v2196_v34, %v9385_v44 }
 0xc12   :  { %v2199_v4 = vpop.permute.xlu0 %2198 }
 0xc13   :  { %v2225_v2 = vrot.slane %v2199_v4, %v9385_v44 }
 0xc15   :  { %v2250_v12 = vsel %vm548_vm3, %v2225_v2, %v2221_v42 }
 0xc16   :  { %v2202_v11 = vpop.permute.xlu0 %2201 }
 0xc17   :  { %v2229_v3 = vrot.slane %v2202_v11, %v9385_v44 }
 0xc19   :  { %v2251_v45 = vsel %vm550_vm4, %v2229_v3, %v2250_v12 }
 0xc1a   :  { %v2205_v52 = vpop.permute.xlu0 %2204 }
 0xc1b   :  { %v2233_v41 = vrot.slane %v2205_v52, %v9385_v44 }
 0xc1d   :  { %v2252_v28 = vsel %vm552_vm5, %v2233_v41, %v2251_v45 }
 0xc1e   :  { %v2208_v31 = vpop.permute.xlu0 %2207 }
 0xc1f   :  { %v2237_v46 = vrot.slane %v2208_v31, %v9385_v44 }
 0xc21   :  { %v2253_v60 = vsel %vm554_vm6, %v2237_v46, %v2252_v28 }
 0xc22   :  { %v2211_v51 = vpop.permute.xlu0 %2210 }
 0xc23   :  { %v2241_v54 = vrot.slane %v2211_v51, %v9385_v44 }
 0xc25   :  { %v2254_v58 = vsel %vm556_vm7, %v2241_v54, %v2253_v60 }
 0xc26   :  { %v2214_v13 = vpop.permute.xlu0 %2213 }
 0xc27   :  { %v2245_v29 = vrot.slane %v2214_v13, %v9385_v44 }
 0xc29   :  { %v2255_v43 = vsel %vm558_vm8, %v2245_v29, %v2254_v58 }
 0xc2a   :  { %v2217_v17 = vpop.permute.xlu0 %2216 }
 0xc2b   :  { %v2249_v25 = vrot.slane %v2217_v17, %v9385_v44 }
 0xc2d   :  { %v2256_v6 = vsel %vm560_vm9, %v2249_v25, %v2255_v43 }
 0xc2e   :  { %v2258_v34 = vsel %vm563_vm10, %v2256_v6, 0.0 }
 0xc2f   :  { %2259 = vadd.xlane.f32.xlu1 %v2258_v34 }
 0xcb8   :  { %v2260_v4 = vpop.xlane.xlu1 %2259 }
 0xcb9   :  { %8629 = vrcp.f32 %v2260_v4 }
 0xcc6   :  { %v8630_v11 = vpop.eup %8629 }
 0xcc7   :  { %v2274_v52 = vrot.slane %v8630_v11, %v9469_v36  ;;  %v2270_v31 = vrot.slane %v8630_v11, %v9420_v38  ;;  %v2290_v3 = vrot.slane %v8630_v11, %v9510_v59  ;;  %v2266_v42 = vrot.slane %v8630_v11, %v9415_v21 }
 0xcc8   :  { %v2278_v13 = vrot.slane %v8630_v11, %v9477_v57  ;;  %v2282_v54 = vrot.slane %v8630_v11, %v9452_v33  ;;  %v2294_v29 = vrot.slane %v8630_v11, %v9502_v56 }
 0xcc9   :  { %v2305_v51 = vmul.f32 %v8618_v35, %v2274_v52  ;;  %v2304_v2 = vmul.f32 %v8616_v1, %v2270_v31  ;;  %v2309_v41 = vmul.f32 %v8626_v10, %v2290_v3  ;;  %v2303_v46 = vmul.f32 %v9900_v27, %v2266_v42 }
 0xcca   :  { %v2306_v12 = vmul.f32 %v8620_v50, %v2278_v13  ;;  %v2307_v45 = vmul.f32 %v8622_v26, %v2282_v54  ;;  %v2286_v1 = vrot.slane %v8630_v11, %v9485_v40  ;;  %v2310_v28 = vmul.f32 %v8628_v37, %v2294_v29 }
 0xccb   :  { %2331 = vperm.xlu1 %8570, %v2305_v51   ;;  %2326 = vperm.xlu0 %8569, %v2304_v2  }
 0xccc   :  { %v2308_v35 = vmul.f32 %v8624_v32, %v2286_v1 }
 0xccf   :  { %2351 = vperm.xlu1 %8570, %v2309_v41   ;;  %2321 = vperm.xlu0 %8569, %v2303_v46  }
 0xcd3   :  { %2336 = vperm.xlu0 %8569, %v2306_v12  }
 0xcd7   :  { %2341 = vperm.xlu0 %8569, %v2307_v45  }
 0xcdb   :  { %2346 = vperm.xlu0 %8569, %v2308_v35  }
 0xcdf   :  { %2356 = vperm.xlu0 %8569, %v2310_v28  }
 0xd46   :  { %v2332_v10 = vpop.permute.xlu1 %2331  ;;  %v2327_v27 = vpop.permute.xlu0 %2326 }
 0xd47   :  { %v2361_v60 = vmul.f32 %v2332_v10, %v9711_v55  ;;  %v2360_v17 = vmul.f32 %v2327_v27, %v9713_v8 }
 0xd49   :  { %v2381_v50 = vsel %vm329_vm1, %v2361_v60, 0.0  ;;  %v2374_v58 = vsel %vm329_vm1, %v2360_v17, 0.0 }
 0xd4a   :  { %v2382_v26 = vrot.slane %v2381_v50, 4  ;;  %v2375_v25 = vrot.slane %v2374_v58, 4  ;;  %v2352_v43 = vpop.permute.xlu1 %2351  ;;  %v2322_v6 = vpop.permute.xlu0 %2321 }
 0xd4b   :  { %v2365_v32 = vmul.f32 %v2352_v43, %v9717_v53  ;;  %v2359_v34 = vmul.f32 %v2322_v6, %v9719_v62  ;;  %v2424_v43 = vrot.slane %v9905_v7, 1 }
 0xd4c   :  { %v2383_v37 = vadd.f32 %v2382_v26, %v2381_v50  ;;  %v2376_v4 = vadd.f32 %v2375_v25, %v2374_v58 }
 0xd4d   :  { %v2409_v11 = vsel %vm329_vm1, %v2365_v32, 0.0  ;;  %v2367_v55 = vsel %vm329_vm1, %v2359_v34, 0.0 }
 0xd4e   :  { %v2384_v52 = vrot.slane %v2383_v37, 2  ;;  %v2377_v8 = vrot.slane %v2376_v4, 2  ;;  %v2410_v31 = vrot.slane %v2409_v11, 4  ;;  %v2368_v51 = vrot.slane %v2367_v55, 4  ;;  %v2337_v2 = vpop.permute.xlu0 %2336 }
 0xd4f   :  { %v2362_v3 = vmul.f32 %v2337_v2, %v9725_v20 }
 0xd50   :  { %v2378_v42 = vadd.f32 %v2377_v8, %v2376_v4  ;;  %v2411_v41 = vadd.f32 %v2410_v31, %v2409_v11  ;;  %v2369_v46 = vadd.f32 %v2368_v51, %v2367_v55  ;;  %v2385_v13 = vadd.f32 %v2384_v52, %v2383_v37 }
 0xd51   :  { %v2388_v53 = vsel %vm329_vm1, %v2362_v3, 0.0  ;;  %v2425_v4 = vrot.slane %v9905_v7, 2  ;;  %v2426_v3 = vrot.slane %v9905_v7, 3 }
 0xd52   :  { %v2379_v62 = vrot.slane %v2378_v42, 1  ;;  %v2412_v12 = vrot.slane %v2411_v41, 2  ;;  %v2370_v54 = vrot.slane %v2369_v46, 2  ;;  %v2342_v45 = vpop.permute.xlu0 %2341  ;;  %v2389_v1 = vrot.slane %v2388_v53, 4 }
 0xd53   :  { %v2363_v35 = vmul.f32 %v2342_v45, %v9730_v16  ;;  %v2386_v28 = vrot.slane %v2385_v13, 1 }
 0xd54   :  { %v2371_v29 = vadd.f32 %v2370_v54, %v2369_v46  ;;  %v2390_v10 = vadd.f32 %v2389_v1, %v2388_v53  ;;  %v2380_v60 = vadd.f32 %v2379_v62, %v2378_v42  ;;  %v2413_v20 = vadd.f32 %v2412_v12, %v2411_v41 }
 0xd55   :  { %v2395_v27 = vsel %vm329_vm1, %v2363_v35, 0.0  ;;  %v2387_v32 = vadd.f32 %v2386_v28, %v2385_v13  ;;  %v2429_v28 = vrot.slane %v9905_v7, 6 }
 0xd56   :  { %v2372_v17 = vrot.slane %v2371_v29, 1  ;;  %v2347_v50 = vpop.permute.xlu0 %2346  ;;  %v2391_v58 = vrot.slane %v2390_v10, 2  ;;  %v2396_v26 = vrot.slane %v2395_v27, 4  ;;  %v2440_v11 = vadd.f32 %v2424_v43, %v2380_v60 }
 0xd57   :  { %v2364_v25 = vmul.f32 %v2347_v50, %v9735_v5  ;;  %v2414_v55 = vrot.slane %v2413_v20, 1  ;;  %v2441_v41 = vadd.f32 %v2425_v4, %v2387_v32  ;;  %v2428_v43 = vrot.slane %v9905_v7, 5 }
 0xd58   :  { %v2373_v6 = vadd.f32 %v2372_v17, %v2371_v29  ;;  %v2392_v34 = vadd.f32 %v2391_v58, %v2390_v10  ;;  %v2397_v37 = vadd.f32 %v2396_v26, %v2395_v27  ;;  %v2455_v62 = vadd.f32 %v9746_v63, %v2440_v11 }
 0xd59   :  { %v2402_v16 = vsel %vm329_vm1, %v2364_v25, 0.0  ;;  %v2415_v45 = vadd.f32 %v2414_v55, %v2413_v20  ;;  %v2456_v27 = vadd.f32 %v9746_v63, %v2441_v41  ;;  %v2427_v17 = vrot.slane %v9905_v7, 4 }
 0xd5a   :  { %v2403_v52 = vrot.slane %v2402_v16, 4  ;;  %v2357_v8 = vpop.permute.xlu0 %2356  ;;  %v2439_v31 = vadd.f32 %v2373_v6, %v9905_v7  ;;  %v2393_v51 = vrot.slane %v2392_v34, 1  ;;  %v2398_v2 = vrot.slane %v2397_v37, 2 }
 0xd5b   :  { %v2366_v5 = vmul.f32 %v2357_v8, %v9741_v48  ;;  %8631 = vtanh.f32 %v2455_v62  ;;  %v2445_v25 = vadd.f32 %v2429_v28, %v2415_v45  ;;  %v2430_v55 = vrot.slane %v9905_v7, 7 }
 0xd5c   :  { %v2404_v42 = vadd.f32 %v2403_v52, %v2402_v16  ;;  %v2394_v46 = vadd.f32 %v2393_v51, %v2392_v34  ;;  %v2399_v13 = vadd.f32 %v2398_v2, %v2397_v37  ;;  %v2454_v1 = vadd.f32 %v9746_v63, %v2439_v31 }
 0xd5d   :  { %v2416_v53 = vsel %vm329_vm1, %v2366_v5, 0.0  ;;  %v2460_v4 = vadd.f32 %v9746_v63, %v2445_v25 }
 0xd5e   :  { %v2405_v12 = vrot.slane %v2404_v42, 2  ;;  %v2417_v54 = vrot.slane %v2416_v53, 4  ;;  %v2442_v35 = vadd.f32 %v2426_v3, %v2394_v46  ;;  %v2400_v29 = vrot.slane %v2399_v13, 1 }
 0xd5f   :  { %8633 = vtanh.f32 %v2454_v1 }
 0xd60   :  { %v2406_v48 = vadd.f32 %v2405_v12, %v2404_v42  ;;  %v2418_v10 = vadd.f32 %v2417_v54, %v2416_v53  ;;  %v2457_v60 = vadd.f32 %v9746_v63, %v2442_v35  ;;  %v2401_v50 = vadd.f32 %v2400_v29, %v2399_v13 }
 0xd62   :  { %v2407_v58 = vrot.slane %v2406_v48, 1  ;;  %v2419_v26 = vrot.slane %v2418_v10, 2  ;;  %v2443_v20 = vadd.f32 %v2427_v17, %v2401_v50  ;;  %8635 = vtanh.f32 %v2457_v60 }
 0xd63   :  { %8637 = vtanh.f32 %v2456_v27 }
 0xd64   :  { %v2408_v6 = vadd.f32 %v2407_v58, %v2406_v48  ;;  %v2420_v32 = vadd.f32 %v2419_v26, %v2418_v10  ;;  %v2458_v34 = vadd.f32 %v9746_v63, %v2443_v20  ;;  %v281_v58 = vadd.f32 %v9787_v15, %v9669_v30  ;;  %v9987_v30 = vld [vmem:[#allocation5] sm:$0xff] }
 0xd66   :  { %v2444_v37 = vadd.f32 %v2428_v43, %v2408_v6  ;;  %v2421_v16 = vrot.slane %v2420_v32, 1  ;;  %8639 = vtanh.f32 %v2458_v34 }
 0xd68   :  { %v2459_v11 = vadd.f32 %v9746_v63, %v2444_v37  ;;  %v2422_v52 = vadd.f32 %v2421_v16, %v2420_v32  ;;  %v8632_v51 = vpop.eup %8631 }
 0xd69   :  { %v2478_v42 = vrot.slane %v8632_v51, 7 }
 0xd6a   :  { %8641 = vtanh.f32 %v2459_v11  ;;  %v2446_v8 = vadd.f32 %v2430_v55, %v2422_v52 }
 0xd6b   :  { %8643 = vtanh.f32 %v2460_v4 }
 0xd6c   :  { %v2461_v31 = vadd.f32 %v9746_v63, %v2446_v8  ;;  %v8634_v2 = vpop.eup %8633 }
 0xd6d   :  { %v2479_v13 = vsel %vm548_vm3, %v2478_v42, %v8634_v2 }
 0xd6e   :  { %8645 = vtanh.f32 %v2461_v31 }
 0xd6f   :  { %v8636_v5 = vpop.eup %8635 }
 0xd70   :  { %v8638_v3 = vpop.eup %8637  ;;  %v2482_v46 = vrot.slane %v8636_v5, 5 }
 0xd71   :  { %v2480_v53 = vrot.slane %v8638_v3, 6 }
 0xd73   :  { %v8640_v41 = vpop.eup %8639  ;;  %v2481_v7 = vsel %vm550_vm4, %v2480_v53, %v2479_v13 }
 0xd74   :  { %v2484_v62 = vrot.slane %v8640_v41, 4  ;;  %v2483_v45 = vsel %vm552_vm5, %v2482_v46, %v2481_v7 }
 0xd76   :  { %v2485_v63 = vsel %vm554_vm6, %v2484_v62, %v2483_v45 }
 0xd77   :  { %v8642_v12 = vpop.eup %8641 }
 0xd78   :  { %v8644_v54 = vpop.eup %8643  ;;  %v2486_v1 = vrot.slane %v8642_v12, 3 }
 0xd79   :  { %v2488_v28 = vrot.slane %v8644_v54, 2 }
 0xd7a   :  { %v2487_v35 = vsel %vm556_vm7, %v2486_v1, %v2485_v63 }
 0xd7b   :  { %v8646_v29 = vpop.eup %8645  ;;  %v2489_v10 = vsel %vm558_vm8, %v2488_v28, %v2487_v35 }
 0xd7c   :  { %v2490_v48 = vrot.slane %v8646_v29, 1 }
 0xd7e   :  { %v2491_v27 = vsel %vm560_vm9, %v2490_v48, %v2489_v10 }
 0xd7f   :  { %2493 = vst.msk [vmem:[#allocation6 + $0x8] sm:$0xff] %vm329_vm1, %v2491_v27  ;;  %8403 = vmatmul.mubr.msk.f32.vlgmr.msra.gmra.mxu0 %vm329_vm1, %v2491_v27 }
 0xd80   :  { %8424 = vmatprep.mubr.msk.f32.mxu0 %vm9104_vm2, %v11393_v22 }
 0xe3f   :  { %v2574_v60 = vpop.f32.mrf.mxu0 }
 0xe40   :  { %v2575_v17 = vadd.f32 %v9783_v9, %v2574_v60  ;;  %v9993_v9 = vrot.slane %v9987_v30, %v9415_v21 }
 0xe41   :  { %v8404_v50 = vpop.f32.mrf.mxu0 }
 0xe42   :  { %2584 = vrot.lane.b32.xlu1 %v2575_v17, %s9105_s2  ;;  %v2578_v26 = vadd.f32 %v2575_v17, %v281_v58 }
 0xe44   :  { %v2579_v25 = vmul.f32 0.5, %v2578_v26 }
 0xe46   :  { %8647 = vtanh.f32 %v2579_v25 }
 0xe53   :  { %v8648_v20 = vpop.eup %8647 }
 0xe54   :  { %v2581_v43 = vadd.f32 1.0, %v8648_v20 }
 0xe56   :  { %v2582_v6 = vmul.f32 0.5, %v2581_v43 }
 0xeb4   :  { %v2585_v32 = vpop.permute.xlu1 %2584 }
 0xeb5   :  { %v2587_v34 = vmul.f32 %v2585_v32, %v2582_v6  ;;  %v10044_v32 = vrot.slane %v9987_v30, %v9477_v57 }
 0xeb7   :  { %2589 = vrot.lane.b32.xlu0 %v2587_v34, %s9105_s2  ;;  %v10048_v34 = vrot.slane %v9987_v30, %v9452_v33 }
 0xebb   :  { %2600 = vrot.lane.b32.xlu0 %v2491_v27, %s9102_s21 }
 0xebf   :  { %2791 = vrot.lane.b32.xlu0 %v9793_v19, %s9102_s21 }
 0xec3   :  { %2795 = vrot.lane.b32.xlu0 %v9797_v23, %s9102_s21  ;;  %v10007_v23 = vrot.slane %v9987_v30, %v9420_v38 }
 0xec7   :  { %2799 = vrot.lane.b32.xlu0 %v9801_v49, %s9102_s21 }
 0xecb   :  { %2803 = vrot.lane.b32.xlu0 %v9805_v24, %s9102_s21  ;;  %v2594_v24 = vsub.f32 1.0, %v2582_v6 }
 0xecf   :  { %2884 = vbcast.lane.b32.xlu0 %v9993_v9, 256 }
 0xf29   :  { %v2590_v15 = vpop.permute.xlu0 %2589 }
 0xf2a   :  { %v2592_v37 = vadd.f32 %v2590_v15, %v281_v58  ;;  %v10054_v15 = vrot.slane %v9987_v30, %v9485_v40 }
 0xf2c   :  { %8649 = vtanh.f32 %v2592_v37 }
 0xf2d   :  { %v2601_v49 = vpop.permute.xlu0 %2600 }
 0xf2e   :  { %v2603_v4 = vmul.f32 %v2601_v49, %v2582_v6  ;;  %v10038_v6 = vrot.slane %v9987_v30, %v9469_v36 }
 0xf31   :  { %v2792_v55 = vpop.permute.xlu0 %2791 }
 0xf35   :  { %v2796_v12 = vpop.permute.xlu0 %2795 }
 0xf39   :  { %v8650_v19 = vpop.eup %8649  ;;  %v2800_v27 = vpop.permute.xlu0 %2799 }
 0xf3a   :  { %2596 = vrot.lane.b32.xlu1 %v8650_v19, %s9106_s27 }
 0xf3d   :  { %v2804_v20 = vpop.permute.xlu0 %2803 }
 0xf3e   :  { %2789 = vrot.lane.b32.xlu1 %v9811_v18, %s9102_s21 }
 0xf41   :  { %v2885_v19 = vpop.permute.xlu0 %2884 }
 0xf42   :  { %2793 = vrot.lane.b32.xlu1 %v9815_v39, %s9102_s21 }
 0xf46   :  { %2797 = vrot.lane.b32.xlu1 %v9819_v14, %s9102_s21 }
 0xf4a   :  { %2801 = vrot.lane.b32.xlu1 %v9823_v47, %s9102_s21 }
 0xf4e   :  { %2891 = vbcast.lane.b32.xlu1 %v10007_v23, 256 }
 0xfac   :  { %v2597_v16 = vpop.permute.xlu1 %2596 }
 0xfad   :  { %v2599_v18 = vmul.f32 %v2597_v16, %v2594_v24 }
 0xfaf   :  { %v10010_v11 = vadd.f32 %v2603_v4, %v2599_v18 }
 0xfb0   :  { %v2790_v39 = vpop.permute.xlu1 %2789 }
 0xfb1   :  { %v2684_v14 = vcombine.high %v10010_v11, %v10010_v11  ;;  %v2691_v47 = vrot.slane %v10010_v11, %v9396_v0 }
 0xfb3   :  { %v2699_v52 = vcombine.high %v2691_v47, %v2691_v47  ;;  %v2707_v8 = vrot.slane %v2691_v47, %v9396_v0  ;;  %v2698_v31 = vrot.slane %v2684_v14, %v9396_v0 }
 0xfb4   :  { %v2794_v51 = vpop.permute.xlu1 %2793 }
 0xfb5   :  { %v2744_v2 = vrot.slane %v2707_v8, %v9415_v21  ;;  %v2729_v5 = vcombine.high %v2707_v8, %v2707_v8  ;;  %v2700_v3 = vcombine.high %v2698_v31, %v2698_v31  ;;  %v2721_v42 = vrot.slane %v2699_v52, %v9396_v0 }
 0xfb6   :  { %v2714_v13 = vrot.slane %v2698_v31, %v9396_v0 }
 0xfb7   :  { %v2813_v41 = vmul.f32 %v2790_v39, %v2744_v2  ;;  %v2752_v46 = vrot.slane %v2729_v5, %v9415_v21  ;;  %v2748_v53 = vrot.slane %v2721_v42, %v9415_v21  ;;  %v2731_v62 = vcombine.high %v2721_v42, %v2721_v42 }
 0xfb8   :  { %v2798_v7 = vpop.permute.xlu1 %2797  ;;  %v2728_v1 = vrot.slane %v2700_v3, %v9396_v0  ;;  %v2760_v35 = vrot.slane %v2714_v13, %v9415_v21  ;;  %v2730_v29 = vcombine.high %v2714_v13, %v2714_v13  ;;  %v10067_v42 = vrot.slane %v9987_v30, %v9510_v59 }
 0xfb9   :  { %2829 = vrot.lane.b32.xlu1 %v2813_v41, %s9106_s27  ;;  %v2814_v54 = vmul.f32 %v2792_v55, %v2748_v53  ;;  %v2756_v45 = vrot.slane %v2731_v62, %v9415_v21  ;;  %v2815_v63 = vmul.f32 %v2794_v51, %v2752_v46  ;;  %v10072_v41 = vrot.slane %v9987_v30, %v9502_v56 }
 0xfba   :  { %v2764_v48 = vrot.slane %v2728_v1, %v9415_v21  ;;  %v2732_v10 = vcombine.high %v2728_v1, %v2728_v1  ;;  %v2817_v60 = vmul.f32 %v2798_v7, %v2760_v35  ;;  %v2768_v50 = vrot.slane %v2730_v29, %v9415_v21 }
 0xfbb   :  { %2831 = vrot.lane.b32.xlu0 %v2814_v54, %s9106_s27  ;;  %v2816_v28 = vmul.f32 %v2796_v12, %v2756_v45 }
 0xfbc   :  { %v2802_v17 = vpop.permute.xlu1 %2801  ;;  %v2818_v58 = vmul.f32 %v2800_v27, %v2764_v48  ;;  %v2772_v26 = vrot.slane %v2732_v10, %v9415_v21  ;;  %v2608_v27 = vld [vmem:[#allocation19 + $0x18] sm:$0xff] }
 0xfbd   :  { %2833 = vrot.lane.b32.xlu1 %v2815_v63, %s9106_s27  ;;  %v2819_v25 = vmul.f32 %v2802_v17, %v2768_v50  ;;  %8406 = vmatpush3.msra.mxu1 %v2608_v27 }
 0xfbe   :  { %v2820_v43 = vmul.f32 %v2804_v20, %v2772_v26  ;;  %8407 = vmatprep.subr.mxu1 %v11393_v22  ;;  %v2605_v26 = vld [vmem:[#allocation19] sm:$0xff] }
 0xfbf   :  { %2835 = vrot.lane.b32.xlu0 %v2816_v28, %s9106_s27 }
 0xfc0   :  { %v2892_v37 = vpop.permute.xlu1 %2891 }
 0xfc1   :  { %2837 = vrot.lane.b32.xlu1 %v2817_v60, %s9106_s27  ;;  %v2607_v60 = vld [vmem:[#allocation19 + $0x10] sm:$0xff] }
 0xfc2   :  { %8408 = vmatpush3.msra.mxu1 %v2607_v60 }
 0xfc3   :  { %2839 = vrot.lane.b32.xlu0 %v2818_v58, %s9106_s27  ;;  %8409 = vmatprep.subr.mxu1 %v11393_v22  ;;  %v2606_v58 = vld [vmem:[#allocation19 + $0x8] sm:$0xff] }
 0xfc4   :  { %8410 = vmatpush3.msra.mxu1 %v2606_v58 }
 0xfc5   :  { %2841 = vrot.lane.b32.xlu1 %v2819_v25, %s9106_s27  ;;  %8411 = vmatprep.subr.mxu1 %v11393_v22 }
 0xfc6   :  { %8412 = vmatpush3.msra.mxu1 %v2605_v26 }
 0xfc7   :  { %2843 = vrot.lane.b32.xlu0 %v2820_v43, %s9106_s27  ;;  %8427 = vmatprep.subr.mxu1 %v11393_v22 }
 0xfc9   :  { %2898 = vbcast.lane.b32.xlu1 %v10038_v6, 256 }
 0xfcb   :  { %2905 = vbcast.lane.b32.xlu0 %v10044_v32, 256 }
 0xfcd   :  { %2912 = vbcast.lane.b32.xlu1 %v10048_v34, 256 }
 0xfcf   :  { %2919 = vbcast.lane.b32.xlu0 %v10054_v15, 256 }
0x102b   :  { %v2830_v49 = vpop.permute.xlu1 %2829 }
0x102c   :  { %v2853_v24 = vsel %vm329_vm1, %v2830_v49, 0.0 }
0x102d   :  { %2854 = vadd.xlane.f32.xlu1 %v2853_v24  ;;  %v2832_v16 = vpop.permute.xlu0 %2831 }
0x102e   :  { %v2856_v18 = vsel %vm329_vm1, %v2832_v16, 0.0 }
0x102f   :  { %v2834_v4 = vpop.permute.xlu1 %2833  ;;  %2857 = vadd.xlane.f32.xlu0 %v2856_v18 }
0x1030   :  { %v2859_v47 = vsel %vm329_vm1, %v2834_v4, 0.0 }
0x1031   :  { %v2836_v39 = vpop.permute.xlu0 %2835 }
0x1032   :  { %v2862_v55 = vsel %vm329_vm1, %v2836_v39, 0.0 }
0x1033   :  { %v2838_v14 = vpop.permute.xlu1 %2837  ;;  %2860 = vadd.xlane.f32.xlu0 %v2859_v47  ;;  %2863 = vadd.xlane.f32.xlu1 %v2862_v55 }
0x1034   :  { %v2865_v8 = vsel %vm329_vm1, %v2838_v14, 0.0 }
0x1035   :  { %v2840_v52 = vpop.permute.xlu0 %2839 }
0x1036   :  { %v2868_v31 = vsel %vm329_vm1, %v2840_v52, 0.0 }
0x1037   :  { %v2842_v51 = vpop.permute.xlu1 %2841  ;;  %2866 = vadd.xlane.f32.xlu0 %v2865_v8  ;;  %2869 = vadd.xlane.f32.xlu1 %v2868_v31 }
0x1038   :  { %v2871_v5 = vsel %vm329_vm1, %v2842_v51, 0.0 }
0x1039   :  { %v2844_v2 = vpop.permute.xlu0 %2843 }
0x103a   :  { %v2874_v3 = vsel %vm329_vm1, %v2844_v2, 0.0 }
0x103b   :  { %2872 = vadd.xlane.f32.xlu0 %v2871_v5  ;;  %2875 = vadd.xlane.f32.xlu1 %v2874_v3  ;;  %v2899_v46 = vpop.permute.xlu1 %2898 }
0x103d   :  { %v2906_v13 = vpop.permute.xlu0 %2905 }
0x103f   :  { %v2913_v53 = vpop.permute.xlu1 %2912 }
0x1041   :  { %v2920_v62 = vpop.permute.xlu0 %2919 }
0x104c   :  { %2926 = vbcast.lane.b32.xlu1 %v10067_v42, 256 }
0x1051   :  { %2933 = vbcast.lane.b32.xlu0 %v10072_v41, 256 }
0x10b6   :  { %v2855_v12 = vpop.xlane.xlu1 %2854 }
0x10b7   :  { %v10075_v7 = vadd.f32 %v2885_v19, %v2855_v12 }
0x10b8   :  { %v2858_v54 = vpop.xlane.xlu0 %2857 }
0x10b9   :  { %2960 = vperm.xlu1 %8570, %v10075_v7   ;;  %v10078_v45 = vadd.f32 %v2892_v37, %v2858_v54 }
0x10bb   :  { %2963 = vperm.xlu0 %8569, %v10078_v45  }
0x10bc   :  { %v2864_v1 = vpop.xlane.xlu1 %2863  ;;  %v2861_v63 = vpop.xlane.xlu0 %2860 }
0x10bd   :  { %v10081_v30 = vadd.f32 %v2906_v13, %v2864_v1  ;;  %v10083_v35 = vadd.f32 %v2899_v46, %v2861_v63 }
0x10bf   :  { %2969 = vperm.xlu0 %8569, %v10081_v30   ;;  %2966 = vperm.xlu1 %8570, %v10083_v35  }
0x10c0   :  { %v2870_v29 = vpop.xlane.xlu1 %2869  ;;  %v2867_v28 = vpop.xlane.xlu0 %2866 }
0x10c1   :  { %v10087_v48 = vadd.f32 %v2920_v62, %v2870_v29  ;;  %v10089_v10 = vadd.f32 %v2913_v53, %v2867_v28 }
0x10c3   :  { %2975 = vperm.xlu0 %8569, %v10087_v48   ;;  %2972 = vperm.xlu1 %8570, %v10089_v10  }
0x10c4   :  { %v2876_v17 = vpop.xlane.xlu1 %2875  ;;  %v2873_v50 = vpop.xlane.xlu0 %2872 }
0x10c8   :  { %v2927_v25 = vpop.permute.xlu1 %2926  ;;  %v2934_v20 = vpop.permute.xlu0 %2933 }
0x10c9   :  { %v10095_v43 = vadd.f32 %v2927_v25, %v2873_v50  ;;  %v10097_v37 = vadd.f32 %v2934_v20, %v2876_v17 }
0x10cb   :  { %2978 = vperm.xlu1 %8570, %v10095_v43   ;;  %2981 = vperm.xlu0 %8569, %v10097_v37  }
0x10cf   :  { %2610 = vrot.lane.b32.xlu0 %v10010_v11, %s9106_s27 }
0x1134   :  { %v2961_v19 = vpop.permute.xlu1 %2960 }
0x1135   :  { %v2986_v39 = vrot.slane %v2961_v19, %v9385_v44 }
0x1136   :  { %v2964_v49 = vpop.permute.xlu0 %2963 }
0x1137   :  { %v2990_v4 = vrot.slane %v2964_v49, %v9385_v44 }
0x1139   :  { %v3015_v47 = vsel %vm548_vm3, %v2990_v4, %v2986_v39 }
0x113a   :  { %v2967_v24 = vpop.permute.xlu1 %2966  ;;  %v2970_v16 = vpop.permute.xlu0 %2969 }
0x113b   :  { %v2994_v18 = vrot.slane %v2967_v24, %v9385_v44  ;;  %v2998_v55 = vrot.slane %v2970_v16, %v9385_v44 }
0x113d   :  { %v3016_v52 = vsel %vm550_vm4, %v2994_v18, %v3015_v47 }
0x113e   :  { %v2973_v14 = vpop.permute.xlu1 %2972  ;;  %v2976_v11 = vpop.permute.xlu0 %2975  ;;  %v3017_v31 = vsel %vm552_vm5, %v2998_v55, %v3016_v52 }
0x113f   :  { %v3002_v8 = vrot.slane %v2973_v14, %v9385_v44  ;;  %v3006_v51 = vrot.slane %v2976_v11, %v9385_v44 }
0x1141   :  { %v3018_v2 = vsel %vm554_vm6, %v3002_v8, %v3017_v31 }
0x1142   :  { %v3019_v53 = vsel %vm556_vm7, %v3006_v51, %v3018_v2 }
0x1146   :  { %v2979_v5 = vpop.permute.xlu1 %2978  ;;  %v2982_v3 = vpop.permute.xlu0 %2981 }
0x1147   :  { %v3010_v46 = vrot.slane %v2979_v5, %v9385_v44  ;;  %v3014_v13 = vrot.slane %v2982_v3, %v9385_v44 }
0x1149   :  { %v3020_v62 = vsel %vm558_vm8, %v3010_v46, %v3019_v53 }
0x114a   :  { %v2611_v12 = vpop.permute.xlu0 %2610  ;;  %v3021_v54 = vsel %vm560_vm9, %v3014_v13, %v3020_v62 }
0x114b   :  { %8414 = vmatmul.mubr.msk.f32.vlgmr.msra.gmra.mxu1 %vm329_vm1, %v2611_v12  ;;  %v3023_v1 = vsel %vm563_vm10, %v3021_v54, -inf }
0x114c   :  { %3024 = vmax.xlane.f32.xlu1 %v3023_v1  ;;  %8428 = vmatpush3.msra.mxu1 %v2608_v27 }
0x114d   :  { %8429 = vmatprep.subr.mxu1 %v11393_v22  ;;  %8435 = vmatprep.mubr.msk.f32.mxu1 %vm9104_vm2, %v11393_v22 }
0x114e   :  { %8430 = vmatpush3.msra.mxu1 %v2607_v60 }
0x114f   :  { %8431 = vmatprep.subr.mxu1 %v11393_v22 }
0x1150   :  { %8432 = vmatpush3.msra.mxu1 %v2606_v58 }
0x1151   :  { %8433 = vmatprep.subr.mxu1 %v11393_v22 }
0x1152   :  { %8434 = vmatpush3.msra.mxu1 %v2605_v26 }
0x1153   :  { %8449 = vmatprep.subr.mxu1 %v11393_v22 }
0x11d5   :  { %v3025_v63 = vpop.xlane.xlu1 %3024 }
0x11d6   :  { %v3030_v29 = vrot.slane %v3025_v63, %v9415_v21  ;;  %v3034_v28 = vrot.slane %v3025_v63, %v9420_v38  ;;  %v3038_v27 = vrot.slane %v3025_v63, %v9469_v36  ;;  %v3042_v25 = vrot.slane %v3025_v63, %v9477_v57 }
0x11d7   :  { %v3046_v20 = vrot.slane %v3025_v63, %v9452_v33  ;;  %v3050_v24 = vrot.slane %v3025_v63, %v9485_v40 }
0x11d8   :  { %v3067_v17 = vsub.f32 %v10075_v7, %v3030_v29  ;;  %v3068_v50 = vsub.f32 %v10078_v45, %v3034_v28  ;;  %v3069_v58 = vsub.f32 %v10083_v35, %v3038_v27  ;;  %v3070_v19 = vsub.f32 %v10081_v30, %v3042_v25 }
0x11d9   :  { %v3071_v16 = vsub.f32 %v10089_v10, %v3046_v20  ;;  %v3054_v45 = vrot.slane %v3025_v63, %v9510_v59  ;;  %v3072_v4 = vsub.f32 %v10087_v48, %v3050_v24  ;;  %v3058_v30 = vrot.slane %v3025_v63, %v9502_v56 }
0x11da   :  { %v3075_v60 = vmul.f32 1.442695, %v3067_v17  ;;  %v3077_v26 = vmul.f32 1.442695, %v3068_v50  ;;  %v3079_v49 = vmul.f32 1.442695, %v3069_v58 }
0x11db   :  { %v3081_v7 = vmul.f32 1.442695, %v3070_v19  ;;  %v3083_v35 = vmul.f32 1.442695, %v3071_v16  ;;  %v3073_v39 = vsub.f32 %v10095_v43, %v3054_v45  ;;  %v3085_v14 = vmul.f32 1.442695, %v3072_v4 }
0x11dc   :  { %8651 = vpow2.f32 %v3075_v60  ;;  %v3074_v10 = vsub.f32 %v10097_v37, %v3058_v30 }
0x11dd   :  { %8653 = vpow2.f32 %v3077_v26  ;;  %v3087_v55 = vmul.f32 1.442695, %v3073_v39 }
0x11de   :  { %8655 = vpow2.f32 %v3079_v49  ;;  %v3089_v48 = vmul.f32 1.442695, %v3074_v10 }
0x11df   :  { %8657 = vpow2.f32 %v3081_v7 }
0x11e0   :  { %8659 = vpow2.f32 %v3083_v35 }
0x11e1   :  { %8661 = vpow2.f32 %v3085_v14 }
0x11e2   :  { %8663 = vpow2.f32 %v3087_v55 }
0x11e3   :  { %8665 = vpow2.f32 %v3089_v48 }
0x11e9   :  { %v10141_v18 = vpop.eup %8651 }
0x11ea   :  { %3100 = vperm.xlu0 %8569, %v10141_v18   ;;  %v8654_v47 = vpop.eup %8653 }
0x11eb   :  { %v8656_v52 = vpop.eup %8655 }
0x11ec   :  { %v8658_v8 = vpop.eup %8657 }
0x11ed   :  { %v8660_v11 = vpop.eup %8659 }
0x11ee   :  { %3103 = vperm.xlu0 %8569, %v8654_v47   ;;  %v8662_v31 = vpop.eup %8661 }
0x11ef   :  { %v8664_v43 = vpop.eup %8663 }
0x11f0   :  { %v8666_v51 = vpop.eup %8665 }
0x11f2   :  { %3106 = vperm.xlu0 %8569, %v8656_v52  }
0x11f6   :  { %3109 = vperm.xlu0 %8569, %v8658_v8  }
0x11fa   :  { %3112 = vperm.xlu0 %8569, %v8660_v11  }
0x11fe   :  { %3115 = vperm.xlu0 %8569, %v8662_v31  }
0x1202   :  { %3118 = vperm.xlu0 %8569, %v8664_v43  }
0x1206   :  { %3121 = vperm.xlu0 %8569, %v8666_v51  }
0x120b   :  { %v10147_v2 = vpop.f32.mrf.mxu1 }
0x120d   :  { %v8415_v37 = vpop.f32.mrf.mxu1 }
0x1265   :  { %v3101_v5 = vpop.permute.xlu0 %3100 }
0x1266   :  { %v3126_v1 = vrot.slane %v3101_v5, %v9385_v44 }
0x1269   :  { %v3104_v3 = vpop.permute.xlu0 %3103 }
0x126a   :  { %v3130_v12 = vrot.slane %v3104_v3, %v9385_v44 }
0x126c   :  { %v3155_v27 = vsel %vm548_vm3, %v3130_v12, %v3126_v1 }
0x126d   :  { %v3107_v46 = vpop.permute.xlu0 %3106 }
0x126e   :  { %v3134_v54 = vrot.slane %v3107_v46, %v9385_v44 }
0x1270   :  { %v3156_v50 = vsel %vm550_vm4, %v3134_v54, %v3155_v27 }
0x1271   :  { %v3110_v13 = vpop.permute.xlu0 %3109 }
0x1272   :  { %v3138_v63 = vrot.slane %v3110_v13, %v9385_v44 }
0x1274   :  { %v3157_v25 = vsel %vm552_vm5, %v3138_v63, %v3156_v50 }
0x1275   :  { %v3113_v53 = vpop.permute.xlu0 %3112 }
0x1276   :  { %v3142_v29 = vrot.slane %v3113_v53, %v9385_v44 }
0x1278   :  { %v3158_v58 = vsel %vm554_vm6, %v3142_v29, %v3157_v25 }
0x1279   :  { %v3116_v62 = vpop.permute.xlu0 %3115 }
0x127a   :  { %v3146_v17 = vrot.slane %v3116_v62, %v9385_v44  ;;  %v10192_v62 = vld [vmem:[#allocation4 + $0x8] sm:$0xff] }
0x127c   :  { %v3159_v20 = vsel %vm556_vm7, %v3146_v17, %v3158_v58  ;;  %v10198_v17 = vld [vmem:[#allocation4 + $0x30] sm:$0xff] }
0x127d   :  { %v3119_v28 = vpop.permute.xlu0 %3118 }
0x127e   :  { %v3150_v60 = vrot.slane %v3119_v28, %v9385_v44 }
0x1280   :  { %v3160_v49 = vsel %vm558_vm8, %v3150_v60, %v3159_v20  ;;  %v10200_v60 = vld [vmem:[#allocation4] sm:$0xff] }
0x1281   :  { %v3122_v26 = vpop.permute.xlu0 %3121 }
0x1282   :  { %v3154_v19 = vrot.slane %v3122_v26, %v9385_v44 }
0x1284   :  { %v3161_v24 = vsel %vm560_vm9, %v3154_v19, %v3160_v49 }
0x1285   :  { %v3163_v16 = vsel %vm563_vm10, %v3161_v24, 0.0 }
0x1286   :  { %3164 = vadd.xlane.f32.xlu1 %v3163_v16 }
0x130f   :  { %v3165_v7 = vpop.xlane.xlu1 %3164 }
0x1310   :  { %8667 = vrcp.f32 %v3165_v7 }
0x131d   :  { %v8668_v45 = vpop.eup %8667 }
0x131e   :  { %v3179_v4 = vrot.slane %v8668_v45, %v9469_v36  ;;  %v3175_v35 = vrot.slane %v8668_v45, %v9420_v38  ;;  %v3195_v14 = vrot.slane %v8668_v45, %v9510_v59  ;;  %v3171_v10 = vrot.slane %v8668_v45, %v9415_v21 }
0x131f   :  { %v3183_v37 = vrot.slane %v8668_v45, %v9477_v57  ;;  %v3187_v3 = vrot.slane %v8668_v45, %v9452_v33  ;;  %v3199_v13 = vrot.slane %v8668_v45, %v9502_v56 }
0x1320   :  { %v3210_v30 = vmul.f32 %v8656_v52, %v3179_v4  ;;  %v3209_v39 = vmul.f32 %v8654_v47, %v3175_v35  ;;  %v3214_v55 = vmul.f32 %v8664_v43, %v3195_v14  ;;  %v3208_v48 = vmul.f32 %v10141_v18, %v3171_v10  ;;  %v10174_v43 = vld [vmem:[#allocation13 + $0x18] sm:$0xff]  ;;  %v10176_v18 = vld [vmem:[#allocation13 + $0x10] sm:$0xff] }
0x1321   :  { %v3211_v5 = vmul.f32 %v8658_v8, %v3183_v37  ;;  %v3212_v46 = vmul.f32 %v8660_v11, %v3187_v3  ;;  %v3191_v47 = vrot.slane %v8668_v45, %v9485_v40  ;;  %v3215_v53 = vmul.f32 %v8666_v51, %v3199_v13  ;;  %8417 = vmatpush3.msra.mxu0 %v10174_v43  ;;  %v10180_v8 = vld [vmem:[#allocation13 + $0x8] sm:$0xff]  ;;  %v10184_v11 = vld [vmem:[#allocation13] sm:$0xff]  ;;  %v10206_v35 = vld [vmem:[#allocation4 + $0x18] sm:$0xff] }
0x1322   :  { %3236 = vperm.xlu1 %8570, %v3210_v30   ;;  %3231 = vperm.xlu0 %8569, %v3209_v39  }
0x1323   :  { %v3213_v52 = vmul.f32 %v8662_v31, %v3191_v47  ;;  %8418 = vmatprep.subr.mxu0 %v11393_v22  ;;  %v10190_v31 = vld [vmem:[#allocation4 + $0x10] sm:$0xff]  ;;  %v10210_v47 = vld [vmem:[#allocation4 + $0x20] sm:$0xff] }
0x1324   :  { %8419 = vmatpush3.msra.mxu0 %v10176_v18 }
0x1325   :  { %8420 = vmatprep.subr.mxu0 %v11393_v22 }
0x1326   :  { %3256 = vperm.xlu1 %8570, %v3214_v55   ;;  %3226 = vperm.xlu0 %8569, %v3208_v48  }
0x1327   :  { %8421 = vmatpush3.msra.mxu0 %v10180_v8 }
0x1328   :  { %8422 = vmatprep.subr.mxu0 %v11393_v22 }
0x1329   :  { %8423 = vmatpush3.msra.mxu0 %v10184_v11 }
0x132a   :  { %3241 = vperm.xlu0 %8569, %v3211_v5   ;;  %8438 = vmatprep.subr.mxu0 %v11393_v22 }
0x132e   :  { %3246 = vperm.xlu0 %8569, %v3212_v46  }
0x1332   :  { %3251 = vperm.xlu0 %8569, %v3213_v52  }
0x1336   :  { %3261 = vperm.xlu0 %8569, %v3215_v53  }
0x139d   :  { %v3237_v51 = vpop.permute.xlu1 %3236  ;;  %v3232_v12 = vpop.permute.xlu0 %3231 }
0x139e   :  { %v3266_v54 = vmul.f32 %v3237_v51, %v10190_v31  ;;  %v3265_v1 = vmul.f32 %v3232_v12, %v10192_v62 }
0x13a0   :  { %v3286_v63 = vsel %vm329_vm1, %v3266_v54, 0.0  ;;  %v3279_v29 = vsel %vm329_vm1, %v3265_v1, 0.0 }
0x13a1   :  { %v3287_v28 = vrot.slane %v3286_v63, 4  ;;  %v3280_v27 = vrot.slane %v3279_v29, 4  ;;  %v3257_v50 = vpop.permute.xlu1 %3256  ;;  %v3227_v25 = vpop.permute.xlu0 %3226 }
0x13a2   :  { %v3270_v58 = vmul.f32 %v3257_v50, %v10198_v17  ;;  %v3264_v26 = vmul.f32 %v3227_v25, %v10200_v60 }
0x13a3   :  { %v3288_v20 = vadd.f32 %v3287_v28, %v3286_v63  ;;  %v3281_v19 = vadd.f32 %v3280_v27, %v3279_v29  ;;  %v10214_v27 = vld [vmem:[#allocation4 + $0x28] sm:$0xff] }
0x13a4   :  { %v3314_v49 = vsel %vm329_vm1, %v3270_v58, 0.0  ;;  %v3272_v24 = vsel %vm329_vm1, %v3264_v26, 0.0 }
0x13a5   :  { %v3289_v16 = vrot.slane %v3288_v20, 2  ;;  %v3282_v7 = vrot.slane %v3281_v19, 2  ;;  %v3315_v45 = vrot.slane %v3314_v49, 4  ;;  %v3273_v4 = vrot.slane %v3272_v24, 4  ;;  %v3242_v30 = vpop.permute.xlu0 %3241 }
0x13a6   :  { %v3267_v39 = vmul.f32 %v3242_v30, %v10206_v35 }
0x13a7   :  { %v3283_v14 = vadd.f32 %v3282_v7, %v3281_v19  ;;  %v3316_v10 = vadd.f32 %v3315_v45, %v3314_v49  ;;  %v3274_v55 = vadd.f32 %v3273_v4, %v3272_v24  ;;  %v3290_v48 = vadd.f32 %v3289_v16, %v3288_v20 }
0x13a8   :  { %v3293_v37 = vsel %vm329_vm1, %v3267_v39, 0.0  ;;  %v3329_v20 = vrot.slane %v10147_v2, 1  ;;  %v3330_v45 = vrot.slane %v10147_v2, 2 }
0x13a9   :  { %v3284_v5 = vrot.slane %v3283_v14, 1  ;;  %v3317_v3 = vrot.slane %v3316_v10, 2  ;;  %v3275_v46 = vrot.slane %v3274_v55, 2  ;;  %v3247_v52 = vpop.permute.xlu0 %3246  ;;  %v3294_v13 = vrot.slane %v3293_v37, 4 }
0x13aa   :  { %v3268_v53 = vmul.f32 %v3247_v52, %v10210_v47  ;;  %v3291_v12 = vrot.slane %v3290_v48, 1 }
0x13ab   :  { %v3276_v51 = vadd.f32 %v3275_v46, %v3274_v55  ;;  %v3295_v54 = vadd.f32 %v3294_v13, %v3293_v37  ;;  %v3285_v63 = vadd.f32 %v3284_v5, %v3283_v14  ;;  %v3318_v29 = vadd.f32 %v3317_v3, %v3316_v10  ;;  %v10220_v14 = vld [vmem:[#allocation4 + $0x38] sm:$0xff]  ;;  %v10225_v55 = vld [vmem:[%s11383_s11] ss:$0 sm:$0xff] }
0x13ac   :  { %v3300_v1 = vsel %vm329_vm1, %v3268_v53, 0.0  ;;  %v3292_v49 = vadd.f32 %v3291_v12, %v3290_v48  ;;  %v3331_v46 = vrot.slane %v10147_v2, 3 }
0x13ad   :  { %v3277_v28 = vrot.slane %v3276_v51, 1  ;;  %v3252_v50 = vpop.permute.xlu0 %3251  ;;  %v3296_v25 = vrot.slane %v3295_v54, 2  ;;  %v3301_v58 = vrot.slane %v3300_v1, 4  ;;  %v3345_v4 = vadd.f32 %v3329_v20, %v3285_v63 }
0x13ae   :  { %v3269_v26 = vmul.f32 %v3252_v50, %v10214_v27  ;;  %v3319_v30 = vrot.slane %v3318_v29, 1  ;;  %v3346_v13 = vadd.f32 %v3330_v45, %v3292_v49 }
0x13af   :  { %v3278_v19 = vadd.f32 %v3277_v28, %v3276_v51  ;;  %v3297_v24 = vadd.f32 %v3296_v25, %v3295_v54  ;;  %v3302_v16 = vadd.f32 %v3301_v58, %v3300_v1  ;;  %v3360_v54 = vadd.f32 %v10225_v55, %v3345_v4 }
0x13b0   :  { %v3307_v7 = vsel %vm329_vm1, %v3269_v26, 0.0  ;;  %v3320_v28 = vadd.f32 %v3319_v30, %v3318_v29  ;;  %v3334_v26 = vrot.slane %v10147_v2, 6  ;;  %v3333_v30 = vrot.slane %v10147_v2, 5 }
0x13b1   :  { %v3308_v39 = vrot.slane %v3307_v7, 4  ;;  %v3262_v10 = vpop.permute.xlu0 %3261  ;;  %v3344_v37 = vadd.f32 %v3278_v19, %v10147_v2  ;;  %v3298_v48 = vrot.slane %v3297_v24, 1  ;;  %v3303_v5 = vrot.slane %v3302_v16, 2 }
0x13b2   :  { %v3271_v3 = vmul.f32 %v3262_v10, %v10220_v14  ;;  %8669 = vtanh.f32 %v3360_v54 }
0x13b3   :  { %v3309_v52 = vadd.f32 %v3308_v39, %v3307_v7  ;;  %v3299_v53 = vadd.f32 %v3298_v48, %v3297_v24  ;;  %v3304_v51 = vadd.f32 %v3303_v5, %v3302_v16  ;;  %v3359_v50 = vadd.f32 %v10225_v55, %v3344_v37 }
0x13b4   :  { %v3321_v12 = vsel %vm329_vm1, %v3271_v3, 0.0  ;;  %v3361_v7 = vadd.f32 %v10225_v55, %v3346_v13  ;;  %v3332_v24 = vrot.slane %v10147_v2, 4  ;;  %v3350_v39 = vadd.f32 %v3334_v26, %v3320_v28 }
0x13b5   :  { %v3310_v1 = vrot.slane %v3309_v52, 2  ;;  %v3322_v63 = vrot.slane %v3321_v12, 4  ;;  %v3347_v25 = vadd.f32 %v3331_v46, %v3299_v53  ;;  %v3305_v58 = vrot.slane %v3304_v51, 1 }
0x13b6   :  { %8671 = vtanh.f32 %v3359_v50  ;;  %v3365_v46 = vadd.f32 %v10225_v55, %v3350_v39  ;;  %v3335_v13 = vrot.slane %v10147_v2, 7 }
0x13b7   :  { %v3311_v20 = vadd.f32 %v3310_v1, %v3309_v52  ;;  %v3323_v19 = vadd.f32 %v3322_v63, %v3321_v12  ;;  %v3362_v49 = vadd.f32 %v10225_v55, %v3347_v25  ;;  %v3306_v16 = vadd.f32 %v3305_v58, %v3304_v51 }
0x13b9   :  { %v3312_v45 = vrot.slane %v3311_v20, 1  ;;  %v3324_v4 = vrot.slane %v3323_v19, 2  ;;  %v3348_v29 = vadd.f32 %v3332_v24, %v3306_v16  ;;  %8673 = vtanh.f32 %v3362_v49 }
0x13ba   :  { %8675 = vtanh.f32 %v3361_v7 }
0x13bb   :  { %v3313_v10 = vadd.f32 %v3312_v45, %v3311_v20  ;;  %v3325_v37 = vadd.f32 %v3324_v4, %v3323_v19  ;;  %v3363_v48 = vadd.f32 %v10225_v55, %v3348_v29 }
0x13bd   :  { %v3349_v5 = vadd.f32 %v3333_v30, %v3313_v10  ;;  %v3326_v3 = vrot.slane %v3325_v37, 1  ;;  %8677 = vtanh.f32 %v3363_v48  ;;  %v10262_v48 = vld [vmem:[#allocation15] ss:$0 sm:$0xff] }
0x13bf   :  { %v3364_v52 = vadd.f32 %v10225_v55, %v3349_v5  ;;  %v3327_v53 = vadd.f32 %v3326_v3, %v3325_v37  ;;  %v8670_v54 = vpop.eup %8669 }
0x13c0   :  { %v3383_v50 = vrot.slane %v8670_v54, 7  ;;  %v10272_v54 = vld [vmem:[#allocation3 + $0x8] sm:$0xff] }
0x13c1   :  { %8679 = vtanh.f32 %v3364_v52  ;;  %v3351_v51 = vadd.f32 %v3335_v13, %v3327_v53 }
0x13c2   :  { %8681 = vtanh.f32 %v3365_v46  ;;  %v10266_v46 = vld [vmem:[#allocation12] ss:$0 sm:$0xff] }
0x13c3   :  { %v3366_v12 = vadd.f32 %v10225_v55, %v3351_v51  ;;  %v8672_v1 = vpop.eup %8671 }
0x13c4   :  { %v3384_v26 = vsel %vm548_vm3, %v3383_v50, %v8672_v1  ;;  %v10276_v1 = vld [vmem:[#allocation3 + $0x18] sm:$0xff] }
0x13c5   :  { %8683 = vtanh.f32 %v3366_v12 }
0x13c6   :  { %v8674_v63 = vpop.eup %8673 }
0x13c7   :  { %v8676_v28 = vpop.eup %8675  ;;  %v3387_v58 = vrot.slane %v8674_v63, 5  ;;  %v10284_v63 = vld [vmem:[#allocation3 + $0x38] sm:$0xff] }
0x13c8   :  { %v3385_v20 = vrot.slane %v8676_v28, 6 }
0x13ca   :  { %v8678_v25 = vpop.eup %8677  ;;  %v3386_v2 = vsel %vm550_vm4, %v3385_v20, %v3384_v26  ;;  %v10294_v26 = vld [vmem:[#allocation3 + $0x10] sm:$0xff]  ;;  %v10298_v20 = vld [vmem:[#allocation3 + $0x20] sm:$0xff] }
0x13cb   :  { %v3389_v19 = vrot.slane %v8678_v25, 4  ;;  %v3388_v24 = vsel %vm552_vm5, %v3387_v58, %v3386_v2  ;;  %v10290_v58 = vld [vmem:[#allocation3] sm:$0xff] }
0x13cd   :  { %v3390_v45 = vsel %vm554_vm6, %v3389_v19, %v3388_v24 }
0x13ce   :  { %v8680_v7 = vpop.eup %8679 }
0x13cf   :  { %v8682_v49 = vpop.eup %8681  ;;  %v3391_v16 = vrot.slane %v8680_v7, 3 }
0x13d0   :  { %v3393_v29 = vrot.slane %v8682_v49, 2 }
0x13d1   :  { %v3392_v4 = vsel %vm556_vm7, %v3391_v16, %v3390_v45 }
0x13d2   :  { %v8684_v39 = vpop.eup %8683  ;;  %v3394_v10 = vsel %vm558_vm8, %v3393_v29, %v3392_v4 }
0x13d3   :  { %v3395_v30 = vrot.slane %v8684_v39, 1 }
0x13d5   :  { %v3396_v37 = vsel %vm560_vm9, %v3395_v30, %v3394_v10 }
0x13d6   :  { %3398 = vst.msk [vmem:[#allocation6 + $0x10] sm:$0xff] %vm329_vm1, %v3396_v37  ;;  %8425 = vmatmul.mubr.msk.f32.vlgmr.msra.gmra.mxu0 %vm329_vm1, %v3396_v37 }
0x13d7   :  { %8439 = vmatpush3.msra.mxu0 %v10174_v43  ;;  %8446 = vmatprep.mubr.msk.f32.mxu0 %vm9104_vm2, %v11393_v22 }
0x13d8   :  { %8440 = vmatprep.subr.mxu0 %v11393_v22 }
0x13d9   :  { %8441 = vmatpush3.msra.mxu0 %v10176_v18  ;;  %v286_v18 = vadd.f32 %v10266_v46, %v9667_v61  ;;  %v10280_v61 = vld [vmem:[#allocation3 + $0x28] sm:$0xff] }
0x13da   :  { %8442 = vmatprep.subr.mxu0 %v11393_v22 }
0x13db   :  { %8443 = vmatpush3.msra.mxu0 %v10180_v8 }
0x13dc   :  { %8444 = vmatprep.subr.mxu0 %v11393_v22 }
0x13dd   :  { %8445 = vmatpush3.msra.mxu0 %v10184_v11 }
0x13de   :  { %8460 = vmatprep.subr.mxu0 %v11393_v22 }
0x1496   :  { %v3479_v43 = vpop.f32.mrf.mxu0 }
0x1497   :  { %v3480_v5 = vadd.f32 %v10262_v48, %v3479_v43 }
0x1498   :  { %v8426_v3 = vpop.f32.mrf.mxu0 }
0x1499   :  { %3489 = vrot.lane.b32.xlu1 %v3480_v5, %s9105_s2  ;;  %v3483_v8 = vadd.f32 %v3480_v5, %v286_v18 }
0x149b   :  { %v3484_v52 = vmul.f32 0.5, %v3483_v8 }
0x149d   :  { %8685 = vtanh.f32 %v3484_v52 }
0x14aa   :  { %v8686_v13 = vpop.eup %8685 }
0x14ab   :  { %v3486_v11 = vadd.f32 1.0, %v8686_v13 }
0x14ad   :  { %v3487_v53 = vmul.f32 0.5, %v3486_v11 }
0x14af   :  { %v3499_v7 = vsub.f32 1.0, %v3487_v53 }
0x150b   :  { %v3490_v51 = vpop.permute.xlu1 %3489 }
0x150c   :  { %v3492_v12 = vmul.f32 %v3490_v51, %v3487_v53 }
0x150e   :  { %3494 = vrot.lane.b32.xlu0 %v3492_v12, %s9105_s2 }
0x1512   :  { %3505 = vrot.lane.b32.xlu0 %v3396_v37, %s9102_s21 }
0x1516   :  { %3696 = vrot.lane.b32.xlu0 %v10272_v54, %s9102_s21 }
0x151a   :  { %3700 = vrot.lane.b32.xlu0 %v10276_v1, %s9102_s21 }
0x151e   :  { %3704 = vrot.lane.b32.xlu0 %v10280_v61, %s9102_s21 }
0x1522   :  { %3708 = vrot.lane.b32.xlu0 %v10284_v63, %s9102_s21 }
0x1526   :  { %3796 = vbcast.lane.b32.xlu0 %v10007_v23, 256  ;;  %v10302_v23 = vld [vmem:[#allocation3 + $0x30] sm:$0xff] }
0x1580   :  { %v3495_v28 = vpop.permute.xlu0 %3494 }
0x1581   :  { %v3497_v50 = vadd.f32 %v3495_v28, %v286_v18 }
0x1583   :  { %8687 = vtanh.f32 %v3497_v50 }
0x1584   :  { %v3506_v19 = vpop.permute.xlu0 %3505 }
0x1585   :  { %v3508_v49 = vmul.f32 %v3506_v19, %v3487_v53 }
0x1588   :  { %v3697_v29 = vpop.permute.xlu0 %3696 }
0x158c   :  { %v3701_v51 = vpop.permute.xlu0 %3700 }
0x1590   :  { %v8688_v25 = vpop.eup %8687 }
0x1591   :  { %3501 = vrot.lane.b32.xlu1 %v8688_v25, %s9106_s27 }
0x1595   :  { %3694 = vrot.lane.b32.xlu1 %v10290_v58, %s9102_s21 }
0x1599   :  { %3698 = vrot.lane.b32.xlu1 %v10294_v26, %s9102_s21 }
0x159d   :  { %3702 = vrot.lane.b32.xlu1 %v10298_v20, %s9102_s21 }
0x15a1   :  { %3706 = vrot.lane.b32.xlu1 %v10302_v23, %s9102_s21 }
0x15a5   :  { %3789 = vbcast.lane.b32.xlu1 %v9993_v9, 256 }
0x1603   :  { %v3502_v2 = vpop.permute.xlu1 %3501 }
0x1604   :  { %v3504_v24 = vmul.f32 %v3502_v2, %v3499_v7 }
0x1606   :  { %v10307_v16 = vadd.f32 %v3508_v49, %v3504_v24 }
0x1607   :  { %v3695_v45 = vpop.permute.xlu1 %3694 }
0x1608   :  { %v3589_v4 = vcombine.high %v10307_v16, %v10307_v16  ;;  %v3596_v39 = vrot.slane %v10307_v16, %v9396_v0 }
0x160a   :  { %v3604_v30 = vcombine.high %v3596_v39, %v3596_v39  ;;  %v3612_v10 = vrot.slane %v3596_v39, %v9396_v0  ;;  %v3603_v9 = vrot.slane %v3589_v4, %v9396_v0  ;;  %v3705_v4 = vpop.permute.xlu0 %3704 }
0x160b   :  { %v3699_v37 = vpop.permute.xlu1 %3698 }
0x160c   :  { %v3649_v43 = vrot.slane %v3612_v10, %v9415_v21  ;;  %v3634_v5 = vcombine.high %v3612_v10, %v3612_v10  ;;  %v3605_v3 = vcombine.high %v3603_v9, %v3603_v9  ;;  %v3626_v18 = vrot.slane %v3604_v30, %v9396_v0 }
0x160d   :  { %v3619_v13 = vrot.slane %v3603_v9, %v9396_v0 }
0x160e   :  { %v3718_v8 = vmul.f32 %v3695_v45, %v3649_v43  ;;  %v3657_v52 = vrot.slane %v3634_v5, %v9415_v21  ;;  %v3653_v11 = vrot.slane %v3626_v18, %v9415_v21  ;;  %v3636_v53 = vcombine.high %v3626_v18, %v3626_v18  ;;  %v3709_v43 = vpop.permute.xlu0 %3708 }
0x160f   :  { %v3703_v12 = vpop.permute.xlu1 %3702  ;;  %v3633_v25 = vrot.slane %v3605_v3, %v9396_v0  ;;  %v3665_v7 = vrot.slane %v3619_v13, %v9415_v21  ;;  %v3635_v2 = vcombine.high %v3619_v13, %v3619_v13 }
0x1610   :  { %3734 = vrot.lane.b32.xlu1 %v3718_v8, %s9106_s27  ;;  %v3719_v28 = vmul.f32 %v3697_v29, %v3653_v11  ;;  %v3661_v50 = vrot.slane %v3636_v53, %v9415_v21  ;;  %v3720_v19 = vmul.f32 %v3699_v37, %v3657_v52 }
0x1611   :  { %v3669_v24 = vrot.slane %v3633_v25, %v9415_v21  ;;  %v3637_v45 = vcombine.high %v3633_v25, %v3633_v25  ;;  %v3722_v39 = vmul.f32 %v3703_v12, %v3665_v7  ;;  %v3673_v29 = vrot.slane %v3635_v2, %v9415_v21 }
0x1612   :  { %3736 = vrot.lane.b32.xlu0 %v3719_v28, %s9106_s27  ;;  %v3721_v49 = vmul.f32 %v3701_v51, %v3661_v50  ;;  %v3797_v18 = vpop.permute.xlu0 %3796 }
0x1613   :  { %v3707_v30 = vpop.permute.xlu1 %3706  ;;  %v3723_v10 = vmul.f32 %v3705_v4, %v3669_v24  ;;  %v3677_v9 = vrot.slane %v3637_v45, %v9415_v21 }
0x1614   :  { %3738 = vrot.lane.b32.xlu1 %v3720_v19, %s9106_s27  ;;  %v3724_v37 = vmul.f32 %v3707_v30, %v3673_v29 }
0x1615   :  { %v3725_v5 = vmul.f32 %v3709_v43, %v3677_v9 }
0x1616   :  { %3740 = vrot.lane.b32.xlu0 %v3721_v49, %s9106_s27 }
0x1617   :  { %v3790_v3 = vpop.permute.xlu1 %3789 }
0x1618   :  { %3742 = vrot.lane.b32.xlu1 %v3722_v39, %s9106_s27 }
0x161a   :  { %3744 = vrot.lane.b32.xlu0 %v3723_v10, %s9106_s27 }
0x161c   :  { %3746 = vrot.lane.b32.xlu1 %v3724_v37, %s9106_s27 }
0x161e   :  { %3748 = vrot.lane.b32.xlu0 %v3725_v5, %s9106_s27 }
0x1620   :  { %3803 = vbcast.lane.b32.xlu1 %v10038_v6, 256 }
0x1622   :  { %3824 = vbcast.lane.b32.xlu0 %v10054_v15, 256 }
0x1624   :  { %3810 = vbcast.lane.b32.xlu1 %v10044_v32, 256 }
0x1628   :  { %3817 = vbcast.lane.b32.xlu1 %v10048_v34, 256 }
0x1682   :  { %v3735_v8 = vpop.permute.xlu1 %3734 }
0x1683   :  { %v3758_v52 = vsel %vm329_vm1, %v3735_v8, 0.0 }
0x1684   :  { %3759 = vadd.xlane.f32.xlu1 %v3758_v52  ;;  %v3737_v13 = vpop.permute.xlu0 %3736 }
0x1685   :  { %v3761_v53 = vsel %vm329_vm1, %v3737_v13, 0.0 }
0x1686   :  { %v3739_v11 = vpop.permute.xlu1 %3738  ;;  %3762 = vadd.xlane.f32.xlu0 %v3761_v53 }
0x1687   :  { %v3764_v6 = vsel %vm329_vm1, %v3739_v11, 0.0 }
0x1688   :  { %v3741_v51 = vpop.permute.xlu0 %3740 }
0x1689   :  { %v3767_v28 = vsel %vm329_vm1, %v3741_v51, 0.0 }
0x168a   :  { %v3743_v12 = vpop.permute.xlu1 %3742  ;;  %3765 = vadd.xlane.f32.xlu0 %v3764_v6 }
0x168b   :  { %v3770_v32 = vsel %vm329_vm1, %v3743_v12, 0.0 }
0x168c   :  { %3771 = vadd.xlane.f32.xlu1 %v3770_v32  ;;  %v3745_v34 = vpop.permute.xlu0 %3744 }
0x168d   :  { %v3773_v25 = vsel %vm329_vm1, %v3745_v34, 0.0 }
0x168e   :  { %v3747_v15 = vpop.permute.xlu1 %3746  ;;  %3768 = vadd.xlane.f32.xlu0 %v3767_v28 }
0x168f   :  { %v3776_v50 = vsel %vm329_vm1, %v3747_v15, 0.0 }
0x1690   :  { %3777 = vadd.xlane.f32.xlu1 %v3776_v50  ;;  %v3749_v19 = vpop.permute.xlu0 %3748 }
0x1691   :  { %v3779_v7 = vsel %vm329_vm1, %v3749_v19, 0.0 }
0x1692   :  { %3774 = vadd.xlane.f32.xlu0 %v3773_v25  ;;  %v3804_v2 = vpop.permute.xlu1 %3803 }
0x1694   :  { %v3825_v45 = vpop.permute.xlu0 %3824 }
0x1696   :  { %3780 = vadd.xlane.f32.xlu0 %v3779_v7  ;;  %v3811_v49 = vpop.permute.xlu1 %3810 }
0x169a   :  { %v3818_v24 = vpop.permute.xlu1 %3817 }
0x16a1   :  { %3831 = vbcast.lane.b32.xlu1 %v10067_v42, 256 }
0x16ac   :  { %3838 = vbcast.lane.b32.xlu0 %v10072_v41, 256 }
0x170d   :  { %v3760_v4 = vpop.xlane.xlu1 %3759 }
0x170e   :  { %v3848_v39 = vadd.f32 %v3790_v3, %v3760_v4 }
0x170f   :  { %v3763_v30 = vpop.xlane.xlu0 %3762 }
0x1710   :  { %3865 = vperm.xlu1 %8570, %v3848_v39   ;;  %v3849_v29 = vadd.f32 %v3797_v18, %v3763_v30 }
0x1712   :  { %3868 = vperm.xlu0 %8569, %v3849_v29  }
0x1713   :  { %v3766_v10 = vpop.xlane.xlu0 %3765 }
0x1714   :  { %v3850_v9 = vadd.f32 %v3804_v2, %v3766_v10 }
0x1715   :  { %v3772_v37 = vpop.xlane.xlu1 %3771 }
0x1716   :  { %3871 = vperm.xlu1 %8570, %v3850_v9   ;;  %v3852_v5 = vadd.f32 %v3818_v24, %v3772_v37 }
0x1717   :  { %v3769_v43 = vpop.xlane.xlu0 %3768 }
0x1718   :  { %v3851_v8 = vadd.f32 %v3811_v49, %v3769_v43 }
0x1719   :  { %v3778_v42 = vpop.xlane.xlu1 %3777 }
0x171a   :  { %3877 = vperm.xlu1 %8570, %v3852_v5   ;;  %3874 = vperm.xlu0 %8569, %v3851_v8  }
0x171b   :  { %v3775_v41 = vpop.xlane.xlu0 %3774 }
0x171c   :  { %v3853_v52 = vadd.f32 %v3825_v45, %v3775_v41 }
0x171d   :  { %v3832_v13 = vpop.permute.xlu1 %3831 }
0x171e   :  { %v3854_v11 = vadd.f32 %v3832_v13, %v3778_v42  ;;  %3880 = vperm.xlu0 %8569, %v3853_v52  }
0x171f   :  { %v3781_v3 = vpop.xlane.xlu0 %3780 }
0x1720   :  { %3883 = vperm.xlu1 %8570, %v3854_v11  }
0x1723   :  { %v3839_v53 = vpop.permute.xlu0 %3838 }
0x1724   :  { %v3855_v18 = vadd.f32 %v3839_v53, %v3781_v3 }
0x1726   :  { %3886 = vperm.xlu0 %8569, %v3855_v18  }
0x172a   :  { %3515 = vrot.lane.b32.xlu0 %v10307_v16, %s9106_s27 }
0x178b   :  { %v3866_v51 = vpop.permute.xlu1 %3865 }
0x178c   :  { %v3891_v28 = vrot.slane %v3866_v51, %v9385_v44 }
0x178d   :  { %v3869_v12 = vpop.permute.xlu0 %3868 }
0x178e   :  { %v3895_v34 = vrot.slane %v3869_v12, %v9385_v44 }
0x1790   :  { %v3920_v7 = vsel %vm548_vm3, %v3895_v34, %v3891_v28 }
0x1791   :  { %v3872_v6 = vpop.permute.xlu1 %3871 }
0x1792   :  { %v3899_v15 = vrot.slane %v3872_v6, %v9385_v44 }
0x1794   :  { %v3921_v2 = vsel %vm550_vm4, %v3899_v15, %v3920_v7 }
0x1795   :  { %v3875_v32 = vpop.permute.xlu0 %3874  ;;  %v3878_v50 = vpop.permute.xlu1 %3877 }
0x1796   :  { %v3903_v25 = vrot.slane %v3875_v32, %v9385_v44  ;;  %v3907_v16 = vrot.slane %v3878_v50, %v9385_v44 }
0x1798   :  { %v3922_v49 = vsel %vm552_vm5, %v3903_v25, %v3921_v2 }
0x1799   :  { %v3881_v19 = vpop.permute.xlu0 %3880  ;;  %v3923_v4 = vsel %vm554_vm6, %v3907_v16, %v3922_v49 }
0x179a   :  { %v3911_v24 = vrot.slane %v3881_v19, %v9385_v44 }
0x179b   :  { %v3884_v45 = vpop.permute.xlu1 %3883 }
0x179c   :  { %v3915_v30 = vrot.slane %v3884_v45, %v9385_v44  ;;  %v3924_v10 = vsel %vm556_vm7, %v3911_v24, %v3923_v4 }
0x179e   :  { %v3925_v42 = vsel %vm558_vm8, %v3915_v30, %v3924_v10 }
0x17a1   :  { %v3887_v37 = vpop.permute.xlu0 %3886 }
0x17a2   :  { %v3919_v43 = vrot.slane %v3887_v37, %v9385_v44 }
0x17a4   :  { %v3926_v41 = vsel %vm560_vm9, %v3919_v43, %v3925_v42 }
0x17a5   :  { %v3516_v13 = vpop.permute.xlu0 %3515  ;;  %v3928_v3 = vsel %vm563_vm10, %v3926_v41, -inf }
0x17a6   :  { %3929 = vmax.xlane.f32.xlu1 %v3928_v3  ;;  %8436 = vmatmul.mubr.msk.f32.vlgmr.msra.gmra.mxu1 %vm329_vm1, %v3516_v13 }
0x17a7   :  { %8457 = vmatprep.mubr.msk.f32.mxu1 %vm9104_vm2, %v11393_v22 }
0x182f   :  { %v3930_v53 = vpop.xlane.xlu1 %3929 }
0x1830   :  { %v3935_v51 = vrot.slane %v3930_v53, %v9415_v21  ;;  %v3939_v12 = vrot.slane %v3930_v53, %v9420_v38  ;;  %v3943_v6 = vrot.slane %v3930_v53, %v9469_v36  ;;  %v3947_v28 = vrot.slane %v3930_v53, %v9477_v57 }
0x1831   :  { %v3951_v19 = vrot.slane %v3930_v53, %v9452_v33  ;;  %v3955_v16 = vrot.slane %v3930_v53, %v9485_v40  ;;  %v3959_v45 = vrot.slane %v3930_v53, %v9510_v59 }
0x1832   :  { %v3972_v32 = vsub.f32 %v3848_v39, %v3935_v51  ;;  %v3973_v34 = vsub.f32 %v3849_v29, %v3939_v12  ;;  %v3974_v50 = vsub.f32 %v3850_v9, %v3943_v6  ;;  %v3975_v7 = vsub.f32 %v3851_v8, %v3947_v28 }
0x1833   :  { %v3976_v49 = vsub.f32 %v3852_v5, %v3951_v19  ;;  %v3977_v39 = vsub.f32 %v3853_v52, %v3955_v16  ;;  %v3963_v9 = vrot.slane %v3930_v53, %v9502_v56  ;;  %v3978_v30 = vsub.f32 %v3854_v11, %v3959_v45 }
0x1834   :  { %v3980_v15 = vmul.f32 1.442695, %v3972_v32  ;;  %v3982_v25 = vmul.f32 1.442695, %v3973_v34  ;;  %v3984_v2 = vmul.f32 1.442695, %v3974_v50 }
0x1835   :  { %v3986_v24 = vmul.f32 1.442695, %v3975_v7  ;;  %v3988_v29 = vmul.f32 1.442695, %v3976_v49  ;;  %v3990_v8 = vmul.f32 1.442695, %v3977_v39  ;;  %v3979_v37 = vsub.f32 %v3855_v18, %v3963_v9 }
0x1836   :  { %8689 = vpow2.f32 %v3980_v15  ;;  %v3992_v5 = vmul.f32 1.442695, %v3978_v30 }
0x1837   :  { %8691 = vpow2.f32 %v3982_v25  ;;  %v3994_v52 = vmul.f32 1.442695, %v3979_v37 }
0x1838   :  { %8693 = vpow2.f32 %v3984_v2 }
0x1839   :  { %8695 = vpow2.f32 %v3986_v24 }
0x183a   :  { %8697 = vpow2.f32 %v3988_v29 }
0x183b   :  { %8699 = vpow2.f32 %v3990_v8 }
0x183c   :  { %8701 = vpow2.f32 %v3992_v5 }
0x183d   :  { %8703 = vpow2.f32 %v3994_v52 }
0x1843   :  { %v10376_v4 = vpop.eup %8689 }
0x1844   :  { %4005 = vperm.xlu0 %8569, %v10376_v4   ;;  %v8692_v10 = vpop.eup %8691 }
0x1845   :  { %v8694_v43 = vpop.eup %8693 }
0x1846   :  { %v8696_v42 = vpop.eup %8695 }
0x1847   :  { %v8698_v41 = vpop.eup %8697 }
0x1848   :  { %4008 = vperm.xlu0 %8569, %v8692_v10   ;;  %v8700_v13 = vpop.eup %8699 }
0x1849   :  { %v8702_v3 = vpop.eup %8701 }
0x184a   :  { %v8704_v11 = vpop.eup %8703 }
0x184c   :  { %4011 = vperm.xlu0 %8569, %v8694_v43  }
0x1850   :  { %4014 = vperm.xlu0 %8569, %v8696_v42  }
0x1854   :  { %4017 = vperm.xlu0 %8569, %v8698_v41  }
0x1858   :  { %4020 = vperm.xlu0 %8569, %v8700_v13  }
0x185c   :  { %4023 = vperm.xlu0 %8569, %v8702_v3  }
0x1860   :  { %4026 = vperm.xlu0 %8569, %v8704_v11  }
0x1866   :  { %v10380_v53 = vpop.f32.mrf.mxu1 }
0x1868   :  { %v8437_v18 = vpop.f32.mrf.mxu1 }
0x18bf   :  { %v4006_v51 = vpop.permute.xlu0 %4005 }
0x18c0   :  { %v4031_v25 = vrot.slane %v4006_v51, %v9385_v44 }
0x18c3   :  { %v4009_v12 = vpop.permute.xlu0 %4008 }
0x18c4   :  { %v4035_v28 = vrot.slane %v4009_v12, %v9385_v44 }
0x18c6   :  { %v4060_v16 = vsel %vm548_vm3, %v4035_v28, %v4031_v25 }
0x18c7   :  { %v4012_v6 = vpop.permute.xlu0 %4011 }
0x18c8   :  { %v4039_v50 = vrot.slane %v4012_v6, %v9385_v44 }
0x18ca   :  { %v4061_v24 = vsel %vm550_vm4, %v4039_v50, %v4060_v16 }
0x18cb   :  { %v4015_v32 = vpop.permute.xlu0 %4014 }
0x18cc   :  { %v4043_v19 = vrot.slane %v4015_v32, %v9385_v44 }
0x18ce   :  { %v4062_v39 = vsel %vm552_vm5, %v4043_v19, %v4061_v24 }
0x18cf   :  { %v4018_v34 = vpop.permute.xlu0 %4017 }
0x18d0   :  { %v4047_v7 = vrot.slane %v4018_v34, %v9385_v44 }
0x18d2   :  { %v4063_v29 = vsel %vm554_vm6, %v4047_v7, %v4062_v39 }
0x18d3   :  { %v4021_v15 = vpop.permute.xlu0 %4020 }
0x18d4   :  { %v4051_v49 = vrot.slane %v4021_v15, %v9385_v44 }
0x18d6   :  { %v4064_v30 = vsel %vm556_vm7, %v4051_v49, %v4063_v29 }
0x18d7   :  { %v4024_v2 = vpop.permute.xlu0 %4023 }
0x18d8   :  { %v4055_v45 = vrot.slane %v4024_v2, %v9385_v44 }
0x18da   :  { %v4065_v37 = vsel %vm558_vm8, %v4055_v45, %v4064_v30 }
0x18db   :  { %v4027_v9 = vpop.permute.xlu0 %4026 }
0x18dc   :  { %v4059_v8 = vrot.slane %v4027_v9, %v9385_v44 }
0x18de   :  { %v4066_v5 = vsel %vm560_vm9, %v4059_v8, %v4065_v37 }
0x18df   :  { %v4068_v52 = vsel %vm563_vm10, %v4066_v5, 0.0 }
0x18e0   :  { %4069 = vadd.xlane.f32.xlu1 %v4068_v52 }
0x1969   :  { %v4070_v18 = vpop.xlane.xlu1 %4069 }
0x196a   :  { %8705 = vrcp.f32 %v4070_v18 }
0x1977   :  { %v8706_v51 = vpop.eup %8705 }
0x1978   :  { %v4084_v12 = vrot.slane %v8706_v51, %v9469_v36  ;;  %v4080_v6 = vrot.slane %v8706_v51, %v9420_v38  ;;  %v4104_v15 = vrot.slane %v8706_v51, %v9502_v56  ;;  %v4076_v28 = vrot.slane %v8706_v51, %v9415_v21 }
0x1979   :  { %v4088_v19 = vrot.slane %v8706_v51, %v9477_v57  ;;  %v4092_v2 = vrot.slane %v8706_v51, %v9452_v33  ;;  %v4100_v49 = vrot.slane %v8706_v51, %v9510_v59 }
0x197a   :  { %v4115_v32 = vmul.f32 %v8694_v43, %v4084_v12  ;;  %v4114_v34 = vmul.f32 %v8692_v10, %v4080_v6  ;;  %v4120_v50 = vmul.f32 %v8704_v11, %v4104_v15  ;;  %v4113_v25 = vmul.f32 %v10376_v4, %v4076_v28 }
0x197b   :  { %v4116_v7 = vmul.f32 %v8696_v42, %v4088_v19  ;;  %v4117_v16 = vmul.f32 %v8698_v41, %v4092_v2  ;;  %v4096_v10 = vrot.slane %v8706_v51, %v9485_v40  ;;  %v4119_v24 = vmul.f32 %v8702_v3, %v4100_v49 }
0x197c   :  { %4141 = vperm.xlu1 %8570, %v4115_v32   ;;  %4136 = vperm.xlu0 %8569, %v4114_v34  }
0x197d   :  { %v4118_v43 = vmul.f32 %v8700_v13, %v4096_v10 }
0x1980   :  { %4166 = vperm.xlu1 %8570, %v4120_v50   ;;  %4131 = vperm.xlu0 %8569, %v4113_v25  }
0x1984   :  { %4146 = vperm.xlu0 %8569, %v4116_v7  }
0x1988   :  { %4151 = vperm.xlu0 %8569, %v4117_v16  }
0x198c   :  { %4156 = vperm.xlu0 %8569, %v4118_v43  }
0x1990   :  { %4161 = vperm.xlu0 %8569, %v4119_v24  }
0x19f7   :  { %v4142_v11 = vpop.permute.xlu1 %4141  ;;  %v4137_v4 = vpop.permute.xlu0 %4136 }
0x19f8   :  { %v4171_v45 = vmul.f32 %v4142_v11, %v10190_v31  ;;  %v4170_v39 = vmul.f32 %v4137_v4, %v10192_v62 }
0x19fa   :  { %v4191_v42 = vsel %vm329_vm1, %v4171_v45, 0.0  ;;  %v4184_v29 = vsel %vm329_vm1, %v4170_v39, 0.0 }
0x19fb   :  { %v4192_v41 = vrot.slane %v4191_v42, 4  ;;  %v4185_v9 = vrot.slane %v4184_v29, 4  ;;  %v4167_v30 = vpop.permute.xlu1 %4166  ;;  %v4132_v8 = vpop.permute.xlu0 %4131 }
0x19fc   :  { %v4176_v13 = vmul.f32 %v4167_v30, %v10220_v14  ;;  %v4169_v37 = vmul.f32 %v4132_v8, %v10200_v60  ;;  %v4235_v8 = vrot.slane %v10380_v53, 2 }
0x19fd   :  { %v4193_v3 = vadd.f32 %v4192_v41, %v4191_v42  ;;  %v4186_v5 = vadd.f32 %v4185_v9, %v4184_v29 }
0x19fe   :  { %v4226_v52 = vsel %vm329_vm1, %v4176_v13, 0.0  ;;  %v4177_v31 = vsel %vm329_vm1, %v4169_v37, 0.0  ;;  %v4234_v13 = vrot.slane %v10380_v53, 1 }
0x19ff   :  { %v4194_v18 = vrot.slane %v4193_v3, 2  ;;  %v4187_v62 = vrot.slane %v4186_v5, 2  ;;  %v4227_v51 = vrot.slane %v4226_v52, 4  ;;  %v4178_v12 = vrot.slane %v4177_v31, 4  ;;  %v4147_v6 = vpop.permute.xlu0 %4146 }
0x1a00   :  { %v4172_v32 = vmul.f32 %v4147_v6, %v10206_v35 }
0x1a01   :  { %v4195_v34 = vadd.f32 %v4194_v18, %v4193_v3  ;;  %v4188_v15 = vadd.f32 %v4187_v62, %v4186_v5  ;;  %v4179_v28 = vadd.f32 %v4178_v12, %v4177_v31  ;;  %v4228_v50 = vadd.f32 %v4227_v51, %v4226_v52 }
0x1a02   :  { %v4198_v14 = vsel %vm329_vm1, %v4172_v32, 0.0  ;;  %v4236_v51 = vrot.slane %v10380_v53, 3 }
0x1a03   :  { %v4180_v60 = vrot.slane %v4179_v28, 2  ;;  %v4152_v25 = vpop.permute.xlu0 %4151  ;;  %v4199_v19 = vrot.slane %v4198_v14, 4  ;;  %v4196_v2 = vrot.slane %v4195_v34, 1  ;;  %v4189_v16 = vrot.slane %v4188_v15, 1 }
0x1a04   :  { %v4173_v7 = vmul.f32 %v4152_v25, %v10210_v47  ;;  %v4229_v43 = vrot.slane %v4228_v50, 2 }
0x1a05   :  { %v4181_v10 = vadd.f32 %v4180_v60, %v4179_v28  ;;  %v4200_v49 = vadd.f32 %v4199_v19, %v4198_v14  ;;  %v4197_v42 = vadd.f32 %v4196_v2, %v4195_v34  ;;  %v4190_v29 = vadd.f32 %v4189_v16, %v4188_v15 }
0x1a06   :  { %v4205_v24 = vsel %vm329_vm1, %v4173_v7, 0.0  ;;  %v4230_v41 = vadd.f32 %v4229_v43, %v4228_v50 }
0x1a07   :  { %v4182_v11 = vrot.slane %v4181_v10, 1  ;;  %v4157_v35 = vpop.permute.xlu0 %4156  ;;  %v4201_v4 = vrot.slane %v4200_v49, 2  ;;  %v4206_v45 = vrot.slane %v4205_v24, 4  ;;  %v4251_v62 = vadd.f32 %v4235_v8, %v4197_v42 }
0x1a08   :  { %v4174_v39 = vmul.f32 %v4157_v35, %v10214_v27  ;;  %v4250_v27 = vadd.f32 %v4234_v13, %v4190_v29  ;;  %v4231_v6 = vrot.slane %v4230_v41, 1  ;;  %v4240_v35 = vrot.slane %v10380_v53, 7 }
0x1a09   :  { %v4202_v9 = vadd.f32 %v4201_v4, %v4200_v49  ;;  %v4207_v30 = vadd.f32 %v4206_v45, %v4205_v24  ;;  %v4183_v37 = vadd.f32 %v4182_v11, %v4181_v10  ;;  %v4266_v19 = vadd.f32 %v10225_v55, %v4251_v62 }
0x1a0a   :  { %v4212_v47 = vsel %vm329_vm1, %v4174_v39, 0.0  ;;  %v4265_v2 = vadd.f32 %v10225_v55, %v4250_v27  ;;  %v4232_v16 = vadd.f32 %v4231_v6, %v4230_v41  ;;  %v4237_v10 = vrot.slane %v10380_v53, 4 }
0x1a0b   :  { %v4213_v3 = vrot.slane %v4212_v47, 4  ;;  %v4162_v5 = vpop.permute.xlu0 %4161  ;;  %v4203_v52 = vrot.slane %v4202_v9, 1  ;;  %v4208_v31 = vrot.slane %v4207_v30, 2  ;;  %v4249_v28 = vadd.f32 %v4183_v37, %v10380_v53 }
0x1a0c   :  { %v4175_v18 = vmul.f32 %v4162_v5, %v10198_v17  ;;  %8707 = vtanh.f32 %v4266_v19  ;;  %v4238_v39 = vrot.slane %v10380_v53, 5  ;;  %v4239_v13 = vrot.slane %v10380_v53, 6 }
0x1a0d   :  { %v4214_v12 = vadd.f32 %v4213_v3, %v4212_v47  ;;  %v4204_v32 = vadd.f32 %v4203_v52, %v4202_v9  ;;  %v4209_v34 = vadd.f32 %v4208_v31, %v4207_v30  ;;  %v4264_v49 = vadd.f32 %v10225_v55, %v4249_v28 }
0x1a0e   :  { %v4219_v15 = vsel %vm329_vm1, %v4175_v18, 0.0  ;;  %8709 = vtanh.f32 %v4265_v2  ;;  %v4256_v9 = vadd.f32 %v4240_v35, %v4232_v16 }
0x1a0f   :  { %v4215_v50 = vrot.slane %v4214_v12, 2  ;;  %v4220_v14 = vrot.slane %v4219_v15, 4  ;;  %v4252_v60 = vadd.f32 %v4236_v51, %v4204_v32  ;;  %v4210_v25 = vrot.slane %v4209_v34, 1 }
0x1a10   :  { %8711 = vtanh.f32 %v4264_v49  ;;  %v4271_v3 = vadd.f32 %v10225_v55, %v4256_v9 }
0x1a11   :  { %v4216_v7 = vadd.f32 %v4215_v50, %v4214_v12  ;;  %v4221_v17 = vadd.f32 %v4220_v14, %v4219_v15  ;;  %v4211_v43 = vadd.f32 %v4210_v25, %v4209_v34  ;;  %v4267_v4 = vadd.f32 %v10225_v55, %v4252_v60 }
0x1a13   :  { %v4217_v24 = vrot.slane %v4216_v7, 1  ;;  %v4222_v11 = vrot.slane %v4221_v17, 2  ;;  %v4253_v45 = vadd.f32 %v4237_v10, %v4211_v43  ;;  %8713 = vtanh.f32 %v4267_v4 }
0x1a15   :  { %v4218_v42 = vadd.f32 %v4217_v24, %v4216_v7  ;;  %v4223_v29 = vadd.f32 %v4222_v11, %v4221_v17  ;;  %v4268_v41 = vadd.f32 %v10225_v55, %v4253_v45  ;;  %v11394_v24 = vld [vmem:[#allocation30_spill] sm:$0xff] }
0x1a16   :  { %v291_v11 = vadd.f32 %v10266_v46, %v11394_v24 }
0x1a17   :  { %v4254_v30 = vadd.f32 %v4238_v39, %v4218_v42  ;;  %v4224_v47 = vrot.slane %v4223_v29, 1  ;;  %8715 = vtanh.f32 %v4268_v41 }
0x1a19   :  { %v4269_v8 = vadd.f32 %v10225_v55, %v4254_v30  ;;  %v4225_v37 = vadd.f32 %v4224_v47, %v4223_v29  ;;  %v8708_v31 = vpop.eup %8707 }
0x1a1a   :  { %v4290_v53 = vrot.slane %v8708_v31, 6 }
0x1a1b   :  { %8717 = vtanh.f32 %v4269_v8  ;;  %v4255_v5 = vadd.f32 %v4239_v13, %v4225_v37  ;;  %v8710_v18 = vpop.eup %8709 }
0x1a1c   :  { %8719 = vtanh.f32 %v4271_v3  ;;  %v4288_v12 = vrot.slane %v8710_v18, 7 }
0x1a1d   :  { %v4270_v52 = vadd.f32 %v10225_v55, %v4255_v5  ;;  %v8712_v62 = vpop.eup %8711 }
0x1a1e   :  { %v4289_v34 = vsel %vm548_vm3, %v4288_v12, %v8712_v62 }
0x1a1f   :  { %8721 = vtanh.f32 %v4270_v52  ;;  %v4291_v14 = vsel %vm550_vm4, %v4290_v53, %v4289_v34 }
0x1a20   :  { %v8714_v27 = vpop.eup %8713 }
0x1a21   :  { %v4292_v32 = vrot.slane %v8714_v27, 5 }
0x1a23   :  { %v4293_v55 = vsel %vm552_vm5, %v4292_v32, %v4291_v14 }
0x1a24   :  { %v8716_v51 = vpop.eup %8715 }
0x1a25   :  { %v4294_v15 = vrot.slane %v8716_v51, 4 }
0x1a27   :  { %v4295_v25 = vsel %vm554_vm6, %v4294_v15, %v4293_v55 }
0x1a28   :  { %v8718_v6 = vpop.eup %8717 }
0x1a29   :  { %v4296_v28 = vrot.slane %v8718_v6, 3  ;;  %v8720_v50 = vpop.eup %8719 }
0x1a2a   :  { %v4300_v17 = vrot.slane %v8720_v50, 1 }
0x1a2b   :  { %v4297_v7 = vsel %vm556_vm7, %v4296_v28, %v4295_v25 }
0x1a2c   :  { %v8722_v60 = vpop.eup %8721 }
0x1a2d   :  { %v4298_v19 = vrot.slane %v8722_v60, 2 }
0x1a2f   :  { %v4299_v2 = vsel %vm558_vm8, %v4298_v19, %v4297_v7 }
0x1a30   :  { %v4301_v16 = vsel %vm560_vm9, %v4300_v17, %v4299_v2 }
0x1a31   :  { %4303 = vst.msk [vmem:[#allocation6 + $0x18] sm:$0xff] %vm329_vm1, %v4301_v16  ;;  %8447 = vmatmul.mubr.msk.f32.vlgmr.msra.gmra.mxu0 %vm329_vm1, %v4301_v16 }
0x1a32   :  { %8468 = vmatprep.mubr.msk.f32.mxu0 %vm9104_vm2, %v11393_v22 }
0x1af1   :  { %v4384_v10 = vpop.f32.mrf.mxu0 }
0x1af2   :  { %v4385_v43 = vadd.f32 %v10262_v48, %v4384_v10  ;;  %v10462_v48 = vld [vmem:[#allocation5] sm:$0xff] }
0x1af3   :  { %v8448_v49 = vpop.f32.mrf.mxu0  ;;  %v10468_v46 = vrot.slane %v10462_v48, %v9415_v21 }
0x1af4   :  { %4394 = vrot.lane.b32.xlu0 %v4385_v43, %s9105_s2  ;;  %v4388_v35 = vadd.f32 %v4385_v43, %v291_v11 }
0x1af6   :  { %v4389_v4 = vmul.f32 0.5, %v4388_v35 }
0x1af8   :  { %8723 = vtanh.f32 %v4389_v4 }
0x1b05   :  { %v8724_v45 = vpop.eup %8723 }
0x1b06   :  { %v4391_v39 = vadd.f32 1.0, %v8724_v45 }
0x1b08   :  { %v4392_v42 = vmul.f32 0.5, %v4391_v39  ;;  %v10513_v39 = vrot.slane %v10462_v48, %v9452_v33 }
0x1b66   :  { %v4395_v29 = vpop.permute.xlu0 %4394 }
0x1b67   :  { %v4397_v9 = vmul.f32 %v4395_v29, %v4392_v42  ;;  %v10524_v29 = vrot.slane %v10462_v48, %v9477_v57 }
0x1b69   :  { %4399 = vrot.lane.b32.xlu1 %v4397_v9, %s9105_s2  ;;  %v10529_v9 = vrot.slane %v10462_v48, %v9485_v40 }
0x1b6d   :  { %4410 = vrot.lane.b32.xlu1 %v4301_v16, %s9102_s21 }
0x1b71   :  { %4601 = vrot.lane.b32.xlu1 %v10272_v54, %s9102_s21 }
0x1b75   :  { %4605 = vrot.lane.b32.xlu1 %v10276_v1, %s9102_s21  ;;  %v10482_v1 = vrot.slane %v10462_v48, %v9420_v38 }
0x1b79   :  { %4609 = vrot.lane.b32.xlu1 %v10280_v61, %s9102_s21 }
0x1b7d   :  { %4613 = vrot.lane.b32.xlu1 %v10284_v63, %s9102_s21  ;;  %v4404_v63 = vsub.f32 1.0, %v4392_v42 }
0x1b81   :  { %4694 = vbcast.lane.b32.xlu1 %v10468_v46, 256 }
0x1bdb   :  { %v4400_v41 = vpop.permute.xlu1 %4399 }
0x1bdc   :  { %v4402_v30 = vadd.f32 %v4400_v41, %v291_v11 }
0x1bde   :  { %8725 = vtanh.f32 %v4402_v30 }
0x1bdf   :  { %v4411_v61 = vpop.permute.xlu1 %4410 }
0x1be0   :  { %v4413_v8 = vmul.f32 %v4411_v61, %v4392_v42  ;;  %v10519_v42 = vrot.slane %v10462_v48, %v9469_v36 }
0x1be3   :  { %v4602_v37 = vpop.permute.xlu1 %4601 }
0x1be7   :  { %v4606_v15 = vpop.permute.xlu1 %4605 }
0x1beb   :  { %v8726_v54 = vpop.eup %8725  ;;  %v4610_v16 = vpop.permute.xlu1 %4609 }
0x1bec   :  { %4406 = vrot.lane.b32.xlu0 %v8726_v54, %s9106_s27 }
0x1bef   :  { %v4614_v4 = vpop.permute.xlu1 %4613 }
0x1bf0   :  { %4599 = vrot.lane.b32.xlu0 %v10290_v58, %s9102_s21 }
0x1bf3   :  { %v4695_v30 = vpop.permute.xlu1 %4694 }
0x1bf4   :  { %4603 = vrot.lane.b32.xlu0 %v10294_v26, %s9102_s21 }
0x1bf8   :  { %4607 = vrot.lane.b32.xlu0 %v10298_v20, %s9102_s21 }
0x1bfc   :  { %4611 = vrot.lane.b32.xlu0 %v10302_v23, %s9102_s21 }
0x1c00   :  { %4701 = vbcast.lane.b32.xlu0 %v10482_v1, 256 }
0x1c5e   :  { %v4407_v47 = vpop.permute.xlu0 %4406 }
0x1c5f   :  { %v4409_v58 = vmul.f32 %v4407_v47, %v4404_v63 }
0x1c61   :  { %v10485_v13 = vadd.f32 %v4413_v8, %v4409_v58 }
0x1c62   :  { %v4600_v26 = vpop.permute.xlu0 %4599 }
0x1c63   :  { %v4494_v20 = vcombine.high %v10485_v13, %v10485_v13  ;;  %v4501_v23 = vrot.slane %v10485_v13, %v9396_v0 }
0x1c65   :  { %v4509_v3 = vcombine.high %v4501_v23, %v4501_v23  ;;  %v4517_v5 = vrot.slane %v4501_v23, %v9396_v0  ;;  %v4508_v52 = vrot.slane %v4494_v20, %v9396_v0 }
0x1c66   :  { %v4604_v31 = vpop.permute.xlu0 %4603 }
0x1c67   :  { %v4554_v18 = vrot.slane %v4517_v5, %v9415_v21  ;;  %v4539_v62 = vcombine.high %v4517_v5, %v4517_v5  ;;  %v4510_v27 = vcombine.high %v4508_v52, %v4508_v52  ;;  %v4531_v51 = vrot.slane %v4509_v3, %v9396_v0 }
0x1c68   :  { %v4524_v32 = vrot.slane %v4508_v52, %v9396_v0 }
0x1c69   :  { %v4623_v12 = vmul.f32 %v4600_v26, %v4554_v18  ;;  %v4562_v6 = vrot.slane %v4539_v62, %v9415_v21  ;;  %v4558_v34 = vrot.slane %v4531_v51, %v9415_v21  ;;  %v4541_v53 = vcombine.high %v4531_v51, %v4531_v51 }
0x1c6a   :  { %v4608_v28 = vpop.permute.xlu0 %4607  ;;  %v4538_v60 = vrot.slane %v4510_v27, %v9396_v0  ;;  %v4570_v25 = vrot.slane %v4524_v32, %v9415_v21  ;;  %v4540_v19 = vcombine.high %v4524_v32, %v4524_v32  ;;  %v10542_v27 = vrot.slane %v10462_v48, %v9502_v56 }
0x1c6b   :  { %4639 = vrot.lane.b32.xlu0 %v4623_v12, %s9106_s27  ;;  %v4624_v50 = vmul.f32 %v4602_v37, %v4558_v34  ;;  %v4566_v14 = vrot.slane %v4541_v53, %v9415_v21  ;;  %v4625_v55 = vmul.f32 %v4604_v31, %v4562_v6  ;;  %v10547_v51 = vrot.slane %v10462_v48, %v9510_v59 }
0x1c6c   :  { %v4574_v17 = vrot.slane %v4538_v60, %v9415_v21  ;;  %v4542_v2 = vcombine.high %v4538_v60, %v4538_v60  ;;  %v4627_v10 = vmul.f32 %v4608_v28, %v4570_v25  ;;  %v4578_v49 = vrot.slane %v4540_v19, %v9415_v21 }
0x1c6d   :  { %4641 = vrot.lane.b32.xlu1 %v4624_v50, %s9106_s27  ;;  %v4626_v7 = vmul.f32 %v4606_v15, %v4566_v14 }
0x1c6e   :  { %v4612_v43 = vpop.permute.xlu0 %4611  ;;  %v4628_v24 = vmul.f32 %v4610_v16, %v4574_v17  ;;  %v4582_v11 = vrot.slane %v4542_v2, %v9415_v21  ;;  %v4418_v16 = vld [vmem:[#allocation19 + $0x18] sm:$0xff] }
0x1c6f   :  { %4643 = vrot.lane.b32.xlu0 %v4625_v55, %s9106_s27  ;;  %v4629_v35 = vmul.f32 %v4612_v43, %v4578_v49  ;;  %8450 = vmatpush3.msra.mxu1 %v4418_v16  ;;  %v4416_v43 = vld [vmem:[#allocation19 + $0x8] sm:$0xff] }
0x1c70   :  { %v4630_v45 = vmul.f32 %v4614_v4, %v4582_v11  ;;  %8451 = vmatprep.subr.mxu1 %v11393_v22 }
0x1c71   :  { %4645 = vrot.lane.b32.xlu1 %v4626_v7, %s9106_s27 }
0x1c72   :  { %v4702_v41 = vpop.permute.xlu0 %4701 }
0x1c73   :  { %4647 = vrot.lane.b32.xlu0 %v4627_v10, %s9106_s27  ;;  %v4417_v10 = vld [vmem:[#allocation19 + $0x10] sm:$0xff] }
0x1c74   :  { %8452 = vmatpush3.msra.mxu1 %v4417_v10 }
0x1c75   :  { %4649 = vrot.lane.b32.xlu1 %v4628_v24, %s9106_s27  ;;  %8453 = vmatprep.subr.mxu1 %v11393_v22 }
0x1c76   :  { %8454 = vmatpush3.msra.mxu1 %v4416_v43 }
0x1c77   :  { %4651 = vrot.lane.b32.xlu0 %v4629_v35, %s9106_s27  ;;  %v4415_v35 = vld [vmem:[#allocation19] sm:$0xff]  ;;  %8455 = vmatprep.subr.mxu1 %v11393_v22 }
0x1c78   :  { %8456 = vmatpush3.msra.mxu1 %v4415_v35 }
0x1c79   :  { %4653 = vrot.lane.b32.xlu1 %v4630_v45, %s9106_s27  ;;  %8471 = vmatprep.subr.mxu1 %v11393_v22 }
0x1c7b   :  { %4722 = vbcast.lane.b32.xlu0 %v10513_v39, 256 }
0x1c7d   :  { %4708 = vbcast.lane.b32.xlu1 %v10519_v42, 256 }
0x1c81   :  { %4715 = vbcast.lane.b32.xlu1 %v10524_v29, 256 }
0x1c85   :  { %4729 = vbcast.lane.b32.xlu1 %v10529_v9, 256 }
0x1cdd   :  { %v4640_v54 = vpop.permute.xlu0 %4639 }
0x1cde   :  { %v4663_v61 = vsel %vm329_vm1, %v4640_v54, 0.0 }
0x1cdf   :  { %4664 = vadd.xlane.f32.xlu0 %v4663_v61  ;;  %v4642_v63 = vpop.permute.xlu1 %4641 }
0x1ce0   :  { %v4666_v8 = vsel %vm329_vm1, %v4642_v63, 0.0 }
0x1ce1   :  { %v4644_v47 = vpop.permute.xlu0 %4643  ;;  %4667 = vadd.xlane.f32.xlu1 %v4666_v8 }
0x1ce2   :  { %v4669_v58 = vsel %vm329_vm1, %v4644_v47, 0.0 }
0x1ce3   :  { %4670 = vadd.xlane.f32.xlu0 %v4669_v58  ;;  %v4646_v26 = vpop.permute.xlu1 %4645 }
0x1ce4   :  { %v4672_v37 = vsel %vm329_vm1, %v4646_v26, 0.0 }
0x1ce5   :  { %v4648_v20 = vpop.permute.xlu0 %4647 }
0x1ce6   :  { %v4675_v23 = vsel %vm329_vm1, %v4648_v20, 0.0 }
0x1ce7   :  { %4676 = vadd.xlane.f32.xlu1 %v4675_v23  ;;  %4673 = vadd.xlane.f32.xlu0 %v4672_v37  ;;  %v4650_v3 = vpop.permute.xlu1 %4649 }
0x1ce8   :  { %v4678_v31 = vsel %vm329_vm1, %v4650_v3, 0.0 }
0x1ce9   :  { %v4652_v5 = vpop.permute.xlu0 %4651 }
0x1cea   :  { %v4681_v52 = vsel %vm329_vm1, %v4652_v5, 0.0 }
0x1ceb   :  { %4682 = vadd.xlane.f32.xlu1 %v4681_v52  ;;  %4679 = vadd.xlane.f32.xlu0 %v4678_v31  ;;  %v4654_v18 = vpop.permute.xlu1 %4653 }
0x1cec   :  { %v4684_v62 = vsel %vm329_vm1, %v4654_v18, 0.0 }
0x1ced   :  { %v4723_v32 = vpop.permute.xlu0 %4722 }
0x1cef   :  { %4685 = vadd.xlane.f32.xlu0 %v4684_v62  ;;  %v4709_v12 = vpop.permute.xlu1 %4708 }
0x1cf3   :  { %v4716_v6 = vpop.permute.xlu1 %4715 }
0x1cf7   :  { %v4730_v34 = vpop.permute.xlu1 %4729 }
0x1cfc   :  { %4743 = vbcast.lane.b32.xlu1 %v10542_v27, 256 }
0x1d05   :  { %4736 = vbcast.lane.b32.xlu0 %v10547_v51, 256 }
0x1d68   :  { %v4665_v53 = vpop.xlane.xlu0 %4664 }
0x1d69   :  { %v10550_v15 = vadd.f32 %v4695_v30, %v4665_v53 }
0x1d6a   :  { %v4668_v28 = vpop.xlane.xlu1 %4667 }
0x1d6b   :  { %4770 = vperm.xlu0 %8569, %v10550_v15   ;;  %v10553_v50 = vadd.f32 %v4702_v41, %v4668_v28 }
0x1d6c   :  { %v4671_v14 = vpop.xlane.xlu0 %4670 }
0x1d6d   :  { %v10555_v60 = vadd.f32 %v4709_v12, %v4671_v14  ;;  %4773 = vperm.xlu1 %8570, %v10553_v50  }
0x1d6f   :  { %4776 = vperm.xlu0 %8569, %v10555_v60  }
0x1d70   :  { %v4674_v48 = vpop.xlane.xlu0 %4673  ;;  %v4677_v55 = vpop.xlane.xlu1 %4676 }
0x1d71   :  { %v10559_v25 = vadd.f32 %v4716_v6, %v4674_v48  ;;  %v10561_v19 = vadd.f32 %v4723_v32, %v4677_v55 }
0x1d73   :  { %4779 = vperm.xlu1 %8570, %v10559_v25   ;;  %4782 = vperm.xlu0 %8569, %v10561_v19  }
0x1d74   :  { %v4680_v7 = vpop.xlane.xlu0 %4679  ;;  %v4683_v17 = vpop.xlane.xlu1 %4682 }
0x1d75   :  { %v10565_v2 = vadd.f32 %v4730_v34, %v4680_v7 }
0x1d77   :  { %4785 = vperm.xlu1 %8570, %v10565_v2  }
0x1d78   :  { %v4686_v49 = vpop.xlane.xlu0 %4685  ;;  %v4744_v24 = vpop.permute.xlu1 %4743 }
0x1d79   :  { %v4760_v11 = vadd.f32 %v4744_v24, %v4686_v49 }
0x1d7b   :  { %4791 = vperm.xlu1 %8570, %v4760_v11  }
0x1d7c   :  { %v4737_v4 = vpop.permute.xlu0 %4736 }
0x1d7d   :  { %v10571_v45 = vadd.f32 %v4737_v4, %v4683_v17 }
0x1d7f   :  { %4788 = vperm.xlu0 %8569, %v10571_v45   ;;  %4420 = vrot.lane.b32.xlu1 %v10485_v13, %s9106_s27 }
0x1de6   :  { %v4771_v41 = vpop.permute.xlu0 %4770 }
0x1de7   :  { %v4796_v47 = vrot.slane %v4771_v41, %v9385_v44 }
0x1de8   :  { %v4774_v30 = vpop.permute.xlu1 %4773 }
0x1de9   :  { %v4800_v63 = vrot.slane %v4774_v30, %v9385_v44 }
0x1dea   :  { %v4777_v54 = vpop.permute.xlu0 %4776 }
0x1deb   :  { %v4804_v58 = vrot.slane %v4777_v54, %v9385_v44  ;;  %v4825_v26 = vsel %vm548_vm3, %v4800_v63, %v4796_v47 }
0x1ded   :  { %v4826_v3 = vsel %vm550_vm4, %v4804_v58, %v4825_v26 }
0x1dee   :  { %v4780_v61 = vpop.permute.xlu1 %4779  ;;  %v4783_v20 = vpop.permute.xlu0 %4782 }
0x1def   :  { %v4808_v23 = vrot.slane %v4780_v61, %v9385_v44  ;;  %v4812_v13 = vrot.slane %v4783_v20, %v9385_v44 }
0x1df1   :  { %v4827_v5 = vsel %vm552_vm5, %v4808_v23, %v4826_v3 }
0x1df2   :  { %v4786_v8 = vpop.permute.xlu1 %4785  ;;  %v4828_v62 = vsel %vm554_vm6, %v4812_v13, %v4827_v5 }
0x1df3   :  { %v4816_v52 = vrot.slane %v4786_v8, %v9385_v44 }
0x1df5   :  { %v4829_v6 = vsel %vm556_vm7, %v4816_v52, %v4828_v62 }
0x1df6   :  { %v4792_v37 = vpop.permute.xlu1 %4791 }
0x1df7   :  { %v4824_v32 = vrot.slane %v4792_v37, %v9385_v44 }
0x1dfa   :  { %v4789_v31 = vpop.permute.xlu0 %4788  ;;  %v4421_v18 = vpop.permute.xlu1 %4420 }
0x1dfb   :  { %v4820_v12 = vrot.slane %v4789_v31, %v9385_v44  ;;  %8458 = vmatmul.mubr.msk.f32.vlgmr.msra.gmra.mxu1 %vm329_vm1, %v4421_v18 }
0x1dfc   :  { %8472 = vmatpush3.msra.mxu1 %v4418_v16  ;;  %8479 = vmatprep.mubr.msk.f32.mxu1 %vm9104_vm2, %v11393_v22 }
0x1dfd   :  { %v4830_v34 = vsel %vm558_vm8, %v4820_v12, %v4829_v6  ;;  %8473 = vmatprep.subr.mxu1 %v11393_v22 }
0x1dfe   :  { %v4831_v53 = vsel %vm560_vm9, %v4824_v32, %v4830_v34  ;;  %8474 = vmatpush3.msra.mxu1 %v4417_v10 }
0x1dff   :  { %v4833_v28 = vsel %vm563_vm10, %v4831_v53, -inf  ;;  %8475 = vmatprep.subr.mxu1 %v11393_v22 }
0x1e00   :  { %4834 = vmax.xlane.f32.xlu0 %v4833_v28  ;;  %8476 = vmatpush3.msra.mxu1 %v4416_v43 }
0x1e01   :  { %8477 = vmatprep.subr.mxu1 %v11393_v22 }
0x1e02   :  { %8478 = vmatpush3.msra.mxu1 %v4415_v35 }
0x1e03   :  { %8493 = vmatprep.subr.mxu1 %v11393_v22 }
0x1e89   :  { %v4835_v14 = vpop.xlane.xlu0 %4834 }
0x1e8a   :  { %v4840_v48 = vrot.slane %v4835_v14, %v9415_v21  ;;  %v4844_v55 = vrot.slane %v4835_v14, %v9420_v38  ;;  %v4868_v7 = vrot.slane %v4835_v14, %v9502_v56  ;;  %v4848_v17 = vrot.slane %v4835_v14, %v9469_v36 }
0x1e8b   :  { %v4852_v24 = vrot.slane %v4835_v14, %v9477_v57  ;;  %v4856_v30 = vrot.slane %v4835_v14, %v9452_v33  ;;  %v4864_v63 = vrot.slane %v4835_v14, %v9510_v59 }
0x1e8c   :  { %v4877_v16 = vsub.f32 %v10550_v15, %v4840_v48  ;;  %v4878_v10 = vsub.f32 %v10553_v50, %v4844_v55  ;;  %v4884_v43 = vsub.f32 %v4760_v11, %v4868_v7  ;;  %v4879_v35 = vsub.f32 %v10555_v60, %v4848_v17 }
0x1e8d   :  { %v4880_v54 = vsub.f32 %v10559_v25, %v4852_v24  ;;  %v4860_v15 = vrot.slane %v4835_v14, %v9485_v40  ;;  %v4881_v50 = vsub.f32 %v10561_v19, %v4856_v30  ;;  %v4883_v58 = vsub.f32 %v10571_v45, %v4864_v63 }
0x1e8e   :  { %v4885_v49 = vmul.f32 1.442695, %v4877_v16  ;;  %v4887_v4 = vmul.f32 1.442695, %v4878_v10  ;;  %v4899_v41 = vmul.f32 1.442695, %v4884_v43 }
0x1e8f   :  { %v4889_v61 = vmul.f32 1.442695, %v4879_v35  ;;  %v4891_v11 = vmul.f32 1.442695, %v4880_v54  ;;  %v4882_v60 = vsub.f32 %v10565_v2, %v4860_v15  ;;  %v4893_v47 = vmul.f32 1.442695, %v4881_v50 }
0x1e90   :  { %8727 = vpow2.f32 %v4885_v49  ;;  %v4897_v19 = vmul.f32 1.442695, %v4883_v58 }
0x1e91   :  { %8729 = vpow2.f32 %v4887_v4  ;;  %v4895_v25 = vmul.f32 1.442695, %v4882_v60 }
0x1e92   :  { %8731 = vpow2.f32 %v4899_v41 }
0x1e93   :  { %8733 = vpow2.f32 %v4889_v61 }
0x1e94   :  { %8735 = vpow2.f32 %v4891_v11 }
0x1e95   :  { %8737 = vpow2.f32 %v4893_v47 }
0x1e96   :  { %8739 = vpow2.f32 %v4895_v25 }
0x1e97   :  { %8741 = vpow2.f32 %v4897_v19 }
0x1e9d   :  { %v8728_v8 = vpop.eup %8727 }
0x1e9e   :  { %4910 = vperm.xlu1 %8570, %v8728_v8   ;;  %v8730_v26 = vpop.eup %8729 }
0x1e9f   :  { %v10615_v20 = vpop.eup %8731 }
0x1ea0   :  { %v8734_v23 = vpop.eup %8733  ;;  %4931 = vperm.xlu0 %8569, %v10615_v20  }
0x1ea1   :  { %v8736_v2 = vpop.eup %8735 }
0x1ea2   :  { %4913 = vperm.xlu1 %8570, %v8730_v26   ;;  %v8738_v37 = vpop.eup %8737 }
0x1ea3   :  { %v8740_v3 = vpop.eup %8739 }
0x1ea4   :  { %v8742_v45 = vpop.eup %8741 }
0x1ea6   :  { %4916 = vperm.xlu1 %8570, %v8734_v23  }
0x1eaa   :  { %4919 = vperm.xlu1 %8570, %v8736_v2  }
0x1eae   :  { %4922 = vperm.xlu1 %8570, %v8738_v37  }
0x1eb2   :  { %4925 = vperm.xlu1 %8570, %v8740_v3  }
0x1eb6   :  { %4928 = vperm.xlu1 %8570, %v8742_v45  }
0x1ebb   :  { %v10618_v13 = vpop.f32.mrf.mxu1 }
0x1ebd   :  { %v8459_v5 = vpop.f32.mrf.mxu1 }
0x1f19   :  { %v4911_v52 = vpop.permute.xlu1 %4910 }
0x1f1a   :  { %v4936_v34 = vrot.slane %v4911_v52, %v9385_v44 }
0x1f1b   :  { %v4932_v7 = vpop.permute.xlu0 %4931 }
0x1f1c   :  { %v4964_v24 = vrot.slane %v4932_v7, %v9385_v44 }
0x1f1d   :  { %v4914_v31 = vpop.permute.xlu1 %4913 }
0x1f1e   :  { %v4940_v6 = vrot.slane %v4914_v31, %v9385_v44 }
0x1f20   :  { %v4965_v48 = vsel %vm548_vm3, %v4940_v6, %v4936_v34 }
0x1f21   :  { %v4917_v18 = vpop.permute.xlu1 %4916 }
0x1f22   :  { %v4944_v32 = vrot.slane %v4917_v18, %v9385_v44 }
0x1f24   :  { %v4966_v17 = vsel %vm550_vm4, %v4944_v32, %v4965_v48  ;;  %v10669_v48 = vld [vmem:[#allocation4 + $0x10] sm:$0xff] }
0x1f25   :  { %v4920_v62 = vpop.permute.xlu1 %4919 }
0x1f26   :  { %v4948_v53 = vrot.slane %v4920_v62, %v9385_v44  ;;  %v10645_v62 = vld [vmem:[#allocation13 + $0x18] sm:$0xff] }
0x1f27   :  { %8461 = vmatpush3.msra.mxu0 %v10645_v62 }
0x1f28   :  { %v4967_v16 = vsel %vm552_vm5, %v4948_v53, %v4966_v17  ;;  %8462 = vmatprep.subr.mxu0 %v11393_v22 }
0x1f29   :  { %v4923_v12 = vpop.permute.xlu1 %4922 }
0x1f2a   :  { %v4952_v14 = vrot.slane %v4923_v12, %v9385_v44  ;;  %v10663_v12 = vld [vmem:[#allocation4 + $0x8] sm:$0xff] }
0x1f2c   :  { %v4968_v49 = vsel %vm554_vm6, %v4952_v14, %v4967_v16 }
0x1f2d   :  { %v4926_v28 = vpop.permute.xlu1 %4925 }
0x1f2e   :  { %v4956_v55 = vrot.slane %v4926_v28, %v9385_v44 }
0x1f30   :  { %v4969_v35 = vsel %vm556_vm7, %v4956_v55, %v4968_v49 }
0x1f31   :  { %v4929_v10 = vpop.permute.xlu1 %4928 }
0x1f32   :  { %v4960_v43 = vrot.slane %v4929_v10, %v9385_v44 }
0x1f34   :  { %v4970_v4 = vsel %vm558_vm8, %v4960_v43, %v4969_v35 }
0x1f35   :  { %v4971_v41 = vsel %vm560_vm9, %v4964_v24, %v4970_v4  ;;  %v10673_v24 = vld [vmem:[#allocation4] sm:$0xff] }
0x1f36   :  { %v4973_v30 = vsel %vm563_vm10, %v4971_v41, 0.0 }
0x1f37   :  { %4974 = vadd.xlane.f32.xlu1 %v4973_v30 }
0x1fc0   :  { %v4975_v54 = vpop.xlane.xlu1 %4974 }
0x1fc1   :  { %8743 = vrcp.f32 %v4975_v54 }
0x1fce   :  { %v8744_v61 = vpop.eup %8743 }
0x1fcf   :  { %v4997_v15 = vrot.slane %v8744_v61, %v9452_v33  ;;  %v4985_v50 = vrot.slane %v8744_v61, %v9420_v38  ;;  %v4989_v60 = vrot.slane %v8744_v61, %v9469_v36  ;;  %v4981_v58 = vrot.slane %v8744_v61, %v9415_v21 }
0x1fd0   :  { %v4993_v19 = vrot.slane %v8744_v61, %v9477_v57  ;;  %v5001_v52 = vrot.slane %v8744_v61, %v9485_v40  ;;  %v5009_v18 = vrot.slane %v8744_v61, %v9502_v56 }
0x1fd1   :  { %v5022_v11 = vmul.f32 %v8738_v37, %v4997_v15  ;;  %v5019_v63 = vmul.f32 %v8730_v26, %v4985_v50  ;;  %v5020_v47 = vmul.f32 %v8734_v23, %v4989_v60  ;;  %v5018_v25 = vmul.f32 %v8728_v8, %v4981_v58  ;;  %v10647_v8 = vld [vmem:[#allocation13 + $0x10] sm:$0xff] }
0x1fd2   :  { %v5021_v5 = vmul.f32 %v8736_v2, %v4993_v19  ;;  %v5023_v31 = vmul.f32 %v8740_v3, %v5001_v52  ;;  %v5005_v37 = vrot.slane %v8744_v61, %v9510_v59  ;;  %v5025_v23 = vmul.f32 %v10615_v20, %v5009_v18  ;;  %v10651_v2 = vld [vmem:[#allocation13 + $0x8] sm:$0xff]  ;;  %8463 = vmatpush3.msra.mxu0 %v10647_v8  ;;  %v10655_v3 = vld [vmem:[#allocation13] sm:$0xff] }
0x1fd3   :  { %5056 = vperm.xlu1 %8570, %v5022_v11   ;;  %5041 = vperm.xlu0 %8569, %v5019_v63   ;;  %v10661_v20 = vld [vmem:[#allocation4 + $0x20] sm:$0xff]  ;;  %v10677_v11 = vld [vmem:[#allocation4 + $0x18] sm:$0xff] }
0x1fd4   :  { %v5024_v26 = vmul.f32 %v8742_v45, %v5005_v37  ;;  %8464 = vmatprep.subr.mxu0 %v11393_v22 }
0x1fd5   :  { %8465 = vmatpush3.msra.mxu0 %v10651_v2 }
0x1fd6   :  { %8466 = vmatprep.subr.mxu0 %v11393_v22 }
0x1fd7   :  { %5046 = vperm.xlu0 %8569, %v5020_v47   ;;  %8467 = vmatpush3.msra.mxu0 %v10655_v3 }
0x1fd8   :  { %8482 = vmatprep.subr.mxu0 %v11393_v22 }
0x1fdb   :  { %5036 = vperm.xlu0 %8569, %v5018_v25  }
0x1fdf   :  { %5051 = vperm.xlu0 %8569, %v5021_v5  }
0x1fe3   :  { %5061 = vperm.xlu0 %8569, %v5023_v31   ;;  %v10681_v31 = vld [vmem:[#allocation4 + $0x28] sm:$0xff] }
0x1fe7   :  { %5066 = vperm.xlu0 %8569, %v5024_v26  }
0x1feb   :  { %5071 = vperm.xlu0 %8569, %v5025_v23  }
0x204e   :  { %v5057_v45 = vpop.permute.xlu1 %5056  ;;  %v5042_v6 = vpop.permute.xlu0 %5041 }
0x204f   :  { %v5078_v32 = vmul.f32 %v5057_v45, %v10661_v20  ;;  %v5075_v34 = vmul.f32 %v5042_v6, %v10663_v12 }
0x2051   :  { %v5089_v53 = vsel %vm329_vm1, %v5075_v34, 0.0  ;;  %v5110_v28 = vsel %vm329_vm1, %v5078_v32, 0.0 }
0x2052   :  { %v5090_v14 = vrot.slane %v5089_v53, 4  ;;  %v5047_v55 = vpop.permute.xlu0 %5046  ;;  %v5111_v16 = vrot.slane %v5110_v28, 4 }
0x2053   :  { %v5076_v7 = vmul.f32 %v5047_v55, %v10669_v48  ;;  %v10685_v55 = vld [vmem:[#allocation4 + $0x30] sm:$0xff] }
0x2054   :  { %v5091_v17 = vadd.f32 %v5090_v14, %v5089_v53  ;;  %v5112_v30 = vadd.f32 %v5111_v16, %v5110_v28 }
0x2055   :  { %v5096_v10 = vsel %vm329_vm1, %v5076_v7, 0.0 }
0x2056   :  { %v5092_v49 = vrot.slane %v5091_v17, 2  ;;  %v5097_v43 = vrot.slane %v5096_v10, 4  ;;  %v5037_v35 = vpop.permute.xlu0 %5036  ;;  %v5113_v58 = vrot.slane %v5112_v30, 2 }
0x2057   :  { %v5074_v4 = vmul.f32 %v5037_v35, %v10673_v24 }
0x2058   :  { %v5098_v41 = vadd.f32 %v5097_v43, %v5096_v10  ;;  %v5093_v61 = vadd.f32 %v5092_v49, %v5091_v17  ;;  %v5114_v45 = vadd.f32 %v5113_v58, %v5112_v30  ;;  %v5139_v10 = vrot.slane %v10618_v13, 1 }
0x2059   :  { %v5082_v54 = vsel %vm329_vm1, %v5074_v4, 0.0 }
0x205a   :  { %v5099_v15 = vrot.slane %v5098_v41, 2  ;;  %v5083_v50 = vrot.slane %v5082_v54, 4  ;;  %v5052_v63 = vpop.permute.xlu0 %5051  ;;  %v5094_v5 = vrot.slane %v5093_v61, 1  ;;  %v5115_v35 = vrot.slane %v5114_v45, 1 }
0x205b   :  { %v5077_v60 = vmul.f32 %v5052_v63, %v10677_v11 }
0x205c   :  { %v5084_v47 = vadd.f32 %v5083_v50, %v5082_v54  ;;  %v5100_v25 = vadd.f32 %v5099_v15, %v5098_v41  ;;  %v5095_v53 = vadd.f32 %v5094_v5, %v5093_v61  ;;  %v10690_v50 = vld [vmem:[#allocation4 + $0x38] sm:$0xff]  ;;  %v5141_v5 = vrot.slane %v10618_v13, 3 }
0x205d   :  { %v5103_v19 = vsel %vm329_vm1, %v5077_v60, 0.0  ;;  %v10695_v60 = vld [vmem:[%s11383_s11] ss:$0 sm:$0xff] }
0x205e   :  { %v5085_v52 = vrot.slane %v5084_v47, 2  ;;  %v5062_v37 = vpop.permute.xlu0 %5061  ;;  %v5104_v26 = vrot.slane %v5103_v19, 4  ;;  %v5101_v6 = vrot.slane %v5100_v25, 1  ;;  %v5155_v54 = vadd.f32 %v5139_v10, %v5095_v53 }
0x205f   :  { %v5079_v18 = vmul.f32 %v5062_v37, %v10681_v31 }
0x2060   :  { %v5086_v23 = vadd.f32 %v5085_v52, %v5084_v47  ;;  %v5105_v32 = vadd.f32 %v5104_v26, %v5103_v19  ;;  %v5102_v4 = vadd.f32 %v5101_v6, %v5100_v25  ;;  %v5140_v47 = vrot.slane %v10618_v13, 2 }
0x2061   :  { %v5117_v34 = vsel %vm329_vm1, %v5079_v18, 0.0  ;;  %v5116_v26 = vadd.f32 %v5115_v35, %v5114_v45 }
0x2062   :  { %v5087_v28 = vrot.slane %v5086_v23, 1  ;;  %v5118_v14 = vrot.slane %v5117_v34, 4  ;;  %v5067_v7 = vpop.permute.xlu0 %5066  ;;  %v5106_v17 = vrot.slane %v5105_v32, 2  ;;  %v5156_v18 = vadd.f32 %v5140_v47, %v5102_v4 }
0x2063   :  { %v5080_v16 = vmul.f32 %v5067_v7, %v10685_v55 }
0x2064   :  { %v5088_v49 = vadd.f32 %v5087_v28, %v5086_v23  ;;  %v5119_v43 = vadd.f32 %v5118_v14, %v5117_v34  ;;  %v5107_v41 = vadd.f32 %v5106_v17, %v5105_v32  ;;  %v5170_v32 = vadd.f32 %v10695_v60, %v5155_v54 }
0x2065   :  { %v5124_v30 = vsel %vm329_vm1, %v5080_v16, 0.0  ;;  %v5142_v14 = vrot.slane %v10618_v13, 4  ;;  %v5143_v16 = vrot.slane %v10618_v13, 5  ;;  %v5171_v35 = vadd.f32 %v10695_v60, %v5156_v18 }
0x2066   :  { %v5120_v15 = vrot.slane %v5119_v43, 2  ;;  %v5125_v61 = vrot.slane %v5124_v30, 4  ;;  %v5072_v63 = vpop.permute.xlu0 %5071  ;;  %v5154_v58 = vadd.f32 %v5088_v49, %v10618_v13  ;;  %v5108_v19 = vrot.slane %v5107_v41, 1 }
0x2067   :  { %v5081_v25 = vmul.f32 %v5072_v63, %v10690_v50  ;;  %v5158_v45 = vadd.f32 %v5142_v14, %v5116_v26  ;;  %8745 = vtanh.f32 %v5170_v32 }
0x2068   :  { %v5121_v52 = vadd.f32 %v5120_v15, %v5119_v43  ;;  %v5126_v37 = vadd.f32 %v5125_v61, %v5124_v30  ;;  %v5109_v23 = vadd.f32 %v5108_v19, %v5107_v41  ;;  %v5169_v7 = vadd.f32 %v10695_v60, %v5154_v58 }
0x2069   :  { %v5131_v6 = vsel %vm329_vm1, %v5081_v25, 0.0  ;;  %v5144_v15 = vrot.slane %v10618_v13, 6  ;;  %v5173_v58 = vadd.f32 %v10695_v60, %v5158_v45 }
0x206a   :  { %v5122_v34 = vrot.slane %v5121_v52, 1  ;;  %v5127_v53 = vrot.slane %v5126_v37, 2  ;;  %v5132_v28 = vrot.slane %v5131_v6, 4  ;;  %v5157_v17 = vadd.f32 %v5141_v5, %v5109_v23 }
0x206b   :  { %8747 = vtanh.f32 %v5169_v7 }
0x206c   :  { %v5123_v10 = vadd.f32 %v5122_v34, %v5121_v52  ;;  %v5128_v49 = vadd.f32 %v5127_v53, %v5126_v37  ;;  %v5133_v43 = vadd.f32 %v5132_v28, %v5131_v6  ;;  %v5172_v4 = vadd.f32 %v10695_v60, %v5157_v17 }
0x206d   :  { %v5145_v52 = vrot.slane %v10618_v13, 7 }
0x206e   :  { %v5159_v41 = vadd.f32 %v5143_v16, %v5123_v10  ;;  %v5129_v30 = vrot.slane %v5128_v49, 1  ;;  %v5134_v54 = vrot.slane %v5133_v43, 2  ;;  %8749 = vtanh.f32 %v5172_v4 }
0x206f   :  { %8751 = vtanh.f32 %v5171_v35 }
0x2070   :  { %v5174_v61 = vadd.f32 %v10695_v60, %v5159_v41  ;;  %v5130_v63 = vadd.f32 %v5129_v30, %v5128_v49  ;;  %v5135_v47 = vadd.f32 %v5134_v54, %v5133_v43 }
0x2072   :  { %v5160_v19 = vadd.f32 %v5144_v15, %v5130_v63  ;;  %v5136_v25 = vrot.slane %v5135_v47, 1  ;;  %8753 = vtanh.f32 %v5174_v61  ;;  %v10733_v63 = vld [vmem:[#allocation15] ss:$0 sm:$0xff] }
0x2073   :  { %8755 = vtanh.f32 %v5173_v58 }
0x2074   :  { %v5175_v5 = vadd.f32 %v10695_v60, %v5160_v19  ;;  %v5137_v37 = vadd.f32 %v5136_v25, %v5135_v47  ;;  %v8746_v23 = vpop.eup %8745  ;;  %v10737_v19 = vld [vmem:[#allocation12] ss:$0 sm:$0xff] }
0x2075   :  { %v5193_v53 = vrot.slane %v8746_v23, 7  ;;  %v10743_v23 = vld [vmem:[#allocation3 + $0x8] sm:$0xff] }
0x2076   :  { %8757 = vtanh.f32 %v5175_v5  ;;  %v5161_v26 = vadd.f32 %v5145_v52, %v5137_v37 }
0x2078   :  { %v5176_v18 = vadd.f32 %v10695_v60, %v5161_v26  ;;  %v8748_v6 = vpop.eup %8747 }
0x2079   :  { %v5194_v14 = vsel %vm548_vm3, %v5193_v53, %v8748_v6  ;;  %v10747_v6 = vld [vmem:[#allocation3 + $0x18] sm:$0xff] }
0x207a   :  { %8759 = vtanh.f32 %v5176_v18 }
0x207b   :  { %v8750_v32 = vpop.eup %8749 }
0x207c   :  { %v8752_v34 = vpop.eup %8751  ;;  %v5197_v28 = vrot.slane %v8750_v32, 5  ;;  %v10751_v32 = vld [vmem:[#allocation3 + $0x28] sm:$0xff] }
0x207d   :  { %v5195_v17 = vrot.slane %v8752_v34, 6  ;;  %v10755_v34 = vld [vmem:[#allocation3 + $0x38] sm:$0xff] }
0x207f   :  { %v8754_v7 = vpop.eup %8753  ;;  %v5196_v13 = vsel %vm550_vm4, %v5195_v17, %v5194_v14  ;;  %v10765_v17 = vld [vmem:[#allocation3 + $0x10] sm:$0xff] }
0x2080   :  { %v8756_v16 = vpop.eup %8755  ;;  %v5198_v49 = vsel %vm552_vm5, %v5197_v28, %v5196_v13  ;;  %v5201_v43 = vrot.slane %v8754_v7, 3  ;;  %v10761_v7 = vld [vmem:[#allocation3] sm:$0xff] }
0x2081   :  { %v5199_v45 = vrot.slane %v8756_v16, 4  ;;  %v10769_v16 = vld [vmem:[#allocation3 + $0x20] sm:$0xff] }
0x2083   :  { %v8758_v10 = vpop.eup %8757  ;;  %v5200_v41 = vsel %vm554_vm6, %v5199_v45, %v5198_v49 }
0x2084   :  { %v5203_v35 = vrot.slane %v8758_v10, 2  ;;  %v5202_v30 = vsel %vm556_vm7, %v5201_v43, %v5200_v41 }
0x2086   :  { %v5204_v15 = vsel %vm558_vm8, %v5203_v35, %v5202_v30 }
0x2087   :  { %v8760_v4 = vpop.eup %8759 }
0x2088   :  { %v5205_v54 = vrot.slane %v8760_v4, 1 }
0x208a   :  { %v5206_v61 = vsel %vm560_vm9, %v5205_v54, %v5204_v15 }
0x208b   :  { %5208 = vst.msk [vmem:[#allocation6 + $0x20] sm:$0xff] %vm329_vm1, %v5206_v61  ;;  %8469 = vmatmul.mubr.msk.f32.vlgmr.msra.gmra.mxu0 %vm329_vm1, %v5206_v61 }
0x208c   :  { %8483 = vmatpush3.msra.mxu0 %v10645_v62  ;;  %8490 = vmatprep.mubr.msk.f32.mxu0 %vm9104_vm2, %v11393_v22 }
0x208d   :  { %8484 = vmatprep.subr.mxu0 %v11393_v22 }
0x208e   :  { %8485 = vmatpush3.msra.mxu0 %v10647_v8  ;;  %v11395_v8 = vld [vmem:[#allocation29_spill] sm:$0xff] }
0x208f   :  { %8486 = vmatprep.subr.mxu0 %v11393_v22  ;;  %v296_v25 = vadd.f32 %v10737_v19, %v11395_v8 }
0x2090   :  { %8487 = vmatpush3.msra.mxu0 %v10651_v2 }
0x2091   :  { %8488 = vmatprep.subr.mxu0 %v11393_v22 }
0x2092   :  { %8489 = vmatpush3.msra.mxu0 %v10655_v3 }
0x2093   :  { %8504 = vmatprep.subr.mxu0 %v11393_v22 }
0x214b   :  { %v5289_v62 = vpop.f32.mrf.mxu0 }
0x214c   :  { %v5290_v47 = vadd.f32 %v10733_v63, %v5289_v62 }
0x214d   :  { %v8470_v58 = vpop.f32.mrf.mxu0 }
0x214e   :  { %5299 = vrot.lane.b32.xlu0 %v5290_v47, %s9105_s2  ;;  %v5293_v2 = vadd.f32 %v5290_v47, %v296_v25 }
0x2150   :  { %v5294_v5 = vmul.f32 0.5, %v5293_v2 }
0x2152   :  { %8761 = vtanh.f32 %v5294_v5 }
0x215f   :  { %v8762_v52 = vpop.eup %8761 }
0x2160   :  { %v5296_v3 = vadd.f32 1.0, %v8762_v52 }
0x2162   :  { %v5297_v37 = vmul.f32 0.5, %v5296_v3 }
0x2164   :  { %v5309_v13 = vsub.f32 1.0, %v5297_v37 }
0x21c0   :  { %v5300_v26 = vpop.permute.xlu0 %5299 }
0x21c1   :  { %v5302_v18 = vmul.f32 %v5300_v26, %v5297_v37 }
0x21c3   :  { %5304 = vrot.lane.b32.xlu0 %v5302_v18, %s9105_s2 }
0x21c7   :  { %5315 = vrot.lane.b32.xlu0 %v5206_v61, %s9102_s21 }
0x21cb   :  { %5506 = vrot.lane.b32.xlu0 %v10743_v23, %s9102_s21 }
0x21cf   :  { %5510 = vrot.lane.b32.xlu0 %v10747_v6, %s9102_s21 }
0x21d3   :  { %5514 = vrot.lane.b32.xlu0 %v10751_v32, %s9102_s21 }
0x21d7   :  { %5518 = vrot.lane.b32.xlu0 %v10755_v34, %s9102_s21 }
0x21db   :  { %5599 = vbcast.lane.b32.xlu0 %v10468_v46, 256  ;;  %v10773_v46 = vld [vmem:[#allocation3 + $0x30] sm:$0xff] }
0x2235   :  { %v5305_v53 = vpop.permute.xlu0 %5304 }
0x2236   :  { %v5307_v28 = vadd.f32 %v5305_v53, %v296_v25 }
0x2238   :  { %8763 = vtanh.f32 %v5307_v28 }
0x2239   :  { %v5316_v10 = vpop.permute.xlu0 %5315 }
0x223a   :  { %v5318_v43 = vmul.f32 %v5316_v10, %v5297_v37 }
0x223d   :  { %v5507_v54 = vpop.permute.xlu0 %5506 }
0x2241   :  { %v5511_v26 = vpop.permute.xlu0 %5510 }
0x2245   :  { %v8764_v14 = vpop.eup %8763 }
0x2246   :  { %5311 = vrot.lane.b32.xlu1 %v8764_v14, %s9106_s27 }
0x224a   :  { %5504 = vrot.lane.b32.xlu1 %v10761_v7, %s9102_s21 }
0x224e   :  { %5508 = vrot.lane.b32.xlu1 %v10765_v17, %s9102_s21 }
0x2252   :  { %5512 = vrot.lane.b32.xlu1 %v10769_v16, %s9102_s21 }
0x2256   :  { %5516 = vrot.lane.b32.xlu1 %v10773_v46, %s9102_s21 }
0x225a   :  { %5606 = vbcast.lane.b32.xlu1 %v10482_v1, 256 }
0x22b8   :  { %v5312_v49 = vpop.permute.xlu1 %5311 }
0x22b9   :  { %v5314_v45 = vmul.f32 %v5312_v49, %v5309_v13 }
0x22bb   :  { %v10778_v35 = vadd.f32 %v5318_v43, %v5314_v45 }
0x22bc   :  { %v5505_v4 = vpop.permute.xlu1 %5504 }
0x22bd   :  { %v5399_v41 = vcombine.high %v10778_v35, %v10778_v35  ;;  %v5406_v30 = vrot.slane %v10778_v35, %v9396_v0 }
0x22bf   :  { %v5414_v15 = vcombine.high %v5406_v30, %v5406_v30  ;;  %v5422_v61 = vrot.slane %v5406_v30, %v9396_v0  ;;  %v5413_v1 = vrot.slane %v5399_v41, %v9396_v0  ;;  %v5515_v41 = vpop.permute.xlu0 %5514 }
0x22c0   :  { %v5509_v62 = vpop.permute.xlu1 %5508 }
0x22c1   :  { %v5459_v47 = vrot.slane %v5422_v61, %v9415_v21  ;;  %v5444_v58 = vcombine.high %v5422_v61, %v5422_v61  ;;  %v5415_v8 = vcombine.high %v5413_v1, %v5413_v1  ;;  %v5436_v25 = vrot.slane %v5414_v15, %v9396_v0 }
0x22c2   :  { %v5429_v52 = vrot.slane %v5413_v1, %v9396_v0 }
0x22c3   :  { %v5528_v2 = vmul.f32 %v5505_v4, %v5459_v47  ;;  %v5467_v5 = vrot.slane %v5444_v58, %v9415_v21  ;;  %v5463_v3 = vrot.slane %v5436_v25, %v9415_v21  ;;  %v5446_v37 = vcombine.high %v5436_v25, %v5436_v25  ;;  %v5519_v47 = vpop.permute.xlu0 %5518 }
0x22c4   :  { %v5513_v18 = vpop.permute.xlu1 %5512  ;;  %v5443_v14 = vrot.slane %v5415_v8, %v9396_v0  ;;  %v5475_v13 = vrot.slane %v5429_v52, %v9415_v21  ;;  %v5445_v49 = vcombine.high %v5429_v52, %v5429_v52 }
0x22c5   :  { %5544 = vrot.lane.b32.xlu1 %v5528_v2, %s9106_s27  ;;  %v5529_v53 = vmul.f32 %v5507_v54, %v5463_v3  ;;  %v5471_v28 = vrot.slane %v5446_v37, %v9415_v21  ;;  %v5530_v10 = vmul.f32 %v5509_v62, %v5467_v5 }
0x22c6   :  { %v5479_v45 = vrot.slane %v5443_v14, %v9415_v21  ;;  %v5447_v4 = vcombine.high %v5443_v14, %v5443_v14  ;;  %v5532_v30 = vmul.f32 %v5513_v18, %v5475_v13  ;;  %v5483_v54 = vrot.slane %v5445_v49, %v9415_v21 }
0x22c7   :  { %5546 = vrot.lane.b32.xlu0 %v5529_v53, %s9106_s27  ;;  %v5531_v43 = vmul.f32 %v5511_v26, %v5471_v28  ;;  %v5600_v25 = vpop.permute.xlu0 %5599 }
0x22c8   :  { %v5517_v15 = vpop.permute.xlu1 %5516  ;;  %v5533_v61 = vmul.f32 %v5515_v41, %v5479_v45  ;;  %v5487_v1 = vrot.slane %v5447_v4, %v9415_v21 }
0x22c9   :  { %5548 = vrot.lane.b32.xlu1 %v5530_v10, %s9106_s27  ;;  %v5534_v62 = vmul.f32 %v5517_v15, %v5483_v54 }
0x22ca   :  { %v5535_v58 = vmul.f32 %v5519_v47, %v5487_v1 }
0x22cb   :  { %5550 = vrot.lane.b32.xlu0 %v5531_v43, %s9106_s27 }
0x22cc   :  { %v5607_v8 = vpop.permute.xlu1 %5606 }
0x22cd   :  { %5552 = vrot.lane.b32.xlu1 %v5532_v30, %s9106_s27 }
0x22cf   :  { %5554 = vrot.lane.b32.xlu0 %v5533_v61, %s9106_s27 }
0x22d1   :  { %5556 = vrot.lane.b32.xlu1 %v5534_v62, %s9106_s27 }
0x22d3   :  { %5558 = vrot.lane.b32.xlu0 %v5535_v58, %s9106_s27 }
0x22d5   :  { %5613 = vbcast.lane.b32.xlu1 %v10519_v42, 256 }
0x22d7   :  { %5620 = vbcast.lane.b32.xlu0 %v10524_v29, 256 }
0x22d9   :  { %5627 = vbcast.lane.b32.xlu1 %v10513_v39, 256 }
0x22db   :  { %5634 = vbcast.lane.b32.xlu0 %v10529_v9, 256 }
0x2337   :  { %v5545_v2 = vpop.permute.xlu1 %5544 }
0x2338   :  { %v5568_v5 = vsel %vm329_vm1, %v5545_v2, 0.0 }
0x2339   :  { %5569 = vadd.xlane.f32.xlu1 %v5568_v5  ;;  %v5547_v52 = vpop.permute.xlu0 %5546 }
0x233a   :  { %v5571_v37 = vsel %vm329_vm1, %v5547_v52, 0.0 }
0x233b   :  { %v5549_v3 = vpop.permute.xlu1 %5548  ;;  %5572 = vadd.xlane.f32.xlu0 %v5571_v37 }
0x233c   :  { %v5574_v42 = vsel %vm329_vm1, %v5549_v3, 0.0 }
0x233d   :  { %v5551_v26 = vpop.permute.xlu0 %5550 }
0x233e   :  { %v5577_v29 = vsel %vm329_vm1, %v5551_v26, 0.0 }
0x233f   :  { %v5553_v18 = vpop.permute.xlu1 %5552  ;;  %5575 = vadd.xlane.f32.xlu0 %v5574_v42  ;;  %5578 = vadd.xlane.f32.xlu1 %v5577_v29 }
0x2340   :  { %v5580_v9 = vsel %vm329_vm1, %v5553_v18, 0.0 }
0x2341   :  { %v5555_v39 = vpop.permute.xlu0 %5554 }
0x2342   :  { %v5583_v53 = vsel %vm329_vm1, %v5555_v39, 0.0 }
0x2343   :  { %v5557_v28 = vpop.permute.xlu1 %5556  ;;  %5581 = vadd.xlane.f32.xlu0 %v5580_v9  ;;  %5584 = vadd.xlane.f32.xlu1 %v5583_v53 }
0x2344   :  { %v5586_v10 = vsel %vm329_vm1, %v5557_v28, 0.0 }
0x2345   :  { %v5559_v14 = vpop.permute.xlu0 %5558 }
0x2346   :  { %v5589_v13 = vsel %vm329_vm1, %v5559_v14, 0.0 }
0x2347   :  { %5587 = vadd.xlane.f32.xlu0 %v5586_v10  ;;  %5590 = vadd.xlane.f32.xlu1 %v5589_v13  ;;  %v5614_v49 = vpop.permute.xlu1 %5613 }
0x2349   :  { %v5621_v43 = vpop.permute.xlu0 %5620 }
0x234b   :  { %v5628_v45 = vpop.permute.xlu1 %5627 }
0x234d   :  { %v5635_v4 = vpop.permute.xlu0 %5634 }
0x2358   :  { %5641 = vbcast.lane.b32.xlu1 %v10547_v51, 256 }
0x235d   :  { %5648 = vbcast.lane.b32.xlu0 %v10542_v27, 256 }
0x23c2   :  { %v5570_v41 = vpop.xlane.xlu1 %5569 }
0x23c3   :  { %v5658_v30 = vadd.f32 %v5600_v25, %v5570_v41 }
0x23c4   :  { %v5573_v15 = vpop.xlane.xlu0 %5572 }
0x23c5   :  { %5675 = vperm.xlu1 %8570, %v5658_v30   ;;  %v5659_v54 = vadd.f32 %v5607_v8, %v5573_v15 }
0x23c7   :  { %5678 = vperm.xlu0 %8569, %v5659_v54  }
0x23c8   :  { %v5579_v61 = vpop.xlane.xlu1 %5578  ;;  %v5576_v1 = vpop.xlane.xlu0 %5575 }
0x23c9   :  { %v5661_v62 = vadd.f32 %v5621_v43, %v5579_v61  ;;  %v5660_v47 = vadd.f32 %v5614_v49, %v5576_v1 }
0x23cb   :  { %5684 = vperm.xlu0 %8569, %v5661_v62   ;;  %5681 = vperm.xlu1 %8570, %v5660_v47  }
0x23cc   :  { %v5585_v58 = vpop.xlane.xlu1 %5584  ;;  %v5582_v51 = vpop.xlane.xlu0 %5581 }
0x23cd   :  { %v5663_v2 = vadd.f32 %v5635_v4, %v5585_v58  ;;  %v5662_v27 = vadd.f32 %v5628_v45, %v5582_v51 }
0x23cf   :  { %5690 = vperm.xlu0 %8569, %v5663_v2   ;;  %5687 = vperm.xlu1 %8570, %v5662_v27  }
0x23d0   :  { %v5591_v5 = vpop.xlane.xlu1 %5590  ;;  %v5588_v52 = vpop.xlane.xlu0 %5587 }
0x23d4   :  { %v5642_v3 = vpop.permute.xlu1 %5641  ;;  %v5649_v25 = vpop.permute.xlu0 %5648 }
0x23d5   :  { %v5664_v37 = vadd.f32 %v5642_v3, %v5588_v52  ;;  %v10819_v26 = vadd.f32 %v5649_v25, %v5591_v5 }
0x23d7   :  { %5693 = vperm.xlu1 %8570, %v5664_v37   ;;  %5696 = vperm.xlu0 %8569, %v10819_v26  }
0x23db   :  { %5325 = vrot.lane.b32.xlu0 %v10778_v35, %s9106_s27 }
0x2440   :  { %v5676_v8 = vpop.permute.xlu1 %5675 }
0x2441   :  { %v5701_v53 = vrot.slane %v5676_v8, %v9385_v44 }
0x2442   :  { %v5679_v18 = vpop.permute.xlu0 %5678 }
0x2443   :  { %v5705_v39 = vrot.slane %v5679_v18, %v9385_v44 }
0x2445   :  { %v5730_v14 = vsel %vm548_vm3, %v5705_v39, %v5701_v53 }
0x2446   :  { %v5682_v42 = vpop.permute.xlu1 %5681  ;;  %v5685_v29 = vpop.permute.xlu0 %5684 }
0x2447   :  { %v5709_v9 = vrot.slane %v5682_v42, %v9385_v44  ;;  %v5713_v10 = vrot.slane %v5685_v29, %v9385_v44 }
0x2449   :  { %v5731_v13 = vsel %vm550_vm4, %v5709_v9, %v5730_v14 }
0x244a   :  { %v5688_v28 = vpop.permute.xlu1 %5687  ;;  %v5691_v35 = vpop.permute.xlu0 %5690  ;;  %v5732_v43 = vsel %vm552_vm5, %v5713_v10, %v5731_v13 }
0x244b   :  { %v5717_v49 = vrot.slane %v5688_v28, %v9385_v44  ;;  %v5721_v45 = vrot.slane %v5691_v35, %v9385_v44 }
0x244d   :  { %v5733_v4 = vsel %vm554_vm6, %v5717_v49, %v5732_v43 }
0x244e   :  { %v5734_v58 = vsel %vm556_vm7, %v5721_v45, %v5733_v4 }
0x2452   :  { %v5694_v41 = vpop.permute.xlu1 %5693  ;;  %v5697_v15 = vpop.permute.xlu0 %5696 }
0x2453   :  { %v5725_v61 = vrot.slane %v5694_v41, %v9385_v44  ;;  %v5729_v1 = vrot.slane %v5697_v15, %v9385_v44 }
0x2455   :  { %v5735_v51 = vsel %vm558_vm8, %v5725_v61, %v5734_v58 }
0x2456   :  { %v5326_v5 = vpop.permute.xlu0 %5325  ;;  %v5736_v52 = vsel %vm560_vm9, %v5729_v1, %v5735_v51 }
0x2457   :  { %8480 = vmatmul.mubr.msk.f32.vlgmr.msra.gmra.mxu1 %vm329_vm1, %v5326_v5  ;;  %v5738_v3 = vsel %vm563_vm10, %v5736_v52, -inf }
0x2458   :  { %5739 = vmax.xlane.f32.xlu1 %v5738_v3  ;;  %8501 = vmatprep.mubr.msk.f32.mxu1 %vm9104_vm2, %v11393_v22 }
0x24e1   :  { %v5740_v25 = vpop.xlane.xlu1 %5739 }
0x24e2   :  { %v5745_v8 = vrot.slane %v5740_v25, %v9415_v21  ;;  %v5749_v18 = vrot.slane %v5740_v25, %v9420_v38  ;;  %v5753_v42 = vrot.slane %v5740_v25, %v9469_v36  ;;  %v5757_v53 = vrot.slane %v5740_v25, %v9477_v57 }
0x24e3   :  { %v5761_v10 = vrot.slane %v5740_v25, %v9452_v33  ;;  %v5765_v35 = vrot.slane %v5740_v25, %v9485_v40  ;;  %v5769_v4 = vrot.slane %v5740_v25, %v9510_v59 }
0x24e4   :  { %v5782_v29 = vsub.f32 %v5658_v30, %v5745_v8  ;;  %v5783_v39 = vsub.f32 %v5659_v54, %v5749_v18  ;;  %v5784_v28 = vsub.f32 %v5660_v47, %v5753_v42  ;;  %v5785_v13 = vsub.f32 %v5661_v62, %v5757_v53 }
0x24e5   :  { %v5786_v43 = vsub.f32 %v5662_v27, %v5761_v10  ;;  %v5787_v30 = vsub.f32 %v5663_v2, %v5765_v35  ;;  %v5773_v47 = vrot.slane %v5740_v25, %v9502_v56  ;;  %v5788_v15 = vsub.f32 %v5664_v37, %v5769_v4 }
0x24e6   :  { %v5790_v9 = vmul.f32 1.442695, %v5782_v29  ;;  %v5792_v14 = vmul.f32 1.442695, %v5783_v39  ;;  %v5794_v49 = vmul.f32 1.442695, %v5784_v28 }
0x24e7   :  { %v5796_v45 = vmul.f32 1.442695, %v5785_v13  ;;  %v5798_v54 = vmul.f32 1.442695, %v5786_v43  ;;  %v5800_v62 = vmul.f32 1.442695, %v5787_v30  ;;  %v5789_v27 = vsub.f32 %v10819_v26, %v5773_v47 }
0x24e8   :  { %8765 = vpow2.f32 %v5790_v9  ;;  %v5802_v1 = vmul.f32 1.442695, %v5788_v15 }
0x24e9   :  { %8767 = vpow2.f32 %v5792_v14  ;;  %v5804_v2 = vmul.f32 1.442695, %v5789_v27 }
0x24ea   :  { %8769 = vpow2.f32 %v5794_v49 }
0x24eb   :  { %8771 = vpow2.f32 %v5796_v45 }
0x24ec   :  { %8773 = vpow2.f32 %v5798_v54 }
0x24ed   :  { %8775 = vpow2.f32 %v5800_v62 }
0x24ee   :  { %8777 = vpow2.f32 %v5802_v1 }
0x24ef   :  { %8779 = vpow2.f32 %v5804_v2 }
0x24f5   :  { %v10850_v41 = vpop.eup %8765 }
0x24f6   :  { %5815 = vperm.xlu0 %8569, %v10850_v41   ;;  %v8768_v61 = vpop.eup %8767 }
0x24f7   :  { %v8770_v58 = vpop.eup %8769 }
0x24f8   :  { %v8772_v51 = vpop.eup %8771 }
0x24f9   :  { %v8774_v5 = vpop.eup %8773 }
0x24fa   :  { %5818 = vperm.xlu0 %8569, %v8768_v61   ;;  %v8776_v52 = vpop.eup %8775 }
0x24fb   :  { %v8778_v37 = vpop.eup %8777 }
0x24fc   :  { %v8780_v3 = vpop.eup %8779 }
0x24fe   :  { %5821 = vperm.xlu0 %8569, %v8770_v58  }
0x2502   :  { %5824 = vperm.xlu0 %8569, %v8772_v51  }
0x2506   :  { %5827 = vperm.xlu0 %8569, %v8774_v5  }
0x250a   :  { %5830 = vperm.xlu0 %8569, %v8776_v52  }
0x250e   :  { %5833 = vperm.xlu0 %8569, %v8778_v37  }
0x2512   :  { %5836 = vperm.xlu0 %8569, %v8780_v3  }
0x2517   :  { %v10855_v25 = vpop.f32.mrf.mxu1 }
0x2519   :  { %v8481_v26 = vpop.f32.mrf.mxu1 }
0x2571   :  { %v5816_v8 = vpop.permute.xlu0 %5815 }
0x2572   :  { %v5841_v14 = vrot.slane %v5816_v8, %v9385_v44 }
0x2575   :  { %v5819_v18 = vpop.permute.xlu0 %5818 }
0x2576   :  { %v5845_v53 = vrot.slane %v5819_v18, %v9385_v44 }
0x2578   :  { %v5870_v35 = vsel %vm548_vm3, %v5845_v53, %v5841_v14 }
0x2579   :  { %v5822_v42 = vpop.permute.xlu0 %5821 }
0x257a   :  { %v5849_v28 = vrot.slane %v5822_v42, %v9385_v44 }
0x257c   :  { %v5871_v45 = vsel %vm550_vm4, %v5849_v28, %v5870_v35 }
0x257d   :  { %v5825_v29 = vpop.permute.xlu0 %5824 }
0x257e   :  { %v5853_v10 = vrot.slane %v5825_v29, %v9385_v44 }
0x2580   :  { %v5872_v30 = vsel %vm552_vm5, %v5853_v10, %v5871_v45 }
0x2581   :  { %v5828_v39 = vpop.permute.xlu0 %5827 }
0x2582   :  { %v5857_v13 = vrot.slane %v5828_v39, %v9385_v44 }
0x2584   :  { %v5873_v54 = vsel %vm554_vm6, %v5857_v13, %v5872_v30 }
0x2585   :  { %v5831_v9 = vpop.permute.xlu0 %5830 }
0x2586   :  { %v5861_v43 = vrot.slane %v5831_v9, %v9385_v44 }
0x2588   :  { %v5874_v15 = vsel %vm556_vm7, %v5861_v43, %v5873_v54 }
0x2589   :  { %v5834_v49 = vpop.permute.xlu0 %5833 }
0x258a   :  { %v5865_v4 = vrot.slane %v5834_v49, %v9385_v44 }
0x258c   :  { %v5875_v27 = vsel %vm558_vm8, %v5865_v4, %v5874_v15 }
0x258d   :  { %v5837_v47 = vpop.permute.xlu0 %5836 }
0x258e   :  { %v5869_v62 = vrot.slane %v5837_v47, %v9385_v44 }
0x2590   :  { %v5876_v1 = vsel %vm560_vm9, %v5869_v62, %v5875_v27 }
0x2591   :  { %v5878_v2 = vsel %vm563_vm10, %v5876_v1, 0.0 }
0x2592   :  { %5879 = vadd.xlane.f32.xlu1 %v5878_v2 }
0x261b   :  { %v5880_v26 = vpop.xlane.xlu1 %5879 }
0x261c   :  { %8781 = vrcp.f32 %v5880_v26 }
0x2629   :  { %v8782_v8 = vpop.eup %8781 }
0x262a   :  { %v5894_v18 = vrot.slane %v8782_v8, %v9469_v36  ;;  %v5890_v42 = vrot.slane %v8782_v8, %v9420_v38  ;;  %v5910_v9 = vrot.slane %v8782_v8, %v9510_v59  ;;  %v5886_v53 = vrot.slane %v8782_v8, %v9415_v21 }
0x262b   :  { %v5898_v10 = vrot.slane %v8782_v8, %v9477_v57  ;;  %v5902_v49 = vrot.slane %v8782_v8, %v9452_v33  ;;  %v5914_v43 = vrot.slane %v8782_v8, %v9502_v56 }
0x262c   :  { %v5925_v29 = vmul.f32 %v8770_v58, %v5894_v18  ;;  %v5924_v39 = vmul.f32 %v8768_v61, %v5890_v42  ;;  %v5929_v28 = vmul.f32 %v8778_v37, %v5910_v9  ;;  %v5923_v14 = vmul.f32 %v10850_v41, %v5886_v53 }
0x262d   :  { %v5926_v13 = vmul.f32 %v8772_v51, %v5898_v10  ;;  %v5927_v35 = vmul.f32 %v8774_v5, %v5902_v49  ;;  %v5906_v61 = vrot.slane %v8782_v8, %v9485_v40  ;;  %v5930_v45 = vmul.f32 %v8780_v3, %v5914_v43 }
0x262e   :  { %5951 = vperm.xlu1 %8570, %v5925_v29   ;;  %5946 = vperm.xlu0 %8569, %v5924_v39  }
0x262f   :  { %v5928_v58 = vmul.f32 %v8776_v52, %v5906_v61 }
0x2632   :  { %5971 = vperm.xlu1 %8570, %v5929_v28   ;;  %5941 = vperm.xlu0 %8569, %v5923_v14  }
0x2636   :  { %5956 = vperm.xlu0 %8569, %v5926_v13  }
0x263a   :  { %5961 = vperm.xlu0 %8569, %v5927_v35  }
0x263e   :  { %5966 = vperm.xlu0 %8569, %v5928_v58  }
0x2642   :  { %5976 = vperm.xlu0 %8569, %v5930_v45  }
0x26a9   :  { %v5952_v37 = vpop.permute.xlu1 %5951  ;;  %v5947_v41 = vpop.permute.xlu0 %5946 }
0x26aa   :  { %v5981_v4 = vmul.f32 %v5952_v37, %v10669_v48  ;;  %v5980_v30 = vmul.f32 %v5947_v41, %v10663_v12 }
0x26ac   :  { %v6001_v51 = vsel %vm329_vm1, %v5981_v4, 0.0  ;;  %v5994_v54 = vsel %vm329_vm1, %v5980_v30, 0.0 }
0x26ad   :  { %v6002_v5 = vrot.slane %v6001_v51, 4  ;;  %v5995_v47 = vrot.slane %v5994_v54, 4  ;;  %v5972_v15 = vpop.permute.xlu1 %5971  ;;  %v5942_v62 = vpop.permute.xlu0 %5941 }
0x26ae   :  { %v5985_v52 = vmul.f32 %v5972_v15, %v10685_v55  ;;  %v5979_v27 = vmul.f32 %v5942_v62, %v10673_v24 }
0x26af   :  { %v6003_v3 = vadd.f32 %v6002_v5, %v6001_v51  ;;  %v5996_v1 = vadd.f32 %v5995_v47, %v5994_v54  ;;  %v6044_v5 = vrot.slane %v10855_v25, 1 }
0x26b0   :  { %v6029_v2 = vsel %vm329_vm1, %v5985_v52, 0.0  ;;  %v5987_v48 = vsel %vm329_vm1, %v5979_v27, 0.0  ;;  %v6045_v27 = vrot.slane %v10855_v25, 2 }
0x26b1   :  { %v6004_v26 = vrot.slane %v6003_v3, 2  ;;  %v5997_v12 = vrot.slane %v5996_v1, 2  ;;  %v6030_v8 = vrot.slane %v6029_v2, 4  ;;  %v5988_v18 = vrot.slane %v5987_v48, 4  ;;  %v5957_v42 = vpop.permute.xlu0 %5956 }
0x26b2   :  { %v5982_v29 = vmul.f32 %v5957_v42, %v10677_v11 }
0x26b3   :  { %v5998_v39 = vadd.f32 %v5997_v12, %v5996_v1  ;;  %v6031_v9 = vadd.f32 %v6030_v8, %v6029_v2  ;;  %v5989_v53 = vadd.f32 %v5988_v18, %v5987_v48  ;;  %v6005_v28 = vadd.f32 %v6004_v26, %v6003_v3 }
0x26b4   :  { %v6008_v55 = vsel %vm329_vm1, %v5982_v29, 0.0  ;;  %v6046_v18 = vrot.slane %v10855_v25, 3 }
0x26b5   :  { %v5999_v24 = vrot.slane %v5998_v39, 1  ;;  %v6032_v14 = vrot.slane %v6031_v9, 2  ;;  %v5990_v10 = vrot.slane %v5989_v53, 2  ;;  %v5962_v13 = vpop.permute.xlu0 %5961  ;;  %v6009_v49 = vrot.slane %v6008_v55, 4 }
0x26b6   :  { %v5983_v35 = vmul.f32 %v5962_v13, %v10661_v20  ;;  %v6006_v58 = vrot.slane %v6005_v28, 1 }
0x26b7   :  { %v5991_v61 = vadd.f32 %v5990_v10, %v5989_v53  ;;  %v6010_v43 = vadd.f32 %v6009_v49, %v6008_v55  ;;  %v6000_v37 = vadd.f32 %v5999_v24, %v5998_v39  ;;  %v6033_v11 = vadd.f32 %v6032_v14, %v6031_v9 }
0x26b8   :  { %v6015_v45 = vsel %vm329_vm1, %v5983_v35, 0.0  ;;  %v6007_v15 = vadd.f32 %v6006_v58, %v6005_v28  ;;  %v6049_v35 = vrot.slane %v10855_v25, 6 }
0x26b9   :  { %v5992_v41 = vrot.slane %v5991_v61, 1  ;;  %v5967_v4 = vpop.permute.xlu0 %5966  ;;  %v6011_v30 = vrot.slane %v6010_v43, 2  ;;  %v6016_v51 = vrot.slane %v6015_v45, 4  ;;  %v6060_v3 = vadd.f32 %v6044_v5, %v6000_v37 }
0x26ba   :  { %v5984_v54 = vmul.f32 %v5967_v4, %v10681_v31  ;;  %v6034_v1 = vrot.slane %v6033_v11, 1  ;;  %v6061_v29 = vadd.f32 %v6045_v27, %v6007_v15  ;;  %v6050_v27 = vrot.slane %v10855_v25, 7 }
0x26bb   :  { %v5993_v47 = vadd.f32 %v5992_v41, %v5991_v61  ;;  %v6012_v62 = vadd.f32 %v6011_v30, %v6010_v43  ;;  %v6017_v52 = vadd.f32 %v6016_v51, %v6015_v45  ;;  %v6075_v28 = vadd.f32 %v10695_v60, %v6060_v3 }
0x26bc   :  { %v6022_v20 = vsel %vm329_vm1, %v5984_v54, 0.0  ;;  %v6035_v14 = vadd.f32 %v6034_v1, %v6033_v11  ;;  %v6076_v58 = vadd.f32 %v10695_v60, %v6061_v29  ;;  %v6047_v45 = vrot.slane %v10855_v25, 4 }
0x26bd   :  { %v6023_v2 = vrot.slane %v6022_v20, 4  ;;  %v5977_v48 = vpop.permute.xlu0 %5976  ;;  %v6059_v26 = vadd.f32 %v5993_v47, %v10855_v25  ;;  %v6013_v12 = vrot.slane %v6012_v62, 1  ;;  %v6018_v8 = vrot.slane %v6017_v52, 2 }
0x26be   :  { %v5986_v31 = vmul.f32 %v5977_v48, %v10690_v50  ;;  %8783 = vtanh.f32 %v6075_v28  ;;  %v6065_v30 = vadd.f32 %v6049_v35, %v6035_v14  ;;  %v6048_v51 = vrot.slane %v10855_v25, 5 }
0x26bf   :  { %v6024_v42 = vadd.f32 %v6023_v2, %v6022_v20  ;;  %v6014_v39 = vadd.f32 %v6013_v12, %v6012_v62  ;;  %v6019_v9 = vadd.f32 %v6018_v8, %v6017_v52  ;;  %v6074_v10 = vadd.f32 %v10695_v60, %v6059_v26 }
0x26c0   :  { %v6036_v53 = vsel %vm329_vm1, %v5986_v31, 0.0  ;;  %v6080_v52 = vadd.f32 %v10695_v60, %v6065_v30 }
0x26c1   :  { %v6025_v55 = vrot.slane %v6024_v42, 2  ;;  %v6037_v24 = vrot.slane %v6036_v53, 4  ;;  %v6062_v13 = vadd.f32 %v6046_v18, %v6014_v39  ;;  %v6020_v49 = vrot.slane %v6019_v9, 1 }
0x26c2   :  { %8785 = vtanh.f32 %v6074_v10 }
0x26c3   :  { %v6026_v50 = vadd.f32 %v6025_v55, %v6024_v42  ;;  %v6038_v61 = vadd.f32 %v6037_v24, %v6036_v53  ;;  %v6077_v43 = vadd.f32 %v10695_v60, %v6062_v13  ;;  %v6021_v37 = vadd.f32 %v6020_v49, %v6019_v9 }
0x26c5   :  { %v6027_v41 = vrot.slane %v6026_v50, 1  ;;  %v6039_v4 = vrot.slane %v6038_v61, 2  ;;  %v6063_v11 = vadd.f32 %v6047_v45, %v6021_v37  ;;  %8787 = vtanh.f32 %v6077_v43  ;;  %v11396_v45 = vld [vmem:[#allocation32_spill] sm:$0xff] }
0x26c6   :  { %8789 = vtanh.f32 %v6076_v58  ;;  %v301_v37 = vadd.f32 %v10737_v19, %v11396_v45 }
0x26c7   :  { %v6028_v54 = vadd.f32 %v6027_v41, %v6026_v50  ;;  %v6040_v5 = vadd.f32 %v6039_v4, %v6038_v61  ;;  %v6078_v47 = vadd.f32 %v10695_v60, %v6063_v11 }
0x26c9   :  { %v6064_v15 = vadd.f32 %v6048_v51, %v6028_v54  ;;  %v6041_v62 = vrot.slane %v6040_v5, 1  ;;  %8791 = vtanh.f32 %v6078_v47 }
0x26cb   :  { %v6079_v20 = vadd.f32 %v10695_v60, %v6064_v15  ;;  %v6042_v3 = vadd.f32 %v6041_v62, %v6040_v5  ;;  %v8784_v48 = vpop.eup %8783 }
0x26cc   :  { %v6098_v31 = vrot.slane %v8784_v48, 7 }
0x26cd   :  { %8793 = vtanh.f32 %v6079_v20  ;;  %v6066_v1 = vadd.f32 %v6050_v27, %v6042_v3 }
0x26ce   :  { %8795 = vtanh.f32 %v6080_v52 }
0x26cf   :  { %v6081_v2 = vadd.f32 %v10695_v60, %v6066_v1  ;;  %v8786_v26 = vpop.eup %8785 }
0x26d0   :  { %v6099_v29 = vsel %vm548_vm3, %v6098_v31, %v8786_v26 }
0x26d1   :  { %8797 = vtanh.f32 %v6081_v2 }
0x26d2   :  { %v8788_v12 = vpop.eup %8787 }
0x26d3   :  { %v8790_v8 = vpop.eup %8789  ;;  %v6102_v42 = vrot.slane %v8788_v12, 5 }
0x26d4   :  { %v6100_v39 = vrot.slane %v8790_v8, 6 }
0x26d6   :  { %v8792_v18 = vpop.eup %8791  ;;  %v6101_v25 = vsel %vm550_vm4, %v6100_v39, %v6099_v29 }
0x26d7   :  { %v6104_v9 = vrot.slane %v8792_v18, 4  ;;  %v6103_v55 = vsel %vm552_vm5, %v6102_v42, %v6101_v25 }
0x26d9   :  { %v6105_v60 = vsel %vm554_vm6, %v6104_v9, %v6103_v55 }
0x26da   :  { %v8794_v53 = vpop.eup %8793 }
0x26db   :  { %v8796_v28 = vpop.eup %8795  ;;  %v6106_v24 = vrot.slane %v8794_v53, 3 }
0x26dc   :  { %v6108_v13 = vrot.slane %v8796_v28, 2 }
0x26dd   :  { %v6107_v14 = vsel %vm556_vm7, %v6106_v24, %v6105_v60 }
0x26de   :  { %v8798_v10 = vpop.eup %8797  ;;  %v6109_v35 = vsel %vm558_vm8, %v6108_v13, %v6107_v14 }
0x26df   :  { %v6110_v49 = vrot.slane %v8798_v10, 1 }
0x26e1   :  { %v6111_v50 = vsel %vm560_vm9, %v6110_v49, %v6109_v35 }
0x26e2   :  { %6113 = vst.msk [vmem:[#allocation6 + $0x28] sm:$0xff] %vm329_vm1, %v6111_v50  ;;  %8491 = vmatmul.mubr.msk.f32.vlgmr.msra.gmra.mxu0 %vm329_vm1, %v6111_v50 }
0x26e3   :  { %8512 = vmatprep.mubr.msk.f32.mxu0 %vm9104_vm2, %v11393_v22 }
0x27a2   :  { %v6194_v61 = vpop.f32.mrf.mxu0 }
0x27a3   :  { %v6195_v58 = vadd.f32 %v10733_v63, %v6194_v61  ;;  %v10937_v63 = vld [vmem:[#allocation5] sm:$0xff] }
0x27a4   :  { %v8492_v43 = vpop.f32.mrf.mxu0  ;;  %v10943_v19 = vrot.slane %v10937_v63, %v9415_v21 }
0x27a5   :  { %6204 = vrot.lane.b32.xlu1 %v6195_v58, %s9105_s2  ;;  %v6198_v41 = vadd.f32 %v6195_v58, %v301_v37 }
0x27a7   :  { %v6199_v4 = vmul.f32 0.5, %v6198_v41 }
0x27a9   :  { %8799 = vtanh.f32 %v6199_v4 }
0x27b6   :  { %v8800_v30 = vpop.eup %8799 }
0x27b7   :  { %v6201_v11 = vadd.f32 1.0, %v8800_v30 }
0x27b9   :  { %v6202_v51 = vmul.f32 0.5, %v6201_v11  ;;  %v10988_v11 = vrot.slane %v10937_v63, %v9469_v36 }
0x2817   :  { %v6205_v54 = vpop.permute.xlu1 %6204 }
0x2818   :  { %v6207_v5 = vmul.f32 %v6205_v54, %v6202_v51  ;;  %v10998_v54 = vrot.slane %v10937_v63, %v9452_v33 }
0x281a   :  { %6209 = vrot.lane.b32.xlu0 %v6207_v5, %s9105_s2  ;;  %v11004_v5 = vrot.slane %v10937_v63, %v9485_v40 }
0x281e   :  { %6220 = vrot.lane.b32.xlu0 %v6111_v50, %s9102_s21 }
0x2822   :  { %6411 = vrot.lane.b32.xlu0 %v10743_v23, %s9102_s21 }
0x2826   :  { %6415 = vrot.lane.b32.xlu0 %v10747_v6, %s9102_s21  ;;  %v10957_v6 = vrot.slane %v10937_v63, %v9420_v38 }
0x282a   :  { %6419 = vrot.lane.b32.xlu0 %v10751_v32, %s9102_s21 }
0x282e   :  { %6423 = vrot.lane.b32.xlu0 %v10755_v34, %s9102_s21  ;;  %v6214_v34 = vsub.f32 1.0, %v6202_v51 }
0x2832   :  { %6504 = vbcast.lane.b32.xlu0 %v10943_v19, 256 }
0x288c   :  { %v6210_v47 = vpop.permute.xlu0 %6209 }
0x288d   :  { %v6212_v15 = vadd.f32 %v6210_v47, %v301_v37 }
0x288f   :  { %8801 = vtanh.f32 %v6212_v15 }
0x2890   :  { %v6221_v32 = vpop.permute.xlu0 %6220 }
0x2891   :  { %v6223_v52 = vmul.f32 %v6221_v32, %v6202_v51  ;;  %v10994_v51 = vrot.slane %v10937_v63, %v9477_v57 }
0x2894   :  { %v6412_v27 = vpop.permute.xlu0 %6411 }
0x2898   :  { %v6416_v53 = vpop.permute.xlu0 %6415 }
0x289c   :  { %v8802_v23 = vpop.eup %8801  ;;  %v6420_v50 = vpop.permute.xlu0 %6419 }
0x289d   :  { %6216 = vrot.lane.b32.xlu1 %v8802_v23, %s9106_s27 }
0x28a0   :  { %v6424_v4 = vpop.permute.xlu0 %6423 }
0x28a1   :  { %6409 = vrot.lane.b32.xlu1 %v10761_v7, %s9102_s21 }
0x28a4   :  { %v6505_v15 = vpop.permute.xlu0 %6504 }
0x28a5   :  { %6413 = vrot.lane.b32.xlu1 %v10765_v17, %s9102_s21 }
0x28a9   :  { %6417 = vrot.lane.b32.xlu1 %v10769_v16, %s9102_s21 }
0x28ad   :  { %6421 = vrot.lane.b32.xlu1 %v10773_v46, %s9102_s21 }
0x28b1   :  { %6511 = vbcast.lane.b32.xlu1 %v10957_v6, 256 }
0x290f   :  { %v6217_v62 = vpop.permute.xlu1 %6216 }
0x2910   :  { %v6219_v7 = vmul.f32 %v6217_v62, %v6214_v34 }
0x2912   :  { %v10960_v20 = vadd.f32 %v6223_v52, %v6219_v7 }
0x2913   :  { %v6410_v17 = vpop.permute.xlu1 %6409 }
0x2914   :  { %v6304_v16 = vcombine.high %v10960_v20, %v10960_v20  ;;  %v6311_v46 = vrot.slane %v10960_v20, %v9396_v0 }
0x2916   :  { %v6319_v3 = vcombine.high %v6311_v46, %v6311_v46  ;;  %v6327_v1 = vrot.slane %v6311_v46, %v9396_v0  ;;  %v6318_v2 = vrot.slane %v6304_v16, %v9396_v0 }
0x2917   :  { %v6414_v48 = vpop.permute.xlu1 %6413 }
0x2918   :  { %v6364_v26 = vrot.slane %v6327_v1, %v9415_v21  ;;  %v6349_v12 = vcombine.high %v6327_v1, %v6327_v1  ;;  %v6320_v8 = vcombine.high %v6318_v2, %v6318_v2  ;;  %v6341_v31 = vrot.slane %v6319_v3, %v9396_v0 }
0x2919   :  { %v6334_v29 = vrot.slane %v6318_v2, %v9396_v0 }
0x291a   :  { %v6433_v18 = vmul.f32 %v6410_v17, %v6364_v26  ;;  %v6372_v42 = vrot.slane %v6349_v12, %v9415_v21  ;;  %v6368_v39 = vrot.slane %v6341_v31, %v9415_v21  ;;  %v6351_v9 = vcombine.high %v6341_v31, %v6341_v31 }
0x291b   :  { %v6418_v25 = vpop.permute.xlu1 %6417  ;;  %v6348_v28 = vrot.slane %v6320_v8, %v9396_v0  ;;  %v6380_v14 = vrot.slane %v6334_v29, %v9415_v21  ;;  %v6350_v10 = vcombine.high %v6334_v29, %v6334_v29  ;;  %v11017_v8 = vrot.slane %v10937_v63, %v9510_v59 }
0x291c   :  { %6449 = vrot.lane.b32.xlu1 %v6433_v18, %s9106_s27  ;;  %v6434_v55 = vmul.f32 %v6412_v27, %v6368_v39  ;;  %v6376_v24 = vrot.slane %v6351_v9, %v9415_v21  ;;  %v6435_v60 = vmul.f32 %v6414_v48, %v6372_v42  ;;  %v11022_v31 = vrot.slane %v10937_v63, %v9502_v56 }
0x291d   :  { %v6384_v49 = vrot.slane %v6348_v28, %v9415_v21  ;;  %v6352_v35 = vcombine.high %v6348_v28, %v6348_v28  ;;  %v6437_v61 = vmul.f32 %v6418_v25, %v6380_v14  ;;  %v6388_v43 = vrot.slane %v6350_v10, %v9415_v21 }
0x291e   :  { %6451 = vrot.lane.b32.xlu0 %v6434_v55, %s9106_s27  ;;  %v6436_v13 = vmul.f32 %v6416_v53, %v6376_v24 }
0x291f   :  { %v6422_v58 = vpop.permute.xlu1 %6421  ;;  %v6438_v45 = vmul.f32 %v6420_v50, %v6384_v49  ;;  %v6392_v37 = vrot.slane %v6352_v35, %v9415_v21  ;;  %v6228_v35 = vld [vmem:[#allocation19 + $0x18] sm:$0xff]  ;;  %v6227_v50 = vld [vmem:[#allocation19 + $0x10] sm:$0xff] }
0x2920   :  { %6453 = vrot.lane.b32.xlu1 %v6435_v60, %s9106_s27  ;;  %v6439_v41 = vmul.f32 %v6422_v58, %v6388_v43  ;;  %8494 = vmatpush3.msra.mxu1 %v6228_v35  ;;  %v6226_v43 = vld [vmem:[#allocation19 + $0x8] sm:$0xff] }
0x2921   :  { %v6440_v30 = vmul.f32 %v6424_v4, %v6392_v37  ;;  %8495 = vmatprep.subr.mxu1 %v11393_v22 }
0x2922   :  { %6455 = vrot.lane.b32.xlu0 %v6436_v13, %s9106_s27  ;;  %8496 = vmatpush3.msra.mxu1 %v6227_v50 }
0x2923   :  { %v6512_v47 = vpop.permute.xlu1 %6511  ;;  %8497 = vmatprep.subr.mxu1 %v11393_v22 }
0x2924   :  { %6457 = vrot.lane.b32.xlu1 %v6437_v61, %s9106_s27  ;;  %8498 = vmatpush3.msra.mxu1 %v6226_v43 }
0x2925   :  { %8499 = vmatprep.subr.mxu1 %v11393_v22 }
0x2926   :  { %6459 = vrot.lane.b32.xlu0 %v6438_v45, %s9106_s27  ;;  %v6225_v45 = vld [vmem:[#allocation19] sm:$0xff] }
0x2927   :  { %8500 = vmatpush3.msra.mxu1 %v6225_v45 }
0x2928   :  { %6461 = vrot.lane.b32.xlu1 %v6439_v41, %s9106_s27  ;;  %8515 = vmatprep.subr.mxu1 %v11393_v22 }
0x292a   :  { %6463 = vrot.lane.b32.xlu0 %v6440_v30, %s9106_s27 }
0x292c   :  { %6518 = vbcast.lane.b32.xlu1 %v10988_v11, 256 }
0x292e   :  { %6525 = vbcast.lane.b32.xlu0 %v10994_v51, 256 }
0x2930   :  { %6532 = vbcast.lane.b32.xlu1 %v10998_v54, 256 }
0x2932   :  { %6539 = vbcast.lane.b32.xlu0 %v11004_v5, 256 }
0x298e   :  { %v6450_v23 = vpop.permute.xlu1 %6449 }
0x298f   :  { %v6473_v32 = vsel %vm329_vm1, %v6450_v23, 0.0 }
0x2990   :  { %6474 = vadd.xlane.f32.xlu1 %v6473_v32  ;;  %v6452_v34 = vpop.permute.xlu0 %6451 }
0x2991   :  { %v6476_v52 = vsel %vm329_vm1, %v6452_v34, 0.0 }
0x2992   :  { %v6454_v62 = vpop.permute.xlu1 %6453  ;;  %6477 = vadd.xlane.f32.xlu0 %v6476_v52 }
0x2993   :  { %v6479_v17 = vsel %vm329_vm1, %v6454_v62, 0.0 }
0x2994   :  { %v6456_v7 = vpop.permute.xlu0 %6455 }
0x2995   :  { %v6482_v46 = vsel %vm329_vm1, %v6456_v7, 0.0 }
0x2996   :  { %v6458_v16 = vpop.permute.xlu1 %6457  ;;  %6480 = vadd.xlane.f32.xlu0 %v6479_v17  ;;  %6483 = vadd.xlane.f32.xlu1 %v6482_v46 }
0x2997   :  { %v6485_v3 = vsel %vm329_vm1, %v6458_v16, 0.0 }
0x2998   :  { %v6460_v27 = vpop.permute.xlu0 %6459 }
0x2999   :  { %v6488_v1 = vsel %vm329_vm1, %v6460_v27, 0.0 }
0x299a   :  { %v6462_v2 = vpop.permute.xlu1 %6461  ;;  %6486 = vadd.xlane.f32.xlu0 %v6485_v3  ;;  %6489 = vadd.xlane.f32.xlu1 %v6488_v1 }
0x299b   :  { %v6491_v26 = vsel %vm329_vm1, %v6462_v2, 0.0 }
0x299c   :  { %v6464_v48 = vpop.permute.xlu0 %6463 }
0x299d   :  { %v6494_v12 = vsel %vm329_vm1, %v6464_v48, 0.0 }
0x299e   :  { %6492 = vadd.xlane.f32.xlu0 %v6491_v26  ;;  %6495 = vadd.xlane.f32.xlu1 %v6494_v12  ;;  %v6519_v18 = vpop.permute.xlu1 %6518 }
0x29a0   :  { %v6526_v42 = vpop.permute.xlu0 %6525 }
0x29a2   :  { %v6533_v29 = vpop.permute.xlu1 %6532 }
0x29a4   :  { %v6540_v39 = vpop.permute.xlu0 %6539 }
0x29af   :  { %6546 = vbcast.lane.b32.xlu1 %v11017_v8, 256 }
0x29b4   :  { %6553 = vbcast.lane.b32.xlu0 %v11022_v31, 256 }
0x2a19   :  { %v6475_v9 = vpop.xlane.xlu1 %6474 }
0x2a1a   :  { %v11025_v53 = vadd.f32 %v6505_v15, %v6475_v9 }
0x2a1b   :  { %v6478_v25 = vpop.xlane.xlu0 %6477 }
0x2a1c   :  { %6580 = vperm.xlu1 %8570, %v11025_v53   ;;  %v11028_v28 = vadd.f32 %v6512_v47, %v6478_v25 }
0x2a1e   :  { %6583 = vperm.xlu0 %8569, %v11028_v28  }
0x2a1f   :  { %v6484_v55 = vpop.xlane.xlu1 %6483  ;;  %v6481_v24 = vpop.xlane.xlu0 %6480 }
0x2a20   :  { %v11031_v63 = vadd.f32 %v6526_v42, %v6484_v55  ;;  %v11033_v60 = vadd.f32 %v6519_v18, %v6481_v24 }
0x2a22   :  { %6589 = vperm.xlu0 %8569, %v11031_v63   ;;  %6586 = vperm.xlu1 %8570, %v11033_v60  }
0x2a23   :  { %v6490_v14 = vpop.xlane.xlu1 %6489  ;;  %v6487_v10 = vpop.xlane.xlu0 %6486 }
0x2a24   :  { %v11037_v13 = vadd.f32 %v6540_v39, %v6490_v14  ;;  %v11039_v49 = vadd.f32 %v6533_v29, %v6487_v10 }
0x2a26   :  { %6595 = vperm.xlu0 %8569, %v11037_v13   ;;  %6592 = vperm.xlu1 %8570, %v11039_v49  }
0x2a27   :  { %v6496_v61 = vpop.xlane.xlu1 %6495  ;;  %v6493_v58 = vpop.xlane.xlu0 %6492 }
0x2a2b   :  { %v6547_v37 = vpop.permute.xlu1 %6546  ;;  %v6554_v41 = vpop.permute.xlu0 %6553 }
0x2a2c   :  { %v11045_v4 = vadd.f32 %v6547_v37, %v6493_v58  ;;  %v11047_v30 = vadd.f32 %v6554_v41, %v6496_v61 }
0x2a2e   :  { %6598 = vperm.xlu1 %8570, %v11045_v4   ;;  %6601 = vperm.xlu0 %8569, %v11047_v30  }
0x2a32   :  { %6230 = vrot.lane.b32.xlu0 %v10960_v20, %s9106_s27 }
0x2a97   :  { %v6581_v47 = vpop.permute.xlu1 %6580 }
0x2a98   :  { %v6606_v52 = vrot.slane %v6581_v47, %v9385_v44 }
0x2a99   :  { %v6584_v15 = vpop.permute.xlu0 %6583 }
0x2a9a   :  { %v6610_v34 = vrot.slane %v6584_v15, %v9385_v44 }
0x2a9c   :  { %v6635_v17 = vsel %vm548_vm3, %v6610_v34, %v6606_v52 }
0x2a9d   :  { %v6587_v23 = vpop.permute.xlu1 %6586  ;;  %v6590_v32 = vpop.permute.xlu0 %6589 }
0x2a9e   :  { %v6614_v62 = vrot.slane %v6587_v23, %v9385_v44  ;;  %v6618_v16 = vrot.slane %v6590_v32, %v9385_v44 }
0x2aa0   :  { %v6636_v46 = vsel %vm550_vm4, %v6614_v62, %v6635_v17 }
0x2aa1   :  { %v6593_v7 = vpop.permute.xlu1 %6592  ;;  %v6596_v20 = vpop.permute.xlu0 %6595  ;;  %v6637_v3 = vsel %vm552_vm5, %v6618_v16, %v6636_v46 }
0x2aa2   :  { %v6622_v27 = vrot.slane %v6593_v7, %v9385_v44  ;;  %v6626_v1 = vrot.slane %v6596_v20, %v9385_v44 }
0x2aa4   :  { %v6638_v2 = vsel %vm554_vm6, %v6622_v27, %v6637_v3 }
0x2aa5   :  { %v6639_v42 = vsel %vm556_vm7, %v6626_v1, %v6638_v2 }
0x2aa9   :  { %v6599_v48 = vpop.permute.xlu1 %6598  ;;  %v6602_v26 = vpop.permute.xlu0 %6601 }
0x2aaa   :  { %v6630_v12 = vrot.slane %v6599_v48, %v9385_v44  ;;  %v6634_v18 = vrot.slane %v6602_v26, %v9385_v44 }
0x2aac   :  { %v6640_v29 = vsel %vm558_vm8, %v6630_v12, %v6639_v42 }
0x2aad   :  { %v6231_v39 = vpop.permute.xlu0 %6230  ;;  %v6641_v9 = vsel %vm560_vm9, %v6634_v18, %v6640_v29 }
0x2aae   :  { %8502 = vmatmul.mubr.msk.f32.vlgmr.msra.gmra.mxu1 %vm329_vm1, %v6231_v39  ;;  %v6643_v25 = vsel %vm563_vm10, %v6641_v9, -inf }
0x2aaf   :  { %6644 = vmax.xlane.f32.xlu1 %v6643_v25  ;;  %8516 = vmatpush3.msra.mxu1 %v6228_v35 }
0x2ab0   :  { %8517 = vmatprep.subr.mxu1 %v11393_v22  ;;  %8523 = vmatprep.mubr.msk.f32.mxu1 %vm9104_vm2, %v11393_v22 }
0x2ab1   :  { %8518 = vmatpush3.msra.mxu1 %v6227_v50 }
0x2ab2   :  { %8519 = vmatprep.subr.mxu1 %v11393_v22 }
0x2ab3   :  { %8520 = vmatpush3.msra.mxu1 %v6226_v43 }
0x2ab4   :  { %8521 = vmatprep.subr.mxu1 %v11393_v22 }
0x2ab5   :  { %8522 = vmatpush3.msra.mxu1 %v6225_v45 }
0x2b38   :  { %v6645_v55 = vpop.xlane.xlu1 %6644 }
0x2b39   :  { %v6650_v24 = vrot.slane %v6645_v55, %v9415_v21  ;;  %v6654_v14 = vrot.slane %v6645_v55, %v9420_v38  ;;  %v6658_v10 = vrot.slane %v6645_v55, %v9469_v36  ;;  %v6662_v50 = vrot.slane %v6645_v55, %v9477_v57 }
0x2b3a   :  { %v6666_v45 = vrot.slane %v6645_v55, %v9452_v33  ;;  %v6670_v15 = vrot.slane %v6645_v55, %v9485_v40 }
0x2b3b   :  { %v6687_v35 = vsub.f32 %v11025_v53, %v6650_v24  ;;  %v6688_v61 = vsub.f32 %v11028_v28, %v6654_v14  ;;  %v6689_v37 = vsub.f32 %v11033_v60, %v6658_v10  ;;  %v6690_v41 = vsub.f32 %v11031_v63, %v6662_v50 }
0x2b3c   :  { %v6691_v23 = vsub.f32 %v11039_v49, %v6666_v45  ;;  %v6674_v28 = vrot.slane %v6645_v55, %v9510_v59  ;;  %v6692_v32 = vsub.f32 %v11037_v13, %v6670_v15  ;;  %v6678_v63 = vrot.slane %v6645_v55, %v9502_v56 }
0x2b3d   :  { %v6695_v58 = vmul.f32 1.442695, %v6687_v35  ;;  %v6697_v43 = vmul.f32 1.442695, %v6688_v61  ;;  %v6699_v47 = vmul.f32 1.442695, %v6689_v37 }
0x2b3e   :  { %v6701_v53 = vmul.f32 1.442695, %v6690_v41  ;;  %v6703_v60 = vmul.f32 1.442695, %v6691_v23  ;;  %v6693_v62 = vsub.f32 %v11045_v4, %v6674_v28  ;;  %v6705_v52 = vmul.f32 1.442695, %v6692_v32 }
0x2b3f   :  { %8803 = vpow2.f32 %v6695_v58  ;;  %v6694_v49 = vsub.f32 %v11047_v30, %v6678_v63 }
0x2b40   :  { %8805 = vpow2.f32 %v6697_v43  ;;  %v6707_v17 = vmul.f32 1.442695, %v6693_v62 }
0x2b41   :  { %8807 = vpow2.f32 %v6699_v47  ;;  %v6709_v13 = vmul.f32 1.442695, %v6694_v49 }
0x2b42   :  { %8809 = vpow2.f32 %v6701_v53 }
0x2b43   :  { %8811 = vpow2.f32 %v6703_v60 }
0x2b44   :  { %8813 = vpow2.f32 %v6705_v52 }
0x2b45   :  { %8815 = vpow2.f32 %v6707_v17 }
0x2b46   :  { %8817 = vpow2.f32 %v6709_v13 }
0x2b4c   :  { %v11090_v34 = vpop.eup %8803 }
0x2b4d   :  { %6720 = vperm.xlu0 %8569, %v11090_v34   ;;  %v8806_v7 = vpop.eup %8805 }
0x2b4e   :  { %v8808_v16 = vpop.eup %8807 }
0x2b4f   :  { %v8810_v46 = vpop.eup %8809 }
0x2b50   :  { %v8812_v27 = vpop.eup %8811 }
0x2b51   :  { %6723 = vperm.xlu0 %8569, %v8806_v7   ;;  %v8814_v20 = vpop.eup %8813 }
0x2b52   :  { %v8816_v4 = vpop.eup %8815 }
0x2b53   :  { %v8818_v3 = vpop.eup %8817 }
0x2b55   :  { %6726 = vperm.xlu0 %8569, %v8808_v16  }
0x2b59   :  { %6729 = vperm.xlu0 %8569, %v8810_v46  }
0x2b5d   :  { %6732 = vperm.xlu0 %8569, %v8812_v27  }
0x2b61   :  { %6735 = vperm.xlu0 %8569, %v8814_v20  }
0x2b65   :  { %6738 = vperm.xlu0 %8569, %v8816_v4  }
0x2b69   :  { %6741 = vperm.xlu0 %8569, %v8818_v3  }
0x2b6e   :  { %v11096_v1 = vpop.f32.mrf.mxu1 }
0x2b70   :  { %v8503_v30 = vpop.f32.mrf.mxu1 }
0x2bc8   :  { %v6721_v2 = vpop.permute.xlu0 %6720 }
0x2bc9   :  { %v6746_v9 = vrot.slane %v6721_v2, %v9385_v44 }
0x2bcc   :  { %v6724_v48 = vpop.permute.xlu0 %6723 }
0x2bcd   :  { %v6750_v29 = vrot.slane %v6724_v48, %v9385_v44 }
0x2bcf   :  { %v6775_v14 = vsel %vm548_vm3, %v6750_v29, %v6746_v9 }
0x2bd0   :  { %v6727_v26 = vpop.permute.xlu0 %6726 }
0x2bd1   :  { %v6754_v39 = vrot.slane %v6727_v26, %v9385_v44 }
0x2bd3   :  { %v6776_v35 = vsel %vm550_vm4, %v6754_v39, %v6775_v14 }
0x2bd4   :  { %v6730_v12 = vpop.permute.xlu0 %6729 }
0x2bd5   :  { %v6758_v25 = vrot.slane %v6730_v12, %v9385_v44 }
0x2bd7   :  { %v6777_v58 = vsel %vm552_vm5, %v6758_v25, %v6776_v35  ;;  %v11139_v35 = vld [vmem:[#allocation4] sm:$0xff] }
0x2bd8   :  { %v6733_v18 = vpop.permute.xlu0 %6732 }
0x2bd9   :  { %v6762_v55 = vrot.slane %v6733_v18, %v9385_v44  ;;  %v7021_v18 = vld [vmem:[#allocation13 + $0x8] sm:$0xff] }
0x2bdb   :  { %v6778_v50 = vsel %vm554_vm6, %v6762_v55, %v6777_v58 }
0x2bdc   :  { %v6736_v42 = vpop.permute.xlu0 %6735 }
0x2bdd   :  { %v6766_v10 = vrot.slane %v6736_v42, %v9385_v44  ;;  %v11131_v42 = vld [vmem:[#allocation4 + $0x8] sm:$0xff] }
0x2bdf   :  { %v6779_v43 = vsel %vm556_vm7, %v6766_v10, %v6778_v50 }
0x2be0   :  { %v6739_v24 = vpop.permute.xlu0 %6738 }
0x2be1   :  { %v6770_v61 = vrot.slane %v6739_v24, %v9385_v44 }
0x2be3   :  { %v6780_v41 = vsel %vm558_vm8, %v6770_v61, %v6779_v43 }
0x2be4   :  { %v6742_v37 = vpop.permute.xlu0 %6741 }
0x2be5   :  { %v6774_v45 = vrot.slane %v6742_v37, %v9385_v44 }
0x2be7   :  { %v6781_v47 = vsel %vm560_vm9, %v6774_v45, %v6780_v41 }
0x2be8   :  { %v6783_v15 = vsel %vm563_vm10, %v6781_v47, 0.0 }
0x2be9   :  { %6784 = vadd.xlane.f32.xlu1 %v6783_v15 }
0x2c72   :  { %v6785_v23 = vpop.xlane.xlu1 %6784 }
0x2c73   :  { %8819 = vrcp.f32 %v6785_v23 }
0x2c80   :  { %v8820_v53 = vpop.eup %8819 }
0x2c81   :  { %v6799_v28 = vrot.slane %v8820_v53, %v9469_v36  ;;  %v6795_v32 = vrot.slane %v8820_v53, %v9420_v38  ;;  %v6815_v62 = vrot.slane %v8820_v53, %v9510_v59  ;;  %v6791_v52 = vrot.slane %v8820_v53, %v9415_v21 }
0x2c82   :  { %v6803_v13 = vrot.slane %v8820_v53, %v9477_v57  ;;  %v6807_v2 = vrot.slane %v8820_v53, %v9452_v33  ;;  %v6819_v26 = vrot.slane %v8820_v53, %v9502_v56 }
0x2c83   :  { %v6830_v60 = vmul.f32 %v8808_v16, %v6799_v28  ;;  %v6829_v63 = vmul.f32 %v8806_v7, %v6795_v32  ;;  %v6834_v49 = vmul.f32 %v8816_v4, %v6815_v62  ;;  %v6828_v17 = vmul.f32 %v11090_v34, %v6791_v52  ;;  %v7023_v4 = vld [vmem:[#allocation13 + $0x18] sm:$0xff]  ;;  %v7022_v34 = vld [vmem:[#allocation13 + $0x10] sm:$0xff] }
0x2c84   :  { %v6831_v30 = vmul.f32 %v8810_v46, %v6803_v13  ;;  %v6832_v48 = vmul.f32 %v8812_v27, %v6807_v2  ;;  %v6811_v7 = vrot.slane %v8820_v53, %v9485_v40  ;;  %v6835_v12 = vmul.f32 %v8818_v3, %v6819_v26  ;;  %8505 = vmatpush3.msra.mxu0 %v7023_v4  ;;  %v7020_v46 = vld [vmem:[#allocation13] sm:$0xff]  ;;  %v11145_v28 = vld [vmem:[#allocation4 + $0x18] sm:$0xff] }
0x2c85   :  { %6856 = vperm.xlu1 %8570, %v6830_v60   ;;  %6851 = vperm.xlu0 %8569, %v6829_v63   ;;  %v11125_v27 = vld [vmem:[#allocation21 + $0x18] sm:$0xff] }
0x2c86   :  { %v6833_v16 = vmul.f32 %v8814_v20, %v6811_v7  ;;  %8506 = vmatprep.subr.mxu0 %v11393_v22  ;;  %v11129_v20 = vld [vmem:[#allocation4 + $0x10] sm:$0xff] }
0x2c87   :  { %8507 = vmatpush3.msra.mxu0 %v7022_v34 }
0x2c88   :  { %8508 = vmatprep.subr.mxu0 %v11393_v22 }
0x2c89   :  { %6876 = vperm.xlu1 %8570, %v6834_v49   ;;  %6846 = vperm.xlu0 %8569, %v6828_v17  }
0x2c8a   :  { %8509 = vmatpush3.msra.mxu0 %v7021_v18 }
0x2c8b   :  { %8510 = vmatprep.subr.mxu0 %v11393_v22  ;;  %v11137_v22 = vld [vmem:[#allocation4 + $0x30] sm:$0xff] }
0x2c8c   :  { %8511 = vmatpush3.msra.mxu0 %v7020_v46 }
0x2c8d   :  { %6861 = vperm.xlu0 %8569, %v6831_v30   ;;  %8526 = vmatprep.subr.mxu0 %v11125_v27 }
0x2c91   :  { %6866 = vperm.xlu0 %8569, %v6832_v48   ;;  %v11149_v48 = vld [vmem:[#allocation4 + $0x20] sm:$0xff] }
0x2c95   :  { %6871 = vperm.xlu0 %8569, %v6833_v16  }
0x2c99   :  { %6881 = vperm.xlu0 %8569, %v6835_v12  }
0x2d00   :  { %v6857_v3 = vpop.permute.xlu1 %6856  ;;  %v6852_v29 = vpop.permute.xlu0 %6851 }
0x2d01   :  { %v6886_v39 = vmul.f32 %v6857_v3, %v11129_v20  ;;  %v6885_v9 = vmul.f32 %v6852_v29, %v11131_v42 }
0x2d03   :  { %v6906_v25 = vsel %vm329_vm1, %v6886_v39, 0.0  ;;  %v6899_v55 = vsel %vm329_vm1, %v6885_v9, 0.0  ;;  %v11153_v39 = vld [vmem:[#allocation4 + $0x28] sm:$0xff] }
0x2d04   :  { %v6907_v24 = vrot.slane %v6906_v25, 4  ;;  %v6900_v14 = vrot.slane %v6899_v55, 4  ;;  %v6877_v10 = vpop.permute.xlu1 %6876  ;;  %v6847_v61 = vpop.permute.xlu0 %6846 }
0x2d05   :  { %v6890_v58 = vmul.f32 %v6877_v10, %v11137_v22  ;;  %v6884_v50 = vmul.f32 %v6847_v61, %v11139_v35 }
0x2d06   :  { %v6908_v37 = vadd.f32 %v6907_v24, %v6906_v25  ;;  %v6901_v43 = vadd.f32 %v6900_v14, %v6899_v55  ;;  %v6949_v14 = vrot.slane %v11096_v1, 1 }
0x2d07   :  { %v6934_v45 = vsel %vm329_vm1, %v6890_v58, 0.0  ;;  %v6892_v41 = vsel %vm329_vm1, %v6884_v50, 0.0 }
0x2d08   :  { %v6909_v47 = vrot.slane %v6908_v37, 2  ;;  %v6902_v15 = vrot.slane %v6901_v43, 2  ;;  %v6935_v23 = vrot.slane %v6934_v45, 4  ;;  %v6893_v53 = vrot.slane %v6892_v41, 4  ;;  %v6862_v32 = vpop.permute.xlu0 %6861 }
0x2d09   :  { %v6887_v60 = vmul.f32 %v6862_v32, %v11145_v28 }
0x2d0a   :  { %v6903_v63 = vadd.f32 %v6902_v15, %v6901_v43  ;;  %v6936_v62 = vadd.f32 %v6935_v23, %v6934_v45  ;;  %v6894_v52 = vadd.f32 %v6893_v53, %v6892_v41  ;;  %v6910_v49 = vadd.f32 %v6909_v47, %v6908_v37  ;;  %v11159_v15 = vld [vmem:[#allocation4 + $0x38] sm:$0xff]  ;;  %v11164_v53 = vld [vmem:[%s11383_s11] ss:$0 sm:$0xff] }
0x2d0b   :  { %v6913_v17 = vsel %vm329_vm1, %v6887_v60, 0.0  ;;  %v6950_v43 = vrot.slane %v11096_v1, 2 }
0x2d0c   :  { %v6904_v13 = vrot.slane %v6903_v63, 1  ;;  %v6937_v30 = vrot.slane %v6936_v62, 2  ;;  %v6895_v2 = vrot.slane %v6894_v52, 2  ;;  %v6867_v7 = vpop.permute.xlu0 %6866  ;;  %v6914_v16 = vrot.slane %v6913_v17, 4 }
0x2d0d   :  { %v6888_v26 = vmul.f32 %v6867_v7, %v11149_v48  ;;  %v6911_v4 = vrot.slane %v6910_v49, 1 }
0x2d0e   :  { %v6896_v12 = vadd.f32 %v6895_v2, %v6894_v52  ;;  %v6915_v34 = vadd.f32 %v6914_v16, %v6913_v17  ;;  %v6905_v46 = vadd.f32 %v6904_v13, %v6903_v63  ;;  %v6938_v3 = vadd.f32 %v6937_v30, %v6936_v62 }
0x2d0f   :  { %v6920_v18 = vsel %vm329_vm1, %v6888_v26, 0.0  ;;  %v6912_v61 = vadd.f32 %v6911_v4, %v6910_v49  ;;  %v6951_v52 = vrot.slane %v11096_v1, 3 }
0x2d10   :  { %v6897_v29 = vrot.slane %v6896_v12, 1  ;;  %v6872_v9 = vpop.permute.xlu0 %6871  ;;  %v6916_v25 = vrot.slane %v6915_v34, 2  ;;  %v6921_v55 = vrot.slane %v6920_v18, 4  ;;  %v6965_v45 = vadd.f32 %v6949_v14, %v6905_v46 }
0x2d11   :  { %v6889_v24 = vmul.f32 %v6872_v9, %v11153_v39  ;;  %v6939_v41 = vrot.slane %v6938_v3, 1  ;;  %v6966_v17 = vadd.f32 %v6950_v43, %v6912_v61  ;;  %v6954_v46 = vrot.slane %v11096_v1, 6 }
0x2d12   :  { %v6898_v10 = vadd.f32 %v6897_v29, %v6896_v12  ;;  %v6917_v58 = vadd.f32 %v6916_v25, %v6915_v34  ;;  %v6922_v50 = vadd.f32 %v6921_v55, %v6920_v18  ;;  %v6980_v7 = vadd.f32 %v11164_v53, %v6965_v45 }
0x2d13   :  { %v6927_v37 = vsel %vm329_vm1, %v6889_v24, 0.0  ;;  %v6940_v12 = vadd.f32 %v6939_v41, %v6938_v3  ;;  %v6981_v25 = vadd.f32 %v11164_v53, %v6966_v17  ;;  %v6952_v24 = vrot.slane %v11096_v1, 4 }
0x2d14   :  { %v6928_v47 = vrot.slane %v6927_v37, 4  ;;  %v6882_v23 = vpop.permute.xlu0 %6881  ;;  %v6964_v32 = vadd.f32 %v6898_v10, %v11096_v1  ;;  %v6918_v60 = vrot.slane %v6917_v58, 1  ;;  %v6923_v63 = vrot.slane %v6922_v50, 2 }
0x2d15   :  { %v6891_v62 = vmul.f32 %v6882_v23, %v11159_v15  ;;  %8821 = vtanh.f32 %v6980_v7 }
0x2d16   :  { %v6929_v49 = vadd.f32 %v6928_v47, %v6927_v37  ;;  %v6919_v13 = vadd.f32 %v6918_v60, %v6917_v58  ;;  %v6924_v30 = vadd.f32 %v6923_v63, %v6922_v50  ;;  %v6979_v4 = vadd.f32 %v11164_v53, %v6964_v32 }
0x2d17   :  { %v6941_v2 = vsel %vm329_vm1, %v6891_v62, 0.0  ;;  %v6970_v58 = vadd.f32 %v6954_v46, %v6940_v12  ;;  %v6953_v50 = vrot.slane %v11096_v1, 5  ;;  %v6955_v60 = vrot.slane %v11096_v1, 7 }
0x2d18   :  { %v6930_v16 = vrot.slane %v6929_v49, 2  ;;  %v6942_v26 = vrot.slane %v6941_v2, 4  ;;  %v6967_v34 = vadd.f32 %v6951_v52, %v6919_v13  ;;  %v6925_v18 = vrot.slane %v6924_v30, 1 }
0x2d19   :  { %8823 = vtanh.f32 %v6979_v4  ;;  %v6985_v23 = vadd.f32 %v11164_v53, %v6970_v58  ;;  %v7934_v58 = vld [vmem:[#allocation21 + $0x10] sm:$0xff] }
0x2d1a   :  { %v6931_v29 = vadd.f32 %v6930_v16, %v6929_v49  ;;  %v6943_v9 = vadd.f32 %v6942_v26, %v6941_v2  ;;  %v6982_v55 = vadd.f32 %v11164_v53, %v6967_v34  ;;  %v6926_v14 = vadd.f32 %v6925_v18, %v6924_v30 }
0x2d1c   :  { %v6932_v10 = vrot.slane %v6931_v29, 1  ;;  %v6944_v61 = vrot.slane %v6943_v9, 2  ;;  %v6968_v3 = vadd.f32 %v6952_v24, %v6926_v14  ;;  %8825 = vtanh.f32 %v6982_v55 }
0x2d1d   :  { %8827 = vtanh.f32 %v6981_v25 }
0x2d1e   :  { %v6933_v37 = vadd.f32 %v6932_v10, %v6931_v29  ;;  %v6945_v43 = vadd.f32 %v6944_v61, %v6943_v9  ;;  %v6983_v45 = vadd.f32 %v11164_v53, %v6968_v3  ;;  %v7924_v3 = vld [vmem:[#allocation6] sm:$0xff] }
0x2d20   :  { %v6969_v41 = vadd.f32 %v6953_v50, %v6933_v37  ;;  %v6946_v47 = vrot.slane %v6945_v43, 1  ;;  %8829 = vtanh.f32 %v6983_v45  ;;  %v7933_v50 = vld [vmem:[#allocation21 + $0x8] sm:$0xff]  ;;  %v7932_v37 = vld [vmem:[#allocation21] sm:$0xff]  ;;  %v7926_v45 = vld [vmem:[#allocation6 + $0x10] sm:$0xff] }
0x2d22   :  { %v6984_v32 = vadd.f32 %v11164_v53, %v6969_v41  ;;  %v6947_v63 = vadd.f32 %v6946_v47, %v6945_v43  ;;  %v8822_v49 = vpop.eup %8821  ;;  %v7925_v43 = vld [vmem:[#allocation6 + $0x8] sm:$0xff]  ;;  %v7927_v41 = vld [vmem:[#allocation6 + $0x18] sm:$0xff] }
0x2d23   :  { %v7003_v2 = vrot.slane %v8822_v49, 7  ;;  %v7929_v47 = vld [vmem:[#allocation6 + $0x28] sm:$0xff] }
0x2d24   :  { %8831 = vtanh.f32 %v6984_v32  ;;  %v6971_v62 = vadd.f32 %v6955_v60, %v6947_v63  ;;  %v8155_v32 = vld [vmem:[#allocation15] ss:$0 sm:$0xff] }
0x2d25   :  { %8833 = vtanh.f32 %v6985_v23 }
0x2d26   :  { %v6986_v52 = vadd.f32 %v11164_v53, %v6971_v62  ;;  %v8824_v17 = vpop.eup %8823 }
0x2d27   :  { %v7004_v26 = vsel %vm548_vm3, %v7003_v2, %v8824_v17 }
0x2d28   :  { %8835 = vtanh.f32 %v6986_v52  ;;  %v11203_v52 = vld [vmem:[%s11385_s13] ss:$0 sm:$0xff]  ;;  %s9109_s13 = smov [#allocation22]  }
0x2d29   :  { %v8826_v13 = vpop.eup %8825 }
0x2d2a   :  { %v8828_v30 = vpop.eup %8827  ;;  %v7007_v16 = vrot.slane %v8826_v13, 5 }
0x2d2b   :  { %v7005_v12 = vrot.slane %v8828_v30, 6 }
0x2d2d   :  { %v8830_v7 = vpop.eup %8829  ;;  %v7006_v1 = vsel %vm550_vm4, %v7005_v12, %v7004_v26 }
0x2d2e   :  { %v7009_v4 = vrot.slane %v8830_v7, 4  ;;  %v7008_v46 = vsel %vm552_vm5, %v7007_v16, %v7006_v1 }
0x2d30   :  { %v7010_v9 = vsel %vm554_vm6, %v7009_v4, %v7008_v46  ;;  %v11397_v46 = vld [vmem:[#allocation31_spill] sm:$0xff] }
0x2d31   :  { %v8832_v34 = vpop.eup %8831 }
0x2d32   :  { %v8834_v18 = vpop.eup %8833  ;;  %v7011_v29 = vrot.slane %v8832_v34, 3 }
0x2d33   :  { %v7013_v24 = vrot.slane %v8834_v18, 2  ;;  %v8878_v18 = vld [vmem:[#allocation12] ss:$0 sm:$0xff] }
0x2d34   :  { %v7012_v25 = vsel %vm556_vm7, %v7011_v29, %v7010_v9  ;;  %v306_v29 = vadd.f32 %v8878_v18, %v11397_v46 }
0x2d35   :  { %v8836_v55 = vpop.eup %8835  ;;  %v7014_v10 = vsel %vm558_vm8, %v7013_v24, %v7012_v25 }
0x2d36   :  { %v7015_v14 = vrot.slane %v8836_v55, 1 }
0x2d38   :  { %v7016_v61 = vsel %vm560_vm9, %v7015_v14, %v7014_v10 }
0x2d39   :  { %7018 = vst.msk [vmem:[#allocation6 + $0x30] sm:$0xff] %vm329_vm1, %v7016_v61  ;;  %8513 = vmatmul.mubr.msk.f32.vlgmr.msra.gmra.mxu0 %vm329_vm1, %v7016_v61 }
0x2d3a   :  { %8527 = vmatpush3.msra.mxu0 %v11125_v27  ;;  %8534 = vmatprep.mubr.msk.f32.mxu0 %vm329_vm1, %v7924_v3  ;;  %v7928_v27 = vld [vmem:[#allocation6 + $0x20] sm:$0xff] }
0x2d3b   :  { %8528 = vmatprep.subr.mxu0 %v7934_v58  ;;  %v7259_v3 = vld [vmem:[#allocation3 + $0x8] sm:$0xff] }
0x2d3c   :  { %8529 = vmatpush3.msra.mxu0 %v7934_v58 }
0x2d3d   :  { %8530 = vmatprep.subr.mxu0 %v7933_v50 }
0x2d3e   :  { %8531 = vmatpush3.msra.mxu0 %v7933_v50  ;;  %v7261_v50 = vld [vmem:[#allocation3 + $0x18] sm:$0xff] }
0x2d3f   :  { %8532 = vmatprep.subr.mxu0 %v7932_v37 }
0x2d40   :  { %8533 = vmatpush3.msra.mxu0 %v7932_v37  ;;  %v7930_v23 = vld [vmem:[#allocation6 + $0x30] sm:$0xff]  ;;  %v7263_v37 = vld [vmem:[#allocation3 + $0x28] sm:$0xff] }
0x2d41   :  { %8535 = vmatmul.mubr.msk.f32.vlgmr.msra.gmra.mxu0 %vm329_vm1, %v7925_v43  ;;  %v7265_v43 = vld [vmem:[#allocation3 + $0x38] sm:$0xff] }
0x2d42   :  { %8537 = vmatprep.mubr.msk.f32.mxu0 %vm329_vm1, %v7926_v45 }
0x2d45   :  { %8538 = vmatmul.mubr.msk.f32.gmra.mxu0 %vm329_vm1, %v7927_v41 }
0x2d46   :  { %8540 = vmatprep.mubr.msk.f32.mxu0 %vm329_vm1, %v7928_v27 }
0x2d49   :  { %8541 = vmatmul.mubr.msk.f32.gmra.mxu0 %vm329_vm1, %v7929_v47  ;;  %v7260_v47 = vld [vmem:[#allocation3 + $0x10] sm:$0xff] }
0x2d4a   :  { %8543 = vmatprep.mubr.msk.f32.mxu0 %vm329_vm1, %v7930_v23  ;;  %v7262_v23 = vld [vmem:[#allocation3 + $0x20] sm:$0xff] }
0x2df9   :  { %v7099_v60 = vpop.f32.mrf.mxu0 }
0x2dfa   :  { %v7100_v63 = vadd.f32 %v8155_v32, %v7099_v60  ;;  %v7264_v32 = vld [vmem:[#allocation3 + $0x30] sm:$0xff] }
0x2dfb   :  { %v8514_v62 = vpop.f32.mrf.mxu0 }
0x2dfc   :  { %7109 = vrot.lane.b32.xlu1 %v7100_v63, %s9105_s2  ;;  %v7103_v9 = vadd.f32 %v7100_v63, %v306_v29 }
0x2dfe   :  { %v7104_v25 = vmul.f32 0.5, %v7103_v9 }
0x2e00   :  { %8837 = vtanh.f32 %v7104_v25 }
0x2e01   :  { %v8536_v49 = vpop.f32.mrf.mxu0 }
0x2e02   :  { %v8039_v17 = vadd.f32 %v8536_v49, %v11203_v52 }
0x2e03   :  { %v8033_v13 = vpop.f32.mrf.mxu0 }
0x2e04   :  { %8073 = vst [vmem:[#allocation22 + $0x8] sm:$0xff] %v8039_v17  ;;  %v8034_v30 = vadd.f32 %v11203_v52, %v8033_v13 }
0x2e05   :  { %v8539_v2 = vpop.f32.mrf.mxu0 }
0x2e06   :  { %8072 = vst [vmem:[#allocation22] sm:$0xff] %v8034_v30  ;;  %v8049_v7 = vadd.f32 %v8539_v2, %v11203_v52 }
0x2e07   :  { %v8043_v16 = vpop.f32.mrf.mxu0 }
0x2e08   :  { %8075 = vst [vmem:[#allocation22 + $0x18] sm:$0xff] %v8049_v7  ;;  %v8044_v26 = vadd.f32 %v11203_v52, %v8043_v16 }
0x2e09   :  { %v8542_v12 = vpop.f32.mrf.mxu0 }
0x2e0a   :  { %8074 = vst [vmem:[#allocation22 + $0x10] sm:$0xff] %v8044_v26  ;;  %v8059_v4 = vadd.f32 %v8542_v12, %v11203_v52 }
0x2e0b   :  { %v8053_v34 = vpop.f32.mrf.mxu0 }
0x2e0c   :  { %8077 = vst [vmem:[#allocation22 + $0x28] sm:$0xff] %v8059_v4  ;;  %v8054_v1 = vadd.f32 %v11203_v52, %v8053_v34 }
0x2e0d   :  { %v8838_v55 = vpop.eup %8837 }
0x2e0e   :  { %8076 = vst [vmem:[#allocation22 + $0x20] sm:$0xff] %v8054_v1  ;;  %v7106_v24 = vadd.f32 1.0, %v8838_v55 }
0x2e10   :  { %v7107_v14 = vmul.f32 0.5, %v7106_v24 }
0x2e12   :  { %v7119_v60 = vsub.f32 1.0, %v7107_v14 }
0x2e6e   :  { %v7110_v10 = vpop.permute.xlu1 %7109 }
0x2e6f   :  { %v7112_v58 = vmul.f32 %v7110_v10, %v7107_v14 }
0x2e71   :  { %7114 = vrot.lane.b32.xlu0 %v7112_v58, %s9105_s2 }
0x2e75   :  { %7125 = vrot.lane.b32.xlu0 %v7016_v61, %s9102_s21  ;;  %v7258_v61 = vld [vmem:[#allocation3] sm:$0xff] }
0x2e79   :  { %7316 = vrot.lane.b32.xlu0 %v7259_v3, %s9102_s21 }
0x2e7d   :  { %7320 = vrot.lane.b32.xlu0 %v7261_v50, %s9102_s21 }
0x2e81   :  { %7324 = vrot.lane.b32.xlu0 %v7263_v37, %s9102_s21 }
0x2e85   :  { %7328 = vrot.lane.b32.xlu0 %v7265_v43, %s9102_s21 }
0x2e89   :  { %7409 = vbcast.lane.b32.xlu0 %v10943_v19, 256 }
0x2ee3   :  { %v7115_v45 = vpop.permute.xlu0 %7114 }
0x2ee4   :  { %v7117_v41 = vadd.f32 %v7115_v45, %v306_v29 }
0x2ee6   :  { %8839 = vtanh.f32 %v7117_v41 }
0x2ee7   :  { %v7126_v19 = vpop.permute.xlu0 %7125 }
0x2ee8   :  { %v7128_v62 = vmul.f32 %v7126_v19, %v7107_v14 }
0x2eeb   :  { %v7317_v7 = vpop.permute.xlu0 %7316 }
0x2eef   :  { %v7321_v55 = vpop.permute.xlu0 %7320 }
0x2ef3   :  { %v8840_v27 = vpop.eup %8839 }
0x2ef4   :  { %7121 = vrot.lane.b32.xlu1 %v8840_v27, %s9106_s27 }
0x2ef8   :  { %7314 = vrot.lane.b32.xlu1 %v7258_v61, %s9102_s21  ;;  %v7325_v61 = vpop.permute.xlu0 %7324 }
0x2efc   :  { %7318 = vrot.lane.b32.xlu1 %v7260_v47, %s9102_s21 }
0x2f00   :  { %7322 = vrot.lane.b32.xlu1 %v7262_v23, %s9102_s21 }
0x2f04   :  { %7326 = vrot.lane.b32.xlu1 %v7264_v32, %s9102_s21  ;;  %s8085_s21 = sshll.u32 %s9109_s13, 4  ;;  %s8086_s21 = int_to_ptr.vmem [resolvable:$true] %s8085_s21 }
0x2f05   :  { %s9059_s3 = scalar_lea.vmem %s8086_s21, 1024  ;;  %p9064_p4 = scmp.lt.s32.totalorder %s8086_s21, %s8086_s21 }
0x2f06   :  { %p9060_p3 = scmp.ne.s32.totalorder %s8086_s21, %s9059_s3  ;;  %p9065_p5 = scmp.lt.s32.totalorder %s9059_s3, %s9059_s3 }
0x2f08   :  { %7416 = vbcast.lane.b32.xlu1 %v10957_v6, 256  ;;  %p9066_p6 = por %p9065_p5, %p9064_p4 }
0x2f0a   :  { %p9067_p7 = pnand %p9066_p6, %p9060_p3 }
0x2f66   :  { %v7122_v63 = vpop.permute.xlu1 %7121 }
0x2f67   :  { %v7124_v49 = vmul.f32 %v7122_v63, %v7119_v60  ;;  %v7329_v63 = vpop.permute.xlu0 %7328 }
0x2f69   :  { %v11225_v17 = vadd.f32 %v7128_v62, %v7124_v49 }
0x2f6a   :  { %v7315_v13 = vpop.permute.xlu1 %7314 }
0x2f6b   :  { %v7209_v30 = vcombine.high %v11225_v17, %v11225_v17  ;;  %v7216_v2 = vrot.slane %v11225_v17, %v9396_v0 }
0x2f6d   :  { %v7224_v16 = vcombine.high %v7216_v2, %v7216_v2  ;;  %v7232_v26 = vrot.slane %v7216_v2, %v9396_v0  ;;  %v7223_v6 = vrot.slane %v7209_v30, %v9396_v0 }
0x2f6e   :  { %v7319_v12 = vpop.permute.xlu1 %7318 }
0x2f6f   :  { %v7246_v4 = vrot.slane %v7224_v16, %v9396_v0  ;;  %v7269_v34 = vrot.slane %v7232_v26, %v9415_v21  ;;  %v7254_v1 = vcombine.high %v7232_v26, %v7232_v26  ;;  %v7225_v18 = vcombine.high %v7223_v6, %v7223_v6 }
0x2f70   :  { %v7239_v9 = vrot.slane %v7223_v6, %v9396_v0 }
0x2f71   :  { %v7338_v46 = vmul.f32 %v7315_v13, %v7269_v34  ;;  %v7277_v29 = vrot.slane %v7254_v1, %v9415_v21  ;;  %v7273_v25 = vrot.slane %v7246_v4, %v9415_v21  ;;  %v7256_v24 = vcombine.high %v7246_v4, %v7246_v4  ;;  %v7410_v13 = vpop.permute.xlu0 %7409 }
0x2f72   :  { %v7253_v14 = vrot.slane %v7225_v18, %v9396_v0  ;;  %v7323_v58 = vpop.permute.xlu1 %7322  ;;  %v7285_v37 = vrot.slane %v7239_v9, %v9415_v21  ;;  %v7255_v43 = vcombine.high %v7239_v9, %v7239_v9 }
0x2f73   :  { %7354 = vrot.lane.b32.xlu1 %v7338_v46, %s9106_s27  ;;  %v7339_v10 = vmul.f32 %v7317_v7, %v7273_v25  ;;  %v7281_v3 = vrot.slane %v7256_v24, %v9415_v21  ;;  %v7340_v50 = vmul.f32 %v7319_v12, %v7277_v29 }
0x2f74   :  { %v7289_v41 = vrot.slane %v7253_v14, %v9415_v21  ;;  %v7257_v27 = vcombine.high %v7253_v14, %v7253_v14  ;;  %v7342_v0 = vmul.f32 %v7323_v58, %v7285_v37  ;;  %v7293_v23 = vrot.slane %v7255_v43, %v9415_v21 }
0x2f75   :  { %7356 = vrot.lane.b32.xlu0 %v7339_v10, %s9106_s27  ;;  %v7341_v45 = vmul.f32 %v7321_v55, %v7281_v3 }
0x2f76   :  { %v7327_v47 = vpop.permute.xlu1 %7326  ;;  %v7343_v32 = vmul.f32 %v7325_v61, %v7289_v41  ;;  %v7297_v19 = vrot.slane %v7257_v27, %v9415_v21 }
0x2f77   :  { %7358 = vrot.lane.b32.xlu1 %v7340_v50, %s9106_s27  ;;  %v7344_v60 = vmul.f32 %v7327_v47, %v7293_v23 }
0x2f78   :  { %v7345_v62 = vmul.f32 %v7329_v63, %v7297_v19 }
0x2f79   :  { %7360 = vrot.lane.b32.xlu0 %v7341_v45, %s9106_s27 }
0x2f7a   :  { %v7417_v49 = vpop.permute.xlu1 %7416 }
0x2f7b   :  { %7362 = vrot.lane.b32.xlu1 %v7342_v0, %s9106_s27 }
0x2f7d   :  { %7364 = vrot.lane.b32.xlu0 %v7343_v32, %s9106_s27 }
0x2f7f   :  { %7366 = vrot.lane.b32.xlu1 %v7344_v60, %s9106_s27 }
0x2f81   :  { %7368 = vrot.lane.b32.xlu0 %v7345_v62, %s9106_s27 }
0x2f83   :  { %7423 = vbcast.lane.b32.xlu1 %v10988_v11, 256 }
0x2f85   :  { %7430 = vbcast.lane.b32.xlu0 %v10994_v51, 256 }
0x2f87   :  { %7437 = vbcast.lane.b32.xlu1 %v10998_v54, 256 }
0x2f89   :  { %7444 = vbcast.lane.b32.xlu0 %v11004_v5, 256 }
0x2fe5   :  { %v7355_v30 = vpop.permute.xlu1 %7354 }
0x2fe6   :  { %v7378_v2 = vsel %vm329_vm1, %v7355_v30, 0.0 }
0x2fe7   :  { %7379 = vadd.xlane.f32.xlu1 %v7378_v2  ;;  %v7357_v7 = vpop.permute.xlu0 %7356 }
0x2fe8   :  { %v7381_v16 = vsel %vm329_vm1, %v7357_v7, 0.0 }
0x2fe9   :  { %v7359_v26 = vpop.permute.xlu1 %7358  ;;  %7382 = vadd.xlane.f32.xlu0 %v7381_v16 }
0x2fea   :  { %v7384_v11 = vsel %vm329_vm1, %v7359_v26, 0.0 }
0x2feb   :  { %v7361_v6 = vpop.permute.xlu0 %7360 }
0x2fec   :  { %v7387_v51 = vsel %vm329_vm1, %v7361_v6, 0.0 }
0x2fed   :  { %v7363_v12 = vpop.permute.xlu1 %7362  ;;  %7385 = vadd.xlane.f32.xlu0 %v7384_v11  ;;  %7388 = vadd.xlane.f32.xlu1 %v7387_v51 }
0x2fee   :  { %v7390_v5 = vsel %vm329_vm1, %v7363_v12, 0.0 }
0x2fef   :  { %v7365_v54 = vpop.permute.xlu0 %7364 }
0x2ff0   :  { %v7393_v4 = vsel %vm329_vm1, %v7365_v54, 0.0 }
0x2ff1   :  { %v7367_v34 = vpop.permute.xlu1 %7366  ;;  %7391 = vadd.xlane.f32.xlu0 %v7390_v5  ;;  %7394 = vadd.xlane.f32.xlu1 %v7393_v4 }
0x2ff2   :  { %v7396_v18 = vsel %vm329_vm1, %v7367_v34, 0.0 }
0x2ff3   :  { %v7369_v1 = vpop.permute.xlu0 %7368 }
0x2ff4   :  { %v7399_v46 = vsel %vm329_vm1, %v7369_v1, 0.0 }
0x2ff5   :  { %7397 = vadd.xlane.f32.xlu0 %v7396_v18  ;;  %7400 = vadd.xlane.f32.xlu1 %v7399_v46  ;;  %v7424_v29 = vpop.permute.xlu1 %7423 }
0x2ff7   :  { %v7431_v9 = vpop.permute.xlu0 %7430 }
0x2ff9   :  { %v7438_v25 = vpop.permute.xlu1 %7437 }
0x2ffb   :  { %v7445_v55 = vpop.permute.xlu0 %7444 }
0x3006   :  { %7451 = vbcast.lane.b32.xlu1 %v11017_v8, 256 }
0x300b   :  { %7458 = vbcast.lane.b32.xlu0 %v11022_v31, 256 }
0x3070   :  { %v7380_v24 = vpop.xlane.xlu1 %7379 }
0x3071   :  { %v7468_v14 = vadd.f32 %v7410_v13, %v7380_v24 }
0x3072   :  { %v7383_v10 = vpop.xlane.xlu0 %7382 }
0x3073   :  { %v7469_v58 = vadd.f32 %v7417_v49, %v7383_v10  ;;  %7485 = vperm.xlu1 %8570, %v7468_v14  }
0x3075   :  { %7488 = vperm.xlu0 %8569, %v7469_v58  }
0x3076   :  { %v7389_v3 = vpop.xlane.xlu1 %7388  ;;  %v7386_v50 = vpop.xlane.xlu0 %7385 }
0x3077   :  { %v7471_v37 = vadd.f32 %v7431_v9, %v7389_v3  ;;  %v7470_v43 = vadd.f32 %v7424_v29, %v7386_v50 }
0x3079   :  { %7494 = vperm.xlu0 %8569, %v7471_v37   ;;  %7491 = vperm.xlu1 %8570, %v7470_v43  }
0x307a   :  { %v7395_v45 = vpop.xlane.xlu1 %7394  ;;  %v7392_v8 = vpop.xlane.xlu0 %7391 }
0x307b   :  { %v7473_v41 = vadd.f32 %v7445_v55, %v7395_v45  ;;  %v7472_v31 = vadd.f32 %v7438_v25, %v7392_v8 }
0x307d   :  { %7500 = vperm.xlu0 %8569, %v7473_v41   ;;  %7497 = vperm.xlu1 %8570, %v7472_v31  }
0x307e   :  { %v7401_v27 = vpop.xlane.xlu1 %7400  ;;  %v7398_v61 = vpop.xlane.xlu0 %7397 }
0x3082   :  { %v7452_v0 = vpop.permute.xlu1 %7451  ;;  %v7459_v47 = vpop.permute.xlu0 %7458 }
0x3083   :  { %v7474_v23 = vadd.f32 %v7452_v0, %v7398_v61  ;;  %v7475_v32 = vadd.f32 %v7459_v47, %v7401_v27 }
0x3085   :  { %7503 = vperm.xlu1 %8570, %v7474_v23   ;;  %7506 = vperm.xlu0 %8569, %v7475_v32  }
0x3089   :  { %7135 = vrot.lane.b32.xlu0 %v11225_v17, %s9106_s27 }
0x30ee   :  { %v7486_v19 = vpop.permute.xlu1 %7485 }
0x30ef   :  { %v7511_v30 = vrot.slane %v7486_v19, %v9385_v44 }
0x30f0   :  { %v7489_v60 = vpop.permute.xlu0 %7488 }
0x30f1   :  { %v7515_v49 = vrot.slane %v7489_v60, %v9385_v44 }
0x30f3   :  { %v7540_v7 = vsel %vm548_vm3, %v7515_v49, %v7511_v30 }
0x30f4   :  { %v7492_v63 = vpop.permute.xlu1 %7491  ;;  %v7495_v62 = vpop.permute.xlu0 %7494 }
0x30f5   :  { %v7519_v13 = vrot.slane %v7492_v63, %v9385_v44  ;;  %v7523_v16 = vrot.slane %v7495_v62, %v9385_v44 }
0x30f7   :  { %v7541_v26 = vsel %vm550_vm4, %v7519_v13, %v7540_v7 }
0x30f8   :  { %v7498_v2 = vpop.permute.xlu1 %7497  ;;  %v7501_v17 = vpop.permute.xlu0 %7500  ;;  %v7542_v11 = vsel %vm552_vm5, %v7523_v16, %v7541_v26 }
0x30f9   :  { %v7527_v6 = vrot.slane %v7498_v2, %v9385_v44  ;;  %v7531_v51 = vrot.slane %v7501_v17, %v9385_v44 }
0x30fb   :  { %v7543_v12 = vsel %vm554_vm6, %v7527_v6, %v7542_v11 }
0x30fc   :  { %v7544_v1 = vsel %vm556_vm7, %v7531_v51, %v7543_v12 }
0x3100   :  { %v7504_v54 = vpop.permute.xlu1 %7503  ;;  %v7507_v5 = vpop.permute.xlu0 %7506 }
0x3101   :  { %v7535_v4 = vrot.slane %v7504_v54, %v9385_v44  ;;  %v7539_v34 = vrot.slane %v7507_v5, %v9385_v44 }
0x3103   :  { %v7545_v18 = vsel %vm558_vm8, %v7535_v4, %v7544_v1 }
0x3104   :  { %v7136_v46 = vpop.permute.xlu0 %7135  ;;  %v7546_v29 = vsel %vm560_vm9, %v7539_v34, %v7545_v18 }
0x3105   :  { %8524 = vmatmul.mubr.msk.f32.vlgmr.msra.gmra.mxu1 %vm329_vm1, %v7136_v46  ;;  %v7548_v9 = vsel %vm563_vm10, %v7546_v29, -inf }
0x3106   :  { %7549 = vmax.xlane.f32.xlu1 %v7548_v9 }
0x318f   :  { %v7550_v25 = vpop.xlane.xlu1 %7549 }
0x3190   :  { %v7555_v55 = vrot.slane %v7550_v25, %v9415_v21  ;;  %v7559_v24 = vrot.slane %v7550_v25, %v9420_v38  ;;  %v7563_v10 = vrot.slane %v7550_v25, %v9469_v36  ;;  %v7567_v8 = vrot.slane %v7550_v25, %v9477_v57 }
0x3191   :  { %v7571_v0 = vrot.slane %v7550_v25, %v9452_v33  ;;  %v7575_v60 = vrot.slane %v7550_v25, %v9485_v40  ;;  %v7579_v49 = vrot.slane %v7550_v25, %v9510_v59 }
0x3192   :  { %v7592_v3 = vsub.f32 %v7468_v14, %v7555_v55  ;;  %v7593_v50 = vsub.f32 %v7469_v58, %v7559_v24  ;;  %v7594_v27 = vsub.f32 %v7470_v43, %v7563_v10  ;;  %v7595_v47 = vsub.f32 %v7471_v37, %v7567_v8 }
0x3193   :  { %v7596_v63 = vsub.f32 %v7472_v31, %v7571_v0  ;;  %v7597_v14 = vsub.f32 %v7473_v41, %v7575_v60  ;;  %v7583_v43 = vrot.slane %v7550_v25, %v9502_v56  ;;  %v7598_v30 = vsub.f32 %v7474_v23, %v7579_v49 }
0x3194   :  { %v7600_v45 = vmul.f32 1.442695, %v7592_v3  ;;  %v7602_v61 = vmul.f32 1.442695, %v7593_v50  ;;  %v7604_v19 = vmul.f32 1.442695, %v7594_v27 }
0x3195   :  { %v7606_v62 = vmul.f32 1.442695, %v7595_v47  ;;  %v7608_v58 = vmul.f32 1.442695, %v7596_v63  ;;  %v7610_v37 = vmul.f32 1.442695, %v7597_v14  ;;  %v7599_v7 = vsub.f32 %v7475_v32, %v7583_v43 }
0x3196   :  { %8841 = vpow2.f32 %v7600_v45  ;;  %v7612_v31 = vmul.f32 1.442695, %v7598_v30 }
0x3197   :  { %8843 = vpow2.f32 %v7602_v61  ;;  %v7614_v41 = vmul.f32 1.442695, %v7599_v7 }
0x3198   :  { %8845 = vpow2.f32 %v7604_v19 }
0x3199   :  { %8847 = vpow2.f32 %v7606_v62 }
0x319a   :  { %8849 = vpow2.f32 %v7608_v58 }
0x319b   :  { %8851 = vpow2.f32 %v7610_v37 }
0x319c   :  { %8853 = vpow2.f32 %v7612_v31 }
0x319d   :  { %8855 = vpow2.f32 %v7614_v41 }
0x31a3   :  { %v11292_v13 = vpop.eup %8841 }
0x31a4   :  { %7625 = vperm.xlu0 %8569, %v11292_v13   ;;  %v8844_v2 = vpop.eup %8843 }
0x31a5   :  { %v8846_v16 = vpop.eup %8845 }
0x31a6   :  { %v8848_v26 = vpop.eup %8847 }
0x31a7   :  { %v8850_v6 = vpop.eup %8849 }
0x31a8   :  { %7628 = vperm.xlu0 %8569, %v8844_v2   ;;  %v8852_v17 = vpop.eup %8851 }
0x31a9   :  { %v8854_v11 = vpop.eup %8853 }
0x31aa   :  { %v8856_v23 = vpop.eup %8855 }
0x31ac   :  { %7631 = vperm.xlu0 %8569, %v8846_v16  }
0x31b0   :  { %7634 = vperm.xlu0 %8569, %v8848_v26  }
0x31b4   :  { %7637 = vperm.xlu0 %8569, %v8850_v6  }
0x31b8   :  { %7640 = vperm.xlu0 %8569, %v8852_v17  }
0x31bc   :  { %7643 = vperm.xlu0 %8569, %v8854_v11  }
0x31c0   :  { %7646 = vperm.xlu0 %8569, %v8856_v23  }
0x31c5   :  { %v11296_v51 = vpop.f32.mrf.mxu1 }
0x31c7   :  { %v8525_v32 = vpop.f32.mrf.mxu1 }
0x321f   :  { %v7626_v12 = vpop.permute.xlu0 %7625 }
0x3220   :  { %v7651_v29 = vrot.slane %v7626_v12, %v9385_v44 }
0x3223   :  { %v7629_v54 = vpop.permute.xlu0 %7628 }
0x3224   :  { %v7655_v18 = vrot.slane %v7629_v54, %v9385_v44 }
0x3226   :  { %v7680_v24 = vsel %vm548_vm3, %v7655_v18, %v7651_v29 }
0x3227   :  { %v7632_v5 = vpop.permute.xlu0 %7631 }
0x3228   :  { %v7659_v46 = vrot.slane %v7632_v5, %v9385_v44 }
0x322a   :  { %v7681_v3 = vsel %vm550_vm4, %v7659_v46, %v7680_v24 }
0x322b   :  { %v7635_v4 = vpop.permute.xlu0 %7634 }
0x322c   :  { %v7663_v9 = vrot.slane %v7635_v4, %v9385_v44 }
0x322e   :  { %v7682_v45 = vsel %vm552_vm5, %v7663_v9, %v7681_v3 }
0x322f   :  { %v7638_v34 = vpop.permute.xlu0 %7637 }
0x3230   :  { %v7667_v25 = vrot.slane %v7638_v34, %v9385_v44 }
0x3232   :  { %v7683_v8 = vsel %vm554_vm6, %v7667_v25, %v7682_v45 }
0x3233   :  { %v7641_v1 = vpop.permute.xlu0 %7640 }
0x3234   :  { %v7671_v10 = vrot.slane %v7641_v1, %v9385_v44 }
0x3236   :  { %v7684_v61 = vsel %vm556_vm7, %v7671_v10, %v7683_v8 }
0x3237   :  { %v7644_v55 = vpop.permute.xlu0 %7643 }
0x3238   :  { %v7675_v50 = vrot.slane %v7644_v55, %v9385_v44 }
0x323a   :  { %v7685_v47 = vsel %vm558_vm8, %v7675_v50, %v7684_v61 }
0x323b   :  { %v7647_v27 = vpop.permute.xlu0 %7646 }
0x323c   :  { %v7679_v0 = vrot.slane %v7647_v27, %v9385_v44 }
0x323e   :  { %v7686_v19 = vsel %vm560_vm9, %v7679_v0, %v7685_v47 }
0x323f   :  { %v7688_v60 = vsel %vm563_vm10, %v7686_v19, 0.0 }
0x3240   :  { %7689 = vadd.xlane.f32.xlu1 %v7688_v60 }
0x32c9   :  { %v7690_v63 = vpop.xlane.xlu1 %7689 }
0x32ca   :  { %8857 = vrcp.f32 %v7690_v63 }
0x32d7   :  { %v8858_v62 = vpop.eup %8857 }
0x32d8   :  { %v7704_v49 = vrot.slane %v8858_v62, %v9469_v36  ;;  %v7700_v14 = vrot.slane %v8858_v62, %v9420_v38  ;;  %v7720_v30 = vrot.slane %v8858_v62, %v9510_v59  ;;  %v7696_v44 = vrot.slane %v8858_v62, %v9415_v21 }
0x32d9   :  { %v7708_v31 = vrot.slane %v8858_v62, %v9477_v57  ;;  %v7712_v36 = vrot.slane %v8858_v62, %v9452_v33  ;;  %v7724_v21 = vrot.slane %v8858_v62, %v9502_v56 }
0x32da   :  { %v7735_v58 = vmul.f32 %v8846_v16, %v7704_v49  ;;  %v7734_v43 = vmul.f32 %v8844_v2, %v7700_v14  ;;  %v7739_v37 = vmul.f32 %v8854_v11, %v7720_v30  ;;  %v7733_v7 = vmul.f32 %v11292_v13, %v7696_v44 }
0x32db   :  { %v7736_v41 = vmul.f32 %v8848_v26, %v7708_v31  ;;  %v7737_v38 = vmul.f32 %v8850_v6, %v7712_v36  ;;  %v7716_v2 = vrot.slane %v8858_v62, %v9485_v40  ;;  %v7740_v16 = vmul.f32 %v8856_v23, %v7724_v21 }
0x32dc   :  { %7761 = vperm.xlu1 %8570, %v7735_v58   ;;  %7756 = vperm.xlu0 %8569, %v7734_v43   ;;  %v7854_v58 = vrot.slane %v11296_v51, 1 }
0x32dd   :  { %v7738_v59 = vmul.f32 %v8852_v17, %v7716_v2 }
0x32e0   :  { %7781 = vperm.xlu1 %8570, %v7739_v37   ;;  %7751 = vperm.xlu0 %8569, %v7733_v7   ;;  %v7855_v7 = vrot.slane %v11296_v51, 2 }
0x32e4   :  { %7766 = vperm.xlu0 %8569, %v7736_v41  }
0x32e8   :  { %7771 = vperm.xlu0 %8569, %v7737_v38  }
0x32ec   :  { %7776 = vperm.xlu0 %8569, %v7738_v59  }
0x32f0   :  { %7786 = vperm.xlu0 %8569, %v7740_v16   ;;  %v7856_v16 = vrot.slane %v11296_v51, 3 }
0x3357   :  { %v7762_v11 = vpop.permute.xlu1 %7761  ;;  %v7757_v13 = vpop.permute.xlu0 %7756 }
0x3358   :  { %v7791_v57 = vmul.f32 %v7762_v11, %v11129_v20  ;;  %v7790_v32 = vmul.f32 %v7757_v13, %v11131_v42 }
0x335a   :  { %v7811_v26 = vsel %vm329_vm1, %v7791_v57, 0.0  ;;  %v7804_v33 = vsel %vm329_vm1, %v7790_v32, 0.0 }
0x335b   :  { %v7812_v6 = vrot.slane %v7811_v26, 4  ;;  %v7805_v12 = vrot.slane %v7804_v33, 4  ;;  %v7782_v40 = vpop.permute.xlu1 %7781  ;;  %v7752_v54 = vpop.permute.xlu0 %7751 }
0x335c   :  { %v7795_v17 = vmul.f32 %v7782_v40, %v11137_v22  ;;  %v7789_v56 = vmul.f32 %v7752_v54, %v11139_v35 }
0x335d   :  { %v7813_v23 = vadd.f32 %v7812_v6, %v7811_v26  ;;  %v7806_v5 = vadd.f32 %v7805_v12, %v7804_v33 }
0x335e   :  { %v7839_v4 = vsel %vm329_vm1, %v7795_v17, 0.0  ;;  %v7797_v20 = vsel %vm329_vm1, %v7789_v56, 0.0 }
0x335f   :  { %v7814_v34 = vrot.slane %v7813_v23, 2  ;;  %v7807_v42 = vrot.slane %v7806_v5, 2  ;;  %v7840_v1 = vrot.slane %v7839_v4, 4  ;;  %v7798_v18 = vrot.slane %v7797_v20, 4  ;;  %v7767_v46 = vpop.permute.xlu0 %7766 }
0x3360   :  { %v7792_v29 = vmul.f32 %v7767_v46, %v11145_v28 }
0x3361   :  { %v7808_v9 = vadd.f32 %v7807_v42, %v7806_v5  ;;  %v7841_v25 = vadd.f32 %v7840_v1, %v7839_v4  ;;  %v7799_v55 = vadd.f32 %v7798_v18, %v7797_v20  ;;  %v7815_v24 = vadd.f32 %v7814_v34, %v7813_v23 }
0x3362   :  { %v7818_v22 = vsel %vm329_vm1, %v7792_v29, 0.0  ;;  %v7859_v23 = vrot.slane %v11296_v51, 6  ;;  %v7857_v34 = vrot.slane %v11296_v51, 4 }
0x3363   :  { %v7809_v35 = vrot.slane %v7808_v9, 1  ;;  %v7842_v10 = vrot.slane %v7841_v25, 2  ;;  %v7800_v3 = vrot.slane %v7799_v55, 2  ;;  %v7772_v50 = vpop.permute.xlu0 %7771  ;;  %v7819_v45 = vrot.slane %v7818_v22, 4 }
0x3364   :  { %v7793_v8 = vmul.f32 %v7772_v50, %v11149_v48  ;;  %v7816_v61 = vrot.slane %v7815_v24, 1  ;;  %v7860_v50 = vrot.slane %v11296_v51, 7 }
0x3365   :  { %v7801_v27 = vadd.f32 %v7800_v3, %v7799_v55  ;;  %v7820_v0 = vadd.f32 %v7819_v45, %v7818_v22  ;;  %v7810_v19 = vadd.f32 %v7809_v35, %v7808_v9  ;;  %v7843_v28 = vadd.f32 %v7842_v10, %v7841_v25 }
0x3366   :  { %v7825_v47 = vsel %vm329_vm1, %v7793_v8, 0.0  ;;  %v7817_v30 = vadd.f32 %v7816_v61, %v7815_v24  ;;  %v7858_v9 = vrot.slane %v11296_v51, 5 }
0x3367   :  { %v7802_v60 = vrot.slane %v7801_v27, 1  ;;  %v7777_v63 = vpop.permute.xlu0 %7776  ;;  %v7821_v62 = vrot.slane %v7820_v0, 2  ;;  %v7826_v49 = vrot.slane %v7825_v47, 4  ;;  %v7870_v31 = vadd.f32 %v7854_v58, %v7810_v19 }
0x3368   :  { %v7794_v14 = vmul.f32 %v7777_v63, %v11153_v39  ;;  %v7844_v41 = vrot.slane %v7843_v28, 1  ;;  %v7871_v13 = vadd.f32 %v7855_v7, %v7817_v30 }
0x3369   :  { %v7803_v43 = vadd.f32 %v7802_v60, %v7801_v27  ;;  %v7822_v44 = vadd.f32 %v7821_v62, %v7820_v0  ;;  %v7827_v37 = vadd.f32 %v7826_v49, %v7825_v47  ;;  %v7885_v33 = vadd.f32 %v11164_v53, %v7870_v31 }
0x336a   :  { %v7832_v48 = vsel %vm329_vm1, %v7794_v14, 0.0  ;;  %v7845_v40 = vadd.f32 %v7844_v41, %v7843_v28  ;;  %v7886_v4 = vadd.f32 %v11164_v53, %v7871_v13 }
0x336b   :  { %v7833_v36 = vrot.slane %v7832_v48, 4  ;;  %v7787_v38 = vpop.permute.xlu0 %7786  ;;  %v7869_v2 = vadd.f32 %v7803_v43, %v11296_v51  ;;  %v7823_v59 = vrot.slane %v7822_v44, 1  ;;  %v7828_v21 = vrot.slane %v7827_v37, 2 }
0x336c   :  { %v7796_v39 = vmul.f32 %v7787_v38, %v11159_v15  ;;  %8859 = vtanh.f32 %v7885_v33  ;;  %v7875_v46 = vadd.f32 %v7859_v23, %v7845_v40 }
0x336d   :  { %v7834_v11 = vadd.f32 %v7833_v36, %v7832_v48  ;;  %v7824_v57 = vadd.f32 %v7823_v59, %v7822_v44  ;;  %v7829_v32 = vadd.f32 %v7828_v21, %v7827_v37  ;;  %v7884_v54 = vadd.f32 %v11164_v53, %v7869_v2 }
0x336e   :  { %v7846_v26 = vsel %vm329_vm1, %v7796_v39, 0.0  ;;  %v7890_v10 = vadd.f32 %v11164_v53, %v7875_v46 }
0x336f   :  { %v7835_v6 = vrot.slane %v7834_v11, 2  ;;  %v7847_v12 = vrot.slane %v7846_v26, 4  ;;  %v7872_v17 = vadd.f32 %v7856_v16, %v7824_v57  ;;  %v7830_v56 = vrot.slane %v7829_v32, 1 }
0x3370   :  { %8861 = vtanh.f32 %v7884_v54 }
0x3371   :  { %v7836_v15 = vadd.f32 %v7835_v6, %v7834_v11  ;;  %v7848_v5 = vadd.f32 %v7847_v12, %v7846_v26  ;;  %v7887_v20 = vadd.f32 %v11164_v53, %v7872_v17  ;;  %v7831_v42 = vadd.f32 %v7830_v56, %v7829_v32 }
0x3373   :  { %v7837_v1 = vrot.slane %v7836_v15, 1  ;;  %v7849_v18 = vrot.slane %v7848_v5, 2  ;;  %v7873_v29 = vadd.f32 %v7857_v34, %v7831_v42  ;;  %8863 = vtanh.f32 %v7887_v20 }
0x3374   :  { %8865 = vtanh.f32 %v7886_v4 }
0x3375   :  { %v7838_v25 = vadd.f32 %v7837_v1, %v7836_v15  ;;  %v7850_v55 = vadd.f32 %v7849_v18, %v7848_v5  ;;  %v7888_v24 = vadd.f32 %v11164_v53, %v7873_v29 }
0x3377   :  { %v7874_v22 = vadd.f32 %v7858_v9, %v7838_v25  ;;  %v7851_v35 = vrot.slane %v7850_v55, 1  ;;  %8867 = vtanh.f32 %v7888_v24 }
0x3379   :  { %v7889_v3 = vadd.f32 %v11164_v53, %v7874_v22  ;;  %v7852_v45 = vadd.f32 %v7851_v35, %v7850_v55  ;;  %v8860_v61 = vpop.eup %8859 }
0x337a   :  { %v7908_v28 = vrot.slane %v8860_v61, 7 }
0x337b   :  { %8869 = vtanh.f32 %v7889_v3  ;;  %v7876_v8 = vadd.f32 %v7860_v50, %v7852_v45 }
0x337c   :  { %8871 = vtanh.f32 %v7890_v10 }
0x337d   :  { %v7891_v27 = vadd.f32 %v11164_v53, %v7876_v8  ;;  %v8862_v0 = vpop.eup %8861 }
0x337e   :  { %v7909_v63 = vsel %vm548_vm3, %v7908_v28, %v8862_v0 }
0x337f   :  { %8873 = vtanh.f32 %v7891_v27 }
0x3380   :  { %v8864_v47 = vpop.eup %8863 }
0x3381   :  { %v8866_v19 = vpop.eup %8865  ;;  %v7912_v62 = vrot.slane %v8864_v47, 5 }
0x3382   :  { %v7910_v49 = vrot.slane %v8866_v19, 6 }
0x3384   :  { %v8868_v60 = vpop.eup %8867  ;;  %v7911_v51 = vsel %vm550_vm4, %v7910_v49, %v7909_v63 }
0x3385   :  { %v7914_v14 = vrot.slane %v8868_v60, 4  ;;  %v7913_v30 = vsel %vm552_vm5, %v7912_v62, %v7911_v51 }
0x3387   :  { %v7915_v53 = vsel %vm554_vm6, %v7914_v14, %v7913_v30 }
0x3388   :  { %v8870_v58 = vpop.eup %8869 }
0x3389   :  { %v8872_v43 = vpop.eup %8871  ;;  %v7916_v44 = vrot.slane %v8870_v58, 3 }
0x338a   :  { %v7918_v7 = vrot.slane %v8872_v43, 2 }
0x338b   :  { %v7917_v37 = vsel %vm556_vm7, %v7916_v44, %v7915_v53 }
0x338c   :  { %v8874_v48 = vpop.eup %8873  ;;  %v7919_v41 = vsel %vm558_vm8, %v7918_v7, %v7917_v37 }
0x338d   :  { %v7920_v31 = vrot.slane %v8874_v48, 1 }
0x338f   :  { %v7921_v36 = vsel %vm560_vm9, %v7920_v31, %v7919_v41 }
0x3390   :  { %7923 = vst.msk [vmem:[#allocation6 + $0x38] sm:$0xff] %vm329_vm1, %v7921_v36 }
0x3397   :  { %v7931_v38 = vld [vmem:[#allocation6 + $0x38] sm:$0xff] }
0x3398   :  { %8544 = vmatmul.mubr.msk.f32.gmra.mxu0 %vm329_vm1, %v7931_v38 }
0x3458   :  { %v8545_v2 = vpop.f32.mrf.mxu0 }
0x3459   :  { %v8069_v59 = vadd.f32 %v8545_v2, %v11203_v52 }
0x345a   :  { %v8063_v21 = vpop.f32.mrf.mxu0 }
0x345b   :  { %8079 = vst [vmem:[#allocation22 + $0x38] sm:$0xff] %v8069_v59  ;;  %v8064_v39 = vadd.f32 %v11203_v52, %v8063_v21 }
0x345d   :  { %8078 = vst [vmem:[#allocation22 + $0x30] sm:$0xff] %v8064_v39 }
0x345e   :  { %9070 = shalt.err (!%p9067_p7)
}
0x345f   :  { %8091 = dma.vmem_to_hbm [thread:$0]  %s8086_s21, 1024, %s11386_s14, [#allocation9], %s9092_s16, %s9092_s16, %s9093_s17  }
0x3460   :  { %9089 = dma.done.wait [#allocation9], 1024  }
0x3461   :  { %9090 = vsyncadd [#allocation9], 4294966272 }
0x3462   :  { %8095 = vsyncpa [#allocation8], 1 }
0x3463   :  { %8096 = vsyncpa [#allocation11], 1 }
0x3464   :  { %8097 = vsyncpa [#allocation14], 1 }
0x3465   :  { %8098 = vsyncpa [#allocation17], 1 }
0x3466   :  { %8099 = vsyncpa [#allocation20], 1 }
0x3467   :  { %8100 = vsyncpa [#allocation9], 1 }

</bundles_post_ra>
